<compile_context>
chip_gen: v6e
topology: v6e:2x2x1
jax: 0.10.0
libtpu: 0.0.40
codegen_flags: <defaults>
</compile_context>

<pallas_src>
import functools

import jax
import jax.numpy as jnp
from jax.experimental import pallas as pl
from jax.experimental.pallas import tpu as pltpu


# ----------------------------------------------------------------------------
# Model hyper-parameters (mirrors KNRM.__init__ defaults except emb_dim, which
# is chosen lane-friendly for the TPU demo).
# ----------------------------------------------------------------------------
NKERNELS = 11
SIGMA = 0.1
EXACT_SIGMA = 0.001
EMB_DIM = 128
VOCAB_SIZE = 64
LANE = 128                                  # TPU lane width
_VMEM_SOFT_BUDGET = 40 * 1024 * 1024        # stay well inside v7x's 64 MiB


def _make_gaussian_params(nkernels=NKERNELS, sigma=SIGMA, exact_sigma=EXACT_SIGMA):
    """Reproduces the mu/sigma schedule from KNRM.__init__ exactly."""
    mus, sigmas = [], []
    for i in range(nkernels):
        mu = 1.0 / (nkernels - 1) + 2.0 * i / (nkernels - 1) - 1.0
        if mu > 1:
            mus.append(1.0)
            sigmas.append(exact_sigma)
        else:
            mus.append(mu)
            sigmas.append(sigma)
    return tuple(mus), tuple(sigmas)


MUS, SIGMAS = _make_gaussian_params()


# ----------------------------------------------------------------------------
# Device-generation helpers (bf16-EUP gating, megacore-aware batch tiling).
# ----------------------------------------------------------------------------
def _device_kind():
    try:
        return jax.devices()[0].device_kind.lower()
    except Exception:
        return ""


def _default_soft_exp_dtype():
    # v6e / v7x EUP has a bf16 path (~2x exp rate); v5e and older do not.
    kind = _device_kind()
    if any(gen in kind for gen in ("v6", "v7")):
        return jnp.bfloat16
    return jnp.float32


def _tensorcores_per_chip():
    return 2 if "v7" in _device_kind() else 1


def _pick_b_tile(batch):
    """Sublane-aligned batch tile; keep >=2 grid tiles on 2-TC chips (v7x)."""
    if batch <= 8:
        return batch
    candidates = [bt for bt in (32, 16, 8) if batch % bt == 0]
    if not candidates:
        return batch                       # odd batch: one full-batch tile
    if _tensorcores_per_chip() >= 2:
        for bt in candidates:
            if batch // bt >= 2:           # keep the "parallel" axis shardable
                return bt
        return candidates[-1]
    return candidates[0]                   # single TC: fewest / fattest tiles


# ----------------------------------------------------------------------------
# Shared Gaussian-pooling body (EUP-bound part).
# ----------------------------------------------------------------------------
def _gaussian_qt_sums(sim, mus, sigmas, soft_exp_dtype):
    """11 Gaussian kernels + row-sum over the doc axis. Returns (Bt, NK, Lq)."""
    lowp = jnp.dtype(soft_exp_dtype) != jnp.dtype(jnp.float32)
    qsums = []
    for mu, sg in zip(mus, sigmas):
        coef = -0.5 / (sg * sg)                  # compile-time constant per kernel
        diff = sim - mu                           # f32 VPU (free under EUP load)
        arg = diff * diff * coef                  # f32 argument (precision-critical)
        if lowp and sg >= 0.01:
            # Soft kernels: bf16 exp on the EUP fast path (v6e / v7x only).
            probs = jnp.exp(arg.astype(soft_exp_dtype)).astype(jnp.float32)
        else:
            # Exact-match kernel (sigma=1e-3) must stay f32: exponent scales
            # any sim error by 5e5.
            probs = jnp.exp(arg)
        qsums.append(jnp.sum(probs, axis=2))      # (Bt, Lq), f32 accumulation
    return jnp.stack(qsums, axis=1)               # (Bt, NK, Lq)


# ----------------------------------------------------------------------------
# Pallas kernels.
# ----------------------------------------------------------------------------
def _knrm_counts_single_kernel(q_ref, d_ref, cnt_ref, *, mus, sigmas,
                               soft_exp_dtype):
    # q_ref: (Bt, Lq, D), d_ref: (Bt, Ld, D), cnt_ref: (Bt, NK)
    # Keep Ld on the lane axis of sim (do NOT transpose to fill MXU rows —
    # the matmul is ~1% of cycles while the 11 exps want lane-dense vregs).
    sim = jnp.einsum("bqd,bkd->bqk", q_ref[...], d_ref[...],
                     preferred_element_type=jnp.float32)
    qt = _gaussian_qt_sums(sim, mus, sigmas, soft_exp_dtype)     # (Bt, NK, Lq)
    cnt_ref[...] = jnp.sum(jnp.log1p(qt), axis=2)                # (Bt, NK)


def _knrm_counts_tiled_kernel(q_ref, d_ref, cnt_ref, acc_ref, *, mus, sigmas,
                              soft_exp_dtype, ld_valid, ld_tile, needs_mask):
    # Fallback for very long documents: Ld swept as the trailing "arbitrary"
    # grid axis, per-(batch, kernel, query-token) sums accumulated in VMEM.
    l = pl.program_id(1)

    @pl.when(l == 0)
    def _init():
        acc_ref[...] = jnp.zeros_like(acc_ref)

    sim = jnp.einsum("bqd,bkd->bqk", q_ref[...], d_ref[...],
                     preferred_element_type=jnp.float32)
    if needs_mask:
        # Padded columns of the (Pallas-padded) last Ld block hold garbage:
        # push them far from every mu so every Gaussian underflows to exactly 0.
        # (Alternative per review: analytic n_pad * exp(-0.5*mu^2/sigma^2)
        #  correction at finalize; the single select is kept for simplicity.)
        col = jax.lax.broadcasted_iota(jnp.int32, sim.shape, 2) + l * ld_tile
        sim = jnp.where(col < ld_valid, sim, jnp.float32(1e9))

    acc_ref[...] += _gaussian_qt_sums(sim, mus, sigmas, soft_exp_dtype)

    @pl.when(l == pl.num_programs(1) - 1)
    def _fin():
        cnt_ref[...] = jnp.sum(jnp.log1p(acc_ref[...]), axis=2)   # (Bt, NK)


# ----------------------------------------------------------------------------
# Wrapper around pallas_call.
# ----------------------------------------------------------------------------
def knrm_kernel_counts(q_emb, d_emb, *, b_tile=None, ld_tile=None,
                       soft_exp_dtype=None, nkernels=NKERNELS):
    """Returns the (B, NKERNELS) log1p-pooled kernel match counts.

    q_emb: (B, Lq, D) f32, d_emb: (B, Ld, D) f32 (already L2-normalised).
    ld_tile=None -> collapse the Ld axis whenever the doc block fits VMEM.
    """
    B, Lq, D = q_emb.shape
    _, Ld, _ = d_emb.shape

    if soft_exp_dtype is None:
        soft_exp_dtype = _default_soft_exp_dtype()
    if b_tile is None:
        b_tile = _pick_b_tile(B)
    assert B % b_tile == 0, "batch must be divisible by the batch tile"

    def _footprint(ld_block):
        # Double-buffered input windows + a few live (Bt, Lq, ld_block) f32
        # temporaries (sim / diff / probs).
        in_bytes = 2 * 4 * b_tile * (Lq + ld_block) * D
        work_bytes = 4 * 4 * b_tile * Lq * max(ld_block, LANE)
        return in_bytes + work_bytes

    if ld_tile is None and _footprint(Ld) <= _VMEM_SOFT_BUDGET:
        # ---- single-pass path: no Ld grid axis, no scratch, no pad, no mask ----
        kernel = functools.partial(
            _knrm_counts_single_kernel, mus=MUS, sigmas=SIGMAS,
            soft_exp_dtype=soft_exp_dtype)
        vmem_limit = int(min(max(2 * _footprint(Ld), 16 << 20), 48 << 20))
        return pl.pallas_call(
            kernel,
            out_shape=jax.ShapeDtypeStruct((B, nkernels), jnp.float32),
            grid_spec=pltpu.PrefetchScalarGridSpec(
                num_scalar_prefetch=0,
                grid=(B // b_tile,),
                in_specs=[
                    pl.BlockSpec((b_tile, Lq, D), lambda b: (b, 0, 0)),
                    pl.BlockSpec((b_tile, Ld, D), lambda b: (b, 0, 0)),
                ],
                out_specs=pl.BlockSpec((b_tile, nkernels), lambda b: (b, 0)),
            ),
            compiler_params=pltpu.CompilerParams(
                dimension_semantics=("parallel",),
                vmem_limit_bytes=vmem_limit,
            ),
        )(q_emb, d_emb)

    # ---- Ld-tiled fallback (very long documents) ----
    if ld_tile is None:
        ld_tile = 512          # fatter DMAs / fewer grid steps than 128 (review)
    assert ld_tile % 8 == 0, "Ld tile must be sublane aligned"
    needs_mask = (Ld % ld_tile) != 0
    grid = (B // b_tile, pl.cdiv(Ld, ld_tile))

    kernel = functools.partial(
        _knrm_counts_tiled_kernel, mus=MUS, sigmas=SIGMAS,
        soft_exp_dtype=soft_exp_dtype, ld_valid=Ld, ld_tile=ld_tile,
        needs_mask=needs_mask)
    vmem_limit = int(min(max(2 * _footprint(ld_tile), 16 << 20), 48 << 20))
    return pl.pallas_call(
        kernel,
        out_shape=jax.ShapeDtypeStruct((B, nkernels), jnp.float32),
        grid_spec=pltpu.PrefetchScalarGridSpec(
            num_scalar_prefetch=0,
            grid=grid,
            in_specs=[
                pl.BlockSpec((b_tile, Lq, D), lambda b, l: (b, 0, 0)),
                pl.BlockSpec((b_tile, ld_tile, D), lambda b, l: (b, l, 0)),
            ],
            out_specs=pl.BlockSpec((b_tile, nkernels), lambda b, l: (b, 0)),
            scratch_shapes=[pltpu.VMEM((b_tile, nkernels, Lq), jnp.float32)],
        ),
        compiler_params=pltpu.CompilerParams(
            dimension_semantics=("parallel", "arbitrary"),
            vmem_limit_bytes=vmem_limit,
        ),
    )(q_emb, d_emb)


# ----------------------------------------------------------------------------
# Plain-JAX glue: embedding lookup + L2 normalisation (KNRM.embed) and the
# trivial NK->1 linear (no bias) + 1e-10 from forward().
# ----------------------------------------------------------------------------
def embed(tokens, emb_table):
    # tokens: (B, L, 1) int32 — PyTorch indexes x[:, :, 0]
    x_emb = jnp.take(emb_table, tokens[:, :, 0], axis=0)              # (B, L, D)
    norm = jnp.linalg.norm(x_emb, axis=2, keepdims=True)
    return x_emb / (norm + 1e-10)


def knrm_forward(q, d, qlen, dlen, emb_table, linear_w, *, b_tile=None,
                 ld_tile=None, soft_exp_dtype=None):
    del qlen, dlen  # unused in KNRM.score (kept for signature parity)
    q_emb = embed(q, emb_table)
    d_emb = embed(d, emb_table)
    counts = knrm_kernel_counts(q_emb, d_emb, b_tile=b_tile, ld_tile=ld_tile,
                                soft_exp_dtype=soft_exp_dtype)        # (B, NK)
    return counts @ linear_w[0] + 1e-10                               # (B,)


# ----------------------------------------------------------------------------
# Reference implementation in plain JAX (for the sanity checks).
# ----------------------------------------------------------------------------
def knrm_forward_ref(q, d, qlen, dlen, emb_table, linear_w):
    del qlen, dlen
    q_emb = embed(q, emb_table)
    d_emb = embed(d, emb_table)
    sim = jnp.einsum("bqd,bkd->bqk", q_emb, d_emb)
    counts = []
    for mu, sg in zip(MUS, SIGMAS):
        probs = jnp.exp(-0.5 * (sim - mu) ** 2 / (sg * sg))
        qt = jnp.sum(probs, axis=2)
        counts.append(jnp.sum(jnp.log1p(qt), axis=1))
    counts = jnp.stack(counts, axis=1)                                # (B, NK)
    return counts @ linear_w[0] + 1e-10


if __name__ == "__main__":
    # Small but non-trivial shapes: B=16 gives 2 batch tiles on v7x (b_tile=8)
    # or 1 fat tile on v5e/v6e (b_tile=16); Ld=200 uses the collapsed path by
    # default and exercises the uneven-block mask in the forced-tiled check.
    B, Lq, Ld = 16, 8, 200

    key = jax.random.PRNGKey(0)
    k_emb, k_lin, k_q, k_d = jax.random.split(key, 4)

    # Deterministic parameter init (shapes from KNRM.__init__):
    #   nn.Embedding(vocab_size, emb_dim) -> N(0, 1)
    #   nn.Linear(nkernels, 1, bias=False) -> U(-1/sqrt(nk), 1/sqrt(nk))
    emb_table = jax.random.normal(k_emb, (VOCAB_SIZE, EMB_DIM), dtype=jnp.float32)
    bound = 1.0 / (NKERNELS ** 0.5)
    linear_w = jax.random.uniform(
        k_lin, (1, NKERNELS), minval=-bound, maxval=bound, dtype=jnp.float32)

    # Token-id inputs, shape (B, L, 1) — the module indexes x[:, :, 0].
    q_tok = jax.random.randint(k_q, (B, Lq, 1), 0, VOCAB_SIZE, dtype=jnp.int32)
    d_tok = jax.random.randint(k_d, (B, Ld, 1), 0, VOCAB_SIZE, dtype=jnp.int32)
    qlen = jnp.full((B,), Lq, dtype=jnp.int32)
    dlen = jnp.full((B,), Ld, dtype=jnp.int32)

    ref = knrm_forward_ref(q_tok, d_tok, qlen, dlen, emb_table, linear_w)

    # 1) Default path: collapsed Ld axis, device-selected exp precision
    #    (bf16 soft kernels on v6e/v7x, all-f32 on v5e and older).
    score = knrm_forward(q_tok, d_tok, qlen, dlen, emb_table, linear_w)
    score = jax.block_until_ready(score)
    assert score.shape == (B,)
    bf16_used = _default_soft_exp_dtype() != jnp.float32
    tol = dict(rtol=2e-2, atol=5e-2) if bf16_used else dict(rtol=1e-3, atol=1e-3)
    assert jnp.allclose(score, ref, **tol), (score, ref)

    # 2) Collapsed path, all-f32 exp — tight numerical check on any generation.
    score_f32 = knrm_forward(q_tok, d_tok, qlen, dlen, emb_table, linear_w,
                             soft_exp_dtype=jnp.float32)
    score_f32 = jax.block_until_ready(score_f32)
    assert jnp.allclose(score_f32, ref, rtol=1e-3, atol=1e-3), (score_f32, ref)

    # 3) Ld-tiled fallback (forced small ld_tile so the uneven last block and
    #    the in-kernel mask are exercised), all-f32 exp.
    score_tiled = knrm_forward(q_tok, d_tok, qlen, dlen, emb_table, linear_w,
                               soft_exp_dtype=jnp.float32, ld_tile=128)
    score_tiled = jax.block_until_ready(score_tiled)
    assert jnp.allclose(score_tiled, ref, rtol=1e-3, atol=1e-3), (score_tiled, ref)

    print("KERNEL_OK")
</pallas_src>

<mosaic_0001>
module attributes {stable_mosaic.version = 11 : i64} {
  func.func @_knrm_counts_single_kernel(%arg0: i32, %arg1: memref<16x8x128xf32, #tpu.memory_space<vmem>>, %arg2: memref<16x200x128xf32, #tpu.memory_space<vmem>>, %arg3: memref<16x11xf32, #tpu.memory_space<vmem>>) attributes {dimension_semantics = [#tpu.dimension_semantics<parallel>], iteration_bounds = array<i64: 1>, scalar_prefetch = 0 : i64, scratch_operands = 0 : i64, tpu.core_type = #tpu.core_type<tc>, window_params = [{transform_indices = @transform_0, window_bounds = array<i64: 16, 8, 128>}, {transform_indices = @transform_1, window_bounds = array<i64: 16, 200, 128>}, {transform_indices = @transform_2, window_bounds = array<i64: 16, 11>}]} {
    %c0 = arith.constant 0 : index
    %c0_0 = arith.constant 0 : index
    %c0_1 = arith.constant 0 : index
    %0 = vector.load %arg1[%c0, %c0_0, %c0_1] : memref<16x8x128xf32, #tpu.memory_space<vmem>>, vector<16x8x128xf32>
    %c0_2 = arith.constant 0 : index
    %c0_3 = arith.constant 0 : index
    %c0_4 = arith.constant 0 : index
    %1 = vector.load %arg2[%c0_2, %c0_3, %c0_4] : memref<16x200x128xf32, #tpu.memory_space<vmem>>, vector<16x200x128xf32>
    "tpu.trace_start"() <{level = 10 : i32, message = "bqd,bkd->bqk"}> : () -> ()
    %cst = arith.constant dense<0.000000e+00> : vector<16x8x200xf32>
    %2 = tpu.matmul %0, %1, %cst {dimension_numbers = #tpu.dot_dimension_numbers<[2], [2], [1], [1], [0, 0, 0, 1, 1, 1], [0], [0]>} : vector<16x8x128xf32>, vector<16x200x128xf32>, vector<16x8x200xf32> -> vector<16x8x200xf32>
    "tpu.trace_stop"() : () -> ()
    %cst_5 = arith.constant -0.899999976 : f32
    %3 = vector.broadcast %cst_5 : f32 to vector<16x8x200xf32>
    %4 = arith.subf %2, %3 : vector<16x8x200xf32>
    %5 = arith.mulf %4, %4 : vector<16x8x200xf32>
    %cst_6 = arith.constant -5.000000e+01 : f32
    %6 = vector.broadcast %cst_6 : f32 to vector<16x8x200xf32>
    %7 = arith.mulf %5, %6 : vector<16x8x200xf32>
    %8 = math.exp %7 : vector<16x8x200xf32>
    %cst_7 = arith.constant dense<0.000000e+00> : vector<16x8xf32>
    %9 = vector.multi_reduction <add>, %8, %cst_7 [2] : vector<16x8x200xf32> to vector<16x8xf32>
    %cst_8 = arith.constant -0.699999988 : f32
    %10 = vector.broadcast %cst_8 : f32 to vector<16x8x200xf32>
    %11 = arith.subf %2, %10 : vector<16x8x200xf32>
    %12 = arith.mulf %11, %11 : vector<16x8x200xf32>
    %cst_9 = arith.constant -5.000000e+01 : f32
    %13 = vector.broadcast %cst_9 : f32 to vector<16x8x200xf32>
    %14 = arith.mulf %12, %13 : vector<16x8x200xf32>
    %15 = math.exp %14 : vector<16x8x200xf32>
    %cst_10 = arith.constant dense<0.000000e+00> : vector<16x8xf32>
    %16 = vector.multi_reduction <add>, %15, %cst_10 [2] : vector<16x8x200xf32> to vector<16x8xf32>
    %cst_11 = arith.constant -5.000000e-01 : f32
    %17 = vector.broadcast %cst_11 : f32 to vector<16x8x200xf32>
    %18 = arith.subf %2, %17 : vector<16x8x200xf32>
    %19 = arith.mulf %18, %18 : vector<16x8x200xf32>
    %cst_12 = arith.constant -5.000000e+01 : f32
    %20 = vector.broadcast %cst_12 : f32 to vector<16x8x200xf32>
    %21 = arith.mulf %19, %20 : vector<16x8x200xf32>
    %22 = math.exp %21 : vector<16x8x200xf32>
    %cst_13 = arith.constant dense<0.000000e+00> : vector<16x8xf32>
    %23 = vector.multi_reduction <add>, %22, %cst_13 [2] : vector<16x8x200xf32> to vector<16x8xf32>
    %cst_14 = arith.constant -3.000000e-01 : f32
    %24 = vector.broadcast %cst_14 : f32 to vector<16x8x200xf32>
    %25 = arith.subf %2, %24 : vector<16x8x200xf32>
    %26 = arith.mulf %25, %25 : vector<16x8x200xf32>
    %cst_15 = arith.constant -5.000000e+01 : f32
    %27 = vector.broadcast %cst_15 : f32 to vector<16x8x200xf32>
    %28 = arith.mulf %26, %27 : vector<16x8x200xf32>
    %29 = math.exp %28 : vector<16x8x200xf32>
    %cst_16 = arith.constant dense<0.000000e+00> : vector<16x8xf32>
    %30 = vector.multi_reduction <add>, %29, %cst_16 [2] : vector<16x8x200xf32> to vector<16x8xf32>
    %cst_17 = arith.constant -1.000000e-01 : f32
    %31 = vector.broadcast %cst_17 : f32 to vector<16x8x200xf32>
    %32 = arith.subf %2, %31 : vector<16x8x200xf32>
    %33 = arith.mulf %32, %32 : vector<16x8x200xf32>
    %cst_18 = arith.constant -5.000000e+01 : f32
    %34 = vector.broadcast %cst_18 : f32 to vector<16x8x200xf32>
    %35 = arith.mulf %33, %34 : vector<16x8x200xf32>
    %36 = math.exp %35 : vector<16x8x200xf32>
    %cst_19 = arith.constant dense<0.000000e+00> : vector<16x8xf32>
    %37 = vector.multi_reduction <add>, %36, %cst_19 [2] : vector<16x8x200xf32> to vector<16x8xf32>
    %cst_20 = arith.constant 1.000000e-01 : f32
    %38 = vector.broadcast %cst_20 : f32 to vector<16x8x200xf32>
    %39 = arith.subf %2, %38 : vector<16x8x200xf32>
    %40 = arith.mulf %39, %39 : vector<16x8x200xf32>
    %cst_21 = arith.constant -5.000000e+01 : f32
    %41 = vector.broadcast %cst_21 : f32 to vector<16x8x200xf32>
    %42 = arith.mulf %40, %41 : vector<16x8x200xf32>
    %43 = math.exp %42 : vector<16x8x200xf32>
    %cst_22 = arith.constant dense<0.000000e+00> : vector<16x8xf32>
    %44 = vector.multi_reduction <add>, %43, %cst_22 [2] : vector<16x8x200xf32> to vector<16x8xf32>
    %cst_23 = arith.constant 3.000000e-01 : f32
    %45 = vector.broadcast %cst_23 : f32 to vector<16x8x200xf32>
    %46 = arith.subf %2, %45 : vector<16x8x200xf32>
    %47 = arith.mulf %46, %46 : vector<16x8x200xf32>
    %cst_24 = arith.constant -5.000000e+01 : f32
    %48 = vector.broadcast %cst_24 : f32 to vector<16x8x200xf32>
    %49 = arith.mulf %47, %48 : vector<16x8x200xf32>
    %50 = math.exp %49 : vector<16x8x200xf32>
    %cst_25 = arith.constant dense<0.000000e+00> : vector<16x8xf32>
    %51 = vector.multi_reduction <add>, %50, %cst_25 [2] : vector<16x8x200xf32> to vector<16x8xf32>
    %cst_26 = arith.constant 5.000000e-01 : f32
    %52 = vector.broadcast %cst_26 : f32 to vector<16x8x200xf32>
    %53 = arith.subf %2, %52 : vector<16x8x200xf32>
    %54 = arith.mulf %53, %53 : vector<16x8x200xf32>
    %cst_27 = arith.constant -5.000000e+01 : f32
    %55 = vector.broadcast %cst_27 : f32 to vector<16x8x200xf32>
    %56 = arith.mulf %54, %55 : vector<16x8x200xf32>
    %57 = math.exp %56 : vector<16x8x200xf32>
    %cst_28 = arith.constant dense<0.000000e+00> : vector<16x8xf32>
    %58 = vector.multi_reduction <add>, %57, %cst_28 [2] : vector<16x8x200xf32> to vector<16x8xf32>
    %cst_29 = arith.constant 0.699999988 : f32
    %59 = vector.broadcast %cst_29 : f32 to vector<16x8x200xf32>
    %60 = arith.subf %2, %59 : vector<16x8x200xf32>
    %61 = arith.mulf %60, %60 : vector<16x8x200xf32>
    %cst_30 = arith.constant -5.000000e+01 : f32
    %62 = vector.broadcast %cst_30 : f32 to vector<16x8x200xf32>
    %63 = arith.mulf %61, %62 : vector<16x8x200xf32>
    %64 = math.exp %63 : vector<16x8x200xf32>
    %cst_31 = arith.constant dense<0.000000e+00> : vector<16x8xf32>
    %65 = vector.multi_reduction <add>, %64, %cst_31 [2] : vector<16x8x200xf32> to vector<16x8xf32>
    %cst_32 = arith.constant 0.899999976 : f32
    %66 = vector.broadcast %cst_32 : f32 to vector<16x8x200xf32>
    %67 = arith.subf %2, %66 : vector<16x8x200xf32>
    %68 = arith.mulf %67, %67 : vector<16x8x200xf32>
    %cst_33 = arith.constant -5.000000e+01 : f32
    %69 = vector.broadcast %cst_33 : f32 to vector<16x8x200xf32>
    %70 = arith.mulf %68, %69 : vector<16x8x200xf32>
    %71 = math.exp %70 : vector<16x8x200xf32>
    %cst_34 = arith.constant dense<0.000000e+00> : vector<16x8xf32>
    %72 = vector.multi_reduction <add>, %71, %cst_34 [2] : vector<16x8x200xf32> to vector<16x8xf32>
    %cst_35 = arith.constant 1.000000e+00 : f32
    %73 = vector.broadcast %cst_35 : f32 to vector<16x8x200xf32>
    %74 = arith.subf %2, %73 : vector<16x8x200xf32>
    %75 = arith.mulf %74, %74 : vector<16x8x200xf32>
    %cst_36 = arith.constant -5.000000e+05 : f32
    %76 = vector.broadcast %cst_36 : f32 to vector<16x8x200xf32>
    %77 = arith.mulf %75, %76 : vector<16x8x200xf32>
    %78 = math.exp %77 : vector<16x8x200xf32>
    %cst_37 = arith.constant dense<0.000000e+00> : vector<16x8xf32>
    %79 = vector.multi_reduction <add>, %78, %cst_37 [2] : vector<16x8x200xf32> to vector<16x8xf32>
    %80 = vector.shape_cast %9 : vector<16x8xf32> to vector<16x1x8xf32>
    %81 = vector.shape_cast %16 : vector<16x8xf32> to vector<16x1x8xf32>
    %82 = vector.shape_cast %23 : vector<16x8xf32> to vector<16x1x8xf32>
    %83 = vector.shape_cast %30 : vector<16x8xf32> to vector<16x1x8xf32>
    %84 = vector.shape_cast %37 : vector<16x8xf32> to vector<16x1x8xf32>
    %85 = vector.shape_cast %44 : vector<16x8xf32> to vector<16x1x8xf32>
    %86 = vector.shape_cast %51 : vector<16x8xf32> to vector<16x1x8xf32>
    %87 = vector.shape_cast %58 : vector<16x8xf32> to vector<16x1x8xf32>
    %88 = vector.shape_cast %65 : vector<16x8xf32> to vector<16x1x8xf32>
    %89 = vector.shape_cast %72 : vector<16x8xf32> to vector<16x1x8xf32>
    %90 = vector.shape_cast %79 : vector<16x8xf32> to vector<16x1x8xf32>
    %91 = tpu.concatenate %80, %81, %82, %83, %84, %85, %86, %87, %88, %89, %90 in 1 : vector<16x1x8xf32>, vector<16x1x8xf32>, vector<16x1x8xf32>, vector<16x1x8xf32>, vector<16x1x8xf32>, vector<16x1x8xf32>, vector<16x1x8xf32>, vector<16x1x8xf32>, vector<16x1x8xf32>, vector<16x1x8xf32>, vector<16x1x8xf32> -> vector<16x11x8xf32>
    %92 = math.log1p %91 : vector<16x11x8xf32>
    %cst_38 = arith.constant dense<0.000000e+00> : vector<16x11xf32>
    %93 = vector.multi_reduction <add>, %92, %cst_38 [2] : vector<16x11x8xf32> to vector<16x11xf32>
    %c0_39 = arith.constant 0 : index
    %c0_40 = arith.constant 0 : index
    %94 = vector.load %arg3[%c0_39, %c0_40] : memref<16x11xf32, #tpu.memory_space<vmem>>, vector<16x11xf32>
    tpu.vector_store %arg3[%c0_39, %c0_40], %93 {strides = array<i32>} : memref<16x11xf32, #tpu.memory_space<vmem>>, vector<16x11xf32>,
    return
  }
  func.func @transform_0(%arg0: i32) -> (i32, i32, i32) {
    %c0_i32 = arith.constant 0 : i32
    %c0_i32_0 = arith.constant 0 : i32
    %c0_i32_1 = arith.constant 0 : i32
    return %arg0, %c0_i32, %c0_i32_0 : i32, i32, i32
  }
  func.func @transform_1(%arg0: i32) -> (i32, i32, i32) {
    %c0_i32 = arith.constant 0 : i32
    %c0_i32_0 = arith.constant 0 : i32
    %c0_i32_1 = arith.constant 0 : i32
    return %arg0, %c0_i32, %c0_i32_0 : i32, i32, i32
  }
  func.func @transform_2(%arg0: i32) -> (i32, i32) {
    %c0_i32 = arith.constant 0 : i32
    %c0_i32_0 = arith.constant 0 : i32
    return %arg0, %c0_i32 : i32, i32
  }
}

</mosaic_0001>

<bundles_post_ra>
// kernel: tpu_custom_call.1
= control target key start
LH: loop header
LB: loop body
LE: loop exit
PB: predicated region body
PF: predicated region fallthrough
CT: control target
= control target key end

     0   :  { %7 = vsyncpa [#allocation3], 0  ;;  %s9498_s0 = inlined_call_operand.hbm [shape: f32[16,8,128], index: 0, kind: input, shape index: {}]   ;;  %s9499_s1 = inlined_call_operand.hbm [shape: f32[16,200,128], index: 1, kind: input, shape index: {}]   ;;  %s9500_s2 = inlined_call_operand.hbm [shape: f32[16,11], index: 2, kind: output, shape index: {}]  }
   0x1   :  { %8 = vsyncpa [#allocation6], 0 }
   0x2   :  { %9 = vsyncpa [#allocation4], 0  ;;  %s7066_s9 = smov [#allocation2]  }
   0x3   :  { %s15_s10 = sshll.u32 %s7066_s9, 4  ;;  %s16_s10 = int_to_ptr.vmem [resolvable:$true] %s15_s10 }
   0x4   :  { %s7008_s11 = scalar_lea.vmem %s16_s10, 2048  ;;  %p7013_p1 = scmp.lt.s32.totalorder %s16_s10, %s16_s10 }
   0x5   :  { %p7009_p0 = scmp.ne.s32.totalorder %s16_s10, %s7008_s11  ;;  %p7014_p2 = scmp.lt.s32.totalorder %s7008_s11, %s7008_s11 }
   0x7   :  { %p7015_p3 = por %p7014_p2, %p7013_p1 }
   0x9   :  { %p7016_p4 = pnand %p7015_p3, %p7009_p0 }
   0xb   :  { %7019 = shalt.err (!%p7016_p4)
}
   0xc   :  { %s7067_s12 = smov 128   ;;  %s7068_s13 = smov 8  }
   0xd   :  { %21 = dma.hbm_to_vmem [thread:$0]  %s9498_s0, 2048, %s16_s10, [#allocation3], %s7067_s12, %s7067_s12, %s7068_s13  }
   0xe   :  { %s7069_s16 = smov [#allocation5]  }
   0xf   :  { %s27_s17 = sshll.u32 %s7069_s16, 4  ;;  %s28_s17 = int_to_ptr.vmem [resolvable:$true] %s27_s17 }
  0x10   :  { %s7028_s18 = scalar_lea.vmem %s28_s17, 51200  ;;  %p7033_p6 = scmp.lt.s32.totalorder %s28_s17, %s28_s17 }
  0x11   :  { %p7029_p5 = scmp.ne.s32.totalorder %s28_s17, %s7028_s18  ;;  %p7034_p7 = scmp.lt.s32.totalorder %s7028_s18, %s7028_s18 }
  0x13   :  { %p7035_p8 = por %p7034_p7, %p7033_p6 }
  0x15   :  { %p7036_p9 = pnand %p7035_p8, %p7029_p5 }
  0x17   :  { %7039 = shalt.err (!%p7036_p9)
}
  0x18   :  { %33 = dma.hbm_to_vmem [thread:$0]  %s9499_s1, 51200, %s28_s17, [#allocation6], %s7067_s12, %s7067_s12, %s7068_s13  }
  0x19   :  { %7060 = dma.done.wait [#allocation3], 2048  }
  0x1a   :  { %7061 = vsyncadd [#allocation3], 4294965248 }
  0x1b   :  { %7062 = dma.done.wait [#allocation6], 51200  }
  0x1c   :  { %7063 = vsyncadd [#allocation6], 4294916096  ;;  %v7070_v0 = vmov 0.0   ;;  %v71_v1 = vld [vmem:[#allocation5 + $0x78] sm:$0xff]  ;;  %v96_v2 = vld [vmem:[#allocation5 + $0x140] sm:$0xff]  ;;  %vm1752_vm0 = vcmask 588800  }
  0x1d   :  { %456 = vmatprep.subr.mxu0 %v7070_v0  ;;  %527 = vmatprep.subr.mxu1 %v7070_v0  ;;  %v70_v3 = vld [vmem:[#allocation5 + $0x70] sm:$0xff]  ;;  %v95_v4 = vld [vmem:[#allocation5 + $0x138] sm:$0xff]  ;;  %v69_v5 = vld [vmem:[#allocation5 + $0x68] sm:$0xff]  ;;  %vm5115_vm1 = vcmask 1040384   ;;  %vm5132_vm2 = vcmask 1041408   ;;  %vm5149_vm3 = vcmask 1042432  }
  0x1e   :  { %520 = vmatprep.mubr.f32.mxu0 %v7070_v0  ;;  %591 = vmatprep.mubr.f32.mxu1 %v7070_v0  ;;  %v94_v6 = vld [vmem:[#allocation5 + $0x130] sm:$0xff]  ;;  %v68_v7 = vld [vmem:[#allocation5 + $0x60] sm:$0xff]  ;;  %v93_v8 = vld [vmem:[#allocation5 + $0x128] sm:$0xff]  ;;  %vm5166_vm4 = vcmask 1043456   ;;  %vm5183_vm5 = vcmask 1044480   ;;  %vm5200_vm6 = vcmask 1045504  }
  0x1f   :  { %457 = vmatpush1.xpose.msra.mxu0 %v71_v1  ;;  %528 = vmatpush1.xpose.msra.mxu1 %v96_v2  ;;  %v67_v9 = vld [vmem:[#allocation5 + $0x58] sm:$0xff]  ;;  %v92_v10 = vld [vmem:[#allocation5 + $0x120] sm:$0xff]  ;;  %v66_v11 = vld [vmem:[#allocation5 + $0x50] sm:$0xff]  ;;  %vm5217_vm7 = vcmask 1046528   ;;  %vm5554_vm8 = vcmask 64512   ;;  %vm5558_vm9 = vcmask 59392  }
  0x20   :  { %458 = vmatprep.subr.mxu0 %v7070_v0  ;;  %529 = vmatprep.subr.mxu1 %v7070_v0  ;;  %v91_v12 = vld [vmem:[#allocation5 + $0x118] sm:$0xff]  ;;  %v65_v13 = vld [vmem:[#allocation5 + $0x48] sm:$0xff]  ;;  %v90_v14 = vld [vmem:[#allocation5 + $0x110] sm:$0xff]  ;;  %s7071_s0 = smov [#allocation7]  }
  0x21   :  { %v64_v15 = vld [vmem:[#allocation5 + $0x40] sm:$0xff]  ;;  %v89_v16 = vld [vmem:[#allocation5 + $0x108] sm:$0xff]  ;;  %v63_v17 = vld [vmem:[#allocation5 + $0x38] sm:$0xff]  ;;  %s5861_s1 = sshll.u32 %s7071_s0, 4  ;;  %s5862_s1 = int_to_ptr.vmem [resolvable:$true] %s5861_s1 }
  0x22   :  { %v88_v18 = vld [vmem:[#allocation5 + $0x100] sm:$0xff]  ;;  %v62_v19 = vld [vmem:[#allocation5 + $0x30] sm:$0xff]  ;;  %v87_v20 = vld [vmem:[#allocation5 + $0xf8] sm:$0xff]  ;;  %s7040_s21 = scalar_lea.vmem %s5862_s1, 256  ;;  %p7045_p11 = scmp.lt.s32.totalorder %s5862_s1, %s5862_s1 }
  0x23   :  { %459 = vmatpush1.xpose.msra.mxu0 %v70_v3  ;;  %530 = vmatpush1.xpose.msra.mxu1 %v95_v4  ;;  %v61_v21 = vld [vmem:[#allocation5 + $0x28] sm:$0xff]  ;;  %v86_v22 = vld [vmem:[#allocation5 + $0xf0] sm:$0xff]  ;;  %v60_v23 = vld [vmem:[#allocation5 + $0x20] sm:$0xff]  ;;  %p7041_p10 = scmp.ne.s32.totalorder %s5862_s1, %s7040_s21  ;;  %p7046_p12 = scmp.lt.s32.totalorder %s7040_s21, %s7040_s21 }
  0x24   :  { %460 = vmatprep.subr.mxu0 %v7070_v0  ;;  %531 = vmatprep.subr.mxu1 %v7070_v0  ;;  %v85_v24 = vld [vmem:[#allocation5 + $0xe8] sm:$0xff]  ;;  %v59_v25 = vld [vmem:[#allocation5 + $0x18] sm:$0xff]  ;;  %v84_v26 = vld [vmem:[#allocation5 + $0xe0] sm:$0xff] }
  0x25   :  { %v58_v27 = vld [vmem:[#allocation5 + $0x10] sm:$0xff]  ;;  %v83_v28 = vld [vmem:[#allocation5 + $0xd8] sm:$0xff]  ;;  %v57_v29 = vld [vmem:[#allocation5 + $0x8] sm:$0xff]  ;;  %p7047_p13 = por %p7046_p12, %p7045_p11 }
  0x26   :  { %v82_v30 = vld [vmem:[#allocation5 + $0xd0] sm:$0xff]  ;;  %v56_v31 = vld [vmem:[#allocation5] sm:$0xff]  ;;  %v81_v32 = vld [vmem:[#allocation5 + $0xc8] sm:$0xff] }
  0x27   :  { %461 = vmatpush1.xpose.msra.mxu0 %v69_v5  ;;  %532 = vmatpush1.xpose.msra.mxu1 %v94_v6  ;;  %v80_v33 = vld [vmem:[#allocation5 + $0xc0] sm:$0xff]  ;;  %v105_v34 = vld [vmem:[#allocation5 + $0x188] sm:$0xff]  ;;  %v79_v35 = vld [vmem:[#allocation5 + $0xb8] sm:$0xff]  ;;  %p7048_p0 = pnand %p7047_p13, %p7041_p10 }
  0x28   :  { %462 = vmatprep.subr.mxu0 %v7070_v0  ;;  %533 = vmatprep.subr.mxu1 %v7070_v0  ;;  %v104_v36 = vld [vmem:[#allocation5 + $0x180] sm:$0xff]  ;;  %v78_v37 = vld [vmem:[#allocation5 + $0xb0] sm:$0xff]  ;;  %v103_v38 = vld [vmem:[#allocation5 + $0x178] sm:$0xff] }
  0x29   :  { %v77_v39 = vld [vmem:[#allocation5 + $0xa8] sm:$0xff]  ;;  %v102_v40 = vld [vmem:[#allocation5 + $0x170] sm:$0xff]  ;;  %v76_v41 = vld [vmem:[#allocation5 + $0xa0] sm:$0xff] }
  0x2a   :  { %v101_v42 = vld [vmem:[#allocation5 + $0x168] sm:$0xff]  ;;  %v75_v43 = vld [vmem:[#allocation5 + $0x98] sm:$0xff]  ;;  %v100_v44 = vld [vmem:[#allocation5 + $0x160] sm:$0xff] }
  0x2b   :  { %463 = vmatpush1.xpose.msra.mxu0 %v68_v7  ;;  %534 = vmatpush1.xpose.msra.mxu1 %v93_v8  ;;  %v74_v45 = vld [vmem:[#allocation5 + $0x90] sm:$0xff]  ;;  %v99_v46 = vld [vmem:[#allocation5 + $0x158] sm:$0xff]  ;;  %v73_v47 = vld [vmem:[#allocation5 + $0x88] sm:$0xff] }
  0x2c   :  { %464 = vmatprep.subr.mxu0 %v7070_v0  ;;  %535 = vmatprep.subr.mxu1 %v7070_v0  ;;  %v98_v48 = vld [vmem:[#allocation5 + $0x150] sm:$0xff]  ;;  %v72_v49 = vld [vmem:[#allocation5 + $0x80] sm:$0xff]  ;;  %v97_v50 = vld [vmem:[#allocation5 + $0x148] sm:$0xff] }
  0x2d   :  { %v40_v51 = vld [vmem:[#allocation2] sm:$0xff]  ;;  %v41_v52 = vld [vmem:[#allocation2 + $0x8] sm:$0xff]  ;;  %v146_v54 = vld [vmem:[#allocation5 + $0x2d0] sm:$0xff] }
  0x2e   :  { %v121_v53 = vld [vmem:[#allocation5 + $0x208] sm:$0xff]  ;;  %v120_v55 = vld [vmem:[#allocation5 + $0x200] sm:$0xff]  ;;  %v119_v57 = vld [vmem:[#allocation5 + $0x1f8] sm:$0xff] }
  0x2f   :  { %465 = vmatpush1.xpose.msra.mxu0 %v67_v9  ;;  %536 = vmatpush1.xpose.msra.mxu1 %v92_v10  ;;  %v145_v56 = vld [vmem:[#allocation5 + $0x2c8] sm:$0xff]  ;;  %v144_v58 = vld [vmem:[#allocation5 + $0x2c0] sm:$0xff]  ;;  %v118_v59 = vld [vmem:[#allocation5 + $0x1f0] sm:$0xff] }
  0x30   :  { %466 = vmatprep.subr.mxu0 %v7070_v0  ;;  %537 = vmatprep.subr.mxu1 %v7070_v0  ;;  %v143_v60 = vld [vmem:[#allocation5 + $0x2b8] sm:$0xff]  ;;  %v117_v61 = vld [vmem:[#allocation5 + $0x1e8] sm:$0xff]  ;;  %v142_v62 = vld [vmem:[#allocation5 + $0x2b0] sm:$0xff] }
  0x31   :  { %v116_v63 = vld [vmem:[#allocation5 + $0x1e0] sm:$0xff]  ;;  %v141_v1 = vld [vmem:[#allocation5 + $0x2a8] sm:$0xff]  ;;  %v115_v2 = vld [vmem:[#allocation5 + $0x1d8] sm:$0xff] }
  0x32   :  { %v140_v3 = vld [vmem:[#allocation5 + $0x2a0] sm:$0xff]  ;;  %v114_v4 = vld [vmem:[#allocation5 + $0x1d0] sm:$0xff]  ;;  %v139_v5 = vld [vmem:[#allocation5 + $0x298] sm:$0xff] }
  0x33   :  { %467 = vmatpush1.xpose.msra.mxu0 %v66_v11  ;;  %538 = vmatpush1.xpose.msra.mxu1 %v91_v12  ;;  %v113_v6 = vld [vmem:[#allocation5 + $0x1c8] sm:$0xff]  ;;  %v138_v7 = vld [vmem:[#allocation5 + $0x290] sm:$0xff]  ;;  %v112_v8 = vld [vmem:[#allocation5 + $0x1c0] sm:$0xff] }
  0x34   :  { %468 = vmatprep.subr.mxu0 %v7070_v0  ;;  %539 = vmatprep.subr.mxu1 %v7070_v0  ;;  %v137_v9 = vld [vmem:[#allocation5 + $0x288] sm:$0xff]  ;;  %v111_v10 = vld [vmem:[#allocation5 + $0x1b8] sm:$0xff]  ;;  %v136_v11 = vld [vmem:[#allocation5 + $0x280] sm:$0xff] }
  0x35   :  { %v110_v12 = vld [vmem:[#allocation5 + $0x1b0] sm:$0xff] }
  0x37   :  { %469 = vmatpush1.xpose.msra.mxu0 %v65_v13  ;;  %540 = vmatpush1.xpose.msra.mxu1 %v90_v14  ;;  %v135_v13 = vld [vmem:[#allocation5 + $0x278] sm:$0xff]  ;;  %v109_v14 = vld [vmem:[#allocation5 + $0x1a8] sm:$0xff] }
  0x38   :  { %470 = vmatprep.subr.mxu0 %v7070_v0  ;;  %541 = vmatprep.subr.mxu1 %v7070_v0 }
  0x3b   :  { %471 = vmatpush1.xpose.msra.mxu0 %v64_v15  ;;  %542 = vmatpush1.xpose.msra.mxu1 %v89_v16  ;;  %v134_v15 = vld [vmem:[#allocation5 + $0x270] sm:$0xff]  ;;  %v108_v16 = vld [vmem:[#allocation5 + $0x1a0] sm:$0xff] }
  0x3c   :  { %472 = vmatprep.subr.mxu0 %v7070_v0  ;;  %543 = vmatprep.subr.mxu1 %v7070_v0 }
  0x3f   :  { %473 = vmatpush1.xpose.msra.mxu0 %v63_v17  ;;  %544 = vmatpush1.xpose.msra.mxu1 %v88_v18  ;;  %v133_v17 = vld [vmem:[#allocation5 + $0x268] sm:$0xff]  ;;  %v107_v18 = vld [vmem:[#allocation5 + $0x198] sm:$0xff] }
  0x40   :  { %474 = vmatprep.subr.mxu0 %v7070_v0  ;;  %545 = vmatprep.subr.mxu1 %v7070_v0 }
  0x43   :  { %475 = vmatpush1.xpose.msra.mxu0 %v62_v19  ;;  %546 = vmatpush1.xpose.msra.mxu1 %v87_v20  ;;  %v132_v19 = vld [vmem:[#allocation5 + $0x260] sm:$0xff]  ;;  %v106_v20 = vld [vmem:[#allocation5 + $0x190] sm:$0xff] }
  0x44   :  { %476 = vmatprep.subr.mxu0 %v7070_v0  ;;  %547 = vmatprep.subr.mxu1 %v7070_v0 }
  0x47   :  { %477 = vmatpush1.xpose.msra.mxu0 %v61_v21  ;;  %548 = vmatpush1.xpose.msra.mxu1 %v86_v22  ;;  %v131_v21 = vld [vmem:[#allocation5 + $0x258] sm:$0xff]  ;;  %v130_v22 = vld [vmem:[#allocation5 + $0x250] sm:$0xff] }
  0x48   :  { %478 = vmatprep.subr.mxu0 %v7070_v0  ;;  %549 = vmatprep.subr.mxu1 %v7070_v0 }
  0x4b   :  { %479 = vmatpush1.xpose.msra.mxu0 %v60_v23  ;;  %550 = vmatpush1.xpose.msra.mxu1 %v85_v24  ;;  %v155_v23 = vld [vmem:[#allocation5 + $0x318] sm:$0xff]  ;;  %v129_v24 = vld [vmem:[#allocation5 + $0x248] sm:$0xff] }
  0x4c   :  { %480 = vmatprep.subr.mxu0 %v7070_v0  ;;  %551 = vmatprep.subr.mxu1 %v7070_v0 }
  0x4f   :  { %481 = vmatpush1.xpose.msra.mxu0 %v59_v25  ;;  %552 = vmatpush1.xpose.msra.mxu1 %v84_v26  ;;  %v154_v25 = vld [vmem:[#allocation5 + $0x310] sm:$0xff]  ;;  %v128_v26 = vld [vmem:[#allocation5 + $0x240] sm:$0xff] }
  0x50   :  { %482 = vmatprep.subr.mxu0 %v7070_v0  ;;  %553 = vmatprep.subr.mxu1 %v7070_v0 }
  0x53   :  { %483 = vmatpush1.xpose.msra.mxu0 %v58_v27  ;;  %554 = vmatpush1.xpose.msra.mxu1 %v83_v28  ;;  %v153_v27 = vld [vmem:[#allocation5 + $0x308] sm:$0xff]  ;;  %v127_v28 = vld [vmem:[#allocation5 + $0x238] sm:$0xff] }
  0x54   :  { %484 = vmatprep.subr.mxu0 %v7070_v0  ;;  %555 = vmatprep.subr.mxu1 %v7070_v0 }
  0x57   :  { %485 = vmatpush1.xpose.msra.mxu0 %v57_v29  ;;  %556 = vmatpush1.xpose.msra.mxu1 %v82_v30  ;;  %v152_v29 = vld [vmem:[#allocation5 + $0x300] sm:$0xff]  ;;  %v126_v30 = vld [vmem:[#allocation5 + $0x230] sm:$0xff] }
  0x58   :  { %486 = vmatprep.subr.mxu0 %v7070_v0  ;;  %557 = vmatprep.subr.mxu1 %v7070_v0 }
  0x5b   :  { %487 = vmatpush1.xpose.msra.mxu0 %v56_v31  ;;  %558 = vmatpush1.xpose.msra.mxu1 %v81_v32  ;;  %v151_v31 = vld [vmem:[#allocation5 + $0x2f8] sm:$0xff]  ;;  %v125_v32 = vld [vmem:[#allocation5 + $0x228] sm:$0xff] }
  0x5c   :  { %502 = vmatprep.subr.mxu0 %v7070_v0  ;;  %573 = vmatprep.subr.mxu1 %v7070_v0 }
  0x5f   :  { %503 = vmatpush2.xpose.msra.mxu0 %v80_v33  ;;  %574 = vmatpush2.xpose.msra.mxu1 %v105_v34  ;;  %v150_v33 = vld [vmem:[#allocation5 + $0x2f0] sm:$0xff]  ;;  %v124_v34 = vld [vmem:[#allocation5 + $0x220] sm:$0xff] }
  0x60   :  { %504 = vmatprep.subr.mxu0 %v7070_v0  ;;  %575 = vmatprep.subr.mxu1 %v7070_v0 }
  0x63   :  { %505 = vmatpush2.xpose.msra.mxu0 %v79_v35  ;;  %576 = vmatpush2.xpose.msra.mxu1 %v104_v36  ;;  %v149_v35 = vld [vmem:[#allocation5 + $0x2e8] sm:$0xff]  ;;  %v123_v36 = vld [vmem:[#allocation5 + $0x218] sm:$0xff] }
  0x64   :  { %506 = vmatprep.subr.mxu0 %v7070_v0  ;;  %577 = vmatprep.subr.mxu1 %v7070_v0 }
  0x67   :  { %507 = vmatpush2.xpose.msra.mxu0 %v78_v37  ;;  %578 = vmatpush2.xpose.msra.mxu1 %v103_v38  ;;  %v148_v37 = vld [vmem:[#allocation5 + $0x2e0] sm:$0xff]  ;;  %v122_v38 = vld [vmem:[#allocation5 + $0x210] sm:$0xff] }
  0x68   :  { %508 = vmatprep.subr.mxu0 %v7070_v0  ;;  %579 = vmatprep.subr.mxu1 %v7070_v0 }
  0x6b   :  { %509 = vmatpush2.xpose.msra.mxu0 %v77_v39  ;;  %580 = vmatpush2.xpose.msra.mxu1 %v102_v40  ;;  %v147_v39 = vld [vmem:[#allocation5 + $0x2d8] sm:$0xff]  ;;  %v42_v40 = vld [vmem:[#allocation2 + $0x10] sm:$0xff] }
  0x6c   :  { %510 = vmatprep.subr.mxu0 %v7070_v0  ;;  %581 = vmatprep.subr.mxu1 %v7070_v0 }
  0x6f   :  { %511 = vmatpush2.xpose.msra.mxu0 %v76_v41  ;;  %582 = vmatpush2.xpose.msra.mxu1 %v101_v42  ;;  %v43_v41 = vld [vmem:[#allocation2 + $0x18] sm:$0xff] }
  0x70   :  { %512 = vmatprep.subr.mxu0 %v7070_v0  ;;  %583 = vmatprep.subr.mxu1 %v7070_v0  ;;  %v171_v42 = vld [vmem:[#allocation5 + $0x398] sm:$0xff] }
  0x73   :  { %513 = vmatpush2.xpose.msra.mxu0 %v75_v43  ;;  %584 = vmatpush2.xpose.msra.mxu1 %v100_v44  ;;  %v196_v43 = vld [vmem:[#allocation5 + $0x460] sm:$0xff]  ;;  %v170_v44 = vld [vmem:[#allocation5 + $0x390] sm:$0xff] }
  0x74   :  { %514 = vmatprep.subr.mxu0 %v7070_v0  ;;  %585 = vmatprep.subr.mxu1 %v7070_v0 }
  0x77   :  { %515 = vmatpush2.xpose.msra.mxu0 %v74_v45  ;;  %586 = vmatpush2.xpose.msra.mxu1 %v99_v46  ;;  %v195_v45 = vld [vmem:[#allocation5 + $0x458] sm:$0xff]  ;;  %v169_v46 = vld [vmem:[#allocation5 + $0x388] sm:$0xff] }
  0x78   :  { %516 = vmatprep.subr.mxu0 %v7070_v0  ;;  %587 = vmatprep.subr.mxu1 %v7070_v0 }
  0x7b   :  { %517 = vmatpush2.xpose.msra.mxu0 %v73_v47  ;;  %588 = vmatpush2.xpose.msra.mxu1 %v98_v48  ;;  %v194_v47 = vld [vmem:[#allocation5 + $0x450] sm:$0xff]  ;;  %v168_v48 = vld [vmem:[#allocation5 + $0x380] sm:$0xff] }
  0x7c   :  { %518 = vmatprep.subr.mxu0 %v7070_v0  ;;  %589 = vmatprep.subr.mxu1 %v7070_v0 }
  0x7f   :  { %519 = vmatpush2.xpose.msra.mxu0 %v72_v49  ;;  %590 = vmatpush2.xpose.msra.mxu1 %v97_v50  ;;  %v193_v49 = vld [vmem:[#allocation5 + $0x448] sm:$0xff]  ;;  %v167_v50 = vld [vmem:[#allocation5 + $0x378] sm:$0xff] }
  0x80   :  { %598 = vmatprep.subr.mxu0 %v7070_v0  ;;  %669 = vmatprep.subr.mxu1 %v7070_v0 }
  0x82   :  { %521 = vmatmul.mubr.f32.vlgmr.msra.gmra.mxu0 %v40_v51  ;;  %592 = vmatmul.mubr.f32.vlgmr.msra.gmra.mxu1 %v41_v52  ;;  %v192_v51 = vld [vmem:[#allocation5 + $0x440] sm:$0xff]  ;;  %v166_v52 = vld [vmem:[#allocation5 + $0x370] sm:$0xff] }
  0x83   :  { %599 = vmatpush1.xpose.msra.mxu0 %v121_v53  ;;  %670 = vmatpush1.xpose.msra.mxu1 %v146_v54  ;;  %v191_v53 = vld [vmem:[#allocation5 + $0x438] sm:$0xff]  ;;  %v165_v54 = vld [vmem:[#allocation5 + $0x368] sm:$0xff] }
  0x84   :  { %600 = vmatprep.subr.mxu0 %v7070_v0  ;;  %671 = vmatprep.subr.mxu1 %v7070_v0 }
  0x85   :  { %662 = vmatprep.mubr.f32.mxu0 %v7070_v0  ;;  %733 = vmatprep.mubr.f32.mxu1 %v7070_v0 }
  0x87   :  { %601 = vmatpush1.xpose.msra.mxu0 %v120_v55  ;;  %672 = vmatpush1.xpose.msra.mxu1 %v145_v56  ;;  %v190_v55 = vld [vmem:[#allocation5 + $0x430] sm:$0xff]  ;;  %v164_v56 = vld [vmem:[#allocation5 + $0x360] sm:$0xff] }
  0x88   :  { %602 = vmatprep.subr.mxu0 %v7070_v0  ;;  %673 = vmatprep.subr.mxu1 %v7070_v0 }
  0x8b   :  { %603 = vmatpush1.xpose.msra.mxu0 %v119_v57  ;;  %674 = vmatpush1.xpose.msra.mxu1 %v144_v58  ;;  %v189_v57 = vld [vmem:[#allocation5 + $0x428] sm:$0xff]  ;;  %v163_v58 = vld [vmem:[#allocation5 + $0x358] sm:$0xff] }
  0x8c   :  { %604 = vmatprep.subr.mxu0 %v7070_v0  ;;  %675 = vmatprep.subr.mxu1 %v7070_v0 }
  0x8f   :  { %605 = vmatpush1.xpose.msra.mxu0 %v118_v59  ;;  %676 = vmatpush1.xpose.msra.mxu1 %v143_v60  ;;  %v188_v59 = vld [vmem:[#allocation5 + $0x420] sm:$0xff]  ;;  %v162_v60 = vld [vmem:[#allocation5 + $0x350] sm:$0xff] }
  0x90   :  { %606 = vmatprep.subr.mxu0 %v7070_v0  ;;  %677 = vmatprep.subr.mxu1 %v7070_v0 }
  0x93   :  { %607 = vmatpush1.xpose.msra.mxu0 %v117_v61  ;;  %678 = vmatpush1.xpose.msra.mxu1 %v142_v62  ;;  %v187_v61 = vld [vmem:[#allocation5 + $0x418] sm:$0xff]  ;;  %v161_v62 = vld [vmem:[#allocation5 + $0x348] sm:$0xff] }
  0x94   :  { %608 = vmatprep.subr.mxu0 %v7070_v0  ;;  %679 = vmatprep.subr.mxu1 %v7070_v0 }
  0x97   :  { %609 = vmatpush1.xpose.msra.mxu0 %v116_v63  ;;  %680 = vmatpush1.xpose.msra.mxu1 %v141_v1  ;;  %v186_v63 = vld [vmem:[#allocation5 + $0x410] sm:$0xff]  ;;  %v160_v1 = vld [vmem:[#allocation5 + $0x340] sm:$0xff] }
  0x98   :  { %610 = vmatprep.subr.mxu0 %v7070_v0  ;;  %681 = vmatprep.subr.mxu1 %v7070_v0 }
  0x9b   :  { %611 = vmatpush1.xpose.msra.mxu0 %v115_v2  ;;  %682 = vmatpush1.xpose.msra.mxu1 %v140_v3  ;;  %v185_v2 = vld [vmem:[#allocation5 + $0x408] sm:$0xff]  ;;  %v159_v3 = vld [vmem:[#allocation5 + $0x338] sm:$0xff] }
  0x9c   :  { %612 = vmatprep.subr.mxu0 %v7070_v0  ;;  %683 = vmatprep.subr.mxu1 %v7070_v0 }
  0x9f   :  { %613 = vmatpush1.xpose.msra.mxu0 %v114_v4  ;;  %684 = vmatpush1.xpose.msra.mxu1 %v139_v5  ;;  %v184_v4 = vld [vmem:[#allocation5 + $0x400] sm:$0xff]  ;;  %v158_v5 = vld [vmem:[#allocation5 + $0x330] sm:$0xff] }
  0xa0   :  { %614 = vmatprep.subr.mxu0 %v7070_v0  ;;  %685 = vmatprep.subr.mxu1 %v7070_v0 }
  0xa3   :  { %615 = vmatpush1.xpose.msra.mxu0 %v113_v6  ;;  %686 = vmatpush1.xpose.msra.mxu1 %v138_v7  ;;  %v183_v6 = vld [vmem:[#allocation5 + $0x3f8] sm:$0xff]  ;;  %v157_v7 = vld [vmem:[#allocation5 + $0x328] sm:$0xff] }
  0xa4   :  { %616 = vmatprep.subr.mxu0 %v7070_v0  ;;  %687 = vmatprep.subr.mxu1 %v7070_v0 }
  0xa7   :  { %617 = vmatpush1.xpose.msra.mxu0 %v112_v8  ;;  %688 = vmatpush1.xpose.msra.mxu1 %v137_v9  ;;  %v182_v8 = vld [vmem:[#allocation5 + $0x3f0] sm:$0xff]  ;;  %v156_v9 = vld [vmem:[#allocation5 + $0x320] sm:$0xff] }
  0xa8   :  { %618 = vmatprep.subr.mxu0 %v7070_v0  ;;  %689 = vmatprep.subr.mxu1 %v7070_v0 }
  0xab   :  { %619 = vmatpush1.xpose.msra.mxu0 %v111_v10  ;;  %690 = vmatpush1.xpose.msra.mxu1 %v136_v11  ;;  %v181_v10 = vld [vmem:[#allocation5 + $0x3e8] sm:$0xff]  ;;  %v180_v11 = vld [vmem:[#allocation5 + $0x3e0] sm:$0xff] }
  0xac   :  { %620 = vmatprep.subr.mxu0 %v7070_v0  ;;  %691 = vmatprep.subr.mxu1 %v7070_v0 }
  0xaf   :  { %621 = vmatpush1.xpose.msra.mxu0 %v110_v12  ;;  %692 = vmatpush1.xpose.msra.mxu1 %v135_v13  ;;  %v205_v12 = vld [vmem:[#allocation5 + $0x4a8] sm:$0xff]  ;;  %v179_v13 = vld [vmem:[#allocation5 + $0x3d8] sm:$0xff] }
  0xb0   :  { %622 = vmatprep.subr.mxu0 %v7070_v0  ;;  %693 = vmatprep.subr.mxu1 %v7070_v0 }
  0xb3   :  { %623 = vmatpush1.xpose.msra.mxu0 %v109_v14  ;;  %694 = vmatpush1.xpose.msra.mxu1 %v134_v15  ;;  %v204_v14 = vld [vmem:[#allocation5 + $0x4a0] sm:$0xff]  ;;  %v178_v15 = vld [vmem:[#allocation5 + $0x3d0] sm:$0xff] }
  0xb4   :  { %624 = vmatprep.subr.mxu0 %v7070_v0  ;;  %695 = vmatprep.subr.mxu1 %v7070_v0 }
  0xb7   :  { %625 = vmatpush1.xpose.msra.mxu0 %v108_v16  ;;  %696 = vmatpush1.xpose.msra.mxu1 %v133_v17  ;;  %v203_v16 = vld [vmem:[#allocation5 + $0x498] sm:$0xff]  ;;  %v177_v17 = vld [vmem:[#allocation5 + $0x3c8] sm:$0xff] }
  0xb8   :  { %626 = vmatprep.subr.mxu0 %v7070_v0  ;;  %697 = vmatprep.subr.mxu1 %v7070_v0 }
  0xbb   :  { %627 = vmatpush1.xpose.msra.mxu0 %v107_v18  ;;  %698 = vmatpush1.xpose.msra.mxu1 %v132_v19  ;;  %v202_v18 = vld [vmem:[#allocation5 + $0x490] sm:$0xff]  ;;  %v176_v19 = vld [vmem:[#allocation5 + $0x3c0] sm:$0xff] }
  0xbc   :  { %628 = vmatprep.subr.mxu0 %v7070_v0  ;;  %699 = vmatprep.subr.mxu1 %v7070_v0 }
  0xbf   :  { %629 = vmatpush1.xpose.msra.mxu0 %v106_v20  ;;  %700 = vmatpush1.xpose.msra.mxu1 %v131_v21  ;;  %v201_v20 = vld [vmem:[#allocation5 + $0x488] sm:$0xff]  ;;  %v175_v21 = vld [vmem:[#allocation5 + $0x3b8] sm:$0xff] }
  0xc0   :  { %644 = vmatprep.subr.mxu0 %v7070_v0  ;;  %715 = vmatprep.subr.mxu1 %v7070_v0 }
  0xc3   :  { %645 = vmatpush2.xpose.msra.mxu0 %v130_v22  ;;  %716 = vmatpush2.xpose.msra.mxu1 %v155_v23  ;;  %v200_v22 = vld [vmem:[#allocation5 + $0x480] sm:$0xff]  ;;  %v174_v23 = vld [vmem:[#allocation5 + $0x3b0] sm:$0xff] }
  0xc4   :  { %646 = vmatprep.subr.mxu0 %v7070_v0  ;;  %717 = vmatprep.subr.mxu1 %v7070_v0 }
  0xc7   :  { %647 = vmatpush2.xpose.msra.mxu0 %v129_v24  ;;  %718 = vmatpush2.xpose.msra.mxu1 %v154_v25  ;;  %v199_v24 = vld [vmem:[#allocation5 + $0x478] sm:$0xff]  ;;  %v173_v25 = vld [vmem:[#allocation5 + $0x3a8] sm:$0xff] }
  0xc8   :  { %648 = vmatprep.subr.mxu0 %v7070_v0  ;;  %719 = vmatprep.subr.mxu1 %v7070_v0 }
  0xcb   :  { %649 = vmatpush2.xpose.msra.mxu0 %v128_v26  ;;  %720 = vmatpush2.xpose.msra.mxu1 %v153_v27  ;;  %v198_v26 = vld [vmem:[#allocation5 + $0x470] sm:$0xff] }
  0xcc   :  { %650 = vmatprep.subr.mxu0 %v7070_v0  ;;  %721 = vmatprep.subr.mxu1 %v7070_v0 }
  0xcf   :  { %651 = vmatpush2.xpose.msra.mxu0 %v127_v28  ;;  %722 = vmatpush2.xpose.msra.mxu1 %v152_v29  ;;  %v172_v29 = vld [vmem:[#allocation5 + $0x3a0] sm:$0xff] }
  0xd0   :  { %652 = vmatprep.subr.mxu0 %v7070_v0  ;;  %723 = vmatprep.subr.mxu1 %v7070_v0 }
  0xd3   :  { %653 = vmatpush2.xpose.msra.mxu0 %v126_v30  ;;  %724 = vmatpush2.xpose.msra.mxu1 %v151_v31  ;;  %v197_v30 = vld [vmem:[#allocation5 + $0x468] sm:$0xff] }
  0xd4   :  { %654 = vmatprep.subr.mxu0 %v7070_v0  ;;  %725 = vmatprep.subr.mxu1 %v7070_v0 }
  0xd7   :  { %655 = vmatpush2.xpose.msra.mxu0 %v125_v32  ;;  %726 = vmatpush2.xpose.msra.mxu1 %v150_v33 }
  0xd8   :  { %656 = vmatprep.subr.mxu0 %v7070_v0  ;;  %727 = vmatprep.subr.mxu1 %v7070_v0 }
  0xdb   :  { %657 = vmatpush2.xpose.msra.mxu0 %v124_v34  ;;  %728 = vmatpush2.xpose.msra.mxu1 %v149_v35 }
  0xdc   :  { %658 = vmatprep.subr.mxu0 %v7070_v0  ;;  %729 = vmatprep.subr.mxu1 %v7070_v0 }
  0xdf   :  { %659 = vmatpush2.xpose.msra.mxu0 %v123_v36  ;;  %730 = vmatpush2.xpose.msra.mxu1 %v148_v37 }
  0xe0   :  { %660 = vmatprep.subr.mxu0 %v7070_v0  ;;  %731 = vmatprep.subr.mxu1 %v7070_v0 }
  0xe3   :  { %661 = vmatpush2.xpose.msra.mxu0 %v122_v38  ;;  %732 = vmatpush2.xpose.msra.mxu1 %v147_v39 }
  0xe4   :  { %740 = vmatprep.subr.mxu0 %v7070_v0  ;;  %811 = vmatprep.subr.mxu1 %v7070_v0 }
  0xe6   :  { %663 = vmatmul.mubr.f32.vlgmr.msra.gmra.mxu0 %v42_v40  ;;  %734 = vmatmul.mubr.f32.vlgmr.msra.gmra.mxu1 %v43_v41 }
  0xe7   :  { %741 = vmatpush1.xpose.msra.mxu0 %v171_v42  ;;  %812 = vmatpush1.xpose.msra.mxu1 %v196_v43 }
  0xe8   :  { %742 = vmatprep.subr.mxu0 %v7070_v0  ;;  %813 = vmatprep.subr.mxu1 %v7070_v0 }
  0xe9   :  { %804 = vmatprep.mubr.f32.mxu0 %v7070_v0  ;;  %875 = vmatprep.mubr.f32.mxu1 %v7070_v0 }
  0xeb   :  { %743 = vmatpush1.xpose.msra.mxu0 %v170_v44  ;;  %814 = vmatpush1.xpose.msra.mxu1 %v195_v45 }
  0xec   :  { %744 = vmatprep.subr.mxu0 %v7070_v0  ;;  %815 = vmatprep.subr.mxu1 %v7070_v0 }
  0xef   :  { %745 = vmatpush1.xpose.msra.mxu0 %v169_v46  ;;  %816 = vmatpush1.xpose.msra.mxu1 %v194_v47 }
  0xf0   :  { %746 = vmatprep.subr.mxu0 %v7070_v0  ;;  %817 = vmatprep.subr.mxu1 %v7070_v0 }
  0xf3   :  { %747 = vmatpush1.xpose.msra.mxu0 %v168_v48  ;;  %818 = vmatpush1.xpose.msra.mxu1 %v193_v49  ;;  %v44_v48 = vld [vmem:[#allocation2 + $0x20] sm:$0xff]  ;;  %v45_v49 = vld [vmem:[#allocation2 + $0x28] sm:$0xff] }
  0xf4   :  { %748 = vmatprep.subr.mxu0 %v7070_v0  ;;  %819 = vmatprep.subr.mxu1 %v7070_v0 }
  0xf7   :  { %749 = vmatpush1.xpose.msra.mxu0 %v167_v50  ;;  %820 = vmatpush1.xpose.msra.mxu1 %v192_v51 }
  0xf8   :  { %750 = vmatprep.subr.mxu0 %v7070_v0  ;;  %821 = vmatprep.subr.mxu1 %v7070_v0 }
  0xfb   :  { %751 = vmatpush1.xpose.msra.mxu0 %v166_v52  ;;  %822 = vmatpush1.xpose.msra.mxu1 %v191_v53 }
  0xfc   :  { %752 = vmatprep.subr.mxu0 %v7070_v0  ;;  %823 = vmatprep.subr.mxu1 %v7070_v0 }
  0xff   :  { %753 = vmatpush1.xpose.msra.mxu0 %v165_v54  ;;  %824 = vmatpush1.xpose.msra.mxu1 %v190_v55  ;;  %v221_v54 = vld [vmem:[#allocation5 + $0x528] sm:$0xff]  ;;  %v246_v55 = vld [vmem:[#allocation5 + $0x5f0] sm:$0xff] }
 0x100   :  { %754 = vmatprep.subr.mxu0 %v7070_v0  ;;  %825 = vmatprep.subr.mxu1 %v7070_v0 }
 0x103   :  { %755 = vmatpush1.xpose.msra.mxu0 %v164_v56  ;;  %826 = vmatpush1.xpose.msra.mxu1 %v189_v57 }
 0x104   :  { %756 = vmatprep.subr.mxu0 %v7070_v0  ;;  %827 = vmatprep.subr.mxu1 %v7070_v0 }
 0x107   :  { %757 = vmatpush1.xpose.msra.mxu0 %v163_v58  ;;  %828 = vmatpush1.xpose.msra.mxu1 %v188_v59 }
 0x108   :  { %758 = vmatprep.subr.mxu0 %v7070_v0  ;;  %829 = vmatprep.subr.mxu1 %v7070_v0 }
 0x10b   :  { %759 = vmatpush1.xpose.msra.mxu0 %v162_v60  ;;  %830 = vmatpush1.xpose.msra.mxu1 %v187_v61 }
 0x10c   :  { %760 = vmatprep.subr.mxu0 %v7070_v0  ;;  %831 = vmatprep.subr.mxu1 %v7070_v0 }
 0x10f   :  { %761 = vmatpush1.xpose.msra.mxu0 %v161_v62  ;;  %832 = vmatpush1.xpose.msra.mxu1 %v186_v63 }
 0x110   :  { %762 = vmatprep.subr.mxu0 %v7070_v0  ;;  %833 = vmatprep.subr.mxu1 %v7070_v0 }
 0x113   :  { %763 = vmatpush1.xpose.msra.mxu0 %v160_v1  ;;  %834 = vmatpush1.xpose.msra.mxu1 %v185_v2 }
 0x114   :  { %764 = vmatprep.subr.mxu0 %v7070_v0  ;;  %835 = vmatprep.subr.mxu1 %v7070_v0 }
 0x117   :  { %765 = vmatpush1.xpose.msra.mxu0 %v159_v3  ;;  %836 = vmatpush1.xpose.msra.mxu1 %v184_v4 }
 0x118   :  { %766 = vmatprep.subr.mxu0 %v7070_v0  ;;  %837 = vmatprep.subr.mxu1 %v7070_v0 }
 0x11b   :  { %767 = vmatpush1.xpose.msra.mxu0 %v158_v5  ;;  %838 = vmatpush1.xpose.msra.mxu1 %v183_v6 }
 0x11c   :  { %768 = vmatprep.subr.mxu0 %v7070_v0  ;;  %839 = vmatprep.subr.mxu1 %v7070_v0 }
 0x11f   :  { %769 = vmatpush1.xpose.msra.mxu0 %v157_v7  ;;  %840 = vmatpush1.xpose.msra.mxu1 %v182_v8  ;;  %v220_v8 = vld [vmem:[#allocation5 + $0x520] sm:$0xff] }
 0x120   :  { %770 = vmatprep.subr.mxu0 %v7070_v0  ;;  %841 = vmatprep.subr.mxu1 %v7070_v0 }
 0x123   :  { %771 = vmatpush1.xpose.msra.mxu0 %v156_v9  ;;  %842 = vmatpush1.xpose.msra.mxu1 %v181_v10  ;;  %v245_v9 = vld [vmem:[#allocation5 + $0x5e8] sm:$0xff] }
 0x124   :  { %786 = vmatprep.subr.mxu0 %v7070_v0  ;;  %857 = vmatprep.subr.mxu1 %v7070_v0 }
 0x127   :  { %787 = vmatpush2.xpose.msra.mxu0 %v180_v11  ;;  %858 = vmatpush2.xpose.msra.mxu1 %v205_v12 }
 0x128   :  { %788 = vmatprep.subr.mxu0 %v7070_v0  ;;  %859 = vmatprep.subr.mxu1 %v7070_v0 }
 0x12b   :  { %789 = vmatpush2.xpose.msra.mxu0 %v179_v13  ;;  %860 = vmatpush2.xpose.msra.mxu1 %v204_v14 }
 0x12c   :  { %790 = vmatprep.subr.mxu0 %v7070_v0  ;;  %861 = vmatprep.subr.mxu1 %v7070_v0 }
 0x12f   :  { %791 = vmatpush2.xpose.msra.mxu0 %v178_v15  ;;  %862 = vmatpush2.xpose.msra.mxu1 %v203_v16 }
 0x130   :  { %792 = vmatprep.subr.mxu0 %v7070_v0  ;;  %863 = vmatprep.subr.mxu1 %v7070_v0 }
 0x133   :  { %793 = vmatpush2.xpose.msra.mxu0 %v177_v17  ;;  %864 = vmatpush2.xpose.msra.mxu1 %v202_v18 }
 0x134   :  { %794 = vmatprep.subr.mxu0 %v7070_v0  ;;  %865 = vmatprep.subr.mxu1 %v7070_v0 }
 0x137   :  { %795 = vmatpush2.xpose.msra.mxu0 %v176_v19  ;;  %866 = vmatpush2.xpose.msra.mxu1 %v201_v20 }
 0x138   :  { %796 = vmatprep.subr.mxu0 %v7070_v0  ;;  %867 = vmatprep.subr.mxu1 %v7070_v0 }
 0x13b   :  { %797 = vmatpush2.xpose.msra.mxu0 %v175_v21  ;;  %868 = vmatpush2.xpose.msra.mxu1 %v200_v22  ;;  %v219_v22 = vld [vmem:[#allocation5 + $0x518] sm:$0xff] }
 0x13c   :  { %798 = vmatprep.subr.mxu0 %v7070_v0  ;;  %869 = vmatprep.subr.mxu1 %v7070_v0 }
 0x13f   :  { %799 = vmatpush2.xpose.msra.mxu0 %v174_v23  ;;  %870 = vmatpush2.xpose.msra.mxu1 %v199_v24  ;;  %v244_v23 = vld [vmem:[#allocation5 + $0x5e0] sm:$0xff] }
 0x140   :  { %800 = vmatprep.subr.mxu0 %v7070_v0  ;;  %871 = vmatprep.subr.mxu1 %v7070_v0 }
 0x142   :  { %v7253_v27 = vpop.f32.mrf.mxu0  ;;  %v7255_v28 = vpop.f32.mrf.mxu1 }
 0x143   :  { %801 = vmatpush2.xpose.msra.mxu0 %v173_v25  ;;  %872 = vmatpush2.xpose.msra.mxu1 %v198_v26  ;;  %v5908_v31 = vadd.f32 0.7, %v7255_v28  ;;  %v5874_v32 = vadd.f32 0.9, %v7253_v27  ;;  %v5940_v33 = vadd.f32 0.5, %v7255_v28  ;;  %v7261_v34 = vadd.f32 0.5, %v7253_v27 }
 0x144   :  { %v7263_v35 = vpop.f32.mrf.mxu0  ;;  %v7265_v36 = vpop.f32.mrf.mxu1  ;;  %802 = vmatprep.subr.mxu0 %v7070_v0  ;;  %873 = vmatprep.subr.mxu1 %v7070_v0  ;;  %v5876_v37 = vadd.f32 0.9, %v7255_v28  ;;  %v5972_v38 = vadd.f32 0.3, %v7255_v28  ;;  %v5906_v39 = vadd.f32 0.7, %v7253_v27 }
 0x145   :  { %v5909_v40 = vadd.f32 0.7, %v7265_v36  ;;  %v1851_v41 = vmul.f32 %v5908_v31, %v5908_v31  ;;  %v5875_v42 = vadd.f32 0.9, %v7263_v35  ;;  %v1624_v43 = vmul.f32 %v5874_v32, %v5874_v32 }
 0x146   :  { %v5941_v44 = vadd.f32 0.5, %v7265_v36  ;;  %v2075_v45 = vmul.f32 %v5940_v33, %v5940_v33  ;;  %v5877_v46 = vadd.f32 0.9, %v7265_v36  ;;  %v1626_v47 = vmul.f32 %v5876_v37, %v5876_v37 }
 0x147   :  { %803 = vmatpush2.xpose.msra.mxu0 %v172_v29  ;;  %874 = vmatpush2.xpose.msra.mxu1 %v197_v30  ;;  %v1852_v50 = vmul.f32 %v5909_v40, %v5909_v40  ;;  %v1883_v51 = vmul.f32 -50.0, %v1851_v41  ;;  %v1625_v52 = vmul.f32 %v5875_v42, %v5875_v42  ;;  %v1656_v53 = vmul.f32 -50.0, %v1624_v43  ;;  %v218_v41 = vld [vmem:[#allocation5 + $0x510] sm:$0xff]  ;;  %v243_v42 = vld [vmem:[#allocation5 + $0x5d8] sm:$0xff] }
 0x148   :  { %882 = vmatprep.subr.mxu0 %v7070_v0  ;;  %953 = vmatprep.subr.mxu1 %v7070_v0  ;;  %v2076_v56 = vmul.f32 %v5941_v44, %v5941_v44  ;;  %v2107_v57 = vmul.f32 -50.0, %v2075_v45  ;;  %v1627_v58 = vmul.f32 %v5877_v46, %v5877_v46  ;;  %v1658_v59 = vmul.f32 -50.0, %v1626_v47 }
 0x149   :  { %v1884_v60 = vmul.f32 -50.0, %v1852_v50  ;;  %v1917_v61 = vmul.f32 1.442695, %v1883_v51  ;;  %v1657_v62 = vmul.f32 -50.0, %v1625_v52  ;;  %v1688_v63 = vmul.f32 1.442695, %v1656_v53 }
 0x14a   :  { %805 = vmatmul.mubr.f32.vlgmr.msra.gmra.mxu0 %v44_v48  ;;  %876 = vmatmul.mubr.f32.vlgmr.msra.gmra.mxu1 %v45_v49  ;;  %v2108_v1 = vmul.f32 -50.0, %v2076_v56  ;;  %v2141_v2 = vmul.f32 1.442695, %v2107_v57  ;;  %v1659_v3 = vmul.f32 -50.0, %v1627_v58  ;;  %v1692_v4 = vmul.f32 1.442695, %v1658_v59 }
 0x14b   :  { %883 = vmatpush1.xpose.msra.mxu0 %v221_v54  ;;  %954 = vmatpush1.xpose.msra.mxu1 %v246_v55  ;;  %6232 = vpow2.f32 %v1917_v61  ;;  %v1919_v5 = vmul.f32 1.442695, %v1884_v60  ;;  %v1690_v6 = vmul.f32 1.442695, %v1657_v62  ;;  %v5973_v7 = vadd.f32 0.3, %v7265_v36 }
 0x14c   :  { %884 = vmatprep.subr.mxu0 %v7070_v0  ;;  %955 = vmatprep.subr.mxu1 %v7070_v0  ;;  %6234 = vpow2.f32 %v1688_v63  ;;  %v2143_v10 = vmul.f32 1.442695, %v2108_v1  ;;  %v1694_v11 = vmul.f32 1.442695, %v1659_v3  ;;  %v2299_v12 = vmul.f32 %v5972_v38, %v5972_v38  ;;  %v217_v55 = vld [vmem:[#allocation5 + $0x508] sm:$0xff]  ;;  %v242_v56 = vld [vmem:[#allocation5 + $0x5d0] sm:$0xff] }
 0x14d   :  { %6236 = vpow2.f32 %v1919_v5  ;;  %v2300_v13 = vmul.f32 %v5973_v7, %v5973_v7  ;;  %v5907_v14 = vadd.f32 0.7, %v7263_v35  ;;  %v1849_v15 = vmul.f32 %v5906_v39, %v5906_v39  ;;  %946 = vmatprep.mubr.f32.mxu0 %v7070_v0  ;;  %1017 = vmatprep.mubr.f32.mxu1 %v7070_v0 }
 0x14e   :  { %6238 = vpow2.f32 %v1690_v6  ;;  %v2331_v16 = vmul.f32 -50.0, %v2299_v12  ;;  %v6004_v17 = vadd.f32 0.1, %v7255_v28  ;;  %v6005_v18 = vadd.f32 0.1, %v7265_v36  ;;  %v216_v12 = vld [vmem:[#allocation5 + $0x500] sm:$0xff] }
 0x14f   :  { %885 = vmatpush1.xpose.msra.mxu0 %v220_v8  ;;  %956 = vmatpush1.xpose.msra.mxu1 %v245_v9  ;;  %6240 = vpow2.f32 %v2141_v2  ;;  %v2332_v19 = vmul.f32 -50.0, %v2300_v13  ;;  %v1850_v20 = vmul.f32 %v5907_v14, %v5907_v14  ;;  %v1881_v21 = vmul.f32 -50.0, %v1849_v15 }
 0x150   :  { %886 = vmatprep.subr.mxu0 %v7070_v0  ;;  %957 = vmatprep.subr.mxu1 %v7070_v0  ;;  %6242 = vpow2.f32 %v2143_v10  ;;  %v2365_v24 = vmul.f32 1.442695, %v2331_v16  ;;  %v2523_v25 = vmul.f32 %v6004_v17, %v6004_v17  ;;  %v2524_v26 = vmul.f32 %v6005_v18, %v6005_v18  ;;  %v241_v17 = vld [vmem:[#allocation5 + $0x5c8] sm:$0xff] }
 0x151   :  { %6244 = vpow2.f32 %v1692_v4  ;;  %v2367_v29 = vmul.f32 1.442695, %v2332_v19  ;;  %v1882_v30 = vmul.f32 -50.0, %v1850_v20  ;;  %v1913_v31 = vmul.f32 1.442695, %v1881_v21 }
 0x152   :  { %6246 = vpow2.f32 %v1694_v11  ;;  %v2555_v32 = vmul.f32 -50.0, %v2523_v25  ;;  %v2556_v33 = vmul.f32 -50.0, %v2524_v26  ;;  %v5939_v37 = vadd.f32 0.5, %v7263_v35 }
 0x153   :  { %887 = vmatpush1.xpose.msra.mxu0 %v219_v22  ;;  %958 = vmatpush1.xpose.msra.mxu1 %v244_v23  ;;  %6248 = vpow2.f32 %v2365_v24  ;;  %v1915_v38 = vmul.f32 1.442695, %v1882_v30  ;;  %v2073_v39 = vmul.f32 %v7261_v34, %v7261_v34  ;;  %v6036_v40 = vadd.f32 -0.1, %v7255_v28 }
 0x154   :  { %888 = vmatprep.subr.mxu0 %v7070_v0  ;;  %959 = vmatprep.subr.mxu1 %v7070_v0  ;;  %6250 = vpow2.f32 %v2367_v29  ;;  %v2589_v43 = vmul.f32 1.442695, %v2555_v32  ;;  %v2591_v44 = vmul.f32 1.442695, %v2556_v33  ;;  %v2074_v45 = vmul.f32 %v5939_v37, %v5939_v37  ;;  %v215_v32 = vld [vmem:[#allocation5 + $0x4f8] sm:$0xff] }
 0x155   :  { %6252 = vpow2.f32 %v1913_v31  ;;  %v2105_v46 = vmul.f32 -50.0, %v2073_v39  ;;  %v6037_v47 = vadd.f32 -0.1, %v7265_v36  ;;  %v2747_v48 = vmul.f32 %v6036_v40, %v6036_v40 }
 0x156   :  { %6254 = vpow2.f32 %v1915_v38  ;;  %v2106_v49 = vmul.f32 -50.0, %v2074_v45  ;;  %v5970_v34 = vadd.f32 0.3, %v7253_v27  ;;  %v5971_v50 = vadd.f32 0.3, %v7263_v35 }
 0x157   :  { %889 = vmatpush1.xpose.msra.mxu0 %v218_v41  ;;  %960 = vmatpush1.xpose.msra.mxu1 %v243_v42  ;;  %6256 = vpow2.f32 %v2589_v43  ;;  %v2137_v51 = vmul.f32 1.442695, %v2105_v46  ;;  %v2748_v52 = vmul.f32 %v6037_v47, %v6037_v47  ;;  %v2779_v53 = vmul.f32 -50.0, %v2747_v48  ;;  %v240_v41 = vld [vmem:[#allocation5 + $0x5c0] sm:$0xff] }
 0x158   :  { %v6233_v54 = vpop.eup %6232  ;;  %890 = vmatprep.subr.mxu0 %v7070_v0  ;;  %961 = vmatprep.subr.mxu1 %v7070_v0  ;;  %6258 = vpow2.f32 %v2591_v44  ;;  %v2139_v57 = vmul.f32 1.442695, %v2106_v49  ;;  %v2297_v58 = vmul.f32 %v5970_v34, %v5970_v34  ;;  %v2298_v59 = vmul.f32 %v5971_v50, %v5971_v50  ;;  %v214_v50 = vld [vmem:[#allocation5 + $0x4f0] sm:$0xff] }
 0x159   :  { %v6235_v60 = vpop.eup %6234  ;;  %6260 = vpow2.f32 %v2137_v51  ;;  %v2780_v61 = vmul.f32 -50.0, %v2748_v52  ;;  %v2813_v62 = vmul.f32 1.442695, %v2779_v53  ;;  %v6068_v63 = vadd.f32 -0.3, %v7255_v28 }
 0x15a   :  { %v6237_v1 = vpop.eup %6236  ;;  %6262 = vpow2.f32 %v2139_v57  ;;  %v2329_v2 = vmul.f32 -50.0, %v2297_v58  ;;  %v2330_v3 = vmul.f32 -50.0, %v2298_v59  ;;  %v6069_v4 = vadd.f32 -0.3, %v7265_v36 }
 0x15b   :  { %v6239_v5 = vpop.eup %6238  ;;  %891 = vmatpush1.xpose.msra.mxu0 %v217_v55  ;;  %962 = vmatpush1.xpose.msra.mxu1 %v242_v56  ;;  %v1981_v6 = vsel %vm1752_vm0, %v6237_v1, 0.0  ;;  %6264 = vpow2.f32 %v2813_v62  ;;  %v2815_v7 = vmul.f32 1.442695, %v2780_v61  ;;  %v2971_v8 = vmul.f32 %v6068_v63, %v6068_v63 }
 0x15c   :  { %v6241_v9 = vpop.eup %6240  ;;  %963 = vmatprep.subr.mxu1 %v7070_v0  ;;  %v1982_v10 = vadd.f32 %v6233_v54, %v1981_v6  ;;  %892 = vmatprep.subr.mxu0 %v7070_v0  ;;  %v1753_v11 = vsel %vm1752_vm0, %v6239_v5, 0.0  ;;  %v2361_v13 = vmul.f32 1.442695, %v2329_v2  ;;  %v2363_v14 = vmul.f32 1.442695, %v2330_v3 }
 0x15d   :  { %v6243_v15 = vpop.eup %6242  ;;  %v1754_v16 = vadd.f32 %v6235_v60, %v1753_v11  ;;  %6266 = vpow2.f32 %v2815_v7  ;;  %v2972_v18 = vmul.f32 %v6069_v4, %v6069_v4  ;;  %v3003_v19 = vmul.f32 -50.0, %v2971_v8  ;;  %v239_v60 = vld [vmem:[#allocation5 + $0x5b8] sm:$0xff]  ;;  %v213_v11 = vld [vmem:[#allocation5 + $0x4e8] sm:$0xff] }
 0x15e   :  { %v6245_v20 = vpop.eup %6244  ;;  %1983 = vadd.xlane.f32.xlu1 %v1982_v10  ;;  %v2205_v21 = vsel %vm1752_vm0, %v6243_v15, 0.0  ;;  %6268 = vpow2.f32 %v2361_v13  ;;  %v6002_v22 = vadd.f32 0.1, %v7253_v27  ;;  %v6003_v23 = vadd.f32 0.1, %v7263_v35  ;;  %v238_v15 = vld [vmem:[#allocation5 + $0x5b0] sm:$0xff] }
 0x15f   :  { %v6247_v24 = vpop.eup %6246  ;;  %1755 = vadd.xlane.f32.xlu0 %v1754_v16  ;;  %893 = vmatpush1.xpose.msra.mxu0 %v216_v12  ;;  %v2206_v25 = vadd.f32 %v6241_v9, %v2205_v21  ;;  %6270 = vpow2.f32 %v2363_v14  ;;  %v3004_v26 = vmul.f32 -50.0, %v2972_v18  ;;  %v3037_v29 = vmul.f32 1.442695, %v3003_v19 }
 0x160   :  { %v6249_v30 = vpop.eup %6248  ;;  %964 = vmatpush1.xpose.msra.mxu1 %v241_v17  ;;  %894 = vmatprep.subr.mxu0 %v7070_v0  ;;  %v1757_v31 = vsel %vm1752_vm0, %v6247_v24, 0.0  ;;  %v2521_v33 = vmul.f32 %v6002_v22, %v6002_v22  ;;  %v2522_v37 = vmul.f32 %v6003_v23, %v6003_v23  ;;  %v6100_v38 = vadd.f32 -0.5, %v7255_v28 }
 0x161   :  { %v6251_v39 = vpop.eup %6250  ;;  %965 = vmatprep.subr.mxu1 %v7070_v0  ;;  %v1758_v40 = vadd.f32 %v6245_v20, %v1757_v31  ;;  %6272 = vpow2.f32 %v3037_v29  ;;  %v3039_v42 = vmul.f32 1.442695, %v3004_v26  ;;  %v6101_v43 = vadd.f32 -0.5, %v7265_v36 }
 0x162   :  { %v6253_v44 = vpop.eup %6252  ;;  %2207 = vadd.xlane.f32.xlu1 %v2206_v25  ;;  %v2429_v45 = vsel %vm1752_vm0, %v6251_v39, 0.0  ;;  %v2553_v46 = vmul.f32 -50.0, %v2521_v33  ;;  %v2554_v47 = vmul.f32 -50.0, %v2522_v37  ;;  %v3195_v48 = vmul.f32 %v6100_v38, %v6100_v38  ;;  %v237_v39 = vld [vmem:[#allocation5 + $0x5a8] sm:$0xff] }
 0x163   :  { %v6255_v49 = vpop.eup %6254  ;;  %1759 = vadd.xlane.f32.xlu0 %v1758_v40  ;;  %895 = vmatpush1.xpose.msra.mxu0 %v215_v32  ;;  %v2430_v34 = vadd.f32 %v6249_v30, %v2429_v45  ;;  %6274 = vpow2.f32 %v3039_v42  ;;  %v3196_v51 = vmul.f32 %v6101_v43, %v6101_v43  ;;  %v6034_v52 = vadd.f32 -0.1, %v7253_v27  ;;  %v212_v32 = vld [vmem:[#allocation5 + $0x4e0] sm:$0xff] }
 0x164   :  { %v6257_v53 = vpop.eup %6256  ;;  %966 = vmatpush1.xpose.msra.mxu1 %v240_v41  ;;  %896 = vmatprep.subr.mxu0 %v7070_v0  ;;  %v1977_v54 = vsel %vm1752_vm0, %v6255_v49, 0.0  ;;  %v2585_v55 = vmul.f32 1.442695, %v2553_v46  ;;  %v2587_v56 = vmul.f32 1.442695, %v2554_v47  ;;  %v3227_v57 = vmul.f32 -50.0, %v3195_v48 }
 0x165   :  { %v6259_v58 = vpop.eup %6258  ;;  %967 = vmatprep.subr.mxu1 %v7070_v0  ;;  %v1978_v59 = vadd.f32 %v6253_v44, %v1977_v54  ;;  %v3228_v61 = vmul.f32 -50.0, %v3196_v51  ;;  %v6035_v62 = vadd.f32 -0.1, %v7263_v35  ;;  %v2745_v63 = vmul.f32 %v6034_v52, %v6034_v52 }
 0x166   :  { %v6261_v1 = vpop.eup %6260  ;;  %2431 = vadd.xlane.f32.xlu1 %v2430_v34  ;;  %v2653_v2 = vsel %vm1752_vm0, %v6259_v58, 0.0  ;;  %6276 = vpow2.f32 %v2585_v55  ;;  %v3261_v3 = vmul.f32 1.442695, %v3227_v57  ;;  %v6130_v4 = vadd.f32 -0.7, %v7253_v27  ;;  %v236_v55 = vld [vmem:[#allocation5 + $0x5a0] sm:$0xff] }
 0x167   :  { %v6263_v5 = vpop.eup %6262  ;;  %1979 = vadd.xlane.f32.xlu0 %v1978_v59  ;;  %897 = vmatpush1.xpose.msra.mxu0 %v214_v50  ;;  %v2654_v6 = vadd.f32 %v6257_v53, %v2653_v2  ;;  %6278 = vpow2.f32 %v2587_v56  ;;  %v3263_v7 = vmul.f32 1.442695, %v3228_v61  ;;  %v2746_v8 = vmul.f32 %v6035_v62, %v6035_v62  ;;  %v211_v50 = vld [vmem:[#allocation5 + $0x4d8] sm:$0xff] }
 0x168   :  { %v6265_v9 = vpop.eup %6264  ;;  %968 = vmatpush1.xpose.msra.mxu1 %v239_v60  ;;  %898 = vmatprep.subr.mxu0 %v7070_v0  ;;  %v2201_v10 = vsel %vm1752_vm0, %v6263_v5, 0.0  ;;  %6280 = vpow2.f32 %v3261_v3  ;;  %v2777_v12 = vmul.f32 -50.0, %v2745_v63  ;;  %v6131_v13 = vadd.f32 -0.7, %v7263_v35  ;;  %v210_v63 = vld [vmem:[#allocation5 + $0x4d0] sm:$0xff] }
 0x169   :  { %969 = vmatprep.subr.mxu1 %v7070_v0  ;;  %v2202_v14 = vadd.f32 %v6261_v1, %v2201_v10  ;;  %6282 = vpow2.f32 %v3263_v7  ;;  %v2778_v16 = vmul.f32 -50.0, %v2746_v8  ;;  %v3417_v17 = vmul.f32 %v6130_v4, %v6130_v4 }
 0x16a   :  { %v6267_v18 = vpop.eup %6266  ;;  %2655 = vadd.xlane.f32.xlu1 %v2654_v6  ;;  %v2809_v19 = vmul.f32 1.442695, %v2777_v12  ;;  %v3418_v20 = vmul.f32 %v6131_v13, %v6131_v13  ;;  %v6066_v21 = vadd.f32 -0.3, %v7253_v27  ;;  %v6067_v22 = vadd.f32 -0.3, %v7263_v35 }
 0x16b   :  { %v6269_v23 = vpop.eup %6268  ;;  %2203 = vadd.xlane.f32.xlu0 %v2202_v14  ;;  %899 = vmatpush1.xpose.msra.mxu0 %v213_v11  ;;  %v2877_v24 = vsel %vm1752_vm0, %v6267_v18, 0.0  ;;  %v2811_v25 = vmul.f32 1.442695, %v2778_v16  ;;  %v3449_v26 = vmul.f32 -50.0, %v3417_v17  ;;  %v6162_v29 = vadd.f32 -0.9, %v7253_v27 }
 0x16c   :  { %v6271_v30 = vpop.eup %6270  ;;  %970 = vmatpush1.xpose.msra.mxu1 %v238_v15  ;;  %v2878_v31 = vadd.f32 %v6265_v9, %v2877_v24  ;;  %900 = vmatprep.subr.mxu0 %v7070_v0  ;;  %6284 = vpow2.f32 %v2809_v19  ;;  %v3450_v33 = vmul.f32 -50.0, %v3418_v20  ;;  %v2969_v37 = vmul.f32 %v6066_v21, %v6066_v21  ;;  %v235_v11 = vld [vmem:[#allocation5 + $0x598] sm:$0xff] }
 0x16d   :  { %971 = vmatprep.subr.mxu1 %v7070_v0  ;;  %v2425_v38 = vsel %vm1752_vm0, %v6271_v30, 0.0  ;;  %6286 = vpow2.f32 %v2811_v25  ;;  %v3481_v40 = vmul.f32 1.442695, %v3449_v26  ;;  %v2970_v41 = vmul.f32 %v6067_v22, %v6067_v22  ;;  %v209_v22 = vld [vmem:[#allocation5 + $0x4c8] sm:$0xff] }
 0x16e   :  { %v6273_v42 = vpop.eup %6272  ;;  %2879 = vadd.xlane.f32.xlu1 %v2878_v31  ;;  %v2426_v43 = vadd.f32 %v6269_v23, %v2425_v38  ;;  %v3483_v44 = vmul.f32 1.442695, %v3450_v33  ;;  %v3001_v45 = vmul.f32 -50.0, %v2969_v37  ;;  %v6163_v46 = vadd.f32 -0.9, %v7263_v35  ;;  %v234_v23 = vld [vmem:[#allocation5 + $0x590] sm:$0xff] }
 0x16f   :  { %901 = vmatpush1.xpose.msra.mxu0 %v212_v32  ;;  %6288 = vpow2.f32 %v3481_v40  ;;  %v3002_v47 = vmul.f32 -50.0, %v2970_v41  ;;  %v3641_v48 = vmul.f32 %v6162_v29, %v6162_v29  ;;  %v6098_v49 = vadd.f32 -0.5, %v7253_v27 }
 0x170   :  { %v6275_v34 = vpop.eup %6274  ;;  %2427 = vadd.xlane.f32.xlu0 %v2426_v43  ;;  %972 = vmatpush1.xpose.msra.mxu1 %v237_v39  ;;  %6290 = vpow2.f32 %v3483_v44  ;;  %v3033_v51 = vmul.f32 1.442695, %v3001_v45  ;;  %v3642_v52 = vmul.f32 %v6163_v46, %v6163_v46  ;;  %v6099_v53 = vadd.f32 -0.5, %v7263_v35 }
 0x171   :  { %973 = vmatprep.subr.mxu1 %v7070_v0  ;;  %v3101_v54 = vsel %vm1752_vm0, %v6275_v34, 0.0  ;;  %902 = vmatprep.subr.mxu0 %v7070_v0  ;;  %v3035_v56 = vmul.f32 1.442695, %v3002_v47  ;;  %v3673_v57 = vmul.f32 -50.0, %v3641_v48  ;;  %v3193_v58 = vmul.f32 %v6098_v49, %v6098_v49 }
 0x172   :  { %v3102_v59 = vadd.f32 %v6273_v42, %v3101_v54  ;;  %6292 = vpow2.f32 %v3033_v51  ;;  %v3674_v60 = vmul.f32 -50.0, %v3642_v52  ;;  %v3194_v61 = vmul.f32 %v6099_v53, %v6099_v53  ;;  %v207_v54 = vld [vmem:[#allocation5 + $0x4b8] sm:$0xff] }
 0x173   :  { %v6277_v62 = vpop.eup %6276  ;;  %903 = vmatpush1.xpose.msra.mxu0 %v211_v50  ;;  %6294 = vpow2.f32 %v3035_v56  ;;  %v3705_v1 = vmul.f32 1.442695, %v3673_v57  ;;  %v3225_v2 = vmul.f32 -50.0, %v3193_v58  ;;  %v6196_v3 = vadd.f32 -1.0, %v7255_v28 }
 0x174   :  { %v6279_v4 = vpop.eup %6278  ;;  %3103 = vadd.xlane.f32.xlu1 %v3102_v59  ;;  %974 = vmatpush1.xpose.msra.mxu1 %v236_v55  ;;  %v3707_v5 = vmul.f32 1.442695, %v3674_v60  ;;  %v3226_v6 = vmul.f32 -50.0, %v3194_v61  ;;  %v6197_v7 = vadd.f32 -1.0, %v7265_v36  ;;  %v6132_v8 = vadd.f32 -0.7, %v7255_v28 }
 0x175   :  { %v6281_v9 = vpop.eup %6280  ;;  %v2649_v10 = vsel %vm1752_vm0, %v6279_v4, 0.0  ;;  %975 = vmatprep.subr.mxu1 %v7070_v0  ;;  %904 = vmatprep.subr.mxu0 %v7070_v0  ;;  %6296 = vpow2.f32 %v3705_v1  ;;  %v3257_v12 = vmul.f32 1.442695, %v3225_v2  ;;  %v3867_v13 = vmul.f32 %v6196_v3, %v6196_v3  ;;  %v232_v61 = vld [vmem:[#allocation5 + $0x580] sm:$0xff] }
 0x176   :  { %v6283_v14 = vpop.eup %6282  ;;  %v2650_v15 = vadd.f32 %v6277_v62, %v2649_v10  ;;  %6298 = vpow2.f32 %v3707_v5  ;;  %v3259_v16 = vmul.f32 1.442695, %v3226_v6  ;;  %v3868_v17 = vmul.f32 %v6197_v7, %v6197_v7  ;;  %v206_v5 = vld [vmem:[#allocation5 + $0x4b0] sm:$0xff] }
 0x177   :  { %v3325_v18 = vsel %vm1752_vm0, %v6283_v14, 0.0  ;;  %905 = vmatpush1.xpose.msra.mxu0 %v210_v63  ;;  %6300 = vpow2.f32 %v3257_v12  ;;  %v3899_v19 = vmul.f32 -500000.0, %v3867_v13  ;;  %v6133_v20 = vadd.f32 -0.7, %v7265_v36  ;;  %v230_v13 = vld [vmem:[#allocation5 + $0x570] sm:$0xff] }
 0x178   :  { %2651 = vadd.xlane.f32.xlu0 %v2650_v15  ;;  %v3326_v21 = vadd.f32 %v6281_v9, %v3325_v18  ;;  %976 = vmatpush1.xpose.msra.mxu1 %v235_v11  ;;  %6302 = vpow2.f32 %v3259_v16  ;;  %v3900_v24 = vmul.f32 -500000.0, %v3868_v17  ;;  %v3419_v25 = vmul.f32 %v6132_v8, %v6132_v8  ;;  %v231_v9 = vld [vmem:[#allocation5 + $0x578] sm:$0xff] }
 0x179   :  { %v6285_v26 = vpop.eup %6284  ;;  %906 = vmatprep.subr.mxu0 %v7070_v0  ;;  %977 = vmatprep.subr.mxu1 %v7070_v0  ;;  %v3933_v29 = vmul.f32 1.442695, %v3899_v19  ;;  %v3420_v30 = vmul.f32 %v6133_v20, %v6133_v20  ;;  %v6164_v31 = vadd.f32 -0.9, %v7255_v28  ;;  %v6165_v32 = vadd.f32 -0.9, %v7265_v36 }
 0x17a   :  { %v6287_v33 = vpop.eup %6286  ;;  %3327 = vadd.xlane.f32.xlu1 %v3326_v21  ;;  %v3935_v37 = vmul.f32 1.442695, %v3900_v24  ;;  %v3451_v38 = vmul.f32 -50.0, %v3419_v25  ;;  %v6194_v39 = vadd.f32 -1.0, %v7253_v27  ;;  %v6195_v40 = vadd.f32 -1.0, %v7263_v35  ;;  %v208_v28 = vld [vmem:[#allocation5 + $0x4c0] sm:$0xff] }
 0x17b   :  { %v2873_v41 = vsel %vm1752_vm0, %v6287_v33, 0.0  ;;  %907 = vmatpush1.xpose.msra.mxu0 %v209_v22  ;;  %6304 = vpow2.f32 %v3933_v29  ;;  %v3452_v42 = vmul.f32 -50.0, %v3420_v30  ;;  %v3643_v43 = vmul.f32 %v6164_v31, %v6164_v31  ;;  %v233_v27 = vld [vmem:[#allocation5 + $0x588] sm:$0xff]  ;;  %v255_v15 = vld [vmem:[#allocation5 + $0x638] sm:$0xff]  ;;  %v254_v22 = vld [vmem:[#allocation5 + $0x630] sm:$0xff] }
 0x17c   :  { %v6289_v44 = vpop.eup %6288  ;;  %v2874_v45 = vadd.f32 %v6285_v26, %v2873_v41  ;;  %978 = vmatpush1.xpose.msra.mxu1 %v234_v23  ;;  %908 = vmatprep.subr.mxu0 %v7070_v0  ;;  %6306 = vpow2.f32 %v3935_v37  ;;  %v3485_v36 = vmul.f32 1.442695, %v3451_v38  ;;  %v3644_v46 = vmul.f32 %v6165_v32, %v6165_v32  ;;  %v229_v20 = vld [vmem:[#allocation5 + $0x568] sm:$0xff]  ;;  %v228_v29 = vld [vmem:[#allocation5 + $0x560] sm:$0xff]  ;;  %v227_v37 = vld [vmem:[#allocation5 + $0x558] sm:$0xff] }
 0x17d   :  { %v6291_v47 = vpop.eup %6290  ;;  %979 = vmatprep.subr.mxu1 %v7070_v0  ;;  %v3487_v35 = vmul.f32 1.442695, %v3452_v42  ;;  %v3675_v48 = vmul.f32 -50.0, %v3643_v43  ;;  %v3865_v49 = vmul.f32 %v6194_v39, %v6194_v39  ;;  %v3866_v34 = vmul.f32 %v6195_v40, %v6195_v40  ;;  %v253_v31 = vld [vmem:[#allocation5 + $0x628] sm:$0xff]  ;;  %v252_v39 = vld [vmem:[#allocation5 + $0x620] sm:$0xff]  ;;  %v226_v41 = vld [vmem:[#allocation5 + $0x550] sm:$0xff] }
 0x17e   :  { %2875 = vadd.xlane.f32.xlu0 %v2874_v45  ;;  %v3545_v50 = vsel %vm1752_vm0, %v6291_v47, 0.0  ;;  %6308 = vpow2.f32 %v3485_v36  ;;  %v3676_v51 = vmul.f32 -50.0, %v3644_v46  ;;  %v251_v42 = vld [vmem:[#allocation5 + $0x618] sm:$0xff]  ;;  %v225_v43 = vld [vmem:[#allocation5 + $0x548] sm:$0xff]  ;;  %v224_v45 = vld [vmem:[#allocation5 + $0x540] sm:$0xff] }
 0x17f   :  { %v6293_v52 = vpop.eup %6292  ;;  %v3546_v53 = vadd.f32 %v6289_v44, %v3545_v50  ;;  %909 = vmatpush1.xpose.msra.mxu0 %v208_v28  ;;  %6310 = vpow2.f32 %v3487_v35  ;;  %v3709_v55 = vmul.f32 1.442695, %v3675_v48  ;;  %v3897_v58 = vmul.f32 -500000.0, %v3865_v49  ;;  %v250_v44 = vld [vmem:[#allocation5 + $0x610] sm:$0xff]  ;;  %v249_v28 = vld [vmem:[#allocation5 + $0x608] sm:$0xff] }
 0x180   :  { %v6295_v56 = vpop.eup %6294  ;;  %980 = vmatpush1.xpose.msra.mxu1 %v233_v27  ;;  %910 = vmatprep.subr.mxu0 %v7070_v0  ;;  %v3711_v57 = vmul.f32 1.442695, %v3676_v51  ;;  %v3898_v59 = vmul.f32 -500000.0, %v3866_v34  ;;  %v223_v36 = vld [vmem:[#allocation5 + $0x538] sm:$0xff]  ;;  %v248_v46 = vld [vmem:[#allocation5 + $0x600] sm:$0xff] }
 0x181   :  { %3547 = vadd.xlane.f32.xlu1 %v3546_v53  ;;  %v3097_v60 = vsel %vm1752_vm0, %v6295_v56, 0.0  ;;  %981 = vmatprep.subr.mxu1 %v7070_v0  ;;  %6312 = vpow2.f32 %v3709_v55  ;;  %v3929_v6 = vmul.f32 1.442695, %v3897_v58  ;;  %v222_v35 = vld [vmem:[#allocation5 + $0x530] sm:$0xff]  ;;  %v247_v56 = vld [vmem:[#allocation5 + $0x5f8] sm:$0xff] }
 0x182   :  { %v6297_v62 = vpop.eup %6296  ;;  %v3098_v63 = vadd.f32 %v6293_v52, %v3097_v60  ;;  %6314 = vpow2.f32 %v3711_v57  ;;  %v3931_v1 = vmul.f32 1.442695, %v3898_v59 }
 0x183   :  { %v6299_v2 = vpop.eup %6298  ;;  %911 = vmatpush1.xpose.msra.mxu0 %v207_v54 }
 0x184   :  { %v6301_v3 = vpop.eup %6300  ;;  %3099 = vadd.xlane.f32.xlu0 %v3098_v63  ;;  %v3769_v4 = vsel %vm1752_vm0, %v6299_v2, 0.0  ;;  %982 = vmatpush1.xpose.msra.mxu1 %v232_v61  ;;  %6316 = vpow2.f32 %v3931_v1  ;;  %v46_v2 = vld [vmem:[#allocation2 + $0x30] sm:$0xff] }
 0x185   :  { %v6303_v7 = vpop.eup %6302  ;;  %v3770_v8 = vadd.f32 %v6297_v62, %v3769_v4  ;;  %912 = vmatprep.subr.mxu0 %v7070_v0  ;;  %983 = vmatprep.subr.mxu1 %v7070_v0  ;;  %6318 = vpow2.f32 %v3929_v6 }
 0x186   :  { %v3321_v10 = vsel %vm1752_vm0, %v6303_v7, 0.0  ;;  %v47_v7 = vld [vmem:[#allocation2 + $0x38] sm:$0xff] }
 0x187   :  { %3771 = vadd.xlane.f32.xlu1 %v3770_v8  ;;  %v3322_v11 = vadd.f32 %v6301_v3, %v3321_v10  ;;  %913 = vmatpush1.xpose.msra.mxu0 %v206_v5  ;;  %v271_v8 = vld [vmem:[#allocation5 + $0x6b8] sm:$0xff] }
 0x188   :  { %v6305_v12 = vpop.eup %6304  ;;  %984 = vmatpush1.xpose.msra.mxu1 %v231_v9  ;;  %928 = vmatprep.subr.mxu0 %v7070_v0  ;;  %v296_v9 = vld [vmem:[#allocation5 + $0x780] sm:$0xff] }
 0x189   :  { %v6307_v14 = vpop.eup %6306  ;;  %3323 = vadd.xlane.f32.xlu0 %v3322_v11  ;;  %999 = vmatprep.subr.mxu1 %v7070_v0 }
 0x18a   :  { %v3997_v16 = vsel %vm1752_vm0, %v6307_v14, 0.0 }
 0x18b   :  { %v6309_v17 = vpop.eup %6308  ;;  %v3998_v18 = vadd.f32 %v6305_v12, %v3997_v16  ;;  %929 = vmatpush2.xpose.msra.mxu0 %v230_v13 }
 0x18c   :  { %v6311_v19 = vpop.eup %6310  ;;  %1000 = vmatpush2.xpose.msra.mxu1 %v255_v15  ;;  %930 = vmatprep.subr.mxu0 %v7070_v0 }
 0x18d   :  { %3999 = vadd.xlane.f32.xlu1 %v3998_v18  ;;  %v3549_v21 = vsel %vm1752_vm0, %v6311_v19, 0.0  ;;  %1001 = vmatprep.subr.mxu1 %v7070_v0 }
 0x18e   :  { %v6313_v23 = vpop.eup %6312  ;;  %v3550_v24 = vadd.f32 %v6309_v17, %v3549_v21 }
 0x18f   :  { %v6315_v25 = vpop.eup %6314  ;;  %931 = vmatpush2.xpose.msra.mxu0 %v229_v20 }
 0x190   :  { %3551 = vadd.xlane.f32.xlu0 %v3550_v24  ;;  %v3773_v26 = vsel %vm1752_vm0, %v6315_v25, 0.0  ;;  %1002 = vmatpush2.xpose.msra.mxu1 %v254_v22  ;;  %v270_v25 = vld [vmem:[#allocation5 + $0x6b0] sm:$0xff] }
 0x191   :  { %v6317_v30 = vpop.eup %6316  ;;  %932 = vmatprep.subr.mxu0 %v7070_v0  ;;  %1003 = vmatprep.subr.mxu1 %v7070_v0  ;;  %v3774_v32 = vadd.f32 %v6313_v23, %v3773_v26 }
 0x192   :  { %v3993_v33 = vsel %vm1752_vm0, %v6317_v30, 0.0  ;;  %v6319_v38 = vpop.eup %6318 }
 0x193   :  { %933 = vmatpush2.xpose.msra.mxu0 %v228_v29  ;;  %v3994_v40 = vadd.f32 %v6319_v38, %v3993_v33 }
 0x194   :  { %3775 = vadd.xlane.f32.xlu0 %v3774_v32  ;;  %1004 = vmatpush2.xpose.msra.mxu1 %v253_v31  ;;  %v295_v31 = vld [vmem:[#allocation5 + $0x778] sm:$0xff] }
 0x195   :  { %934 = vmatprep.subr.mxu0 %v7070_v0  ;;  %1005 = vmatprep.subr.mxu1 %v7070_v0 }
 0x197   :  { %935 = vmatpush2.xpose.msra.mxu0 %v227_v37 }
 0x198   :  { %3995 = vadd.xlane.f32.xlu0 %v3994_v40  ;;  %1006 = vmatpush2.xpose.msra.mxu1 %v252_v39 }
 0x199   :  { %936 = vmatprep.subr.mxu0 %v7070_v0  ;;  %1007 = vmatprep.subr.mxu1 %v7070_v0 }
 0x19b   :  { %937 = vmatpush2.xpose.msra.mxu0 %v226_v41 }
 0x19c   :  { %1008 = vmatpush2.xpose.msra.mxu1 %v251_v42  ;;  %938 = vmatprep.subr.mxu0 %v7070_v0 }
 0x19d   :  { %1009 = vmatprep.subr.mxu1 %v7070_v0 }
 0x19f   :  { %939 = vmatpush2.xpose.msra.mxu0 %v225_v43 }
 0x1a0   :  { %1010 = vmatpush2.xpose.msra.mxu1 %v250_v44  ;;  %940 = vmatprep.subr.mxu0 %v7070_v0  ;;  %v269_v44 = vld [vmem:[#allocation5 + $0x6a8] sm:$0xff] }
 0x1a1   :  { %1011 = vmatprep.subr.mxu1 %v7070_v0 }
 0x1a3   :  { %941 = vmatpush2.xpose.msra.mxu0 %v224_v45 }
 0x1a4   :  { %1012 = vmatpush2.xpose.msra.mxu1 %v249_v28  ;;  %942 = vmatprep.subr.mxu0 %v7070_v0 }
 0x1a5   :  { %1013 = vmatprep.subr.mxu1 %v7070_v0 }
 0x1a6   :  { %v7383_v47 = vpop.f32.mrf.mxu0  ;;  %v7385_v27 = vpop.f32.mrf.mxu1 }
 0x1a7   :  { %943 = vmatpush2.xpose.msra.mxu0 %v223_v36  ;;  %v5910_v48 = vadd.f32 0.7, %v7383_v47  ;;  %v5878_v49 = vadd.f32 0.9, %v7383_v47  ;;  %v5942_v34 = vadd.f32 0.5, %v7383_v47  ;;  %v7391_v50 = vadd.f32 0.5, %v7385_v27 }
 0x1a8   :  { %1014 = vmatpush2.xpose.msra.mxu1 %v248_v46  ;;  %v7393_v51 = vpop.f32.mrf.mxu0  ;;  %944 = vmatprep.subr.mxu0 %v7070_v0  ;;  %v7396_v52 = vpop.f32.mrf.mxu1  ;;  %v5880_v53 = vadd.f32 0.9, %v7385_v27  ;;  %v5974_v54 = vadd.f32 0.3, %v7383_v47  ;;  %v5912_v55 = vadd.f32 0.7, %v7385_v27 }
 0x1a9   :  { %1015 = vmatprep.subr.mxu1 %v7070_v0  ;;  %v5911_v57 = vadd.f32 0.7, %v7393_v51  ;;  %v1853_v58 = vmul.f32 %v5910_v48, %v5910_v48  ;;  %v5879_v59 = vadd.f32 0.9, %v7393_v51  ;;  %v1628_v60 = vmul.f32 %v5878_v49, %v5878_v49  ;;  %v294_v46 = vld [vmem:[#allocation5 + $0x770] sm:$0xff] }
 0x1aa   :  { %v5943_v61 = vadd.f32 0.5, %v7393_v51  ;;  %v2077_v62 = vmul.f32 %v5942_v34, %v5942_v34  ;;  %v5881_v63 = vadd.f32 0.9, %v7396_v52  ;;  %v1630_v1 = vmul.f32 %v5880_v53, %v5880_v53 }
 0x1ab   :  { %945 = vmatpush2.xpose.msra.mxu0 %v222_v35  ;;  %v1854_v3 = vmul.f32 %v5911_v57, %v5911_v57  ;;  %v1885_v4 = vmul.f32 -50.0, %v1853_v58  ;;  %v1629_v5 = vmul.f32 %v5879_v59, %v5879_v59  ;;  %v1660_v6 = vmul.f32 -50.0, %v1628_v60  ;;  %v268_v58 = vld [vmem:[#allocation5 + $0x6a0] sm:$0xff] }
 0x1ac   :  { %1016 = vmatpush2.xpose.msra.mxu1 %v247_v56  ;;  %1024 = vmatprep.subr.mxu0 %v7070_v0  ;;  %v2078_v10 = vmul.f32 %v5943_v61, %v5943_v61  ;;  %v2109_v11 = vmul.f32 -50.0, %v2077_v62  ;;  %v1631_v12 = vmul.f32 %v5881_v63, %v5881_v63  ;;  %v1662_v13 = vmul.f32 -50.0, %v1630_v1  ;;  %v293_v62 = vld [vmem:[#allocation5 + $0x768] sm:$0xff] }
 0x1ad   :  { %1095 = vmatprep.subr.mxu1 %v7070_v0  ;;  %v1886_v14 = vmul.f32 -50.0, %v1854_v3  ;;  %v1921_v15 = vmul.f32 1.442695, %v1885_v4  ;;  %v1661_v16 = vmul.f32 -50.0, %v1629_v5  ;;  %v1696_v17 = vmul.f32 1.442695, %v1660_v6 }
 0x1ae   :  { %947 = vmatmul.mubr.f32.vlgmr.msra.gmra.mxu0 %v46_v2  ;;  %v2110_v18 = vmul.f32 -50.0, %v2078_v10  ;;  %v2145_v19 = vmul.f32 1.442695, %v2109_v11  ;;  %v1663_v20 = vmul.f32 -50.0, %v1631_v12  ;;  %v1700_v21 = vmul.f32 1.442695, %v1662_v13 }
 0x1af   :  { %1018 = vmatmul.mubr.f32.vlgmr.msra.gmra.mxu1 %v47_v7  ;;  %1025 = vmatpush1.xpose.msra.mxu0 %v271_v8  ;;  %6320 = vpow2.f32 %v1921_v15  ;;  %v1923_v22 = vmul.f32 1.442695, %v1886_v14  ;;  %v1698_v23 = vmul.f32 1.442695, %v1661_v16  ;;  %v5975_v24 = vadd.f32 0.3, %v7393_v51 }
 0x1b0   :  { %1096 = vmatpush1.xpose.msra.mxu1 %v296_v9  ;;  %1026 = vmatprep.subr.mxu0 %v7070_v0  ;;  %6322 = vpow2.f32 %v1696_v17  ;;  %v2147_v26 = vmul.f32 1.442695, %v2110_v18  ;;  %v1702_v29 = vmul.f32 1.442695, %v1663_v20  ;;  %v2301_v30 = vmul.f32 %v5974_v54, %v5974_v54  ;;  %v267_v9 = vld [vmem:[#allocation5 + $0x698] sm:$0xff]  ;;  %v292_v14 = vld [vmem:[#allocation5 + $0x760] sm:$0xff] }
 0x1b1   :  { %1097 = vmatprep.subr.mxu1 %v7070_v0  ;;  %6324 = vpow2.f32 %v1923_v22  ;;  %v2302_v32 = vmul.f32 %v5975_v24, %v5975_v24  ;;  %v5913_v33 = vadd.f32 0.7, %v7396_v52  ;;  %v1855_v37 = vmul.f32 %v5912_v55, %v5912_v55  ;;  %1088 = vmatprep.mubr.f32.mxu0 %v7070_v0 }
 0x1b2   :  { %6326 = vpow2.f32 %v1698_v23  ;;  %v2333_v38 = vmul.f32 -50.0, %v2301_v30  ;;  %v6006_v39 = vadd.f32 0.1, %v7383_v47  ;;  %v6007_v40 = vadd.f32 0.1, %v7393_v51  ;;  %1159 = vmatprep.mubr.f32.mxu1 %v7070_v0 }
 0x1b3   :  { %1027 = vmatpush1.xpose.msra.mxu0 %v270_v25  ;;  %6328 = vpow2.f32 %v2145_v19  ;;  %v2334_v41 = vmul.f32 -50.0, %v2302_v32  ;;  %v1856_v42 = vmul.f32 %v5913_v33, %v5913_v33  ;;  %v1887_v43 = vmul.f32 -50.0, %v1855_v37 }
 0x1b4   :  { %1098 = vmatpush1.xpose.msra.mxu1 %v295_v31  ;;  %1028 = vmatprep.subr.mxu0 %v7070_v0  ;;  %6330 = vpow2.f32 %v2147_v26  ;;  %v2369_v45 = vmul.f32 1.442695, %v2333_v38  ;;  %v2525_v28 = vmul.f32 %v6006_v39, %v6006_v39  ;;  %v2526_v36 = vmul.f32 %v6007_v40, %v6007_v40  ;;  %v266_v31 = vld [vmem:[#allocation5 + $0x690] sm:$0xff]  ;;  %v291_v39 = vld [vmem:[#allocation5 + $0x758] sm:$0xff] }
 0x1b5   :  { %1099 = vmatprep.subr.mxu1 %v7070_v0  ;;  %6332 = vpow2.f32 %v1700_v21  ;;  %v2371_v35 = vmul.f32 1.442695, %v2334_v41  ;;  %v1888_v48 = vmul.f32 -50.0, %v1856_v42  ;;  %v1925_v49 = vmul.f32 1.442695, %v1887_v43 }
 0x1b6   :  { %6334 = vpow2.f32 %v1702_v29  ;;  %v2557_v34 = vmul.f32 -50.0, %v2525_v28  ;;  %v2558_v53 = vmul.f32 -50.0, %v2526_v36  ;;  %v5945_v54 = vadd.f32 0.5, %v7396_v52 }
 0x1b7   :  { %1029 = vmatpush1.xpose.msra.mxu0 %v269_v44  ;;  %6336 = vpow2.f32 %v2369_v45  ;;  %v1927_v55 = vmul.f32 1.442695, %v1888_v48  ;;  %v2079_v56 = vmul.f32 %v7391_v50, %v7391_v50  ;;  %v6038_v57 = vadd.f32 -0.1, %v7383_v47 }
 0x1b8   :  { %1100 = vmatpush1.xpose.msra.mxu1 %v294_v46  ;;  %1030 = vmatprep.subr.mxu0 %v7070_v0  ;;  %6338 = vpow2.f32 %v2371_v35  ;;  %v2593_v59 = vmul.f32 1.442695, %v2557_v34  ;;  %v2595_v60 = vmul.f32 1.442695, %v2558_v53  ;;  %v2080_v61 = vmul.f32 %v5945_v54, %v5945_v54  ;;  %v265_v34 = vld [vmem:[#allocation5 + $0x688] sm:$0xff] }
 0x1b9   :  { %1101 = vmatprep.subr.mxu1 %v7070_v0  ;;  %6340 = vpow2.f32 %v1925_v49  ;;  %v2111_v63 = vmul.f32 -50.0, %v2079_v56  ;;  %v6039_v1 = vadd.f32 -0.1, %v7393_v51  ;;  %v2749_v2 = vmul.f32 %v6038_v57, %v6038_v57 }
 0x1ba   :  { %6342 = vpow2.f32 %v1927_v55  ;;  %v2112_v50 = vmul.f32 -50.0, %v2080_v61  ;;  %v5976_v3 = vadd.f32 0.3, %v7385_v27  ;;  %v5977_v4 = vadd.f32 0.3, %v7396_v52 }
 0x1bb   :  { %1031 = vmatpush1.xpose.msra.mxu0 %v268_v58  ;;  %6344 = vpow2.f32 %v2593_v59  ;;  %v2149_v5 = vmul.f32 1.442695, %v2111_v63  ;;  %v2750_v6 = vmul.f32 %v6039_v1, %v6039_v1  ;;  %v2781_v7 = vmul.f32 -50.0, %v2749_v2  ;;  %v290_v58 = vld [vmem:[#allocation5 + $0x750] sm:$0xff] }
 0x1bc   :  { %v6321_v8 = vpop.eup %6320  ;;  %1102 = vmatpush1.xpose.msra.mxu1 %v293_v62  ;;  %1032 = vmatprep.subr.mxu0 %v7070_v0  ;;  %6346 = vpow2.f32 %v2595_v60  ;;  %v2151_v10 = vmul.f32 1.442695, %v2112_v50  ;;  %v2303_v11 = vmul.f32 %v5976_v3, %v5976_v3  ;;  %v2304_v12 = vmul.f32 %v5977_v4, %v5977_v4  ;;  %v264_v4 = vld [vmem:[#allocation5 + $0x680] sm:$0xff] }
 0x1bd   :  { %v6323_v13 = vpop.eup %6322  ;;  %1103 = vmatprep.subr.mxu1 %v7070_v0  ;;  %6348 = vpow2.f32 %v2149_v5  ;;  %v2782_v15 = vmul.f32 -50.0, %v2750_v6  ;;  %v2817_v16 = vmul.f32 1.442695, %v2781_v7  ;;  %v6070_v17 = vadd.f32 -0.3, %v7383_v47 }
 0x1be   :  { %v6325_v18 = vpop.eup %6324  ;;  %6350 = vpow2.f32 %v2151_v10  ;;  %v2335_v19 = vmul.f32 -50.0, %v2303_v11  ;;  %v2336_v20 = vmul.f32 -50.0, %v2304_v12  ;;  %v6071_v21 = vadd.f32 -0.3, %v7393_v51 }
 0x1bf   :  { %v6327_v22 = vpop.eup %6326  ;;  %1033 = vmatpush1.xpose.msra.mxu0 %v267_v9  ;;  %v1985_v23 = vsel %vm1752_vm0, %v6325_v18, 0.0  ;;  %6352 = vpow2.f32 %v2817_v16  ;;  %v2819_v24 = vmul.f32 1.442695, %v2782_v15  ;;  %v2973_v25 = vmul.f32 %v6070_v17, %v6070_v17 }
 0x1c0   :  { %v6329_v26 = vpop.eup %6328  ;;  %1104 = vmatpush1.xpose.msra.mxu1 %v292_v14  ;;  %1034 = vmatprep.subr.mxu0 %v7070_v0  ;;  %v1986_v29 = vadd.f32 %v6321_v8, %v1985_v23  ;;  %v1761_v30 = vsel %vm1752_vm0, %v6327_v22, 0.0  ;;  %v2373_v32 = vmul.f32 1.442695, %v2335_v19  ;;  %v2375_v33 = vmul.f32 1.442695, %v2336_v20  ;;  %v289_v14 = vld [vmem:[#allocation5 + $0x748] sm:$0xff] }
 0x1c1   :  { %v6331_v37 = vpop.eup %6330  ;;  %1105 = vmatprep.subr.mxu1 %v7070_v0  ;;  %v1762_v38 = vadd.f32 %v6323_v13, %v1761_v30  ;;  %6354 = vpow2.f32 %v2819_v24  ;;  %v2974_v40 = vmul.f32 %v6071_v21, %v6071_v21  ;;  %v3005_v41 = vmul.f32 -50.0, %v2973_v25  ;;  %v263_v30 = vld [vmem:[#allocation5 + $0x678] sm:$0xff] }
 0x1c2   :  { %v6333_v42 = vpop.eup %6332  ;;  %1987 = vadd.xlane.f32.xlu0 %v1986_v29  ;;  %v2209_v43 = vsel %vm1752_vm0, %v6331_v37, 0.0  ;;  %6356 = vpow2.f32 %v2373_v32  ;;  %v6008_v44 = vadd.f32 0.1, %v7385_v27  ;;  %v6009_v45 = vadd.f32 0.1, %v7396_v52  ;;  %v288_v37 = vld [vmem:[#allocation5 + $0x740] sm:$0xff] }
 0x1c3   :  { %v6335_v28 = vpop.eup %6334  ;;  %1763 = vadd.xlane.f32.xlu1 %v1762_v38  ;;  %1035 = vmatpush1.xpose.msra.mxu0 %v266_v31  ;;  %v2210_v36 = vadd.f32 %v6329_v26, %v2209_v43  ;;  %6358 = vpow2.f32 %v2375_v33  ;;  %v3006_v46 = vmul.f32 -50.0, %v2974_v40  ;;  %v3041_v35 = vmul.f32 1.442695, %v3005_v41 }
 0x1c4   :  { %v6337_v48 = vpop.eup %6336  ;;  %1106 = vmatpush1.xpose.msra.mxu1 %v291_v39  ;;  %1036 = vmatprep.subr.mxu0 %v7070_v0  ;;  %v1765_v49 = vsel %vm1752_vm0, %v6335_v28, 0.0  ;;  %v2527_v53 = vmul.f32 %v6008_v44, %v6008_v44  ;;  %v2528_v54 = vmul.f32 %v6009_v45, %v6009_v45  ;;  %v6102_v55 = vadd.f32 -0.5, %v7383_v47 }
 0x1c5   :  { %v6339_v56 = vpop.eup %6338  ;;  %1107 = vmatprep.subr.mxu1 %v7070_v0  ;;  %v1766_v57 = vadd.f32 %v6333_v42, %v1765_v49  ;;  %6360 = vpow2.f32 %v3041_v35  ;;  %v3043_v59 = vmul.f32 1.442695, %v3006_v46  ;;  %v6103_v60 = vadd.f32 -0.5, %v7393_v51 }
 0x1c6   :  { %v6341_v61 = vpop.eup %6340  ;;  %2211 = vadd.xlane.f32.xlu0 %v2210_v36  ;;  %v2433_v62 = vsel %vm1752_vm0, %v6339_v56, 0.0  ;;  %v2559_v63 = vmul.f32 -50.0, %v2527_v53  ;;  %v2560_v1 = vmul.f32 -50.0, %v2528_v54  ;;  %v3197_v2 = vmul.f32 %v6102_v55, %v6102_v55  ;;  %v287_v56 = vld [vmem:[#allocation5 + $0x738] sm:$0xff] }
 0x1c7   :  { %v6343_v50 = vpop.eup %6342  ;;  %1767 = vadd.xlane.f32.xlu1 %v1766_v57  ;;  %1037 = vmatpush1.xpose.msra.mxu0 %v265_v34  ;;  %v2434_v3 = vadd.f32 %v6337_v48, %v2433_v62  ;;  %6362 = vpow2.f32 %v3043_v59  ;;  %v3198_v5 = vmul.f32 %v6103_v60, %v6103_v60  ;;  %v6040_v6 = vadd.f32 -0.1, %v7385_v27  ;;  %v262_v34 = vld [vmem:[#allocation5 + $0x670] sm:$0xff] }
 0x1c8   :  { %v6345_v7 = vpop.eup %6344  ;;  %1108 = vmatpush1.xpose.msra.mxu1 %v290_v58  ;;  %1038 = vmatprep.subr.mxu0 %v7070_v0  ;;  %v1989_v8 = vsel %vm1752_vm0, %v6343_v50, 0.0  ;;  %v2597_v9 = vmul.f32 1.442695, %v2559_v63  ;;  %v2599_v10 = vmul.f32 1.442695, %v2560_v1  ;;  %v3229_v11 = vmul.f32 -50.0, %v3197_v2 }
 0x1c9   :  { %v6347_v12 = vpop.eup %6346  ;;  %1109 = vmatprep.subr.mxu1 %v7070_v0  ;;  %v1990_v13 = vadd.f32 %v6341_v61, %v1989_v8  ;;  %v3230_v15 = vmul.f32 -50.0, %v3198_v5  ;;  %v6041_v16 = vadd.f32 -0.1, %v7396_v52  ;;  %v2751_v17 = vmul.f32 %v6040_v6, %v6040_v6 }
 0x1ca   :  { %v6349_v18 = vpop.eup %6348  ;;  %2435 = vadd.xlane.f32.xlu0 %v2434_v3  ;;  %v2657_v19 = vsel %vm1752_vm0, %v6347_v12, 0.0  ;;  %6364 = vpow2.f32 %v2597_v9  ;;  %v3265_v20 = vmul.f32 1.442695, %v3229_v11  ;;  %v6134_v21 = vadd.f32 -0.7, %v7383_v47  ;;  %v286_v9 = vld [vmem:[#allocation5 + $0x730] sm:$0xff] }
 0x1cb   :  { %v6351_v22 = vpop.eup %6350  ;;  %1991 = vadd.xlane.f32.xlu1 %v1990_v13  ;;  %1039 = vmatpush1.xpose.msra.mxu0 %v264_v4  ;;  %v2658_v23 = vadd.f32 %v6345_v7, %v2657_v19  ;;  %6366 = vpow2.f32 %v2599_v10  ;;  %v3267_v24 = vmul.f32 1.442695, %v3230_v15  ;;  %v2752_v25 = vmul.f32 %v6041_v16, %v6041_v16  ;;  %v261_v4 = vld [vmem:[#allocation5 + $0x668] sm:$0xff] }
 0x1cc   :  { %v6353_v26 = vpop.eup %6352  ;;  %1110 = vmatpush1.xpose.msra.mxu1 %v289_v14  ;;  %1040 = vmatprep.subr.mxu0 %v7070_v0  ;;  %v2213_v29 = vsel %vm1752_vm0, %v6351_v22, 0.0  ;;  %6368 = vpow2.f32 %v3265_v20  ;;  %v2783_v31 = vmul.f32 -50.0, %v2751_v17  ;;  %v6135_v32 = vadd.f32 -0.7, %v7393_v51  ;;  %v260_v17 = vld [vmem:[#allocation5 + $0x660] sm:$0xff] }
 0x1cd   :  { %1111 = vmatprep.subr.mxu1 %v7070_v0  ;;  %v2214_v33 = vadd.f32 %v6349_v18, %v2213_v29  ;;  %6370 = vpow2.f32 %v3267_v24  ;;  %v2784_v38 = vmul.f32 -50.0, %v2752_v25  ;;  %v3421_v39 = vmul.f32 %v6134_v21, %v6134_v21 }
 0x1ce   :  { %v6355_v40 = vpop.eup %6354  ;;  %2659 = vadd.xlane.f32.xlu0 %v2658_v23  ;;  %v2821_v41 = vmul.f32 1.442695, %v2783_v31  ;;  %v3422_v42 = vmul.f32 %v6135_v32, %v6135_v32  ;;  %v6072_v43 = vadd.f32 -0.3, %v7385_v27  ;;  %v6073_v44 = vadd.f32 -0.3, %v7396_v52 }
 0x1cf   :  { %v6357_v45 = vpop.eup %6356  ;;  %2215 = vadd.xlane.f32.xlu1 %v2214_v33  ;;  %1041 = vmatpush1.xpose.msra.mxu0 %v263_v30  ;;  %v2881_v28 = vsel %vm1752_vm0, %v6355_v40, 0.0  ;;  %v2823_v36 = vmul.f32 1.442695, %v2784_v38  ;;  %v3453_v46 = vmul.f32 -50.0, %v3421_v39  ;;  %v6166_v35 = vadd.f32 -0.9, %v7383_v47 }
 0x1d0   :  { %v6359_v48 = vpop.eup %6358  ;;  %1112 = vmatpush1.xpose.msra.mxu1 %v288_v37  ;;  %1042 = vmatprep.subr.mxu0 %v7070_v0  ;;  %v2882_v49 = vadd.f32 %v6353_v26, %v2881_v28  ;;  %6372 = vpow2.f32 %v2821_v41  ;;  %v3454_v53 = vmul.f32 -50.0, %v3422_v42  ;;  %v2975_v54 = vmul.f32 %v6072_v43, %v6072_v43  ;;  %v285_v30 = vld [vmem:[#allocation5 + $0x728] sm:$0xff] }
 0x1d1   :  { %1113 = vmatprep.subr.mxu1 %v7070_v0  ;;  %v2437_v55 = vsel %vm1752_vm0, %v6359_v48, 0.0  ;;  %6374 = vpow2.f32 %v2823_v36  ;;  %v3489_v57 = vmul.f32 1.442695, %v3453_v46  ;;  %v2976_v58 = vmul.f32 %v6073_v44, %v6073_v44  ;;  %v259_v44 = vld [vmem:[#allocation5 + $0x658] sm:$0xff] }
 0x1d2   :  { %v6361_v59 = vpop.eup %6360  ;;  %2883 = vadd.xlane.f32.xlu0 %v2882_v49  ;;  %v2438_v60 = vadd.f32 %v6357_v45, %v2437_v55  ;;  %v3491_v61 = vmul.f32 1.442695, %v3454_v53  ;;  %v3007_v62 = vmul.f32 -50.0, %v2975_v54  ;;  %v6167_v63 = vadd.f32 -0.9, %v7393_v51  ;;  %v284_v45 = vld [vmem:[#allocation5 + $0x720] sm:$0xff] }
 0x1d3   :  { %1043 = vmatpush1.xpose.msra.mxu0 %v262_v34  ;;  %6376 = vpow2.f32 %v3489_v57  ;;  %v3008_v1 = vmul.f32 -50.0, %v2976_v58  ;;  %v3645_v2 = vmul.f32 %v6166_v35, %v6166_v35  ;;  %v6104_v50 = vadd.f32 -0.5, %v7385_v27 }
 0x1d4   :  { %v6363_v3 = vpop.eup %6362  ;;  %2439 = vadd.xlane.f32.xlu1 %v2438_v60  ;;  %1114 = vmatpush1.xpose.msra.mxu1 %v287_v56  ;;  %6378 = vpow2.f32 %v3491_v61  ;;  %v3045_v5 = vmul.f32 1.442695, %v3007_v62  ;;  %v3646_v6 = vmul.f32 %v6167_v63, %v6167_v63  ;;  %v6105_v7 = vadd.f32 -0.5, %v7396_v52 }
 0x1d5   :  { %1044 = vmatprep.subr.mxu0 %v7070_v0  ;;  %1115 = vmatprep.subr.mxu1 %v7070_v0  ;;  %v3105_v8 = vsel %vm1752_vm0, %v6363_v3, 0.0  ;;  %v3047_v10 = vmul.f32 1.442695, %v3008_v1  ;;  %v3677_v11 = vmul.f32 -50.0, %v3645_v2  ;;  %v3199_v12 = vmul.f32 %v6104_v50, %v6104_v50 }
 0x1d6   :  { %v3106_v13 = vadd.f32 %v6361_v59, %v3105_v8  ;;  %6380 = vpow2.f32 %v3045_v5  ;;  %v3678_v14 = vmul.f32 -50.0, %v3646_v6  ;;  %v3200_v15 = vmul.f32 %v6105_v7, %v6105_v7  ;;  %v257_v8 = vld [vmem:[#allocation5 + $0x648] sm:$0xff] }
 0x1d7   :  { %v6365_v16 = vpop.eup %6364  ;;  %1045 = vmatpush1.xpose.msra.mxu0 %v261_v4  ;;  %6382 = vpow2.f32 %v3047_v10  ;;  %v3713_v18 = vmul.f32 1.442695, %v3677_v11  ;;  %v3231_v19 = vmul.f32 -50.0, %v3199_v12  ;;  %v6200_v20 = vadd.f32 -1.0, %v7385_v27 }
 0x1d8   :  { %v6367_v21 = vpop.eup %6366  ;;  %3107 = vadd.xlane.f32.xlu0 %v3106_v13  ;;  %1116 = vmatpush1.xpose.msra.mxu1 %v286_v9  ;;  %v3715_v22 = vmul.f32 1.442695, %v3678_v14  ;;  %v3232_v23 = vmul.f32 -50.0, %v3200_v15  ;;  %v6201_v24 = vadd.f32 -1.0, %v7396_v52  ;;  %v6136_v25 = vadd.f32 -0.7, %v7385_v27 }
 0x1d9   :  { %v6369_v26 = vpop.eup %6368  ;;  %v2661_v29 = vsel %vm1752_vm0, %v6367_v21, 0.0  ;;  %1046 = vmatprep.subr.mxu0 %v7070_v0  ;;  %1117 = vmatprep.subr.mxu1 %v7070_v0  ;;  %6384 = vpow2.f32 %v3713_v18  ;;  %v3269_v31 = vmul.f32 1.442695, %v3231_v19  ;;  %v3871_v32 = vmul.f32 %v6200_v20, %v6200_v20  ;;  %v282_v15 = vld [vmem:[#allocation5 + $0x710] sm:$0xff] }
 0x1da   :  { %v6371_v33 = vpop.eup %6370  ;;  %v2662_v37 = vadd.f32 %v6365_v16, %v2661_v29  ;;  %6386 = vpow2.f32 %v3715_v22  ;;  %v3271_v38 = vmul.f32 1.442695, %v3232_v23  ;;  %v3872_v39 = vmul.f32 %v6201_v24, %v6201_v24  ;;  %v256_v22 = vld [vmem:[#allocation5 + $0x640] sm:$0xff] }
 0x1db   :  { %v3329_v40 = vsel %vm1752_vm0, %v6371_v33, 0.0  ;;  %1047 = vmatpush1.xpose.msra.mxu0 %v260_v17  ;;  %6388 = vpow2.f32 %v3269_v31  ;;  %v3903_v41 = vmul.f32 -500000.0, %v3871_v32  ;;  %v6137_v42 = vadd.f32 -0.7, %v7396_v52  ;;  %v280_v32 = vld [vmem:[#allocation5 + $0x700] sm:$0xff] }
 0x1dc   :  { %2663 = vadd.xlane.f32.xlu1 %v2662_v37  ;;  %v3330_v43 = vadd.f32 %v6369_v26, %v3329_v40  ;;  %1118 = vmatpush1.xpose.msra.mxu1 %v285_v30  ;;  %6390 = vpow2.f32 %v3271_v38  ;;  %v3904_v28 = vmul.f32 -500000.0, %v3872_v39  ;;  %v3423_v36 = vmul.f32 %v6136_v25, %v6136_v25  ;;  %v281_v26 = vld [vmem:[#allocation5 + $0x708] sm:$0xff] }
 0x1dd   :  { %v6373_v46 = vpop.eup %6372  ;;  %1048 = vmatprep.subr.mxu0 %v7070_v0  ;;  %1119 = vmatprep.subr.mxu1 %v7070_v0  ;;  %v3941_v35 = vmul.f32 1.442695, %v3903_v41  ;;  %v3424_v48 = vmul.f32 %v6137_v42, %v6137_v42  ;;  %v6168_v49 = vadd.f32 -0.9, %v7385_v27  ;;  %v6169_v34 = vadd.f32 -0.9, %v7396_v52 }
 0x1de   :  { %v6375_v53 = vpop.eup %6374  ;;  %3331 = vadd.xlane.f32.xlu0 %v3330_v43  ;;  %v3943_v54 = vmul.f32 1.442695, %v3904_v28  ;;  %v3455_v55 = vmul.f32 -50.0, %v3423_v36  ;;  %v6198_v56 = vadd.f32 -1.0, %v7383_v47  ;;  %v6199_v57 = vadd.f32 -1.0, %v7393_v51  ;;  %v258_v27 = vld [vmem:[#allocation5 + $0x650] sm:$0xff] }
 0x1df   :  { %v2885_v58 = vsel %vm1752_vm0, %v6375_v53, 0.0  ;;  %1049 = vmatpush1.xpose.msra.mxu0 %v259_v44  ;;  %6392 = vpow2.f32 %v3941_v35  ;;  %v3456_v59 = vmul.f32 -50.0, %v3424_v48  ;;  %v3647_v60 = vmul.f32 %v6168_v49, %v6168_v49  ;;  %v283_v47 = vld [vmem:[#allocation5 + $0x718] sm:$0xff]  ;;  %v305_v37 = vld [vmem:[#allocation5 + $0x7c8] sm:$0xff]  ;;  %v304_v44 = vld [vmem:[#allocation5 + $0x7c0] sm:$0xff] }
 0x1e0   :  { %v6377_v61 = vpop.eup %6376  ;;  %v2886_v62 = vadd.f32 %v6373_v46, %v2885_v58  ;;  %1120 = vmatpush1.xpose.msra.mxu1 %v284_v45  ;;  %1050 = vmatprep.subr.mxu0 %v7070_v0  ;;  %6394 = vpow2.f32 %v3943_v54  ;;  %v3493_v52 = vmul.f32 1.442695, %v3455_v55  ;;  %v3648_v63 = vmul.f32 %v6169_v34, %v6169_v34  ;;  %v279_v42 = vld [vmem:[#allocation5 + $0x6f8] sm:$0xff]  ;;  %v278_v35 = vld [vmem:[#allocation5 + $0x6f0] sm:$0xff]  ;;  %v277_v54 = vld [vmem:[#allocation5 + $0x6e8] sm:$0xff] }
 0x1e1   :  { %v6379_v1 = vpop.eup %6378  ;;  %1121 = vmatprep.subr.mxu1 %v7070_v0  ;;  %v3495_v51 = vmul.f32 1.442695, %v3456_v59  ;;  %v3679_v2 = vmul.f32 -50.0, %v3647_v60  ;;  %v3869_v50 = vmul.f32 %v6198_v56, %v6198_v56  ;;  %v3870_v3 = vmul.f32 %v6199_v57, %v6199_v57  ;;  %v303_v49 = vld [vmem:[#allocation5 + $0x7b8] sm:$0xff]  ;;  %v302_v56 = vld [vmem:[#allocation5 + $0x7b0] sm:$0xff]  ;;  %v276_v58 = vld [vmem:[#allocation5 + $0x6e0] sm:$0xff] }
 0x1e2   :  { %2887 = vadd.xlane.f32.xlu1 %v2886_v62  ;;  %v3553_v4 = vsel %vm1752_vm0, %v6379_v1, 0.0  ;;  %6396 = vpow2.f32 %v3493_v52  ;;  %v3680_v5 = vmul.f32 -50.0, %v3648_v63  ;;  %v301_v59 = vld [vmem:[#allocation5 + $0x7a8] sm:$0xff]  ;;  %v275_v60 = vld [vmem:[#allocation5 + $0x6d8] sm:$0xff]  ;;  %v274_v62 = vld [vmem:[#allocation5 + $0x6d0] sm:$0xff] }
 0x1e3   :  { %v6381_v6 = vpop.eup %6380  ;;  %v3554_v7 = vadd.f32 %v6377_v61, %v3553_v4  ;;  %1051 = vmatpush1.xpose.msra.mxu0 %v258_v27  ;;  %6398 = vpow2.f32 %v3495_v51  ;;  %v3717_v9 = vmul.f32 1.442695, %v3679_v2  ;;  %v3901_v12 = vmul.f32 -500000.0, %v3869_v50  ;;  %v300_v61 = vld [vmem:[#allocation5 + $0x7a0] sm:$0xff]  ;;  %v299_v27 = vld [vmem:[#allocation5 + $0x798] sm:$0xff] }
 0x1e4   :  { %v6383_v10 = vpop.eup %6382  ;;  %1122 = vmatpush1.xpose.msra.mxu1 %v283_v47  ;;  %1052 = vmatprep.subr.mxu0 %v7070_v0  ;;  %v3719_v11 = vmul.f32 1.442695, %v3680_v5  ;;  %v3902_v13 = vmul.f32 -500000.0, %v3870_v3  ;;  %v273_v52 = vld [vmem:[#allocation5 + $0x6c8] sm:$0xff]  ;;  %v298_v63 = vld [vmem:[#allocation5 + $0x790] sm:$0xff] }
 0x1e5   :  { %3555 = vadd.xlane.f32.xlu0 %v3554_v7  ;;  %v3109_v14 = vsel %vm1752_vm0, %v6383_v10, 0.0  ;;  %1123 = vmatprep.subr.mxu1 %v7070_v0  ;;  %6400 = vpow2.f32 %v3717_v9  ;;  %v3937_v23 = vmul.f32 1.442695, %v3901_v12  ;;  %v272_v3 = vld [vmem:[#allocation5 + $0x6c0] sm:$0xff]  ;;  %v297_v7 = vld [vmem:[#allocation5 + $0x788] sm:$0xff] }
 0x1e6   :  { %v6385_v16 = vpop.eup %6384  ;;  %v3110_v17 = vadd.f32 %v6381_v6, %v3109_v14  ;;  %6402 = vpow2.f32 %v3719_v11  ;;  %v3939_v18 = vmul.f32 1.442695, %v3902_v13 }
 0x1e7   :  { %v6387_v19 = vpop.eup %6386  ;;  %1053 = vmatpush1.xpose.msra.mxu0 %v257_v8 }
 0x1e8   :  { %v6389_v20 = vpop.eup %6388  ;;  %3111 = vadd.xlane.f32.xlu1 %v3110_v17  ;;  %v3777_v21 = vsel %vm1752_vm0, %v6387_v19, 0.0  ;;  %1124 = vmatpush1.xpose.msra.mxu1 %v282_v15  ;;  %6404 = vpow2.f32 %v3939_v18  ;;  %v48_v15 = vld [vmem:[#allocation2 + $0x40] sm:$0xff]  ;;  %v49_v19 = vld [vmem:[#allocation2 + $0x48] sm:$0xff] }
 0x1e9   :  { %v6391_v24 = vpop.eup %6390  ;;  %v3778_v25 = vadd.f32 %v6385_v16, %v3777_v21  ;;  %1054 = vmatprep.subr.mxu0 %v7070_v0  ;;  %1125 = vmatprep.subr.mxu1 %v7070_v0  ;;  %6406 = vpow2.f32 %v3937_v23 }
 0x1ea   :  { %v3333_v29 = vsel %vm1752_vm0, %v6391_v24, 0.0 }
 0x1eb   :  { %3779 = vadd.xlane.f32.xlu0 %v3778_v25  ;;  %v3334_v30 = vadd.f32 %v6389_v20, %v3333_v29  ;;  %1055 = vmatpush1.xpose.msra.mxu0 %v256_v22  ;;  %v321_v20 = vld [vmem:[#allocation5 + $0x848] sm:$0xff]  ;;  %v346_v25 = vld [vmem:[#allocation5 + $0x910] sm:$0xff] }
 0x1ec   :  { %v6393_v31 = vpop.eup %6392  ;;  %1126 = vmatpush1.xpose.msra.mxu1 %v281_v26  ;;  %1070 = vmatprep.subr.mxu0 %v7070_v0 }
 0x1ed   :  { %v6395_v33 = vpop.eup %6394  ;;  %3335 = vadd.xlane.f32.xlu1 %v3334_v30  ;;  %1141 = vmatprep.subr.mxu1 %v7070_v0 }
 0x1ee   :  { %v4005_v38 = vsel %vm1752_vm0, %v6395_v33, 0.0 }
 0x1ef   :  { %v6397_v39 = vpop.eup %6396  ;;  %v4006_v40 = vadd.f32 %v6393_v31, %v4005_v38  ;;  %1071 = vmatpush2.xpose.msra.mxu0 %v280_v32 }
 0x1f0   :  { %v6399_v41 = vpop.eup %6398  ;;  %1142 = vmatpush2.xpose.msra.mxu1 %v305_v37  ;;  %1072 = vmatprep.subr.mxu0 %v7070_v0 }
 0x1f1   :  { %4007 = vadd.xlane.f32.xlu0 %v4006_v40  ;;  %v3557_v43 = vsel %vm1752_vm0, %v6399_v41, 0.0  ;;  %1143 = vmatprep.subr.mxu1 %v7070_v0 }
 0x1f2   :  { %v6401_v45 = vpop.eup %6400  ;;  %v3558_v28 = vadd.f32 %v6397_v39, %v3557_v43  ;;  %v320_v39 = vld [vmem:[#allocation5 + $0x840] sm:$0xff] }
 0x1f3   :  { %v6403_v36 = vpop.eup %6402  ;;  %1073 = vmatpush2.xpose.msra.mxu0 %v279_v42 }
 0x1f4   :  { %3559 = vadd.xlane.f32.xlu1 %v3558_v28  ;;  %v3781_v46 = vsel %vm1752_vm0, %v6403_v36, 0.0  ;;  %1144 = vmatpush2.xpose.msra.mxu1 %v304_v44 }
 0x1f5   :  { %v6405_v48 = vpop.eup %6404  ;;  %1074 = vmatprep.subr.mxu0 %v7070_v0  ;;  %1145 = vmatprep.subr.mxu1 %v7070_v0  ;;  %v3782_v34 = vadd.f32 %v6401_v45, %v3781_v46  ;;  %v345_v45 = vld [vmem:[#allocation5 + $0x908] sm:$0xff] }
 0x1f6   :  { %v4001_v53 = vsel %vm1752_vm0, %v6405_v48, 0.0  ;;  %v6407_v55 = vpop.eup %6406 }
 0x1f7   :  { %1075 = vmatpush2.xpose.msra.mxu0 %v278_v35  ;;  %v4002_v57 = vadd.f32 %v6407_v55, %v4001_v53 }
 0x1f8   :  { %3783 = vadd.xlane.f32.xlu1 %v3782_v34  ;;  %1146 = vmatpush2.xpose.msra.mxu1 %v303_v49  ;;  %v319_v34 = vld [vmem:[#allocation5 + $0x838] sm:$0xff] }
 0x1f9   :  { %1076 = vmatprep.subr.mxu0 %v7070_v0  ;;  %1147 = vmatprep.subr.mxu1 %v7070_v0 }
 0x1fb   :  { %1077 = vmatpush2.xpose.msra.mxu0 %v277_v54 }
 0x1fc   :  { %4003 = vadd.xlane.f32.xlu1 %v4002_v57  ;;  %1148 = vmatpush2.xpose.msra.mxu1 %v302_v56  ;;  %v344_v56 = vld [vmem:[#allocation5 + $0x900] sm:$0xff] }
 0x1fd   :  { %1078 = vmatprep.subr.mxu0 %v7070_v0  ;;  %1149 = vmatprep.subr.mxu1 %v7070_v0 }
 0x1ff   :  { %1079 = vmatpush2.xpose.msra.mxu0 %v276_v58 }
 0x200   :  { %1150 = vmatpush2.xpose.msra.mxu1 %v301_v59  ;;  %1080 = vmatprep.subr.mxu0 %v7070_v0 }
 0x201   :  { %1151 = vmatprep.subr.mxu1 %v7070_v0 }
 0x203   :  { %1081 = vmatpush2.xpose.msra.mxu0 %v275_v60 }
 0x204   :  { %1152 = vmatpush2.xpose.msra.mxu1 %v300_v61  ;;  %1082 = vmatprep.subr.mxu0 %v7070_v0 }
 0x205   :  { %1153 = vmatprep.subr.mxu1 %v7070_v0 }
 0x207   :  { %1083 = vmatpush2.xpose.msra.mxu0 %v274_v62  ;;  %v318_v62 = vld [vmem:[#allocation5 + $0x830] sm:$0xff] }
 0x208   :  { %1154 = vmatpush2.xpose.msra.mxu1 %v299_v27  ;;  %1084 = vmatprep.subr.mxu0 %v7070_v0  ;;  %v343_v27 = vld [vmem:[#allocation5 + $0x8f8] sm:$0xff] }
 0x209   :  { %1155 = vmatprep.subr.mxu1 %v7070_v0 }
 0x20a   :  { %v7513_v1 = vpop.f32.mrf.mxu0  ;;  %v7515_v47 = vpop.f32.mrf.mxu1 }
 0x20b   :  { %1085 = vmatpush2.xpose.msra.mxu0 %v273_v52  ;;  %v5882_v51 = vadd.f32 0.9, %v7513_v1  ;;  %v5914_v2 = vadd.f32 0.7, %v7513_v1  ;;  %v5884_v4 = vadd.f32 0.9, %v7515_v47 }
 0x20c   :  { %1156 = vmatpush2.xpose.msra.mxu1 %v298_v63  ;;  %v7519_v50 = vpop.f32.mrf.mxu0  ;;  %1086 = vmatprep.subr.mxu0 %v7070_v0  ;;  %v5916_v5 = vadd.f32 0.7, %v7515_v47  ;;  %v7524_v6 = vpop.f32.mrf.mxu1  ;;  %v5948_v24 = vadd.f32 0.5, %v7515_v47  ;;  %v5946_v41 = vadd.f32 0.5, %v7513_v1  ;;  %v5980_v58 = vadd.f32 0.3, %v7515_v47 }
 0x20d   :  { %1157 = vmatprep.subr.mxu1 %v7070_v0  ;;  %v5883_v8 = vadd.f32 0.9, %v7519_v50  ;;  %v1632_v9 = vmul.f32 %v5882_v51, %v5882_v51  ;;  %v5915_v10 = vadd.f32 0.7, %v7519_v50  ;;  %v5885_v11 = vadd.f32 0.9, %v7524_v6 }
 0x20e   :  { %v1634_v12 = vmul.f32 %v5884_v4, %v5884_v4  ;;  %v5917_v13 = vadd.f32 0.7, %v7524_v6  ;;  %v1857_v14 = vmul.f32 %v5914_v2, %v5914_v2  ;;  %v1859_v18 = vmul.f32 %v5916_v5, %v5916_v5 }
 0x20f   :  { %1087 = vmatpush2.xpose.msra.mxu0 %v272_v3  ;;  %v1633_v16 = vmul.f32 %v5883_v8, %v5883_v8  ;;  %v1664_v17 = vmul.f32 -50.0, %v1632_v9  ;;  %v1635_v21 = vmul.f32 %v5885_v11, %v5885_v11  ;;  %v1858_v31 = vmul.f32 %v5915_v10, %v5915_v10 }
 0x210   :  { %1158 = vmatpush2.xpose.msra.mxu1 %v297_v7  ;;  %1166 = vmatprep.subr.mxu0 %v7070_v0  ;;  %v1666_v22 = vmul.f32 -50.0, %v1634_v12  ;;  %v1860_v23 = vmul.f32 %v5917_v13, %v5917_v13  ;;  %v1891_v30 = vmul.f32 -50.0, %v1859_v18  ;;  %v1889_v38 = vmul.f32 -50.0, %v1857_v14 }
 0x211   :  { %1237 = vmatprep.subr.mxu1 %v7070_v0  ;;  %v1665_v26 = vmul.f32 -50.0, %v1633_v16  ;;  %v1704_v29 = vmul.f32 1.442695, %v1664_v17  ;;  %v1667_v32 = vmul.f32 -50.0, %v1635_v21  ;;  %v1890_v28 = vmul.f32 -50.0, %v1858_v31  ;;  %v317_v17 = vld [vmem:[#allocation5 + $0x828] sm:$0xff] }
 0x212   :  { %1089 = vmatmul.mubr.f32.vlgmr.msra.gmra.mxu0 %v48_v15  ;;  %v1708_v33 = vmul.f32 1.442695, %v1666_v22  ;;  %v1892_v37 = vmul.f32 -50.0, %v1860_v23  ;;  %v1933_v43 = vmul.f32 1.442695, %v1891_v30  ;;  %v5949_v46 = vadd.f32 0.5, %v7524_v6 }
 0x213   :  { %1160 = vmatmul.mubr.f32.vlgmr.msra.gmra.mxu1 %v49_v19  ;;  %1167 = vmatpush1.xpose.msra.mxu0 %v321_v20  ;;  %6408 = vpow2.f32 %v1704_v29  ;;  %v1706_v40 = vmul.f32 1.442695, %v1665_v26  ;;  %v1710_v42 = vmul.f32 1.442695, %v1667_v32  ;;  %v1929_v36 = vmul.f32 1.442695, %v1889_v38 }
 0x214   :  { %1238 = vmatpush1.xpose.msra.mxu1 %v346_v25  ;;  %1168 = vmatprep.subr.mxu0 %v7070_v0  ;;  %6410 = vpow2.f32 %v1708_v33  ;;  %v1935_v44 = vmul.f32 1.442695, %v1892_v37  ;;  %v2083_v35 = vmul.f32 %v5948_v24, %v5948_v24  ;;  %v1931_v48 = vmul.f32 1.442695, %v1890_v28  ;;  %v342_v21 = vld [vmem:[#allocation5 + $0x8f0] sm:$0xff] }
 0x215   :  { %1239 = vmatprep.subr.mxu1 %v7070_v0  ;;  %6412 = vpow2.f32 %v1706_v40  ;;  %1230 = vmatprep.mubr.f32.mxu0 %v7070_v0  ;;  %v5947_v49 = vadd.f32 0.5, %v7519_v50  ;;  %v2084_v53 = vmul.f32 %v5949_v46, %v5949_v46  ;;  %v2081_v55 = vmul.f32 %v5946_v41, %v5946_v41  ;;  %v316_v40 = vld [vmem:[#allocation5 + $0x820] sm:$0xff] }
 0x216   :  { %6414 = vpow2.f32 %v1710_v42  ;;  %1301 = vmatprep.mubr.f32.mxu1 %v7070_v0  ;;  %v2115_v54 = vmul.f32 -50.0, %v2083_v35  ;;  %v5981_v59 = vadd.f32 0.3, %v7524_v6  ;;  %v2307_v51 = vmul.f32 %v5980_v58, %v5980_v58 }
 0x217   :  { %1169 = vmatpush1.xpose.msra.mxu0 %v320_v39  ;;  %6416 = vpow2.f32 %v1933_v43  ;;  %v2082_v57 = vmul.f32 %v5947_v49, %v5947_v49  ;;  %v2116_v60 = vmul.f32 -50.0, %v2084_v53  ;;  %v2113_v52 = vmul.f32 -50.0, %v2081_v55  ;;  %v341_v43 = vld [vmem:[#allocation5 + $0x8e8] sm:$0xff] }
 0x218   :  { %1240 = vmatpush1.xpose.msra.mxu1 %v345_v45  ;;  %1170 = vmatprep.subr.mxu0 %v7070_v0  ;;  %6418 = vpow2.f32 %v1935_v44  ;;  %v2157_v61 = vmul.f32 1.442695, %v2115_v54  ;;  %v2308_v2 = vmul.f32 %v5981_v59, %v5981_v59  ;;  %v5978_v4 = vadd.f32 0.3, %v7513_v1 }
 0x219   :  { %1241 = vmatprep.subr.mxu1 %v7070_v0  ;;  %6420 = vpow2.f32 %v1929_v36  ;;  %v2114_v63 = vmul.f32 -50.0, %v2082_v57  ;;  %v2159_v3 = vmul.f32 1.442695, %v2116_v60  ;;  %v5979_v5 = vadd.f32 0.3, %v7519_v50 }
 0x21a   :  { %6422 = vpow2.f32 %v1931_v48  ;;  %v2153_v7 = vmul.f32 1.442695, %v2113_v52  ;;  %v2339_v9 = vmul.f32 -50.0, %v2307_v51  ;;  %v2340_v10 = vmul.f32 -50.0, %v2308_v2 }
 0x21b   :  { %1171 = vmatpush1.xpose.msra.mxu0 %v319_v34  ;;  %6424 = vpow2.f32 %v2157_v61  ;;  %v2155_v8 = vmul.f32 1.442695, %v2114_v63  ;;  %v2305_v11 = vmul.f32 %v5978_v4, %v5978_v4  ;;  %v2306_v12 = vmul.f32 %v5979_v5, %v5979_v5  ;;  %v315_v61 = vld [vmem:[#allocation5 + $0x818] sm:$0xff] }
 0x21c   :  { %1242 = vmatpush1.xpose.msra.mxu1 %v344_v56  ;;  %1172 = vmatprep.subr.mxu0 %v7070_v0  ;;  %6426 = vpow2.f32 %v2159_v3  ;;  %v2381_v13 = vmul.f32 1.442695, %v2339_v9  ;;  %v2383_v14 = vmul.f32 1.442695, %v2340_v10  ;;  %v6012_v15 = vadd.f32 0.1, %v7515_v47 }
 0x21d   :  { %1243 = vmatprep.subr.mxu1 %v7070_v0  ;;  %6428 = vpow2.f32 %v2153_v7  ;;  %v2337_v18 = vmul.f32 -50.0, %v2305_v11  ;;  %v2338_v19 = vmul.f32 -50.0, %v2306_v12  ;;  %v6013_v22 = vadd.f32 0.1, %v7524_v6 }
 0x21e   :  { %6430 = vpow2.f32 %v2155_v8  ;;  %v2531_v23 = vmul.f32 %v6012_v15, %v6012_v15  ;;  %v6010_v33 = vadd.f32 0.1, %v7513_v1  ;;  %v7559_v45 = vadd.f32 -0.5, %v7515_v47 }
 0x21f   :  { %1173 = vmatpush1.xpose.msra.mxu0 %v318_v62  ;;  %6432 = vpow2.f32 %v2381_v13  ;;  %v2377_v25 = vmul.f32 1.442695, %v2337_v18  ;;  %v2379_v26 = vmul.f32 1.442695, %v2338_v19  ;;  %v2532_v31 = vmul.f32 %v6013_v22, %v6013_v22  ;;  %v340_v62 = vld [vmem:[#allocation5 + $0x8e0] sm:$0xff] }
 0x220   :  { %v6409_v16 = vpop.eup %6408  ;;  %1244 = vmatpush1.xpose.msra.mxu1 %v343_v27  ;;  %1174 = vmatprep.subr.mxu0 %v7070_v0  ;;  %6434 = vpow2.f32 %v2383_v14  ;;  %v2563_v32 = vmul.f32 -50.0, %v2531_v23  ;;  %v6011_v35 = vadd.f32 0.1, %v7519_v50  ;;  %v2529_v48 = vmul.f32 %v6010_v33, %v6010_v33 }
 0x221   :  { %v6411_v20 = vpop.eup %6410  ;;  %1245 = vmatprep.subr.mxu1 %v7070_v0  ;;  %6436 = vpow2.f32 %v2377_v25  ;;  %v2564_v44 = vmul.f32 -50.0, %v2532_v31  ;;  %v6044_v54 = vadd.f32 -0.1, %v7515_v47  ;;  %v6045_v55 = vadd.f32 -0.1, %v7524_v6 }
 0x222   :  { %v6413_v24 = vpop.eup %6412  ;;  %6438 = vpow2.f32 %v2379_v26  ;;  %v2605_v46 = vmul.f32 1.442695, %v2563_v32  ;;  %v2530_v57 = vmul.f32 %v6011_v35, %v6011_v35  ;;  %v2561_v58 = vmul.f32 -50.0, %v2529_v48  ;;  %v313_v32 = vld [vmem:[#allocation5 + $0x808] sm:$0xff] }
 0x223   :  { %v6415_v29 = vpop.eup %6414  ;;  %1175 = vmatpush1.xpose.msra.mxu0 %v317_v17  ;;  %v1769_v30 = vsel %vm1752_vm0, %v6413_v24, 0.0  ;;  %v2607_v53 = vmul.f32 1.442695, %v2564_v44  ;;  %v2755_v27 = vmul.f32 %v6044_v54, %v6044_v54  ;;  %v2756_v52 = vmul.f32 %v6045_v55, %v6045_v55  ;;  %v339_v17 = vld [vmem:[#allocation5 + $0x8d8] sm:$0xff] }
 0x224   :  { %v6417_v37 = vpop.eup %6416  ;;  %1246 = vmatpush1.xpose.msra.mxu1 %v342_v21  ;;  %1176 = vmatprep.subr.mxu0 %v7070_v0  ;;  %v1773_v38 = vsel %vm1752_vm0, %v6415_v29, 0.0  ;;  %v1770_v39 = vadd.f32 %v6409_v16, %v1769_v30  ;;  %6440 = vpow2.f32 %v2605_v46  ;;  %v2562_v63 = vmul.f32 -50.0, %v2530_v57  ;;  %v314_v16 = vld [vmem:[#allocation5 + $0x810] sm:$0xff]  ;;  %v337_v57 = vld [vmem:[#allocation5 + $0x8c8] sm:$0xff] }
 0x225   :  { %v6419_v41 = vpop.eup %6418  ;;  %1247 = vmatprep.subr.mxu1 %v7070_v0  ;;  %v1774_v42 = vadd.f32 %v6411_v20, %v1773_v38  ;;  %6442 = vpow2.f32 %v2607_v53  ;;  %v2601_v51 = vmul.f32 1.442695, %v2561_v58  ;;  %v6042_v2 = vadd.f32 -0.1, %v7513_v1 }
 0x226   :  { %v6421_v28 = vpop.eup %6420  ;;  %1771 = vadd.xlane.f32.xlu0 %v1770_v39  ;;  %v1997_v36 = vsel %vm1752_vm0, %v6419_v41, 0.0  ;;  %v7570_v3 = vadd.f32 -0.5, %v7524_v6  ;;  %v2787_v5 = vmul.f32 -50.0, %v2755_v27  ;;  %v2788_v7 = vmul.f32 -50.0, %v2756_v52 }
 0x227   :  { %v6423_v49 = vpop.eup %6422  ;;  %1775 = vadd.xlane.f32.xlu1 %v1774_v42  ;;  %1177 = vmatpush1.xpose.msra.mxu0 %v316_v40  ;;  %v1998_v34 = vadd.f32 %v6417_v37, %v1997_v36  ;;  %v6043_v8 = vadd.f32 -0.1, %v7519_v50  ;;  %v6076_v9 = vadd.f32 -0.3, %v7515_v47  ;;  %6444 = vpow2.f32 %v2601_v51  ;;  %v338_v40 = vld [vmem:[#allocation5 + $0x8d0] sm:$0xff] }
 0x228   :  { %1248 = vmatpush1.xpose.msra.mxu1 %v341_v43  ;;  %1178 = vmatprep.subr.mxu0 %v7070_v0  ;;  %v1993_v56 = vsel %vm1752_vm0, %v6423_v49, 0.0  ;;  %v6425_v59 = vpop.eup %6424  ;;  %v2603_v12 = vmul.f32 1.442695, %v2562_v63  ;;  %v2753_v13 = vmul.f32 %v6042_v2, %v6042_v2  ;;  %v2829_v18 = vmul.f32 1.442695, %v2787_v5  ;;  %v311_v5 = vld [vmem:[#allocation5 + $0x7f8] sm:$0xff] }
 0x229   :  { %1249 = vmatprep.subr.mxu1 %v7070_v0  ;;  %v1994_v60 = vadd.f32 %v6421_v28, %v1993_v56  ;;  %v6427_v4 = vpop.eup %6426  ;;  %v2831_v19 = vmul.f32 1.442695, %v2788_v7  ;;  %v2754_v20 = vmul.f32 %v6043_v8, %v6043_v8  ;;  %v6077_v24 = vadd.f32 -0.3, %v7524_v6 }
 0x22a   :  { %v6429_v10 = vpop.eup %6428  ;;  %v2221_v11 = vsel %vm1752_vm0, %v6427_v4, 0.0  ;;  %6446 = vpow2.f32 %v2603_v12  ;;  %v2785_v23 = vmul.f32 -50.0, %v2753_v13  ;;  %v2979_v30 = vmul.f32 %v6076_v9, %v6076_v9 }
 0x22b   :  { %1999 = vadd.xlane.f32.xlu1 %v1998_v34  ;;  %1995 = vadd.xlane.f32.xlu0 %v1994_v60  ;;  %v6431_v14 = vpop.eup %6430  ;;  %v2222_v15 = vadd.f32 %v6425_v59, %v2221_v11  ;;  %6448 = vpow2.f32 %v2829_v18  ;;  %v2786_v29 = vmul.f32 -50.0, %v2754_v20  ;;  %v2980_v37 = vmul.f32 %v6077_v24, %v6077_v24  ;;  %v336_v11 = vld [vmem:[#allocation5 + $0x8c0] sm:$0xff] }
 0x22c   :  { %1179 = vmatpush1.xpose.msra.mxu0 %v315_v61  ;;  %1250 = vmatpush1.xpose.msra.mxu1 %v340_v62  ;;  %v6433_v21 = vpop.eup %6432  ;;  %v2217_v22 = vsel %vm1752_vm0, %v6431_v14, 0.0  ;;  %6450 = vpow2.f32 %v2831_v19  ;;  %v2825_v33 = vmul.f32 1.442695, %v2785_v23  ;;  %v3011_v42 = vmul.f32 -50.0, %v2979_v30  ;;  %v310_v30 = vld [vmem:[#allocation5 + $0x7f0] sm:$0xff] }
 0x22d   :  { %1180 = vmatprep.subr.mxu0 %v7070_v0  ;;  %1251 = vmatprep.subr.mxu1 %v7070_v0  ;;  %v6435_v25 = vpop.eup %6434  ;;  %v2218_v26 = vadd.f32 %v6429_v10, %v2217_v22  ;;  %v2827_v41 = vmul.f32 1.442695, %v2786_v29  ;;  %v6074_v43 = vadd.f32 -0.3, %v7513_v1  ;;  %v3012_v28 = vmul.f32 -50.0, %v2980_v37 }
 0x22e   :  { %v2445_v31 = vsel %vm1752_vm0, %v6435_v25, 0.0  ;;  %v6437_v38 = vpop.eup %6436  ;;  %6452 = vpow2.f32 %v2825_v33  ;;  %v6075_v36 = vadd.f32 -0.3, %v7519_v50  ;;  %v3203_v46 = vmul.f32 %v7559_v45, %v7559_v45  ;;  %v312_v45 = vld [vmem:[#allocation5 + $0x800] sm:$0xff] }
 0x22f   :  { %2223 = vadd.xlane.f32.xlu1 %v2222_v15  ;;  %2219 = vadd.xlane.f32.xlu0 %v2218_v26  ;;  %v2446_v39 = vadd.f32 %v6433_v21, %v2445_v31  ;;  %v6439_v44 = vpop.eup %6438  ;;  %6454 = vpow2.f32 %v2827_v41  ;;  %v3053_v48 = vmul.f32 1.442695, %v3011_v42  ;;  %v2977_v49 = vmul.f32 %v6074_v43, %v6074_v43  ;;  %v335_v31 = vld [vmem:[#allocation5 + $0x8b8] sm:$0xff] }
 0x230   :  { %1181 = vmatpush1.xpose.msra.mxu0 %v314_v16  ;;  %1252 = vmatpush1.xpose.msra.mxu1 %v339_v17  ;;  %v2441_v35 = vsel %vm1752_vm0, %v6439_v44, 0.0  ;;  %v3055_v53 = vmul.f32 1.442695, %v3012_v28  ;;  %v2978_v54 = vmul.f32 %v6075_v36, %v6075_v36  ;;  %v3204_v55 = vmul.f32 %v7570_v3, %v7570_v3 }
 0x231   :  { %1182 = vmatprep.subr.mxu0 %v7070_v0  ;;  %1253 = vmatprep.subr.mxu1 %v7070_v0  ;;  %v2442_v34 = vadd.f32 %v6437_v38, %v2441_v35  ;;  %v6441_v56 = vpop.eup %6440  ;;  %6456 = vpow2.f32 %v3053_v48  ;;  %v3009_v58 = vmul.f32 -50.0, %v2977_v49  ;;  %v3235_v59 = vmul.f32 -50.0, %v3203_v46 }
 0x232   :  { %v6106_v60 = vadd.f32 -0.5, %v7513_v1  ;;  %v6443_v61 = vpop.eup %6442  ;;  %6458 = vpow2.f32 %v3055_v53  ;;  %v3010_v62 = vmul.f32 -50.0, %v2978_v54  ;;  %v3236_v27 = vmul.f32 -50.0, %v3204_v55 }
 0x233   :  { %2447 = vadd.xlane.f32.xlu1 %v2446_v39  ;;  %2443 = vadd.xlane.f32.xlu0 %v2442_v34  ;;  %v6107_v52 = vadd.f32 -0.5, %v7519_v50  ;;  %v2669_v63 = vsel %vm1752_vm0, %v6443_v61, 0.0  ;;  %v3049_v51 = vmul.f32 1.442695, %v3009_v58  ;;  %v3277_v2 = vmul.f32 1.442695, %v3235_v59 }
 0x234   :  { %1183 = vmatpush1.xpose.msra.mxu0 %v313_v32  ;;  %1254 = vmatpush1.xpose.msra.mxu1 %v338_v40  ;;  %v3201_v3 = vmul.f32 %v6106_v60, %v6106_v60  ;;  %v2670_v4 = vadd.f32 %v6441_v56, %v2669_v63  ;;  %v3051_v7 = vmul.f32 1.442695, %v3010_v62  ;;  %v3279_v8 = vmul.f32 1.442695, %v3236_v27  ;;  %v6445_v10 = vpop.eup %6444  ;;  %v309_v34 = vld [vmem:[#allocation5 + $0x7e8] sm:$0xff] }
 0x235   :  { %1184 = vmatprep.subr.mxu0 %v7070_v0  ;;  %1255 = vmatprep.subr.mxu1 %v7070_v0  ;;  %v3202_v9 = vmul.f32 %v6107_v52, %v6107_v52  ;;  %6460 = vpow2.f32 %v3049_v51  ;;  %v6140_v13 = vadd.f32 -0.7, %v7515_v47  ;;  %v6141_v14 = vadd.f32 -0.7, %v7524_v6  ;;  %v308_v51 = vld [vmem:[#allocation5 + $0x7e0] sm:$0xff] }
 0x236   :  { %v3233_v12 = vmul.f32 -50.0, %v3201_v3  ;;  %6462 = vpow2.f32 %v3051_v7  ;;  %v6138_v16 = vadd.f32 -0.7, %v7513_v1  ;;  %v6139_v17 = vadd.f32 -0.7, %v7519_v50  ;;  %v333_v7 = vld [vmem:[#allocation5 + $0x8a8] sm:$0xff] }
 0x237   :  { %2671 = vadd.xlane.f32.xlu1 %v2670_v4  ;;  %v3234_v15 = vmul.f32 -50.0, %v3202_v9  ;;  %v6447_v18 = vpop.eup %6446  ;;  %6464 = vpow2.f32 %v3277_v2  ;;  %v3427_v20 = vmul.f32 %v6140_v13, %v6140_v13  ;;  %v3428_v21 = vmul.f32 %v6141_v14, %v6141_v14 }
 0x238   :  { %1185 = vmatpush1.xpose.msra.mxu0 %v312_v45  ;;  %1256 = vmatpush1.xpose.msra.mxu1 %v337_v57  ;;  %v3273_v19 = vmul.f32 1.442695, %v3233_v12  ;;  %v6449_v22 = vpop.eup %6448  ;;  %v2665_v23 = vsel %vm1752_vm0, %v6447_v18, 0.0  ;;  %6466 = vpow2.f32 %v3279_v8  ;;  %v3425_v25 = vmul.f32 %v6138_v16, %v6138_v16  ;;  %v334_v45 = vld [vmem:[#allocation5 + $0x8b0] sm:$0xff] }
 0x239   :  { %1186 = vmatprep.subr.mxu0 %v7070_v0  ;;  %1257 = vmatprep.subr.mxu1 %v7070_v0  ;;  %v3275_v24 = vmul.f32 1.442695, %v3234_v15  ;;  %v6451_v26 = vpop.eup %6450  ;;  %v2666_v29 = vadd.f32 %v6445_v10, %v2665_v23  ;;  %v3459_v32 = vmul.f32 -50.0, %v3427_v20  ;;  %v3460_v33 = vmul.f32 -50.0, %v3428_v21  ;;  %v307_v21 = vld [vmem:[#allocation5 + $0x7d8] sm:$0xff] }
 0x23a   :  { %6468 = vpow2.f32 %v3273_v19  ;;  %v2893_v37 = vsel %vm1752_vm0, %v6451_v26, 0.0  ;;  %v3426_v38 = vmul.f32 %v6139_v17, %v6139_v17  ;;  %v3457_v39 = vmul.f32 -50.0, %v3425_v25 }
 0x23b   :  { %6470 = vpow2.f32 %v3275_v24  ;;  %v6453_v40 = vpop.eup %6452  ;;  %2667 = vadd.xlane.f32.xlu0 %v2666_v29  ;;  %v2894_v41 = vadd.f32 %v6449_v22, %v2893_v37  ;;  %v3501_v42 = vmul.f32 1.442695, %v3459_v32  ;;  %v3503_v43 = vmul.f32 1.442695, %v3460_v33 }
 0x23c   :  { %1187 = vmatpush1.xpose.msra.mxu0 %v311_v5  ;;  %1258 = vmatpush1.xpose.msra.mxu1 %v336_v11  ;;  %v6172_v44 = vadd.f32 -0.9, %v7515_v47  ;;  %v6455_v28 = vpop.eup %6454  ;;  %v3458_v36 = vmul.f32 -50.0, %v3426_v38  ;;  %v3497_v46 = vmul.f32 1.442695, %v3457_v39  ;;  %v6202_v48 = vadd.f32 -1.0, %v7513_v1 }
 0x23d   :  { %1188 = vmatprep.subr.mxu0 %v7070_v0  ;;  %1259 = vmatprep.subr.mxu1 %v7070_v0  ;;  %v6173_v35 = vadd.f32 -0.9, %v7524_v6  ;;  %v2889_v49 = vsel %vm1752_vm0, %v6455_v28, 0.0  ;;  %6472 = vpow2.f32 %v3501_v42  ;;  %v6170_v54 = vadd.f32 -0.9, %v7513_v1 }
 0x23e   :  { %2895 = vadd.xlane.f32.xlu1 %v2894_v41  ;;  %v3651_v53 = vmul.f32 %v6172_v44, %v6172_v44  ;;  %v6457_v55 = vpop.eup %6456  ;;  %v2890_v56 = vadd.f32 %v6453_v40, %v2889_v49  ;;  %6474 = vpow2.f32 %v3503_v43  ;;  %v3499_v57 = vmul.f32 1.442695, %v3458_v36  ;;  %v306_v40 = vld [vmem:[#allocation5 + $0x7d0] sm:$0xff]  ;;  %v331_v43 = vld [vmem:[#allocation5 + $0x898] sm:$0xff] }
 0x23f   :  { %v3652_v58 = vmul.f32 %v6173_v35, %v6173_v35  ;;  %v6459_v59 = vpop.eup %6458  ;;  %6476 = vpow2.f32 %v3497_v46  ;;  %v6171_v61 = vadd.f32 -0.9, %v7519_v50  ;;  %v3649_v62 = vmul.f32 %v6170_v54, %v6170_v54 }
 0x240   :  { %1189 = vmatpush1.xpose.msra.mxu0 %v310_v30  ;;  %1260 = vmatpush1.xpose.msra.mxu1 %v335_v31  ;;  %v3683_v60 = vmul.f32 -50.0, %v3651_v53  ;;  %v3117_v27 = vsel %vm1752_vm0, %v6459_v59, 0.0  ;;  %6478 = vpow2.f32 %v3499_v57  ;;  %v6203_v52 = vadd.f32 -1.0, %v7519_v50  ;;  %v354_v57 = vld [vmem:[#allocation5 + $0x950] sm:$0xff] }
 0x241   :  { %1190 = vmatprep.subr.mxu0 %v7070_v0  ;;  %1261 = vmatprep.subr.mxu1 %v7070_v0  ;;  %v3684_v1 = vmul.f32 -50.0, %v3652_v58  ;;  %v3118_v63 = vadd.f32 %v6457_v55, %v3117_v27  ;;  %v3650_v3 = vmul.f32 %v6171_v61, %v6171_v61  ;;  %v3681_v4 = vmul.f32 -50.0, %v3649_v62  ;;  %v328_v62 = vld [vmem:[#allocation5 + $0x880] sm:$0xff] }
 0x242   :  { %2891 = vadd.xlane.f32.xlu0 %v2890_v56  ;;  %v3725_v2 = vmul.f32 1.442695, %v3683_v60  ;;  %v6461_v5 = vpop.eup %6460  ;;  %v3873_v9 = vmul.f32 %v6202_v48, %v6202_v48  ;;  %v3874_v10 = vmul.f32 %v6203_v52, %v6203_v52  ;;  %v6204_v11 = vadd.f32 -1.0, %v7515_v47  ;;  %v330_v48 = vld [vmem:[#allocation5 + $0x890] sm:$0xff]  ;;  %v329_v56 = vld [vmem:[#allocation5 + $0x888] sm:$0xff] }
 0x243   :  { %v3727_v8 = vmul.f32 1.442695, %v3684_v1  ;;  %v6463_v12 = vpop.eup %6462  ;;  %3119 = vadd.xlane.f32.xlu1 %v3118_v63  ;;  %v3682_v50 = vmul.f32 -50.0, %v3650_v3  ;;  %v3721_v13 = vmul.f32 1.442695, %v3681_v4  ;;  %v6205_v14 = vadd.f32 -1.0, %v7524_v6 }
 0x244   :  { %1191 = vmatpush1.xpose.msra.mxu0 %v309_v34  ;;  %1262 = vmatpush1.xpose.msra.mxu1 %v334_v45  ;;  %6480 = vpow2.f32 %v3725_v2  ;;  %v6465_v15 = vpop.eup %6464  ;;  %v3113_v16 = vsel %vm1752_vm0, %v6463_v12, 0.0  ;;  %v3905_v17 = vmul.f32 -500000.0, %v3873_v9  ;;  %v3906_v18 = vmul.f32 -500000.0, %v3874_v10  ;;  %v332_v6 = vld [vmem:[#allocation5 + $0x8a0] sm:$0xff] }
 0x245   :  { %1192 = vmatprep.subr.mxu0 %v7070_v0  ;;  %1263 = vmatprep.subr.mxu1 %v7070_v0  ;;  %6482 = vpow2.f32 %v3727_v8  ;;  %v6467_v19 = vpop.eup %6466  ;;  %v3114_v20 = vadd.f32 %v6461_v5, %v3113_v16  ;;  %v3723_v47 = vmul.f32 1.442695, %v3682_v50  ;;  %v3875_v22 = vmul.f32 %v6204_v11, %v6204_v11  ;;  %v355_v34 = vld [vmem:[#allocation5 + $0x958] sm:$0xff]  ;;  %v353_v52 = vld [vmem:[#allocation5 + $0x948] sm:$0xff]  ;;  %v352_v8 = vld [vmem:[#allocation5 + $0x940] sm:$0xff] }
 0x246   :  { %v3341_v24 = vsel %vm1752_vm0, %v6467_v19, 0.0  ;;  %v3945_v25 = vmul.f32 1.442695, %v3905_v17  ;;  %v3947_v26 = vmul.f32 1.442695, %v3906_v18  ;;  %v3876_v29 = vmul.f32 %v6205_v14, %v6205_v14  ;;  %v327_v5 = vld [vmem:[#allocation5 + $0x878] sm:$0xff] }
 0x247   :  { %v6469_v23 = vpop.eup %6468  ;;  %3115 = vadd.xlane.f32.xlu0 %v3114_v20  ;;  %v3342_v31 = vadd.f32 %v6465_v15, %v3341_v24  ;;  %6484 = vpow2.f32 %v3723_v47  ;;  %v3907_v32 = vmul.f32 -500000.0, %v3875_v22  ;;  %v326_v10 = vld [vmem:[#allocation5 + $0x870] sm:$0xff]  ;;  %v351_v11 = vld [vmem:[#allocation5 + $0x938] sm:$0xff]  ;;  %v325_v12 = vld [vmem:[#allocation5 + $0x868] sm:$0xff] }
 0x248   :  { %1193 = vmatpush1.xpose.msra.mxu0 %v308_v51  ;;  %1264 = vmatpush1.xpose.msra.mxu1 %v333_v7  ;;  %v6471_v30 = vpop.eup %6470  ;;  %6486 = vpow2.f32 %v3721_v13  ;;  %v3908_v37 = vmul.f32 -500000.0, %v3876_v29  ;;  %v350_v50 = vld [vmem:[#allocation5 + $0x930] sm:$0xff]  ;;  %v324_v13 = vld [vmem:[#allocation5 + $0x860] sm:$0xff]  ;;  %v349_v14 = vld [vmem:[#allocation5 + $0x928] sm:$0xff] }
 0x249   :  { %1194 = vmatprep.subr.mxu0 %v7070_v0  ;;  %1265 = vmatprep.subr.mxu1 %v7070_v0  ;;  %v3337_v33 = vsel %vm1752_vm0, %v6471_v30, 0.0  ;;  %6488 = vpow2.f32 %v3947_v26  ;;  %v3949_v39 = vmul.f32 1.442695, %v3907_v32  ;;  %v323_v15 = vld [vmem:[#allocation5 + $0x858] sm:$0xff]  ;;  %v348_v17 = vld [vmem:[#allocation5 + $0x920] sm:$0xff]  ;;  %v322_v24 = vld [vmem:[#allocation5 + $0x850] sm:$0xff] }
 0x24a   :  { %3343 = vadd.xlane.f32.xlu1 %v3342_v31  ;;  %v3338_v38 = vadd.f32 %v6469_v23, %v3337_v33  ;;  %v6473_v41 = vpop.eup %6472  ;;  %6490 = vpow2.f32 %v3945_v25  ;;  %v3951_v42 = vmul.f32 1.442695, %v3908_v37  ;;  %v347_v29 = vld [vmem:[#allocation5 + $0x918] sm:$0xff] }
 0x24b   :  { %v6475_v44 = vpop.eup %6474  ;;  %6492 = vpow2.f32 %v3949_v39 }
 0x24c   :  { %1195 = vmatpush1.xpose.msra.mxu0 %v307_v21  ;;  %1266 = vmatpush1.xpose.msra.mxu1 %v332_v6  ;;  %v6477_v28 = vpop.eup %6476  ;;  %v3565_v36 = vsel %vm1752_vm0, %v6475_v44, 0.0  ;;  %6494 = vpow2.f32 %v3951_v42 }
 0x24d   :  { %1196 = vmatprep.subr.mxu0 %v7070_v0  ;;  %1267 = vmatprep.subr.mxu1 %v7070_v0  ;;  %v6479_v46 = vpop.eup %6478  ;;  %v3566_v35 = vadd.f32 %v6473_v41, %v3565_v36  ;;  %v371_v36 = vld [vmem:[#allocation5 + $0x9d8] sm:$0xff] }
 0x24e   :  { %3339 = vadd.xlane.f32.xlu0 %v3338_v38  ;;  %v3561_v49 = vsel %vm1752_vm0, %v6479_v46, 0.0 }
 0x24f   :  { %3567 = vadd.xlane.f32.xlu1 %v3566_v35  ;;  %v3562_v53 = vadd.f32 %v6477_v28, %v3561_v49  ;;  %v51_v28 = vld [vmem:[#allocation2 + $0x58] sm:$0xff] }
 0x250   :  { %1197 = vmatpush1.xpose.msra.mxu0 %v306_v40  ;;  %1268 = vmatpush1.xpose.msra.mxu1 %v331_v43  ;;  %v50_v40 = vld [vmem:[#allocation2 + $0x50] sm:$0xff] }
 0x251   :  { %1212 = vmatprep.subr.mxu0 %v7070_v0  ;;  %1283 = vmatprep.subr.mxu1 %v7070_v0  ;;  %v6481_v54 = vpop.eup %6480 }
 0x252   :  { %v6483_v55 = vpop.eup %6482  ;;  %3563 = vadd.xlane.f32.xlu0 %v3562_v53 }
 0x253   :  { %v3789_v45 = vsel %vm1752_vm0, %v6483_v55, 0.0 }
 0x254   :  { %1213 = vmatpush2.xpose.msra.mxu0 %v330_v48  ;;  %1284 = vmatpush2.xpose.msra.mxu1 %v355_v34  ;;  %v3790_v58 = vadd.f32 %v6481_v54, %v3789_v45  ;;  %v6485_v59 = vpop.eup %6484  ;;  %v396_v34 = vld [vmem:[#allocation5 + $0xaa0] sm:$0xff] }
 0x255   :  { %1214 = vmatprep.subr.mxu0 %v7070_v0  ;;  %1285 = vmatprep.subr.mxu1 %v7070_v0  ;;  %v6487_v60 = vpop.eup %6486  ;;  %v3785_v61 = vsel %vm1752_vm0, %v6485_v59, 0.0 }
 0x256   :  { %3791 = vadd.xlane.f32.xlu1 %v3790_v58  ;;  %v6489_v27 = vpop.eup %6488  ;;  %v3786_v1 = vadd.f32 %v6487_v60, %v3785_v61  ;;  %v370_v61 = vld [vmem:[#allocation5 + $0x9d0] sm:$0xff] }
 0x257   :  { %v6491_v63 = vpop.eup %6490  ;;  %v4009_v51 = vsel %vm1752_vm0, %v6489_v27, 0.0 }
 0x258   :  { %1215 = vmatpush2.xpose.msra.mxu0 %v329_v56  ;;  %1286 = vmatpush2.xpose.msra.mxu1 %v354_v57  ;;  %v6493_v2 = vpop.eup %6492  ;;  %v4010_v3 = vadd.f32 %v6491_v63, %v4009_v51 }
 0x259   :  { %1216 = vmatprep.subr.mxu0 %v7070_v0  ;;  %1287 = vmatprep.subr.mxu1 %v7070_v0  ;;  %v6495_v4 = vpop.eup %6494 }
 0x25a   :  { %3787 = vadd.xlane.f32.xlu0 %v3786_v1  ;;  %4011 = vadd.xlane.f32.xlu1 %v4010_v3  ;;  %v4013_v7 = vsel %vm1752_vm0, %v6495_v4, 0.0  ;;  %v395_v1 = vld [vmem:[#allocation5 + $0xa98] sm:$0xff] }
 0x25b   :  { %v4014_v9 = vadd.f32 %v6493_v2, %v4013_v7  ;;  %v369_v7 = vld [vmem:[#allocation5 + $0x9c8] sm:$0xff] }
 0x25c   :  { %1217 = vmatpush2.xpose.msra.mxu0 %v328_v62  ;;  %1288 = vmatpush2.xpose.msra.mxu1 %v353_v52 }
 0x25d   :  { %1218 = vmatprep.subr.mxu0 %v7070_v0  ;;  %1289 = vmatprep.subr.mxu1 %v7070_v0 }
 0x25e   :  { %4015 = vadd.xlane.f32.xlu0 %v4014_v9 }
 0x260   :  { %1219 = vmatpush2.xpose.msra.mxu0 %v327_v5  ;;  %1290 = vmatpush2.xpose.msra.mxu1 %v352_v8 }
 0x261   :  { %1220 = vmatprep.subr.mxu0 %v7070_v0  ;;  %1291 = vmatprep.subr.mxu1 %v7070_v0 }
 0x264   :  { %1221 = vmatpush2.xpose.msra.mxu0 %v326_v10  ;;  %1292 = vmatpush2.xpose.msra.mxu1 %v351_v11  ;;  %v394_v11 = vld [vmem:[#allocation5 + $0xa90] sm:$0xff] }
 0x265   :  { %1222 = vmatprep.subr.mxu0 %v7070_v0  ;;  %1293 = vmatprep.subr.mxu1 %v7070_v0 }
 0x268   :  { %1223 = vmatpush2.xpose.msra.mxu0 %v325_v12  ;;  %1294 = vmatpush2.xpose.msra.mxu1 %v350_v50 }
 0x269   :  { %1224 = vmatprep.subr.mxu0 %v7070_v0  ;;  %1295 = vmatprep.subr.mxu1 %v7070_v0 }
 0x26c   :  { %1225 = vmatpush2.xpose.msra.mxu0 %v324_v13  ;;  %1296 = vmatpush2.xpose.msra.mxu1 %v349_v14  ;;  %v368_v13 = vld [vmem:[#allocation5 + $0x9c0] sm:$0xff] }
 0x26d   :  { %1226 = vmatprep.subr.mxu0 %v7070_v0  ;;  %1297 = vmatprep.subr.mxu1 %v7070_v0 }
 0x26e   :  { %v7646_v16 = vpop.f32.mrf.mxu0 }
 0x26f   :  { %v7649_v18 = vpop.f32.mrf.mxu1  ;;  %v5886_v19 = vadd.f32 0.9, %v7646_v16  ;;  %v5918_v20 = vadd.f32 0.7, %v7646_v16  ;;  %v5950_v57 = vadd.f32 0.5, %v7646_v16 }
 0x270   :  { %9514 = vst [vmem:[#allocation11_spill] sm:$0xff] %v7649_v18  ;;  %1227 = vmatpush2.xpose.msra.mxu0 %v323_v15  ;;  %v7653_v47 = vpop.f32.mrf.mxu0  ;;  %v5888_v21 = vadd.f32 0.9, %v7649_v18  ;;  %v5920_v22 = vadd.f32 0.7, %v7649_v18  ;;  %1298 = vmatpush2.xpose.msra.mxu1 %v348_v17  ;;  %v5952_v44 = vadd.f32 0.5, %v7649_v18 }
 0x271   :  { %v7657_v23 = vpop.f32.mrf.mxu1  ;;  %1228 = vmatprep.subr.mxu0 %v7070_v0  ;;  %v5887_v6 = vadd.f32 0.9, %v7653_v47  ;;  %v1636_v25 = vmul.f32 %v5886_v19, %v5886_v19  ;;  %v5919_v26 = vadd.f32 0.7, %v7653_v47  ;;  %1299 = vmatprep.subr.mxu1 %v7070_v0  ;;  %v1861_v33 = vmul.f32 %v5918_v20, %v5918_v20 }
 0x272   :  { %9515 = vst [vmem:[#allocation12_spill] sm:$0xff] %v7657_v23  ;;  %v5889_v30 = vadd.f32 0.9, %v7657_v23  ;;  %v1638_v31 = vmul.f32 %v5888_v21, %v5888_v21  ;;  %v5921_v32 = vadd.f32 0.7, %v7657_v23  ;;  %v1863_v39 = vmul.f32 %v5920_v22, %v5920_v22 }
 0x273   :  { %v1637_v37 = vmul.f32 %v5887_v6, %v5887_v6  ;;  %v1668_v38 = vmul.f32 -50.0, %v1636_v25  ;;  %v1862_v49 = vmul.f32 %v5919_v26, %v5919_v26  ;;  %v1893_v56 = vmul.f32 -50.0, %v1861_v33 }
 0x274   :  { %1229 = vmatpush2.xpose.msra.mxu0 %v322_v24  ;;  %v1639_v41 = vmul.f32 %v5889_v30, %v5889_v30  ;;  %v1670_v42 = vmul.f32 -50.0, %v1638_v31  ;;  %v1864_v43 = vmul.f32 %v5921_v32, %v5921_v32  ;;  %1300 = vmatpush2.xpose.msra.mxu1 %v347_v29  ;;  %v1895_v48 = vmul.f32 -50.0, %v1863_v39  ;;  %v393_v29 = vld [vmem:[#allocation5 + $0xa88] sm:$0xff] }
 0x275   :  { %1308 = vmatprep.subr.mxu0 %v7070_v0  ;;  %v1669_v46 = vmul.f32 -50.0, %v1637_v37  ;;  %v1712_v35 = vmul.f32 1.442695, %v1668_v38  ;;  %1379 = vmatprep.subr.mxu1 %v7070_v0  ;;  %v1894_v62 = vmul.f32 -50.0, %v1862_v49  ;;  %v1937_v27 = vmul.f32 1.442695, %v1893_v56 }
 0x276   :  { %v1671_v53 = vmul.f32 -50.0, %v1639_v41  ;;  %v1716_v54 = vmul.f32 1.442695, %v1670_v42  ;;  %v1896_v55 = vmul.f32 -50.0, %v1864_v43  ;;  %v1941_v59 = vmul.f32 1.442695, %v1895_v48 }
 0x277   :  { %1231 = vmatmul.mubr.f32.vlgmr.msra.gmra.mxu0 %v50_v40  ;;  %6496 = vpow2.f32 %v1712_v35  ;;  %v1714_v45 = vmul.f32 1.442695, %v1669_v46  ;;  %1302 = vmatmul.mubr.f32.vlgmr.msra.gmra.mxu1 %v51_v28  ;;  %v5953_v52 = vadd.f32 0.5, %v7657_v23  ;;  %v2087_v63 = vmul.f32 %v5952_v44, %v5952_v44  ;;  %v367_v42 = vld [vmem:[#allocation5 + $0x9b8] sm:$0xff] }
 0x278   :  { %1309 = vmatpush1.xpose.msra.mxu0 %v371_v36  ;;  %6498 = vpow2.f32 %v1716_v54  ;;  %v1718_v58 = vmul.f32 1.442695, %v1671_v53  ;;  %v1943_v60 = vmul.f32 1.442695, %v1896_v55  ;;  %1380 = vmatpush1.xpose.msra.mxu1 %v396_v34  ;;  %v1939_v51 = vmul.f32 1.442695, %v1894_v62 }
 0x279   :  { %1310 = vmatprep.subr.mxu0 %v7070_v0  ;;  %6500 = vpow2.f32 %v1714_v45  ;;  %1381 = vmatprep.subr.mxu1 %v7070_v0  ;;  %v5951_v2 = vadd.f32 0.5, %v7653_v47  ;;  %v2088_v3 = vmul.f32 %v5953_v52, %v5953_v52  ;;  %v2119_v4 = vmul.f32 -50.0, %v2087_v63  ;;  %v392_v36 = vld [vmem:[#allocation5 + $0xa80] sm:$0xff] }
 0x27a   :  { %6502 = vpow2.f32 %v1718_v58  ;;  %1372 = vmatprep.mubr.f32.mxu0 %v7070_v0  ;;  %1443 = vmatprep.mubr.f32.mxu1 %v7070_v0  ;;  %v2085_v5 = vmul.f32 %v5950_v57, %v5950_v57  ;;  %v5984_v9 = vadd.f32 0.3, %v7649_v18  ;;  %v5985_v10 = vadd.f32 0.3, %v7657_v23 }
 0x27b   :  { %6504 = vpow2.f32 %v1941_v59  ;;  %v2086_v8 = vmul.f32 %v5951_v2, %v5951_v2  ;;  %v2120_v12 = vmul.f32 -50.0, %v2088_v3  ;;  %v2165_v50 = vmul.f32 1.442695, %v2119_v4  ;;  %v366_v59 = vld [vmem:[#allocation5 + $0x9b0] sm:$0xff] }
 0x27c   :  { %1311 = vmatpush1.xpose.msra.mxu0 %v370_v61  ;;  %6506 = vpow2.f32 %v1943_v60  ;;  %1382 = vmatpush1.xpose.msra.mxu1 %v395_v1  ;;  %v2117_v14 = vmul.f32 -50.0, %v2085_v5  ;;  %v2311_v17 = vmul.f32 %v5984_v9, %v5984_v9  ;;  %v2312_v19 = vmul.f32 %v5985_v10, %v5985_v10 }
 0x27d   :  { %1312 = vmatprep.subr.mxu0 %v7070_v0  ;;  %6508 = vpow2.f32 %v1937_v27  ;;  %1383 = vmatprep.subr.mxu1 %v7070_v0  ;;  %v2118_v15 = vmul.f32 -50.0, %v2086_v8  ;;  %v2167_v20 = vmul.f32 1.442695, %v2120_v12  ;;  %v5982_v21 = vadd.f32 0.3, %v7646_v16  ;;  %v391_v27 = vld [vmem:[#allocation5 + $0xa78] sm:$0xff] }
 0x27e   :  { %6510 = vpow2.f32 %v1939_v51  ;;  %v5983_v22 = vadd.f32 0.3, %v7653_v47  ;;  %v2161_v24 = vmul.f32 1.442695, %v2117_v14  ;;  %v2343_v25 = vmul.f32 -50.0, %v2311_v17 }
 0x27f   :  { %6512 = vpow2.f32 %v2165_v50  ;;  %v2163_v6 = vmul.f32 1.442695, %v2118_v15  ;;  %v2344_v26 = vmul.f32 -50.0, %v2312_v19  ;;  %v2309_v30 = vmul.f32 %v5982_v21, %v5982_v21  ;;  %v365_v50 = vld [vmem:[#allocation5 + $0x9a8] sm:$0xff] }
 0x280   :  { %1313 = vmatpush1.xpose.msra.mxu0 %v369_v7  ;;  %1384 = vmatpush1.xpose.msra.mxu1 %v394_v11  ;;  %6514 = vpow2.f32 %v2167_v20  ;;  %v2310_v31 = vmul.f32 %v5983_v22, %v5983_v22  ;;  %v2389_v32 = vmul.f32 1.442695, %v2343_v25  ;;  %v6016_v37 = vadd.f32 0.1, %v7649_v18 }
 0x281   :  { %1314 = vmatprep.subr.mxu0 %v7070_v0  ;;  %1385 = vmatprep.subr.mxu1 %v7070_v0  ;;  %6516 = vpow2.f32 %v2161_v24  ;;  %v2391_v33 = vmul.f32 1.442695, %v2344_v26  ;;  %v2341_v39 = vmul.f32 -50.0, %v2309_v30  ;;  %v6017_v43 = vadd.f32 0.1, %v7657_v23 }
 0x282   :  { %6518 = vpow2.f32 %v2163_v6  ;;  %v2342_v40 = vmul.f32 -50.0, %v2310_v31  ;;  %v2535_v44 = vmul.f32 %v6016_v37, %v6016_v37  ;;  %v6014_v54 = vadd.f32 0.1, %v7646_v16 }
 0x283   :  { %6520 = vpow2.f32 %v2389_v32  ;;  %v2385_v46 = vmul.f32 1.442695, %v2341_v39  ;;  %v2536_v34 = vmul.f32 %v6017_v43, %v6017_v43  ;;  %v7692_v61 = vadd.f32 -0.5, %v7649_v18 }
 0x284   :  { %v6497_v38 = vpop.eup %6496  ;;  %1315 = vmatpush1.xpose.msra.mxu0 %v368_v13  ;;  %1386 = vmatpush1.xpose.msra.mxu1 %v393_v29  ;;  %6522 = vpow2.f32 %v2391_v33  ;;  %v2387_v35 = vmul.f32 1.442695, %v2342_v40  ;;  %v2567_v53 = vmul.f32 -50.0, %v2535_v44  ;;  %v6015_v63 = vadd.f32 0.1, %v7653_v47  ;;  %v390_v13 = vld [vmem:[#allocation5 + $0xa70] sm:$0xff] }
 0x285   :  { %v6499_v41 = vpop.eup %6498  ;;  %1316 = vmatprep.subr.mxu0 %v7070_v0  ;;  %1387 = vmatprep.subr.mxu1 %v7070_v0  ;;  %6524 = vpow2.f32 %v2385_v46  ;;  %v2568_v60 = vmul.f32 -50.0, %v2536_v34  ;;  %v2533_v51 = vmul.f32 %v6014_v54, %v6014_v54  ;;  %v6048_v5 = vadd.f32 -0.1, %v7649_v18  ;;  %v389_v44 = vld [vmem:[#allocation5 + $0xa68] sm:$0xff] }
 0x286   :  { %v6501_v28 = vpop.eup %6500  ;;  %6526 = vpow2.f32 %v2387_v35  ;;  %v2613_v52 = vmul.f32 1.442695, %v2567_v53  ;;  %v6049_v7 = vadd.f32 -0.1, %v7657_v23  ;;  %v2534_v9 = vmul.f32 %v6015_v63, %v6015_v63 }
 0x287   :  { %v6503_v48 = vpop.eup %6502  ;;  %v1777_v49 = vsel %vm1752_vm0, %v6501_v28, 0.0  ;;  %v2615_v4 = vmul.f32 1.442695, %v2568_v60  ;;  %v2565_v10 = vmul.f32 -50.0, %v2533_v51  ;;  %v2759_v14 = vmul.f32 %v6048_v5, %v6048_v5 }
 0x288   :  { %v6505_v55 = vpop.eup %6504  ;;  %1317 = vmatpush1.xpose.msra.mxu0 %v367_v42  ;;  %v1781_v56 = vsel %vm1752_vm0, %v6503_v48, 0.0  ;;  %v1778_v45 = vadd.f32 %v6497_v38, %v1777_v49  ;;  %1388 = vmatpush1.xpose.msra.mxu1 %v392_v36  ;;  %6528 = vpow2.f32 %v2613_v52  ;;  %v2760_v15 = vmul.f32 %v6049_v7, %v6049_v7  ;;  %v364_v38 = vld [vmem:[#allocation5 + $0x9a0] sm:$0xff] }
 0x289   :  { %v6507_v57 = vpop.eup %6506  ;;  %1318 = vmatprep.subr.mxu0 %v7070_v0  ;;  %v1782_v58 = vadd.f32 %v6499_v41, %v1781_v56  ;;  %1389 = vmatprep.subr.mxu1 %v7070_v0  ;;  %6530 = vpow2.f32 %v2615_v4  ;;  %v2566_v17 = vmul.f32 -50.0, %v2534_v9  ;;  %v2609_v19 = vmul.f32 1.442695, %v2565_v10  ;;  %v362_v9 = vld [vmem:[#allocation5 + $0x990] sm:$0xff] }
 0x28a   :  { %v6509_v62 = vpop.eup %6508  ;;  %1779 = vadd.xlane.f32.xlu0 %v1778_v45  ;;  %v2005_v1 = vsel %vm1752_vm0, %v6507_v57, 0.0  ;;  %v6046_v20 = vadd.f32 -0.1, %v7646_v16  ;;  %v7704_v21 = vadd.f32 -0.5, %v7657_v23  ;;  %v2791_v24 = vmul.f32 -50.0, %v2759_v14  ;;  %v363_v45 = vld [vmem:[#allocation5 + $0x998] sm:$0xff] }
 0x28b   :  { %v6511_v2 = vpop.eup %6510  ;;  %1783 = vadd.xlane.f32.xlu1 %v1782_v58  ;;  %v2006_v3 = vadd.f32 %v6505_v55, %v2005_v1  ;;  %v2792_v6 = vmul.f32 -50.0, %v2760_v15  ;;  %v6047_v25 = vadd.f32 -0.1, %v7653_v47  ;;  %v6080_v26 = vadd.f32 -0.3, %v7649_v18 }
 0x28c   :  { %1319 = vmatpush1.xpose.msra.mxu0 %v366_v59  ;;  %v2001_v8 = vsel %vm1752_vm0, %v6511_v2, 0.0  ;;  %v6513_v11 = vpop.eup %6512  ;;  %1390 = vmatpush1.xpose.msra.mxu1 %v391_v27  ;;  %6532 = vpow2.f32 %v2609_v19  ;;  %v2611_v31 = vmul.f32 1.442695, %v2566_v17  ;;  %v2757_v32 = vmul.f32 %v6046_v20, %v6046_v20 }
 0x28d   :  { %1320 = vmatprep.subr.mxu0 %v7070_v0  ;;  %v2002_v12 = vadd.f32 %v6509_v62, %v2001_v8  ;;  %1391 = vmatprep.subr.mxu1 %v7070_v0  ;;  %v6515_v22 = vpop.eup %6514  ;;  %v2837_v39 = vmul.f32 1.442695, %v2791_v24  ;;  %v2839_v40 = vmul.f32 1.442695, %v2792_v6  ;;  %v2758_v41 = vmul.f32 %v6047_v25, %v6047_v25  ;;  %v388_v62 = vld [vmem:[#allocation5 + $0xa60] sm:$0xff] }
 0x28e   :  { %v6517_v29 = vpop.eup %6516  ;;  %v2229_v30 = vsel %vm1752_vm0, %v6515_v22, 0.0  ;;  %6534 = vpow2.f32 %v2611_v31  ;;  %v2789_v28 = vmul.f32 -50.0, %v2757_v32  ;;  %v6081_v36 = vadd.f32 -0.3, %v7657_v23 }
 0x28f   :  { %2007 = vadd.xlane.f32.xlu1 %v2006_v3  ;;  %2003 = vadd.xlane.f32.xlu0 %v2002_v12  ;;  %v6519_v33 = vpop.eup %6518  ;;  %v2230_v37 = vadd.f32 %v6513_v11, %v2229_v30  ;;  %6536 = vpow2.f32 %v2837_v39  ;;  %v2790_v48 = vmul.f32 -50.0, %v2758_v41  ;;  %v2983_v49 = vmul.f32 %v6080_v26, %v6080_v26 }
 0x290   :  { %1321 = vmatpush1.xpose.msra.mxu0 %v365_v50  ;;  %1392 = vmatpush1.xpose.msra.mxu1 %v390_v13  ;;  %v6521_v42 = vpop.eup %6520  ;;  %v2225_v43 = vsel %vm1752_vm0, %v6519_v33, 0.0  ;;  %6538 = vpow2.f32 %v2839_v40  ;;  %v2833_v53 = vmul.f32 1.442695, %v2789_v28  ;;  %v2984_v54 = vmul.f32 %v6081_v36, %v6081_v36  ;;  %v387_v50 = vld [vmem:[#allocation5 + $0xa58] sm:$0xff]  ;;  %v386_v33 = vld [vmem:[#allocation5 + $0xa50] sm:$0xff] }
 0x291   :  { %1322 = vmatprep.subr.mxu0 %v7070_v0  ;;  %1393 = vmatprep.subr.mxu1 %v7070_v0  ;;  %v6523_v46 = vpop.eup %6522  ;;  %v2226_v35 = vadd.f32 %v6517_v29, %v2225_v43  ;;  %v2835_v57 = vmul.f32 1.442695, %v2790_v48  ;;  %v3015_v58 = vmul.f32 -50.0, %v2983_v49  ;;  %v6078_v59 = vadd.f32 -0.3, %v7646_v16  ;;  %v361_v29 = vld [vmem:[#allocation5 + $0x988] sm:$0xff] }
 0x292   :  { %v2453_v34 = vsel %vm1752_vm0, %v6523_v46, 0.0  ;;  %v6525_v55 = vpop.eup %6524  ;;  %6540 = vpow2.f32 %v2833_v53  ;;  %v3016_v27 = vmul.f32 -50.0, %v2984_v54  ;;  %v6079_v1 = vadd.f32 -0.3, %v7653_v47  ;;  %v360_v49 = vld [vmem:[#allocation5 + $0x980] sm:$0xff] }
 0x293   :  { %2231 = vadd.xlane.f32.xlu1 %v2230_v37  ;;  %2227 = vadd.xlane.f32.xlu0 %v2226_v35  ;;  %v2454_v56 = vadd.f32 %v6521_v42, %v2453_v34  ;;  %v6527_v60 = vpop.eup %6526  ;;  %v3207_v52 = vmul.f32 %v7692_v61, %v7692_v61  ;;  %6542 = vpow2.f32 %v2835_v57  ;;  %v3061_v51 = vmul.f32 1.442695, %v3015_v58 }
 0x294   :  { %1323 = vmatpush1.xpose.msra.mxu0 %v364_v38  ;;  %1394 = vmatpush1.xpose.msra.mxu1 %v389_v44  ;;  %v2449_v63 = vsel %vm1752_vm0, %v6527_v60, 0.0  ;;  %v2981_v2 = vmul.f32 %v6078_v59, %v6078_v59  ;;  %v3063_v4 = vmul.f32 1.442695, %v3016_v27  ;;  %v2982_v5 = vmul.f32 %v6079_v1, %v6079_v1 }
 0x295   :  { %1324 = vmatprep.subr.mxu0 %v7070_v0  ;;  %1395 = vmatprep.subr.mxu1 %v7070_v0  ;;  %v2450_v3 = vadd.f32 %v6525_v55, %v2449_v63  ;;  %v3208_v7 = vmul.f32 %v7704_v21, %v7704_v21  ;;  %v6529_v8 = vpop.eup %6528  ;;  %6544 = vpow2.f32 %v3061_v51  ;;  %v3239_v10 = vmul.f32 -50.0, %v3207_v52  ;;  %v385_v55 = vld [vmem:[#allocation5 + $0xa48] sm:$0xff] }
 0x296   :  { %v3013_v61 = vmul.f32 -50.0, %v2981_v2  ;;  %v6110_v11 = vadd.f32 -0.5, %v7646_v16  ;;  %v6531_v12 = vpop.eup %6530  ;;  %6546 = vpow2.f32 %v3063_v4  ;;  %v3014_v13 = vmul.f32 -50.0, %v2982_v5 }
 0x297   :  { %2455 = vadd.xlane.f32.xlu1 %v2454_v56  ;;  %2451 = vadd.xlane.f32.xlu0 %v2450_v3  ;;  %v3240_v14 = vmul.f32 -50.0, %v3208_v7  ;;  %v6111_v15 = vadd.f32 -0.5, %v7653_v47  ;;  %v2677_v17 = vsel %vm1752_vm0, %v6531_v12, 0.0  ;;  %v3285_v20 = vmul.f32 1.442695, %v3239_v10  ;;  %v359_v3 = vld [vmem:[#allocation5 + $0x978] sm:$0xff] }
 0x298   :  { %1325 = vmatpush1.xpose.msra.mxu0 %v363_v45  ;;  %1396 = vmatpush1.xpose.msra.mxu1 %v388_v62  ;;  %v3057_v19 = vmul.f32 1.442695, %v3013_v61  ;;  %v3205_v21 = vmul.f32 %v6110_v11, %v6110_v11  ;;  %v2678_v22 = vadd.f32 %v6529_v8, %v2677_v17  ;;  %v3059_v24 = vmul.f32 1.442695, %v3014_v13 }
 0x299   :  { %1326 = vmatprep.subr.mxu0 %v7070_v0  ;;  %1397 = vmatprep.subr.mxu1 %v7070_v0  ;;  %v3287_v6 = vmul.f32 1.442695, %v3240_v14  ;;  %v3206_v25 = vmul.f32 %v6111_v15, %v6111_v15  ;;  %v6533_v26 = vpop.eup %6532  ;;  %v6144_v31 = vadd.f32 -0.7, %v7649_v18  ;;  %v6145_v32 = vadd.f32 -0.7, %v7657_v23 }
 0x29a   :  { %6548 = vpow2.f32 %v3057_v19  ;;  %v3237_v30 = vmul.f32 -50.0, %v3205_v21  ;;  %v6142_v38 = vadd.f32 -0.7, %v7646_v16  ;;  %v6143_v39 = vadd.f32 -0.7, %v7653_v47  ;;  %v358_v19 = vld [vmem:[#allocation5 + $0x970] sm:$0xff] }
 0x29b   :  { %2679 = vadd.xlane.f32.xlu1 %v2678_v22  ;;  %6550 = vpow2.f32 %v3059_v24  ;;  %v3238_v37 = vmul.f32 -50.0, %v3206_v25  ;;  %v6535_v40 = vpop.eup %6534  ;;  %v3431_v42 = vmul.f32 %v6144_v31, %v6144_v31  ;;  %v3432_v43 = vmul.f32 %v6145_v32, %v6145_v32 }
 0x29c   :  { %1327 = vmatpush1.xpose.msra.mxu0 %v362_v9  ;;  %1398 = vmatpush1.xpose.msra.mxu1 %v387_v50  ;;  %6552 = vpow2.f32 %v3285_v20  ;;  %v3281_v41 = vmul.f32 1.442695, %v3237_v30  ;;  %v6537_v44 = vpop.eup %6536  ;;  %v2673_v28 = vsel %vm1752_vm0, %v6535_v40, 0.0  ;;  %v3429_v46 = vmul.f32 %v6142_v38, %v6142_v38  ;;  %v384_v9 = vld [vmem:[#allocation5 + $0xa40] sm:$0xff] }
 0x29d   :  { %1328 = vmatprep.subr.mxu0 %v7070_v0  ;;  %1399 = vmatprep.subr.mxu1 %v7070_v0  ;;  %6554 = vpow2.f32 %v3287_v6  ;;  %v3283_v36 = vmul.f32 1.442695, %v3238_v37  ;;  %v6539_v35 = vpop.eup %6538  ;;  %v2674_v48 = vadd.f32 %v6533_v26, %v2673_v28  ;;  %v3463_v34 = vmul.f32 -50.0, %v3431_v42  ;;  %v383_v6 = vld [vmem:[#allocation5 + $0xa38] sm:$0xff]  ;;  %v357_v42 = vld [vmem:[#allocation5 + $0x968] sm:$0xff]  ;;  %v382_v28 = vld [vmem:[#allocation5 + $0xa30] sm:$0xff] }
 0x29e   :  { %6556 = vpow2.f32 %v3281_v41  ;;  %v3464_v53 = vmul.f32 -50.0, %v3432_v43  ;;  %v2901_v54 = vsel %vm1752_vm0, %v6539_v35, 0.0  ;;  %v3430_v56 = vmul.f32 %v6143_v39, %v6143_v39 }
 0x29f   :  { %6558 = vpow2.f32 %v3283_v36  ;;  %v3461_v45 = vmul.f32 -50.0, %v3429_v46  ;;  %v6541_v57 = vpop.eup %6540  ;;  %2675 = vadd.xlane.f32.xlu0 %v2674_v48  ;;  %v2902_v58 = vadd.f32 %v6537_v44, %v2901_v54  ;;  %v3509_v59 = vmul.f32 1.442695, %v3463_v34 }
 0x2a0   :  { %1329 = vmatpush1.xpose.msra.mxu0 %v361_v29  ;;  %1400 = vmatpush1.xpose.msra.mxu1 %v386_v33  ;;  %v3511_v60 = vmul.f32 1.442695, %v3464_v53  ;;  %v6176_v62 = vadd.f32 -0.9, %v7649_v18  ;;  %v6543_v27 = vpop.eup %6542  ;;  %v3462_v1 = vmul.f32 -50.0, %v3430_v56  ;;  %v6206_v51 = vadd.f32 -1.0, %v7646_v16 }
 0x2a1   :  { %1330 = vmatprep.subr.mxu0 %v7070_v0  ;;  %1401 = vmatprep.subr.mxu1 %v7070_v0  ;;  %v3505_v52 = vmul.f32 1.442695, %v3461_v45  ;;  %v6177_v63 = vadd.f32 -0.9, %v7657_v23  ;;  %v2897_v2 = vsel %vm1752_vm0, %v6543_v27, 0.0  ;;  %6560 = vpow2.f32 %v3509_v59  ;;  %v356_v53 = vld [vmem:[#allocation5 + $0x960] sm:$0xff] }
 0x2a2   :  { %2903 = vadd.xlane.f32.xlu1 %v2902_v58  ;;  %v3655_v4 = vmul.f32 %v6176_v62, %v6176_v62  ;;  %v6174_v5 = vadd.f32 -0.9, %v7646_v16  ;;  %v6545_v7 = vpop.eup %6544  ;;  %v2898_v8 = vadd.f32 %v6541_v57, %v2897_v2  ;;  %6562 = vpow2.f32 %v3511_v60  ;;  %v380_v60 = vld [vmem:[#allocation5 + $0xa20] sm:$0xff]  ;;  %v405_v27 = vld [vmem:[#allocation5 + $0xae8] sm:$0xff] }
 0x2a3   :  { %v3507_v61 = vmul.f32 1.442695, %v3462_v1  ;;  %v3656_v10 = vmul.f32 %v6177_v63, %v6177_v63  ;;  %v6547_v11 = vpop.eup %6546  ;;  %6564 = vpow2.f32 %v3505_v52  ;;  %v6175_v50 = vadd.f32 -0.9, %v7653_v47 }
 0x2a4   :  { %1331 = vmatpush1.xpose.msra.mxu0 %v360_v49  ;;  %1402 = vmatpush1.xpose.msra.mxu1 %v385_v55  ;;  %v3687_v12 = vmul.f32 -50.0, %v3655_v4  ;;  %v3653_v13 = vmul.f32 %v6174_v5, %v6174_v5  ;;  %v3125_v14 = vsel %vm1752_vm0, %v6547_v11, 0.0  ;;  %v6207_v15 = vadd.f32 -1.0, %v7653_v47  ;;  %v381_v55 = vld [vmem:[#allocation5 + $0xa28] sm:$0xff]  ;;  %v403_v11 = vld [vmem:[#allocation5 + $0xad8] sm:$0xff] }
 0x2a5   :  { %1332 = vmatprep.subr.mxu0 %v7070_v0  ;;  %1403 = vmatprep.subr.mxu1 %v7070_v0  ;;  %6566 = vpow2.f32 %v3507_v61  ;;  %v3688_v16 = vmul.f32 -50.0, %v3656_v10  ;;  %v3126_v17 = vadd.f32 %v6545_v7, %v3125_v14  ;;  %v3654_v21 = vmul.f32 %v6175_v50, %v6175_v50  ;;  %v7768_v14 = vpop.xlane.xlu1 %1983 }
 0x2a6   :  { %2899 = vadd.xlane.f32.xlu0 %v2898_v8  ;;  %v3733_v20 = vmul.f32 1.442695, %v3687_v12  ;;  %v3685_v22 = vmul.f32 -50.0, %v3653_v13  ;;  %v3877_v26 = vmul.f32 %v6206_v51, %v6206_v51  ;;  %v3878_v29 = vmul.f32 %v6207_v15, %v6207_v15  ;;  %v379_v51 = vld [vmem:[#allocation5 + $0xa18] sm:$0xff]  ;;  %v402_v15 = vld [vmem:[#allocation5 + $0xad0] sm:$0xff] }
 0x2a7   :  { %v6549_v24 = vpop.eup %6548  ;;  %v3735_v25 = vmul.f32 1.442695, %v3688_v16  ;;  %3127 = vadd.xlane.f32.xlu1 %v3126_v17  ;;  %v3686_v31 = vmul.f32 -50.0, %v3654_v21  ;;  %v377_v16 = vld [vmem:[#allocation5 + $0xa08] sm:$0xff]  ;;  %v376_v17 = vld [vmem:[#allocation5 + $0xa00] sm:$0xff]  ;;  %v7776_v21 = vpop.xlane.xlu0 %1755 }
 0x2a8   :  { %1333 = vmatpush1.xpose.msra.mxu0 %v359_v3  ;;  %1404 = vmatpush1.xpose.msra.mxu1 %v384_v9  ;;  %v6551_v30 = vpop.eup %6550  ;;  %6568 = vpow2.f32 %v3733_v20  ;;  %v3729_v47 = vmul.f32 1.442695, %v3685_v22  ;;  %v3909_v37 = vmul.f32 -500000.0, %v3877_v26  ;;  %v3910_v38 = vmul.f32 -500000.0, %v3878_v29 }
 0x2a9   :  { %1334 = vmatprep.subr.mxu0 %v7070_v0  ;;  %1405 = vmatprep.subr.mxu1 %v7070_v0  ;;  %v6553_v32 = vpop.eup %6552  ;;  %v3121_v33 = vsel %vm1752_vm0, %v6551_v30, 0.0  ;;  %6570 = vpow2.f32 %v3735_v25  ;;  %v3731_v41 = vmul.f32 1.442695, %v3686_v31  ;;  %v404_v3 = vld [vmem:[#allocation5 + $0xae0] sm:$0xff]  ;;  %v378_v9 = vld [vmem:[#allocation5 + $0xa10] sm:$0xff]  ;;  %v7774_v20 = vpop.xlane.xlu1 %2207  ;;  %v375_v22 = vld [vmem:[#allocation5 + $0x9f8] sm:$0xff] }
 0x2aa   :  { %v6555_v39 = vpop.eup %6554  ;;  %v3122_v40 = vadd.f32 %v6549_v24, %v3121_v33  ;;  %v3953_v36 = vmul.f32 1.442695, %v3909_v37  ;;  %v3955_v46 = vmul.f32 1.442695, %v3910_v38  ;;  %v400_v24 = vld [vmem:[#allocation5 + $0xac0] sm:$0xff]  ;;  %v374_v25 = vld [vmem:[#allocation5 + $0x9f0] sm:$0xff] }
 0x2ab   :  { %v6557_v43 = vpop.eup %6556  ;;  %v3349_v44 = vsel %vm1752_vm0, %v6555_v39, 0.0  ;;  %6572 = vpow2.f32 %v3731_v41  ;;  %v399_v26 = vld [vmem:[#allocation5 + $0xab8] sm:$0xff]  ;;  %v7784_v29 = vpop.xlane.xlu0 %1759  ;;  %v373_v30 = vld [vmem:[#allocation5 + $0x9e8] sm:$0xff] }
 0x2ac   :  { %1335 = vmatpush1.xpose.msra.mxu0 %v358_v19  ;;  %1406 = vmatpush1.xpose.msra.mxu1 %v383_v6  ;;  %v6559_v35 = vpop.eup %6558  ;;  %v3350_v48 = vadd.f32 %v6553_v32, %v3349_v44  ;;  %6574 = vpow2.f32 %v3729_v47  ;;  %v401_v19 = vld [vmem:[#allocation5 + $0xac8] sm:$0xff]  ;;  %v398_v47 = vld [vmem:[#allocation5 + $0xab0] sm:$0xff] }
 0x2ad   :  { %1336 = vmatprep.subr.mxu0 %v7070_v0  ;;  %1407 = vmatprep.subr.mxu1 %v7070_v0  ;;  %v3345_v49 = vsel %vm1752_vm0, %v6559_v35, 0.0  ;;  %6576 = vpow2.f32 %v3955_v46  ;;  %v7780_v6 = vpop.xlane.xlu1 %2431 }
 0x2ae   :  { %3123 = vadd.xlane.f32.xlu0 %v3122_v40  ;;  %3351 = vadd.xlane.f32.xlu1 %v3350_v48  ;;  %v3346_v34 = vadd.f32 %v6557_v43, %v3345_v49  ;;  %v6561_v54 = vpop.eup %6560  ;;  %6578 = vpow2.f32 %v3953_v36  ;;  %v372_v43 = vld [vmem:[#allocation5 + $0x9e0] sm:$0xff]  ;;  %v397_v36 = vld [vmem:[#allocation5 + $0xaa8] sm:$0xff] }
 0x2af   :  { %v6563_v56 = vpop.eup %6562  ;;  %v7799_v41 = vpop.xlane.xlu0 %1979 }
 0x2b0   :  { %1337 = vmatpush1.xpose.msra.mxu0 %v357_v42  ;;  %1408 = vmatpush1.xpose.msra.mxu1 %v382_v28  ;;  %v6565_v45 = vpop.eup %6564  ;;  %v3573_v57 = vsel %vm1752_vm0, %v6563_v56, 0.0  ;;  %v53_v56 = vld [vmem:[#allocation2 + $0x68] sm:$0xff] }
 0x2b1   :  { %1338 = vmatprep.subr.mxu0 %v7070_v0  ;;  %1409 = vmatprep.subr.mxu1 %v7070_v0  ;;  %v3574_v59 = vadd.f32 %v6561_v54, %v3573_v57  ;;  %v7790_v32 = vpop.xlane.xlu1 %2655 }
 0x2b2   :  { %3347 = vadd.xlane.f32.xlu0 %v3346_v34  ;;  %v6567_v58 = vpop.eup %6566 }
 0x2b3   :  { %v3569_v62 = vsel %vm1752_vm0, %v6567_v58, 0.0  ;;  %3575 = vadd.xlane.f32.xlu1 %v3574_v59 }
 0x2b4   :  { %1339 = vmatpush1.xpose.msra.mxu0 %v356_v53  ;;  %1410 = vmatpush1.xpose.msra.mxu1 %v381_v55  ;;  %v3570_v1 = vadd.f32 %v6565_v45, %v3569_v62  ;;  %v52_v55 = vld [vmem:[#allocation2 + $0x60] sm:$0xff]  ;;  %v421_v62 = vld [vmem:[#allocation5 + $0xb68] sm:$0xff] }
 0x2b5   :  { %1354 = vmatprep.subr.mxu0 %v7070_v0  ;;  %1425 = vmatprep.subr.mxu1 %v7070_v0  ;;  %v6569_v52 = vpop.eup %6568 }
 0x2b6   :  { %v6571_v63 = vpop.eup %6570  ;;  %3571 = vadd.xlane.f32.xlu0 %v3570_v1 }
 0x2b7   :  { %v3797_v2 = vsel %vm1752_vm0, %v6571_v63, 0.0  ;;  %v446_v63 = vld [vmem:[#allocation5 + $0xc30] sm:$0xff] }
 0x2b8   :  { %1355 = vmatpush2.xpose.msra.mxu0 %v380_v60  ;;  %1426 = vmatpush2.xpose.msra.mxu1 %v405_v27  ;;  %v3798_v4 = vadd.f32 %v6569_v52, %v3797_v2  ;;  %v6573_v5 = vpop.eup %6572  ;;  %v7809_v60 = vpop.xlane.xlu1 %2879 }
 0x2b9   :  { %1356 = vmatprep.subr.mxu0 %v7070_v0  ;;  %1427 = vmatprep.subr.mxu1 %v7070_v0  ;;  %v6575_v7 = vpop.eup %6574  ;;  %v3793_v8 = vsel %vm1752_vm0, %v6573_v5, 0.0  ;;  %v7815_v5 = vpop.xlane.xlu0 %2203 }
 0x2ba   :  { %3799 = vadd.xlane.f32.xlu1 %v3798_v4  ;;  %v6577_v61 = vpop.eup %6576  ;;  %v3794_v10 = vadd.f32 %v6575_v7, %v3793_v8 }
 0x2bb   :  { %v6579_v12 = vpop.eup %6578  ;;  %v4017_v50 = vsel %vm1752_vm0, %v6577_v61, 0.0 }
 0x2bc   :  { %1357 = vmatpush2.xpose.msra.mxu0 %v379_v51  ;;  %1428 = vmatpush2.xpose.msra.mxu1 %v404_v3  ;;  %v4018_v13 = vadd.f32 %v6579_v12, %v4017_v50 }
 0x2bd   :  { %1358 = vmatprep.subr.mxu0 %v7070_v0  ;;  %1429 = vmatprep.subr.mxu1 %v7070_v0 }
 0x2be   :  { %3795 = vadd.xlane.f32.xlu0 %v3794_v10  ;;  %4019 = vadd.xlane.f32.xlu1 %v4018_v13  ;;  %v445_v13 = vld [vmem:[#allocation5 + $0xc28] sm:$0xff] }
 0x2c0   :  { %1359 = vmatpush2.xpose.msra.mxu0 %v378_v9  ;;  %1430 = vmatpush2.xpose.msra.mxu1 %v403_v11  ;;  %v420_v11 = vld [vmem:[#allocation5 + $0xb60] sm:$0xff] }
 0x2c1   :  { %1360 = vmatprep.subr.mxu0 %v7070_v0  ;;  %1431 = vmatprep.subr.mxu1 %v7070_v0 }
 0x2c4   :  { %1361 = vmatpush2.xpose.msra.mxu0 %v377_v16  ;;  %1432 = vmatpush2.xpose.msra.mxu1 %v402_v15 }
 0x2c5   :  { %1362 = vmatprep.subr.mxu0 %v7070_v0  ;;  %1433 = vmatprep.subr.mxu1 %v7070_v0 }
 0x2c8   :  { %1363 = vmatpush2.xpose.msra.mxu0 %v376_v17  ;;  %1434 = vmatpush2.xpose.msra.mxu1 %v401_v19  ;;  %v7823_v19 = vpop.xlane.xlu1 %3103 }
 0x2c9   :  { %1364 = vmatprep.subr.mxu0 %v7070_v0  ;;  %1435 = vmatprep.subr.mxu1 %v7070_v0 }
 0x2cc   :  { %1365 = vmatpush2.xpose.msra.mxu0 %v375_v22  ;;  %1436 = vmatpush2.xpose.msra.mxu1 %v400_v24 }
 0x2cd   :  { %1366 = vmatprep.subr.mxu0 %v7070_v0  ;;  %1437 = vmatprep.subr.mxu1 %v7070_v0 }
 0x2d0   :  { %1367 = vmatpush2.xpose.msra.mxu0 %v374_v25  ;;  %1438 = vmatpush2.xpose.msra.mxu1 %v399_v26  ;;  %v419_v25 = vld [vmem:[#allocation5 + $0xb58] sm:$0xff]  ;;  %v444_v26 = vld [vmem:[#allocation5 + $0xc20] sm:$0xff] }
 0x2d1   :  { %1368 = vmatprep.subr.mxu0 %v7070_v0  ;;  %1439 = vmatprep.subr.mxu1 %v7070_v0 }
 0x2d2   :  { %v7787_v31 = vpop.f32.mrf.mxu0 }
 0x2d3   :  { %v7792_v33 = vpop.f32.mrf.mxu1  ;;  %v5890_v37 = vadd.f32 0.9, %v7787_v31  ;;  %v5922_v54 = vadd.f32 0.7, %v7787_v31  ;;  %v5954_v10 = vadd.f32 0.5, %v7787_v31 }
 0x2d4   :  { %1369 = vmatpush2.xpose.msra.mxu0 %v373_v30  ;;  %v7795_v38 = vpop.f32.mrf.mxu0  ;;  %v5892_v39 = vadd.f32 0.9, %v7792_v33  ;;  %v5924_v40 = vadd.f32 0.7, %v7792_v33  ;;  %1440 = vmatpush2.xpose.msra.mxu1 %v398_v47  ;;  %v5956_v4 = vadd.f32 0.5, %v7792_v33 }
 0x2d5   :  { %v7801_v42 = vpop.f32.mrf.mxu1  ;;  %1370 = vmatprep.subr.mxu0 %v7070_v0  ;;  %v5891_v44 = vadd.f32 0.9, %v7795_v38  ;;  %v1640_v28 = vmul.f32 %v5890_v37, %v5890_v37  ;;  %1441 = vmatprep.subr.mxu1 %v7070_v0  ;;  %v5923_v52 = vadd.f32 0.7, %v7795_v38  ;;  %v1865_v12 = vmul.f32 %v5922_v54, %v5922_v54 }
 0x2d6   :  { %v5893_v46 = vadd.f32 0.9, %v7801_v42  ;;  %v1642_v35 = vmul.f32 %v5892_v39, %v5892_v39  ;;  %v5925_v48 = vadd.f32 0.7, %v7801_v42  ;;  %v1867_v49 = vmul.f32 %v5924_v40, %v5924_v40  ;;  %v7826_v39 = vpop.xlane.xlu0 %2427 }
 0x2d7   :  { %v1641_v34 = vmul.f32 %v5891_v44, %v5891_v44  ;;  %v1672_v53 = vmul.f32 -50.0, %v1640_v28  ;;  %v1866_v50 = vmul.f32 %v5923_v52, %v5923_v52  ;;  %v5957_v16 = vadd.f32 0.5, %v7801_v42 }
 0x2d8   :  { %1371 = vmatpush2.xpose.msra.mxu0 %v372_v43  ;;  %v1643_v45 = vmul.f32 %v5893_v46, %v5893_v46  ;;  %v1674_v57 = vmul.f32 -50.0, %v1642_v35  ;;  %v1868_v58 = vmul.f32 %v5925_v48, %v5925_v48  ;;  %v1899_v59 = vmul.f32 -50.0, %v1867_v49  ;;  %1442 = vmatpush2.xpose.msra.mxu1 %v397_v36 }
 0x2d9   :  { %1450 = vmatprep.subr.mxu0 %v7070_v0  ;;  %v1673_v27 = vmul.f32 -50.0, %v1641_v34  ;;  %v1720_v1 = vmul.f32 1.442695, %v1672_v53  ;;  %1521 = vmatprep.subr.mxu1 %v7070_v0  ;;  %v2091_v15 = vmul.f32 %v5956_v4, %v5956_v4  ;;  %v5955_v17 = vadd.f32 0.5, %v7795_v38 }
 0x2da   :  { %v1675_v51 = vmul.f32 -50.0, %v1643_v45  ;;  %v1724_v2 = vmul.f32 1.442695, %v1674_v57  ;;  %v1900_v3 = vmul.f32 -50.0, %v1868_v58  ;;  %v1949_v8 = vmul.f32 1.442695, %v1899_v59 }
 0x2db   :  { %1373 = vmatmul.mubr.f32.vlgmr.msra.gmra.mxu0 %v52_v55  ;;  %6580 = vpow2.f32 %v1720_v1  ;;  %v1722_v7 = vmul.f32 1.442695, %v1673_v27  ;;  %1444 = vmatmul.mubr.f32.vlgmr.msra.gmra.mxu1 %v53_v56  ;;  %v1897_v22 = vmul.f32 -50.0, %v1865_v12  ;;  %v1898_v24 = vmul.f32 -50.0, %v1866_v50  ;;  %v7832_v56 = vpop.xlane.xlu1 %3327  ;;  %v418_v45 = vld [vmem:[#allocation5 + $0xb50] sm:$0xff]  ;;  %v443_v59 = vld [vmem:[#allocation5 + $0xc18] sm:$0xff]  ;;  %v7837_v1 = vpop.xlane.xlu0 %2651 }
 0x2dc   :  { %1451 = vmatpush1.xpose.msra.mxu0 %v421_v62  ;;  %6582 = vpow2.f32 %v1724_v2  ;;  %v1726_v9 = vmul.f32 1.442695, %v1675_v51  ;;  %v1951_v61 = vmul.f32 1.442695, %v1900_v3  ;;  %1522 = vmatpush1.xpose.msra.mxu1 %v446_v63  ;;  %v2092_v30 = vmul.f32 %v5957_v16, %v5957_v16 }
 0x2dd   :  { %1452 = vmatprep.subr.mxu0 %v7070_v0  ;;  %6584 = vpow2.f32 %v1722_v7  ;;  %1523 = vmatprep.subr.mxu1 %v7070_v0  ;;  %v2123_v47 = vmul.f32 -50.0, %v2091_v15  ;;  %v2089_v37 = vmul.f32 %v5954_v10, %v5954_v10  ;;  %v1945_v40 = vmul.f32 1.442695, %v1897_v22  ;;  %v417_v7 = vld [vmem:[#allocation5 + $0xb48] sm:$0xff] }
 0x2de   :  { %6586 = vpow2.f32 %v1726_v9  ;;  %1514 = vmatprep.mubr.f32.mxu0 %v7070_v0  ;;  %1585 = vmatprep.mubr.f32.mxu1 %v7070_v0  ;;  %v1947_v43 = vmul.f32 1.442695, %v1898_v24  ;;  %v2090_v44 = vmul.f32 %v5955_v17, %v5955_v17  ;;  %v5988_v28 = vadd.f32 0.3, %v7792_v33 }
 0x2df   :  { %6588 = vpow2.f32 %v1949_v8  ;;  %v2124_v36 = vmul.f32 -50.0, %v2092_v30  ;;  %v2173_v46 = vmul.f32 1.442695, %v2123_v47  ;;  %v2121_v35 = vmul.f32 -50.0, %v2089_v37  ;;  %v7849_v37 = vpop.xlane.xlu0 %2875 }
 0x2e0   :  { %1453 = vmatpush1.xpose.msra.mxu0 %v420_v11  ;;  %6590 = vpow2.f32 %v1951_v61  ;;  %1524 = vmatpush1.xpose.msra.mxu1 %v445_v13  ;;  %v5989_v48 = vadd.f32 0.3, %v7801_v42  ;;  %v2122_v49 = vmul.f32 -50.0, %v2090_v44  ;;  %v2315_v34 = vmul.f32 %v5988_v28, %v5988_v28  ;;  %v442_v11 = vld [vmem:[#allocation5 + $0xc10] sm:$0xff]  ;;  %v7844_v13 = vpop.xlane.xlu1 %3547 }
 0x2e1   :  { %1454 = vmatprep.subr.mxu0 %v7070_v0  ;;  %1525 = vmatprep.subr.mxu1 %v7070_v0  ;;  %6592 = vpow2.f32 %v1945_v40  ;;  %v2175_v53 = vmul.f32 1.442695, %v2124_v36  ;;  %v2169_v54 = vmul.f32 1.442695, %v2121_v35  ;;  %v5986_v27 = vadd.f32 0.3, %v7787_v31 }
 0x2e2   :  { %6594 = vpow2.f32 %v1947_v43  ;;  %v2316_v55 = vmul.f32 %v5989_v48, %v5989_v48  ;;  %v2171_v57 = vmul.f32 1.442695, %v2122_v49  ;;  %v2347_v58 = vmul.f32 -50.0, %v2315_v34  ;;  %v416_v43 = vld [vmem:[#allocation5 + $0xb40] sm:$0xff]  ;;  %v441_v36 = vld [vmem:[#allocation5 + $0xc08] sm:$0xff] }
 0x2e3   :  { %6596 = vpow2.f32 %v2173_v46  ;;  %v5987_v63 = vadd.f32 0.3, %v7795_v38  ;;  %v6020_v51 = vadd.f32 0.1, %v7792_v33  ;;  %v2313_v8 = vmul.f32 %v5986_v27, %v5986_v27  ;;  %v415_v27 = vld [vmem:[#allocation5 + $0xb38] sm:$0xff] }
 0x2e4   :  { %1455 = vmatpush1.xpose.msra.mxu0 %v419_v25  ;;  %1526 = vmatpush1.xpose.msra.mxu1 %v444_v26  ;;  %6598 = vpow2.f32 %v2175_v53  ;;  %v2348_v62 = vmul.f32 -50.0, %v2316_v55  ;;  %v2397_v52 = vmul.f32 1.442695, %v2347_v58  ;;  %v6021_v61 = vadd.f32 0.1, %v7801_v42 }
 0x2e5   :  { %1456 = vmatprep.subr.mxu0 %v7070_v0  ;;  %1527 = vmatprep.subr.mxu1 %v7070_v0  ;;  %6600 = vpow2.f32 %v2169_v54  ;;  %v2314_v9 = vmul.f32 %v5987_v63, %v5987_v63  ;;  %v2539_v12 = vmul.f32 %v6020_v51, %v6020_v51  ;;  %v2345_v15 = vmul.f32 -50.0, %v2313_v8 }
 0x2e6   :  { %6602 = vpow2.f32 %v2171_v57  ;;  %v2399_v3 = vmul.f32 1.442695, %v2348_v62  ;;  %v6018_v17 = vadd.f32 0.1, %v7787_v31  ;;  %v2540_v30 = vmul.f32 %v6021_v61, %v6021_v61  ;;  %v7859_v62 = vpop.xlane.xlu1 %3771  ;;  %v7866_v61 = vpop.xlane.xlu0 %3099 }
 0x2e7   :  { %6604 = vpow2.f32 %v2397_v52  ;;  %v2346_v26 = vmul.f32 -50.0, %v2314_v9  ;;  %v2393_v44 = vmul.f32 1.442695, %v2345_v15  ;;  %v2571_v28 = vmul.f32 -50.0, %v2539_v12 }
 0x2e8   :  { %v6581_v2 = vpop.eup %6580  ;;  %1457 = vmatpush1.xpose.msra.mxu0 %v418_v45  ;;  %1528 = vmatpush1.xpose.msra.mxu1 %v443_v59  ;;  %6606 = vpow2.f32 %v2399_v3  ;;  %v2572_v48 = vmul.f32 -50.0, %v2540_v30  ;;  %v7855_v49 = vadd.f32 -0.5, %v7787_v31  ;;  %v6019_v54 = vadd.f32 0.1, %v7795_v38  ;;  %v414_v30 = vld [vmem:[#allocation5 + $0xb30] sm:$0xff] }
 0x2e9   :  { %v6583_v4 = vpop.eup %6582  ;;  %1458 = vmatprep.subr.mxu0 %v7070_v0  ;;  %1529 = vmatprep.subr.mxu1 %v7070_v0  ;;  %v2395_v35 = vmul.f32 1.442695, %v2346_v26  ;;  %6608 = vpow2.f32 %v2393_v44  ;;  %v2621_v53 = vmul.f32 1.442695, %v2571_v28  ;;  %v2537_v57 = vmul.f32 %v6018_v17, %v6018_v17 }
 0x2ea   :  { %v6585_v10 = vpop.eup %6584  ;;  %v2623_v45 = vmul.f32 1.442695, %v2572_v48  ;;  %v6052_v58 = vadd.f32 -0.1, %v7792_v33  ;;  %v2538_v52 = vmul.f32 %v6019_v54, %v6019_v54  ;;  %v6053_v63 = vadd.f32 -0.1, %v7801_v42 }
 0x2eb   :  { %v6587_v50 = vpop.eup %6586  ;;  %v1785_v16 = vsel %vm1752_vm0, %v6585_v10, 0.0  ;;  %6610 = vpow2.f32 %v2395_v35  ;;  %v6050_v51 = vadd.f32 -0.1, %v7787_v31 }
 0x2ec   :  { %v6589_v22 = vpop.eup %6588  ;;  %1459 = vmatpush1.xpose.msra.mxu0 %v417_v7  ;;  %v1789_v24 = vsel %vm1752_vm0, %v6587_v50, 0.0  ;;  %v1786_v25 = vadd.f32 %v6581_v2, %v1785_v16  ;;  %1530 = vmatpush1.xpose.msra.mxu1 %v442_v11  ;;  %6612 = vpow2.f32 %v2621_v53  ;;  %v2569_v7 = vmul.f32 -50.0, %v2537_v57 }
 0x2ed   :  { %v6591_v47 = vpop.eup %6590  ;;  %1460 = vmatprep.subr.mxu0 %v7070_v0  ;;  %v1790_v40 = vadd.f32 %v6583_v4, %v1789_v24  ;;  %1531 = vmatprep.subr.mxu1 %v7070_v0  ;;  %v440_v4 = vld [vmem:[#allocation5 + $0xc00] sm:$0xff]  ;;  %6614 = vpow2.f32 %v2623_v45  ;;  %v2763_v8 = vmul.f32 %v6052_v58, %v6052_v58  ;;  %v2570_v11 = vmul.f32 -50.0, %v2538_v52  ;;  %v413_v52 = vld [vmem:[#allocation5 + $0xb28] sm:$0xff] }
 0x2ee   :  { %1787 = vadd.xlane.f32.xlu0 %v1786_v25  ;;  %v2013_v46 = vsel %vm1752_vm0, %v6591_v47, 0.0  ;;  %v6593_v55 = vpop.eup %6592  ;;  %v2764_v12 = vmul.f32 %v6053_v63, %v6053_v63  ;;  %v6051_v50 = vadd.f32 -0.1, %v7795_v38  ;;  %v2617_v17 = vmul.f32 1.442695, %v2569_v7 }
 0x2ef   :  { %1791 = vadd.xlane.f32.xlu1 %v1790_v40  ;;  %v2014_v34 = vadd.f32 %v6589_v22, %v2013_v46  ;;  %v6595_v59 = vpop.eup %6594  ;;  %v2795_v22 = vmul.f32 -50.0, %v2763_v8  ;;  %v2761_v24 = vmul.f32 %v6050_v51, %v6050_v51  ;;  %v2619_v47 = vmul.f32 1.442695, %v2570_v11 }
 0x2f0   :  { %1461 = vmatpush1.xpose.msra.mxu0 %v416_v43  ;;  %1532 = vmatpush1.xpose.msra.mxu1 %v441_v36  ;;  %v6597_v2 = vpop.eup %6596  ;;  %v2009_v3 = vsel %vm1752_vm0, %v6595_v59, 0.0  ;;  %v2796_v40 = vmul.f32 -50.0, %v2764_v12  ;;  %v2762_v43 = vmul.f32 %v6051_v50, %v6051_v50  ;;  %v439_v36 = vld [vmem:[#allocation5 + $0xbf8] sm:$0xff]  ;;  %6616 = vpow2.f32 %v2617_v17  ;;  %v7877_v59 = vpop.xlane.xlu0 %3323 }
 0x2f1   :  { %1462 = vmatprep.subr.mxu0 %v7070_v0  ;;  %1533 = vmatprep.subr.mxu1 %v7070_v0  ;;  %v6599_v9 = vpop.eup %6598  ;;  %v2010_v10 = vadd.f32 %v6593_v55, %v2009_v3  ;;  %v2845_v46 = vmul.f32 1.442695, %v2795_v22  ;;  %v2793_v35 = vmul.f32 -50.0, %v2761_v24  ;;  %6618 = vpow2.f32 %v2619_v47  ;;  %v412_v24 = vld [vmem:[#allocation5 + $0xb20] sm:$0xff] }
 0x2f2   :  { %v6601_v16 = vpop.eup %6600  ;;  %v2237_v15 = vsel %vm1752_vm0, %v6599_v9, 0.0  ;;  %v2847_v54 = vmul.f32 1.442695, %v2796_v40  ;;  %v2794_v55 = vmul.f32 -50.0, %v2762_v43  ;;  %v6084_v58 = vadd.f32 -0.3, %v7792_v33 }
 0x2f3   :  { %2015 = vadd.xlane.f32.xlu1 %v2014_v34  ;;  %v6603_v25 = vpop.eup %6602  ;;  %2011 = vadd.xlane.f32.xlu0 %v2010_v10  ;;  %v2238_v26 = vadd.f32 %v6597_v2, %v2237_v15  ;;  %v7873_v34 = vpop.xlane.xlu1 %3999  ;;  %6620 = vpow2.f32 %v2845_v46  ;;  %v2841_v57 = vmul.f32 1.442695, %v2793_v35  ;;  %v6085_v51 = vadd.f32 -0.3, %v7801_v42  ;;  %v438_v2 = vld [vmem:[#allocation5 + $0xbf0] sm:$0xff] }
 0x2f4   :  { %1463 = vmatpush1.xpose.msra.mxu0 %v415_v27  ;;  %1534 = vmatpush1.xpose.msra.mxu1 %v440_v4  ;;  %v6605_v44 = vpop.eup %6604  ;;  %v2233_v28 = vsel %vm1752_vm0, %v6603_v25, 0.0  ;;  %6622 = vpow2.f32 %v2847_v54  ;;  %v2843_v63 = vmul.f32 1.442695, %v2794_v55  ;;  %v2987_v3 = vmul.f32 %v6084_v58, %v6084_v58 }
 0x2f5   :  { %1464 = vmatprep.subr.mxu0 %v7070_v0  ;;  %1535 = vmatprep.subr.mxu1 %v7070_v0  ;;  %v6607_v48 = vpop.eup %6606  ;;  %v2234_v53 = vadd.f32 %v6601_v16, %v2233_v28  ;;  %6624 = vpow2.f32 %v2841_v57  ;;  %v6082_v4 = vadd.f32 -0.3, %v7787_v31  ;;  %v6083_v7 = vadd.f32 -0.3, %v7795_v38 }
 0x2f6   :  { %v2461_v45 = vsel %vm1752_vm0, %v6607_v48, 0.0  ;;  %6626 = vpow2.f32 %v2843_v63  ;;  %v2988_v9 = vmul.f32 %v6085_v51, %v6085_v51  ;;  %v6146_v10 = vadd.f32 -0.7, %v7787_v31  ;;  %v6609_v12 = vpop.eup %6608  ;;  %v7894_v48 = vpop.xlane.xlu0 %3551  ;;  %v411_v63 = vld [vmem:[#allocation5 + $0xb18] sm:$0xff] }
 0x2f7   :  { %2239 = vadd.xlane.f32.xlu1 %v2238_v26  ;;  %2235 = vadd.xlane.f32.xlu0 %v2234_v53  ;;  %v2462_v27 = vadd.f32 %v6605_v44, %v2461_v45  ;;  %v7884_v8 = vpop.xlane.xlu1 %1763  ;;  %v6147_v11 = vadd.f32 -0.7, %v7795_v38  ;;  %v3019_v50 = vmul.f32 -50.0, %v2987_v3  ;;  %v2985_v16 = vmul.f32 %v6082_v4, %v6082_v4  ;;  %v437_v44 = vld [vmem:[#allocation5 + $0xbe8] sm:$0xff]  ;;  %v436_v3 = vld [vmem:[#allocation5 + $0xbe0] sm:$0xff] }
 0x2f8   :  { %1465 = vmatpush1.xpose.msra.mxu0 %v414_v30  ;;  %1536 = vmatpush1.xpose.msra.mxu1 %v439_v36  ;;  %v2986_v15 = vmul.f32 %v6083_v7, %v6083_v7  ;;  %v6115_v17 = vadd.f32 -0.5, %v7795_v38  ;;  %v6611_v22 = vpop.eup %6610  ;;  %v3020_v25 = vmul.f32 -50.0, %v2988_v9  ;;  %v3433_v26 = vmul.f32 %v6146_v10, %v6146_v10 }
 0x2f9   :  { %1466 = vmatprep.subr.mxu0 %v7070_v0  ;;  %1537 = vmatprep.subr.mxu1 %v7070_v0  ;;  %v3434_v30 = vmul.f32 %v6147_v11, %v6147_v11  ;;  %v3209_v47 = vmul.f32 %v7855_v49, %v7855_v49  ;;  %v6613_v40 = vpop.eup %6612  ;;  %v2457_v43 = vsel %vm1752_vm0, %v6611_v22, 0.0  ;;  %v3069_v28 = vmul.f32 1.442695, %v3019_v50 }
 0x2fa   :  { %v3017_v36 = vmul.f32 -50.0, %v2985_v16  ;;  %v3018_v46 = vmul.f32 -50.0, %v2986_v15  ;;  %v6615_v35 = vpop.eup %6614  ;;  %v2458_v53 = vadd.f32 %v6609_v12, %v2457_v43  ;;  %v3071_v54 = vmul.f32 1.442695, %v3020_v25 }
 0x2fb   :  { %2463 = vadd.xlane.f32.xlu1 %v2462_v27  ;;  %v3465_v55 = vmul.f32 -50.0, %v3433_v26  ;;  %v3466_v45 = vmul.f32 -50.0, %v3434_v30  ;;  %v2685_v57 = vsel %vm1752_vm0, %v6615_v35, 0.0  ;;  %6628 = vpow2.f32 %v3069_v28  ;;  %v7897_v27 = vpop.xlane.xlu1 %1767  ;;  %v410_v30 = vld [vmem:[#allocation5 + $0xb10] sm:$0xff]  ;;  %v435_v28 = vld [vmem:[#allocation5 + $0xbd8] sm:$0xff] }
 0x2fc   :  { %1467 = vmatpush1.xpose.msra.mxu0 %v413_v52  ;;  %1538 = vmatpush1.xpose.msra.mxu1 %v438_v2  ;;  %v3065_v49 = vmul.f32 1.442695, %v3017_v36  ;;  %v3067_v58 = vmul.f32 1.442695, %v3018_v46  ;;  %v2686_v52 = vadd.f32 %v6613_v40, %v2685_v57  ;;  %6630 = vpow2.f32 %v3071_v54 }
 0x2fd   :  { %1468 = vmatprep.subr.mxu0 %v7070_v0  ;;  %1539 = vmatprep.subr.mxu1 %v7070_v0  ;;  %v3513_v51 = vmul.f32 1.442695, %v3465_v55  ;;  %v3515_v2 = vmul.f32 1.442695, %v3466_v45  ;;  %v3210_v4 = vmul.f32 %v6115_v17, %v6115_v17  ;;  %v3241_v7 = vmul.f32 -50.0, %v3209_v47  ;;  %v6617_v10 = vpop.eup %6616  ;;  %v7905_v17 = vpop.xlane.xlu0 %3775 }
 0x2fe   :  { %2459 = vadd.xlane.f32.xlu0 %v2458_v53  ;;  %6632 = vpow2.f32 %v3065_v49  ;;  %v6178_v9 = vadd.f32 -0.9, %v7787_v31  ;;  %v6179_v11 = vadd.f32 -0.9, %v7795_v38  ;;  %v6148_v12 = vadd.f32 -0.7, %v7792_v33  ;;  %v6619_v16 = vpop.eup %6618 }
 0x2ff   :  { %2687 = vadd.xlane.f32.xlu1 %v2686_v52  ;;  %6634 = vpow2.f32 %v3067_v58  ;;  %v6149_v50 = vadd.f32 -0.7, %v7801_v42  ;;  %v3242_v15 = vmul.f32 -50.0, %v3210_v4  ;;  %v3289_v22 = vmul.f32 1.442695, %v3241_v7  ;;  %v7910_v53 = vpop.xlane.xlu1 %1991  ;;  %v409_v52 = vld [vmem:[#allocation5 + $0xb08] sm:$0xff] }
 0x300   :  { %1469 = vmatpush1.xpose.msra.mxu0 %v412_v24  ;;  %1540 = vmatpush1.xpose.msra.mxu1 %v437_v44  ;;  %6636 = vpow2.f32 %v3513_v51  ;;  %v3657_v24 = vmul.f32 %v6178_v9, %v6178_v9  ;;  %v6621_v25 = vpop.eup %6620  ;;  %v2681_v26 = vsel %vm1752_vm0, %v6619_v16, 0.0  ;;  %v3658_v47 = vmul.f32 %v6179_v11, %v6179_v11 }
 0x301   :  { %1470 = vmatprep.subr.mxu0 %v7070_v0  ;;  %1541 = vmatprep.subr.mxu1 %v7070_v0  ;;  %6638 = vpow2.f32 %v3515_v2  ;;  %v3435_v40 = vmul.f32 %v6148_v12, %v6148_v12  ;;  %v6623_v43 = vpop.eup %6622  ;;  %v2682_v44 = vadd.f32 %v6617_v10, %v2681_v26  ;;  %v3291_v36 = vmul.f32 1.442695, %v3242_v15  ;;  %v434_v10 = vld [vmem:[#allocation5 + $0xbd0] sm:$0xff] }
 0x302   :  { %6640 = vpow2.f32 %v3289_v22  ;;  %v3689_v46 = vmul.f32 -50.0, %v3657_v24  ;;  %v6625_v35 = vpop.eup %6624  ;;  %v2909_v54 = vsel %vm1752_vm0, %v6623_v43, 0.0  ;;  %v3690_v55 = vmul.f32 -50.0, %v3658_v47 }
 0x303   :  { %v3436_v45 = vmul.f32 %v6149_v50, %v6149_v50  ;;  %v3467_v57 = vmul.f32 -50.0, %v3435_v40  ;;  %v6627_v49 = vpop.eup %6626  ;;  %2683 = vadd.xlane.f32.xlu0 %v2682_v44  ;;  %v2910_v58 = vadd.f32 %v6621_v25, %v2909_v54  ;;  %6642 = vpow2.f32 %v3291_v36  ;;  %v7918_v50 = vpop.xlane.xlu0 %3995  ;;  %v408_v40 = vld [vmem:[#allocation5 + $0xb00] sm:$0xff] }
 0x304   :  { %1471 = vmatpush1.xpose.msra.mxu0 %v411_v63  ;;  %1542 = vmatpush1.xpose.msra.mxu1 %v436_v3  ;;  %v3737_v63 = vmul.f32 1.442695, %v3689_v46  ;;  %v6116_v51 = vadd.f32 -0.5, %v7792_v33  ;;  %v2905_v2 = vsel %vm1752_vm0, %v6627_v49, 0.0  ;;  %v3739_v3 = vmul.f32 1.442695, %v3690_v55  ;;  %v7923_v47 = vpop.xlane.xlu1 %2215 }
 0x305   :  { %1472 = vmatprep.subr.mxu0 %v7070_v0  ;;  %1543 = vmatprep.subr.mxu1 %v7070_v0  ;;  %v3468_v4 = vmul.f32 -50.0, %v3436_v45  ;;  %v3517_v7 = vmul.f32 1.442695, %v3467_v57  ;;  %v2906_v9 = vadd.f32 %v6625_v35, %v2905_v2  ;;  %v6117_v11 = vadd.f32 -0.5, %v7801_v42  ;;  %v433_v46 = vld [vmem:[#allocation5 + $0xbc8] sm:$0xff] }
 0x306   :  { %2911 = vadd.xlane.f32.xlu1 %v2910_v58  ;;  %6644 = vpow2.f32 %v3737_v63  ;;  %v3211_v12 = vmul.f32 %v6116_v51, %v6116_v51  ;;  %v6180_v15 = vadd.f32 -0.9, %v7792_v33  ;;  %v6181_v22 = vadd.f32 -0.9, %v7801_v42 }
 0x307   :  { %6646 = vpow2.f32 %v3739_v3  ;;  %v3519_v16 = vmul.f32 1.442695, %v3468_v4  ;;  %2907 = vadd.xlane.f32.xlu0 %v2906_v9  ;;  %v3212_v24 = vmul.f32 %v6117_v11, %v6117_v11  ;;  %v6212_v26 = vadd.f32 -1.0, %v7792_v33  ;;  %v7929_v57 = vpop.xlane.xlu0 %1987  ;;  %v407_v3 = vld [vmem:[#allocation5 + $0xaf8] sm:$0xff] }
 0x308   :  { %1473 = vmatpush1.xpose.msra.mxu0 %v410_v30  ;;  %1544 = vmatpush1.xpose.msra.mxu1 %v435_v28  ;;  %6648 = vpow2.f32 %v3517_v7  ;;  %v3243_v25 = vmul.f32 -50.0, %v3211_v12  ;;  %v6629_v30 = vpop.eup %6628  ;;  %v3659_v43 = vmul.f32 %v6180_v15, %v6180_v15  ;;  %v3660_v44 = vmul.f32 %v6181_v22, %v6181_v22  ;;  %v432_v15 = vld [vmem:[#allocation5 + $0xbc0] sm:$0xff] }
 0x309   :  { %1474 = vmatprep.subr.mxu0 %v7070_v0  ;;  %1545 = vmatprep.subr.mxu1 %v7070_v0  ;;  %6650 = vpow2.f32 %v3519_v16  ;;  %v6213_v28 = vadd.f32 -1.0, %v7801_v42  ;;  %v6631_v36 = vpop.eup %6630  ;;  %v3244_v35 = vmul.f32 -50.0, %v3212_v24  ;;  %v3883_v55 = vmul.f32 %v6212_v26, %v6212_v26  ;;  %v7936_v26 = vpop.xlane.xlu1 %2439 }
 0x30a   :  { %v3293_v54 = vmul.f32 1.442695, %v3243_v25  ;;  %v6210_v33 = vadd.f32 -1.0, %v7787_v31  ;;  %v3133_v49 = vsel %vm1752_vm0, %v6631_v36, 0.0  ;;  %v3691_v58 = vmul.f32 -50.0, %v3659_v43 }
 0x30b   :  { %v6633_v45 = vpop.eup %6632  ;;  %v3884_v63 = vmul.f32 %v6213_v28, %v6213_v28  ;;  %v3134_v2 = vadd.f32 %v6629_v30, %v3133_v49  ;;  %v3295_v42 = vmul.f32 1.442695, %v3244_v35  ;;  %v3915_v4 = vmul.f32 -500000.0, %v3883_v55  ;;  %v7939_v36 = vpop.xlane.xlu0 %2211 }
 0x30c   :  { %1475 = vmatpush1.xpose.msra.mxu0 %v409_v52  ;;  %1546 = vmatpush1.xpose.msra.mxu1 %v434_v10  ;;  %v3692_v52 = vmul.f32 -50.0, %v3660_v44  ;;  %v6635_v51 = vpop.eup %6634  ;;  %6652 = vpow2.f32 %v3293_v54  ;;  %v3741_v31 = vmul.f32 1.442695, %v3691_v58  ;;  %v6211_v11 = vadd.f32 -1.0, %v7795_v38  ;;  %v406_v54 = vld [vmem:[#allocation5 + $0xaf0] sm:$0xff] }
 0x30d   :  { %1476 = vmatprep.subr.mxu0 %v7070_v0  ;;  %1547 = vmatprep.subr.mxu1 %v7070_v0  ;;  %v6637_v7 = vpop.eup %6636  ;;  %v3129_v9 = vsel %vm1752_vm0, %v6635_v51, 0.0  ;;  %6654 = vpow2.f32 %v3295_v42  ;;  %v3916_v22 = vmul.f32 -500000.0, %v3884_v63  ;;  %v3965_v24 = vmul.f32 1.442695, %v3915_v4 }
 0x30e   :  { %v3743_v10 = vmul.f32 1.442695, %v3692_v52  ;;  %v6639_v12 = vpop.eup %6638  ;;  %3135 = vadd.xlane.f32.xlu1 %v3134_v2  ;;  %v3130_v16 = vadd.f32 %v6633_v45, %v3129_v9  ;;  %6656 = vpow2.f32 %v3741_v31  ;;  %v3882_v43 = vmul.f32 %v6211_v11, %v6211_v11  ;;  %v7944_v2 = vpop.xlane.xlu1 %2663  ;;  %v455_v9 = vld [vmem:[#allocation5 + $0xc78] sm:$0xff] }
 0x30f   :  { %v6641_v25 = vpop.eup %6640  ;;  %v3577_v30 = vsel %vm1752_vm0, %v6639_v12, 0.0  ;;  %v3967_v38 = vmul.f32 1.442695, %v3916_v22  ;;  %v7949_v31 = vpop.xlane.xlu0 %2435 }
 0x310   :  { %1477 = vmatpush1.xpose.msra.mxu0 %v408_v40  ;;  %1548 = vmatpush1.xpose.msra.mxu1 %v433_v46  ;;  %v3881_v40 = vmul.f32 %v6210_v33, %v6210_v33  ;;  %v3578_v44 = vadd.f32 %v6637_v7, %v3577_v30  ;;  %6658 = vpow2.f32 %v3743_v10  ;;  %v6643_v28 = vpop.eup %6642  ;;  %v3914_v35 = vmul.f32 -500000.0, %v3882_v43  ;;  %v431_v33 = vld [vmem:[#allocation5 + $0xbb8] sm:$0xff] }
 0x311   :  { %1478 = vmatprep.subr.mxu0 %v7070_v0  ;;  %1549 = vmatprep.subr.mxu1 %v7070_v0  ;;  %6660 = vpow2.f32 %v3965_v24  ;;  %v3353_v55 = vsel %vm1752_vm0, %v6643_v28, 0.0 }
 0x312   :  { %3131 = vadd.xlane.f32.xlu0 %v3130_v16  ;;  %v3913_v46 = vmul.f32 -500000.0, %v3881_v40  ;;  %3579 = vadd.xlane.f32.xlu1 %v3578_v44  ;;  %6662 = vpow2.f32 %v3967_v38  ;;  %v3354_v49 = vadd.f32 %v6641_v25, %v3353_v55  ;;  %v3963_v52 = vmul.f32 1.442695, %v3914_v35  ;;  %v429_v16 = vld [vmem:[#allocation5 + $0xba8] sm:$0xff]  ;;  %v7954_v24 = vpop.xlane.xlu1 %2887  ;;  %v428_v38 = vld [vmem:[#allocation5 + $0xba0] sm:$0xff] }
 0x313   :  { %v6645_v45 = vpop.eup %6644  ;;  %v7957_v43 = vpop.xlane.xlu0 %2659  ;;  %v453_v35 = vld [vmem:[#allocation5 + $0xc68] sm:$0xff] }
 0x314   :  { %1479 = vmatpush1.xpose.msra.mxu0 %v407_v3  ;;  %1550 = vmatpush1.xpose.msra.mxu1 %v432_v15  ;;  %v3961_v58 = vmul.f32 1.442695, %v3913_v46  ;;  %v6647_v63 = vpop.eup %6646  ;;  %v430_v3 = vld [vmem:[#allocation5 + $0xbb0] sm:$0xff]  ;;  %6664 = vpow2.f32 %v3963_v52  ;;  %v452_v52 = vld [vmem:[#allocation5 + $0xc60] sm:$0xff] }
 0x315   :  { %1480 = vmatprep.subr.mxu0 %v7070_v0  ;;  %1551 = vmatprep.subr.mxu1 %v7070_v0  ;;  %v6649_v51 = vpop.eup %6648  ;;  %v3801_v42 = vsel %vm1752_vm0, %v6647_v63, 0.0  ;;  %v454_v15 = vld [vmem:[#allocation5 + $0xc70] sm:$0xff] }
 0x316   :  { %3355 = vadd.xlane.f32.xlu0 %v3354_v49  ;;  %v6651_v4 = vpop.eup %6650  ;;  %v3802_v7 = vadd.f32 %v6645_v45, %v3801_v42  ;;  %6666 = vpow2.f32 %v3961_v58  ;;  %v7963_v45 = vpop.xlane.xlu1 %3111  ;;  %v427_v58 = vld [vmem:[#allocation5 + $0xb98] sm:$0xff] }
 0x317   :  { %v3581_v10 = vsel %vm1752_vm0, %v6651_v4, 0.0  ;;  %v7967_v42 = vpop.xlane.xlu0 %2883 }
 0x318   :  { %1481 = vmatpush1.xpose.msra.mxu0 %v406_v54  ;;  %1552 = vmatpush1.xpose.msra.mxu1 %v431_v33  ;;  %v3582_v11 = vadd.f32 %v6649_v51, %v3581_v10  ;;  %v4073_v51 = vlaneseq  ;;  %v451_v10 = vld [vmem:[#allocation5 + $0xc58] sm:$0xff] }
 0x319   :  { %1496 = vmatprep.subr.mxu0 %v7070_v0  ;;  %1567 = vmatprep.subr.mxu1 %v7070_v0  ;;  %v6653_v12 = vpop.eup %6652 }
 0x31a   :  { %3803 = vadd.xlane.f32.xlu1 %v3802_v7  ;;  %3583 = vadd.xlane.f32.xlu0 %v3582_v11  ;;  %v6655_v22 = vpop.eup %6654  ;;  %v7972_v11 = vand.u32 127, %v4073_v51 }
 0x31b   :  { %v6657_v25 = vpop.eup %6656  ;;  %v3357_v30 = vsel %vm1752_vm0, %v6655_v22, 0.0  ;;  %v425_v22 = vld [vmem:[#allocation5 + $0xb88] sm:$0xff] }
 0x31c   :  { %1497 = vmatpush2.xpose.msra.mxu0 %v430_v3  ;;  %1568 = vmatpush2.xpose.msra.mxu1 %v455_v9  ;;  %v3358_v44 = vadd.f32 %v6653_v12, %v3357_v30  ;;  %v426_v9 = vld [vmem:[#allocation5 + $0xb90] sm:$0xff]  ;;  %9516 = vst [vmem:[#allocation13_spill] sm:$0xff] %v7972_v11  ;;  %v7974_v12 = vshrl.u32 %v4073_v51, 7 }
 0x31d   :  { %1498 = vmatprep.subr.mxu0 %v7070_v0  ;;  %1569 = vmatprep.subr.mxu1 %v7070_v0  ;;  %v6659_v40 = vpop.eup %6658 }
 0x31e   :  { %v6661_v28 = vpop.eup %6660  ;;  %v3805_v46 = vsel %vm1752_vm0, %v6659_v40, 0.0  ;;  %3359 = vadd.xlane.f32.xlu1 %v3358_v44  ;;  %9517 = vst [vmem:[#allocation14_spill] sm:$0xff] %v7974_v12  ;;  %v7984_v30 = vsub.s32 %v7972_v11, %v7974_v12 }
 0x31f   :  { %v6663_v54 = vpop.eup %6662  ;;  %v3806_v55 = vadd.f32 %v6657_v25, %v3805_v46  ;;  %v450_v25 = vld [vmem:[#allocation5 + $0xc50] sm:$0xff]  ;;  %v449_v46 = vld [vmem:[#allocation5 + $0xc48] sm:$0xff] }
 0x320   :  { %1499 = vmatpush2.xpose.msra.mxu0 %v429_v16  ;;  %1570 = vmatpush2.xpose.msra.mxu1 %v454_v15  ;;  %v4029_v33 = vsel %vm1752_vm0, %v6663_v54, 0.0  ;;  %v7976_v16 = vpop.xlane.xlu1 %3335  ;;  %v7978_v15 = vpop.xlane.xlu0 %3107  ;;  %v4178_v40 = vrot.slane %v7768_v14, %v7984_v30  ;;  %v4082_v44 = vrot.slane %v7784_v29, %v7984_v30  ;;  %v4274_v54 = vrot.slane %v7774_v20, %v7984_v30  ;;  %v423_v29 = vld [vmem:[#allocation5 + $0xb78] sm:$0xff] }
 0x321   :  { %1500 = vmatprep.subr.mxu0 %v7070_v0  ;;  %1571 = vmatprep.subr.mxu1 %v7070_v0  ;;  %v4030_v49 = vadd.f32 %v6661_v28, %v4029_v33  ;;  %v6665_v63 = vpop.eup %6664  ;;  %v424_v28 = vld [vmem:[#allocation5 + $0xb80] sm:$0xff]  ;;  %v4370_v33 = vrot.slane %v7780_v6, %v7984_v30  ;;  %v4174_v51 = vrot.slane %v7799_v41, %v7984_v30  ;;  %v422_v6 = vld [vmem:[#allocation5 + $0xb70] sm:$0xff] }
 0x322   :  { %3807 = vadd.xlane.f32.xlu0 %v3806_v55  ;;  %v4025_v4 = vsel %vm1752_vm0, %v6665_v63, 0.0  ;;  %v5117_v14 = vsel %vm5115_vm1, %v4082_v44, %v4178_v40  ;;  %v448_v55 = vld [vmem:[#allocation5 + $0xc40] sm:$0xff]  ;;  %v4078_v44 = vrot.slane %v7776_v21, %v7984_v30  ;;  %v55_v21 = vld [vmem:[#allocation2 + $0x78] sm:$0xff] }
 0x323   :  { %4031 = vadd.xlane.f32.xlu1 %v4030_v49  ;;  %v6667_v3 = vpop.eup %6666  ;;  %v5134_v20 = vsel %vm5132_vm2, %v5117_v14, %v4274_v54  ;;  %v54_v14 = vld [vmem:[#allocation2 + $0x70] sm:$0xff] }
 0x324   :  { %1501 = vmatpush2.xpose.msra.mxu0 %v428_v38  ;;  %1572 = vmatpush2.xpose.msra.mxu1 %v453_v35  ;;  %v4026_v7 = vadd.f32 %v6667_v3, %v4025_v4  ;;  %v7990_v38 = vpop.xlane.xlu1 %3559  ;;  %v7994_v35 = vpop.xlane.xlu0 %3331 }
 0x325   :  { %1502 = vmatprep.subr.mxu0 %v7070_v0  ;;  %1573 = vmatprep.subr.mxu1 %v7070_v0 }
 0x326   :  { %4027 = vadd.xlane.f32.xlu0 %v4026_v7 }
 0x328   :  { %1503 = vmatpush2.xpose.msra.mxu0 %v427_v58  ;;  %1574 = vmatpush2.xpose.msra.mxu1 %v452_v52  ;;  %v8003_v49 = vpop.xlane.xlu1 %3783  ;;  %v8013_v3 = vpop.xlane.xlu0 %3555 }
 0x329   :  { %1504 = vmatprep.subr.mxu0 %v7070_v0  ;;  %1575 = vmatprep.subr.mxu1 %v7070_v0  ;;  %9518 = vst [vmem:[#allocation15_spill] sm:$0xff] %v8003_v49 }
 0x32c   :  { %1505 = vmatpush2.xpose.msra.mxu0 %v426_v9  ;;  %1576 = vmatpush2.xpose.msra.mxu1 %v451_v10  ;;  %v8033_v11 = vpop.xlane.xlu1 %4003 }
 0x32d   :  { %1506 = vmatprep.subr.mxu0 %v7070_v0  ;;  %1577 = vmatprep.subr.mxu1 %v7070_v0  ;;  %9519 = vst [vmem:[#allocation16_spill] sm:$0xff] %v8033_v11 }
 0x330   :  { %1507 = vmatpush2.xpose.msra.mxu0 %v425_v22  ;;  %1578 = vmatpush2.xpose.msra.mxu1 %v450_v25  ;;  %v447_v22 = vld [vmem:[#allocation5 + $0xc38] sm:$0xff]  ;;  %v8041_v11 = vpop.xlane.xlu1 %1775 }
 0x331   :  { %1508 = vmatprep.subr.mxu0 %v7070_v0  ;;  %1579 = vmatprep.subr.mxu1 %v7070_v0  ;;  %9520 = vst [vmem:[#allocation17_spill] sm:$0xff] %v8041_v11 }
 0x334   :  { %1509 = vmatpush2.xpose.msra.mxu0 %v424_v28  ;;  %1580 = vmatpush2.xpose.msra.mxu1 %v449_v46  ;;  %v5151_v28 = vsel %vm5149_vm3, %v5134_v20, %v4370_v33 }
 0x335   :  { %1510 = vmatprep.subr.mxu0 %v7070_v0  ;;  %1581 = vmatprep.subr.mxu1 %v7070_v0 }
 0x337   :  { %v8005_v58 = vpop.f32.mrf.mxu0  ;;  %v8008_v52 = vpop.f32.mrf.mxu1 }
 0x338   :  { %1511 = vmatpush2.xpose.msra.mxu0 %v423_v29  ;;  %v5894_v63 = vadd.f32 0.9, %v8005_v58  ;;  %1582 = vmatpush2.xpose.msra.mxu1 %v448_v55  ;;  %v5896_v7 = vadd.f32 0.9, %v8008_v52  ;;  %v5928_v9 = vadd.f32 0.7, %v8008_v52 }
 0x339   :  { %v8015_v4 = vpop.f32.mrf.mxu0  ;;  %1512 = vmatprep.subr.mxu0 %v7070_v0  ;;  %v8020_v10 = vpop.f32.mrf.mxu1  ;;  %1583 = vmatprep.subr.mxu1 %v7070_v0  ;;  %v5926_v40 = vadd.f32 0.7, %v8005_v58 }
 0x33a   :  { %v5895_v25 = vadd.f32 0.9, %v8015_v4  ;;  %v1644_v41 = vmul.f32 %v5894_v63, %v5894_v63  ;;  %v5897_v46 = vadd.f32 0.9, %v8020_v10  ;;  %v1646_v54 = vmul.f32 %v5896_v7, %v5896_v7 }
 0x33b   :  { %v5929_v0 = vadd.f32 0.7, %v8020_v10  ;;  %v1871_v12 = vmul.f32 %v5928_v9, %v5928_v9  ;;  %v8031_v63 = vsel %vm5115_vm1, %v4078_v44, %v4174_v51  ;;  %v5927_v20 = vadd.f32 0.7, %v8015_v4 }
 0x33c   :  { %1513 = vmatpush2.xpose.msra.mxu0 %v422_v6  ;;  %v1645_v29 = vmul.f32 %v5895_v25, %v5895_v25  ;;  %v1676_v55 = vmul.f32 -50.0, %v1644_v41  ;;  %1584 = vmatpush2.xpose.msra.mxu1 %v447_v22  ;;  %v1647_v23 = vmul.f32 %v5897_v46, %v5897_v46  ;;  %v1678_v33 = vmul.f32 -50.0, %v1646_v54  ;;  %v8036_v41 = vpop.xlane.xlu0 %3779 }
 0x33d   :  { %v1872_v18 = vmul.f32 %v5929_v0, %v5929_v0  ;;  %v1869_v25 = vmul.f32 %v5926_v40, %v5926_v40  ;;  %v1903_v51 = vmul.f32 -50.0, %v1871_v12  ;;  %v5960_v44 = vadd.f32 0.5, %v8008_v52 }
 0x33e   :  { %v1677_v7 = vmul.f32 -50.0, %v1645_v29  ;;  %v1728_v6 = vmul.f32 1.442695, %v1676_v55  ;;  %v1679_v9 = vmul.f32 -50.0, %v1647_v23  ;;  %v1732_v49 = vmul.f32 1.442695, %v1678_v33 }
 0x33f   :  { %1515 = vmatmul.mubr.f32.vlgmr.msra.gmra.mxu0 %v54_v14  ;;  %v4466_v22 = vrot.slane %v7790_v32, %v7984_v30  ;;  %1586 = vmatmul.mubr.f32.vlgmr.msra.gmra.mxu1 %v55_v21  ;;  %v1904_v54 = vmul.f32 -50.0, %v1872_v18  ;;  %v1957_v40 = vmul.f32 1.442695, %v1903_v51  ;;  %v5958_v55 = vadd.f32 0.5, %v8005_v58 }
 0x340   :  { %6668 = vpow2.f32 %v1728_v6  ;;  %v1730_v46 = vmul.f32 1.442695, %v1677_v7  ;;  %v1734_v29 = vmul.f32 1.442695, %v1679_v9  ;;  %v1870_v14 = vmul.f32 %v5927_v20, %v5927_v20  ;;  %v8048_v7 = vpop.xlane.xlu0 %4007 }
 0x341   :  { %6670 = vpow2.f32 %v1732_v49  ;;  %v1959_v23 = vmul.f32 1.442695, %v1904_v54  ;;  %v1901_v12 = vmul.f32 -50.0, %v1869_v25  ;;  %v4562_v0 = vrot.slane %v7809_v60, %v7984_v30  ;;  %9521 = vst [vmem:[#allocation18_spill] sm:$0xff] %v8048_v7  ;;  %v8052_v54 = vpop.xlane.xlu1 %1999 }
 0x342   :  { %6672 = vpow2.f32 %v1730_v46  ;;  %v5961_v32 = vadd.f32 0.5, %v8020_v10  ;;  %v2095_v21 = vmul.f32 %v5960_v44, %v5960_v44  ;;  %v1902_v18 = vmul.f32 -50.0, %v1870_v14  ;;  %9522 = vst [vmem:[#allocation19_spill] sm:$0xff] %v8052_v54 }
 0x343   :  { %6674 = vpow2.f32 %v1734_v29  ;;  %v1953_v33 = vmul.f32 1.442695, %v1901_v12  ;;  %v5959_v49 = vadd.f32 0.5, %v8015_v4  ;;  %v2093_v51 = vmul.f32 %v5958_v55, %v5958_v55 }
 0x344   :  { %6676 = vpow2.f32 %v1957_v40  ;;  %v2096_v6 = vmul.f32 %v5961_v32, %v5961_v32  ;;  %v2127_v9 = vmul.f32 -50.0, %v2095_v21  ;;  %v5168_v20 = vsel %vm5166_vm4, %v5151_v28, %v4466_v22  ;;  %v8060_v22 = vpop.xlane.xlu0 %1771 }
 0x345   :  { %6678 = vpow2.f32 %v1959_v23  ;;  %v1955_v25 = vmul.f32 1.442695, %v1902_v18  ;;  %v2094_v46 = vmul.f32 %v5959_v49, %v5959_v49  ;;  %v5992_v60 = vadd.f32 0.3, %v8008_v52  ;;  %9523 = vst [vmem:[#allocation20_spill] sm:$0xff] %v8060_v22 }
 0x346   :  { %6680 = vpow2.f32 %v1953_v33  ;;  %v2128_v44 = vmul.f32 -50.0, %v2096_v6  ;;  %v2181_v29 = vmul.f32 1.442695, %v2127_v9  ;;  %v2125_v40 = vmul.f32 -50.0, %v2093_v51 }
 0x347   :  { %6682 = vpow2.f32 %v1955_v25  ;;  %v2126_v14 = vmul.f32 -50.0, %v2094_v46  ;;  %v5993_v12 = vadd.f32 0.3, %v8020_v10  ;;  %v2319_v23 = vmul.f32 %v5992_v60, %v5992_v60 }
 0x348   :  { %v8058_v28 = vsel %vm5183_vm5, %v5168_v20, %v4562_v0  ;;  %6684 = vpow2.f32 %v2181_v29  ;;  %v2183_v32 = vmul.f32 1.442695, %v2128_v44  ;;  %v2177_v21 = vmul.f32 1.442695, %v2125_v40  ;;  %v8071_v44 = vpop.xlane.xlu1 %2223  ;;  %v8074_v22 = vpop.xlane.xlu0 %1995 }
 0x349   :  { %v2179_v18 = vmul.f32 1.442695, %v2126_v14  ;;  %v2320_v33 = vmul.f32 %v5993_v12, %v5993_v12  ;;  %v2351_v49 = vmul.f32 -50.0, %v2319_v23  ;;  %v5990_v6 = vadd.f32 0.3, %v8005_v58  ;;  %9524 = vst [vmem:[#allocation21_spill] sm:$0xff] %v8071_v44 }
 0x34a   :  { %6686 = vpow2.f32 %v2183_v32  ;;  %v5991_v9 = vadd.f32 0.3, %v8015_v4  ;;  %v6024_v51 = vadd.f32 0.1, %v8008_v52  ;;  %v6025_v32 = vadd.f32 0.1, %v8020_v10 }
 0x34b   :  { %v2352_v46 = vmul.f32 -50.0, %v2320_v33  ;;  %6688 = vpow2.f32 %v2179_v18  ;;  %v2405_v29 = vmul.f32 1.442695, %v2351_v49  ;;  %v2317_v40 = vmul.f32 %v5990_v6, %v5990_v6  ;;  %9525 = vst [vmem:[#allocation22_spill] sm:$0xff] %v8074_v22 }
 0x34c   :  { %v2318_v14 = vmul.f32 %v5991_v9, %v5991_v9  ;;  %6690 = vpow2.f32 %v2177_v21  ;;  %v2543_v55 = vmul.f32 %v6024_v51, %v6024_v51  ;;  %v8077_v33 = vadd.f32 -0.5, %v8005_v58  ;;  %v8082_v7 = vpop.xlane.xlu1 %2447 }
 0x34d   :  { %v6669_v60 = vpop.eup %6668  ;;  %v2407_v23 = vmul.f32 1.442695, %v2352_v46  ;;  %6692 = vpow2.f32 %v2405_v29  ;;  %v2349_v0 = vmul.f32 -50.0, %v2317_v40  ;;  %v2544_v49 = vmul.f32 %v6025_v32, %v6025_v32  ;;  %9526 = vst [vmem:[#allocation23_spill] sm:$0xff] %v8082_v7  ;;  %v8087_v32 = vpop.xlane.xlu0 %2219 }
 0x34e   :  { %v6671_v12 = vpop.eup %6670  ;;  %v2350_v20 = vmul.f32 -50.0, %v2318_v14  ;;  %v2575_v6 = vmul.f32 -50.0, %v2543_v55  ;;  %v6022_v14 = vadd.f32 0.1, %v8005_v58  ;;  %v6023_v55 = vadd.f32 0.1, %v8015_v4 }
 0x34f   :  { %v6673_v25 = vpop.eup %6672  ;;  %6694 = vpow2.f32 %v2407_v23  ;;  %v2401_v51 = vmul.f32 1.442695, %v2349_v0  ;;  %v2576_v29 = vmul.f32 -50.0, %v2544_v49  ;;  %v6056_v23 = vadd.f32 -0.1, %v8008_v52  ;;  %9527 = vst [vmem:[#allocation24_spill] sm:$0xff] %v8087_v32 }
 0x350   :  { %v6675_v44 = vpop.eup %6674  ;;  %v1793_v18 = vsel %vm1752_vm0, %v6673_v25, 0.0  ;;  %v2403_v54 = vmul.f32 1.442695, %v2350_v20  ;;  %v2629_v40 = vmul.f32 1.442695, %v2575_v6 }
 0x351   :  { %v6677_v21 = vpop.eup %6676  ;;  %v1797_v9 = vsel %vm1752_vm0, %v6675_v44, 0.0  ;;  %v1794_v46 = vadd.f32 %v6669_v60, %v1793_v18  ;;  %6696 = vpow2.f32 %v2401_v51  ;;  %v2631_v20 = vmul.f32 1.442695, %v2576_v29 }
 0x352   :  { %v6679_v11 = vpop.eup %6678  ;;  %v1798_v22 = vadd.f32 %v6671_v12, %v1797_v9  ;;  %6698 = vpow2.f32 %v2403_v54  ;;  %v2541_v60 = vmul.f32 %v6022_v14, %v6022_v14  ;;  %v2542_v18 = vmul.f32 %v6023_v55, %v6023_v55 }
 0x353   :  { %1795 = vadd.xlane.f32.xlu0 %v1794_v46  ;;  %v2021_v25 = vsel %vm1752_vm0, %v6679_v11, 0.0  ;;  %v6681_v44 = vpop.eup %6680  ;;  %6700 = vpow2.f32 %v2629_v40  ;;  %v6057_v49 = vadd.f32 -0.1, %v8020_v10  ;;  %v2767_v6 = vmul.f32 %v6056_v23, %v6056_v23  ;;  %v8094_v23 = vpop.xlane.xlu1 %2671 }
 0x354   :  { %1799 = vadd.xlane.f32.xlu1 %v1798_v22  ;;  %v2022_v0 = vadd.f32 %v6677_v21, %v2021_v25  ;;  %v6683_v12 = vpop.eup %6682  ;;  %6702 = vpow2.f32 %v2631_v20  ;;  %v2573_v46 = vmul.f32 -50.0, %v2541_v60  ;;  %v6054_v51 = vadd.f32 -0.1, %v8005_v58  ;;  %9528 = vst [vmem:[#allocation25_spill] sm:$0xff] %v8094_v23 }
 0x355   :  { %v6685_v11 = vpop.eup %6684  ;;  %v2017_v9 = vsel %vm1752_vm0, %v6683_v12, 0.0  ;;  %v2574_v21 = vmul.f32 -50.0, %v2542_v18  ;;  %v2768_v54 = vmul.f32 %v6057_v49, %v6057_v49  ;;  %v2799_v29 = vmul.f32 -50.0, %v2767_v6 }
 0x356   :  { %v2018_v22 = vadd.f32 %v6681_v44, %v2017_v9  ;;  %v2625_v25 = vmul.f32 1.442695, %v2573_v46  ;;  %v6055_v40 = vadd.f32 -0.1, %v8015_v4  ;;  %v2765_v55 = vmul.f32 %v6054_v51, %v6054_v51  ;;  %v8097_v9 = vpop.xlane.xlu0 %2443 }
 0x357   :  { %v6687_v14 = vpop.eup %6686  ;;  %v6088_v32 = vadd.f32 -0.3, %v8008_v52  ;;  %v2627_v60 = vmul.f32 1.442695, %v2574_v21  ;;  %v2800_v12 = vmul.f32 -50.0, %v2768_v54  ;;  %9529 = vst [vmem:[#allocation26_spill] sm:$0xff] %v8097_v9  ;;  %v3213_v9 = vmul.f32 %v8077_v33, %v8077_v33 }
 0x358   :  { %2023 = vadd.xlane.f32.xlu1 %v2022_v0  ;;  %2019 = vadd.xlane.f32.xlu0 %v2018_v22  ;;  %v2245_v20 = vsel %vm1752_vm0, %v6687_v14, 0.0  ;;  %v2853_v7 = vmul.f32 1.442695, %v2799_v29  ;;  %v6689_v44 = vpop.eup %6688  ;;  %6704 = vpow2.f32 %v2625_v25  ;;  %v2766_v49 = vmul.f32 %v6055_v40, %v6055_v40 }
 0x359   :  { %v2246_v18 = vadd.f32 %v6685_v11, %v2245_v20  ;;  %v2797_v6 = vmul.f32 -50.0, %v2765_v55  ;;  %v6691_v0 = vpop.eup %6690  ;;  %v2241_v46 = vsel %vm1752_vm0, %v6689_v44, 0.0  ;;  %6706 = vpow2.f32 %v2627_v60 }
 0x35a   :  { %v2855_v51 = vmul.f32 1.442695, %v2800_v12  ;;  %v6089_v23 = vadd.f32 -0.3, %v8020_v10  ;;  %v6693_v22 = vpop.eup %6692  ;;  %v2242_v14 = vadd.f32 %v6691_v0, %v2241_v46  ;;  %6708 = vpow2.f32 %v2853_v7  ;;  %v8104_v12 = vpop.xlane.xlu1 %2895 }
 0x35b   :  { %v2798_v21 = vmul.f32 -50.0, %v2766_v49  ;;  %v2849_v54 = vmul.f32 1.442695, %v2797_v6  ;;  %v2991_v11 = vmul.f32 %v6088_v32, %v6088_v32  ;;  %v6086_v40 = vadd.f32 -0.3, %v8005_v58  ;;  %9530 = vst [vmem:[#allocation27_spill] sm:$0xff] %v8104_v12 }
 0x35c   :  { %2247 = vadd.xlane.f32.xlu1 %v2246_v18  ;;  %v6695_v29 = vpop.eup %6694  ;;  %6710 = vpow2.f32 %v2855_v51  ;;  %v2992_v25 = vmul.f32 %v6089_v23, %v6089_v23  ;;  %2243 = vadd.xlane.f32.xlu0 %v2242_v14  ;;  %v6087_v60 = vadd.f32 -0.3, %v8015_v4  ;;  %v6150_v32 = vadd.f32 -0.7, %v8005_v58  ;;  %v8108_v51 = vpop.xlane.xlu0 %2667 }
 0x35d   :  { %v2469_v55 = vsel %vm1752_vm0, %v6695_v29, 0.0  ;;  %6712 = vpow2.f32 %v2849_v54  ;;  %v2851_v20 = vmul.f32 1.442695, %v2798_v21  ;;  %v3023_v18 = vmul.f32 -50.0, %v2991_v11  ;;  %9531 = vst [vmem:[#allocation28_spill] sm:$0xff] %v8108_v51 }
 0x35e   :  { %v2470_v44 = vadd.f32 %v6693_v22, %v2469_v55  ;;  %v3024_v7 = vmul.f32 -50.0, %v2992_v25  ;;  %v2989_v49 = vmul.f32 %v6086_v40, %v6086_v40  ;;  %v6697_v6 = vpop.eup %6696  ;;  %v2990_v0 = vmul.f32 %v6087_v60, %v6087_v60 }
 0x35f   :  { %6714 = vpow2.f32 %v2851_v20  ;;  %v6151_v23 = vadd.f32 -0.7, %v8015_v4  ;;  %v6699_v46 = vpop.eup %6698  ;;  %v3077_v14 = vmul.f32 1.442695, %v3023_v18  ;;  %v6119_v29 = vadd.f32 -0.5, %v8015_v4 }
 0x360   :  { %2471 = vadd.xlane.f32.xlu1 %v2470_v44  ;;  %v3079_v21 = vmul.f32 1.442695, %v3024_v7  ;;  %v3021_v54 = vmul.f32 -50.0, %v2989_v49  ;;  %v6701_v22 = vpop.eup %6700  ;;  %v2465_v11 = vsel %vm1752_vm0, %v6699_v46, 0.0  ;;  %v3022_v25 = vmul.f32 -50.0, %v2990_v0  ;;  %v8115_v49 = vpop.xlane.xlu1 %3119 }
 0x361   :  { %v3437_v40 = vmul.f32 %v6150_v32, %v6150_v32  ;;  %v3438_v55 = vmul.f32 %v6151_v23, %v6151_v23  ;;  %v6703_v20 = vpop.eup %6702  ;;  %v2466_v60 = vadd.f32 %v6697_v6, %v2465_v11  ;;  %6716 = vpow2.f32 %v3077_v14  ;;  %9532 = vst [vmem:[#allocation29_spill] sm:$0xff] %v8115_v49 }
 0x362   :  { %v3073_v12 = vmul.f32 1.442695, %v3021_v54  ;;  %v2693_v44 = vsel %vm1752_vm0, %v6703_v20, 0.0  ;;  %6718 = vpow2.f32 %v3079_v21  ;;  %v3075_v18 = vmul.f32 1.442695, %v3022_v25  ;;  %v8118_v54 = vpop.xlane.xlu0 %2891 }
 0x363   :  { %v3469_v7 = vmul.f32 -50.0, %v3437_v40  ;;  %2467 = vadd.xlane.f32.xlu0 %v2466_v60  ;;  %v2694_v51 = vadd.f32 %v6701_v22, %v2693_v44  ;;  %v3470_v0 = vmul.f32 -50.0, %v3438_v55  ;;  %v3214_v32 = vmul.f32 %v6119_v29, %v6119_v29  ;;  %9533 = vst [vmem:[#allocation30_spill] sm:$0xff] %v8118_v54 }
 0x364   :  { %6720 = vpow2.f32 %v3073_v12  ;;  %v3245_v6 = vmul.f32 -50.0, %v3213_v9  ;;  %v6182_v46 = vadd.f32 -0.9, %v8005_v58  ;;  %v6183_v11 = vadd.f32 -0.9, %v8015_v4 }
 0x365   :  { %6722 = vpow2.f32 %v3075_v18  ;;  %v3521_v23 = vmul.f32 1.442695, %v3469_v7  ;;  %v6705_v14 = vpop.eup %6704  ;;  %2695 = vadd.xlane.f32.xlu1 %v2694_v51  ;;  %v3523_v33 = vmul.f32 1.442695, %v3470_v0  ;;  %v3246_v21 = vmul.f32 -50.0, %v3214_v32  ;;  %v8125_v32 = vpop.xlane.xlu1 %3343 }
 0x366   :  { %v6120_v25 = vadd.f32 -0.5, %v8008_v52  ;;  %v6707_v40 = vpop.eup %6706  ;;  %v3297_v12 = vmul.f32 1.442695, %v3245_v6  ;;  %v3661_v22 = vmul.f32 %v6182_v46, %v6182_v46  ;;  %v6152_v29 = vadd.f32 -0.7, %v8008_v52  ;;  %9534 = vst [vmem:[#allocation31_spill] sm:$0xff] %v8125_v32 }
 0x367   :  { %6724 = vpow2.f32 %v3521_v23  ;;  %v6709_v55 = vpop.eup %6708  ;;  %v2689_v9 = vsel %vm1752_vm0, %v6707_v40, 0.0  ;;  %v3299_v20 = vmul.f32 1.442695, %v3246_v21  ;;  %v3662_v60 = vmul.f32 %v6183_v11, %v6183_v11 }
 0x368   :  { %6726 = vpow2.f32 %v3523_v33  ;;  %v2690_v51 = vadd.f32 %v6705_v14, %v2689_v9  ;;  %v3693_v18 = vmul.f32 -50.0, %v3661_v22  ;;  %v6153_v7 = vadd.f32 -0.7, %v8020_v10  ;;  %v8129_v14 = vpop.xlane.xlu0 %3115 }
 0x369   :  { %v6711_v44 = vpop.eup %6710  ;;  %6728 = vpow2.f32 %v3297_v12  ;;  %v3694_v6 = vmul.f32 -50.0, %v3662_v60  ;;  %v3439_v46 = vmul.f32 %v6152_v29, %v6152_v29  ;;  %v6121_v21 = vadd.f32 -0.5, %v8020_v10  ;;  %v8134_v32 = vpop.xlane.xlu1 %3567 }
 0x36a   :  { %v6713_v0 = vpop.eup %6712  ;;  %v2917_v23 = vsel %vm1752_vm0, %v6711_v44, 0.0  ;;  %6730 = vpow2.f32 %v3299_v20  ;;  %2691 = vadd.xlane.f32.xlu0 %v2690_v51  ;;  %v3745_v40 = vmul.f32 1.442695, %v3693_v18  ;;  %v3440_v33 = vmul.f32 %v6153_v7, %v6153_v7 }
 0x36b   :  { %v2918_v49 = vadd.f32 %v6709_v55, %v2917_v23  ;;  %v3747_v12 = vmul.f32 1.442695, %v3694_v6  ;;  %v3471_v22 = vmul.f32 -50.0, %v3439_v46  ;;  %v3215_v9 = vmul.f32 %v6120_v25, %v6120_v25 }
 0x36c   :  { %v6715_v11 = vpop.eup %6714  ;;  %v6184_v54 = vadd.f32 -0.9, %v8008_v52  ;;  %6732 = vpow2.f32 %v3745_v40  ;;  %v3472_v20 = vmul.f32 -50.0, %v3440_v33  ;;  %v3216_v29 = vmul.f32 %v6121_v21, %v6121_v21 }
 0x36d   :  { %2919 = vadd.xlane.f32.xlu1 %v2918_v49  ;;  %v2913_v44 = vsel %vm1752_vm0, %v6715_v11, 0.0  ;;  %6734 = vpow2.f32 %v3747_v12  ;;  %v3525_v55 = vmul.f32 1.442695, %v3471_v22  ;;  %v3247_v51 = vmul.f32 -50.0, %v3215_v9  ;;  %v8139_v9 = vpop.xlane.xlu0 %3339 }
 0x36e   :  { %v2914_v60 = vadd.f32 %v6713_v0, %v2913_v44  ;;  %v6717_v18 = vpop.eup %6716  ;;  %v3527_v7 = vmul.f32 1.442695, %v3472_v20  ;;  %v3248_v23 = vmul.f32 -50.0, %v3216_v29  ;;  %v6185_v6 = vadd.f32 -0.9, %v8020_v10 }
 0x36f   :  { %v3663_v46 = vmul.f32 %v6184_v54, %v6184_v54  ;;  %v6719_v25 = vpop.eup %6718  ;;  %6736 = vpow2.f32 %v3525_v55  ;;  %v3301_v49 = vmul.f32 1.442695, %v3247_v51  ;;  %v6216_v40 = vadd.f32 -1.0, %v8008_v52 }
 0x370   :  { %2915 = vadd.xlane.f32.xlu0 %v2914_v60  ;;  %v6217_v0 = vadd.f32 -1.0, %v8020_v10  ;;  %v3141_v21 = vsel %vm1752_vm0, %v6719_v25, 0.0  ;;  %6738 = vpow2.f32 %v3527_v7  ;;  %v3303_v11 = vmul.f32 1.442695, %v3248_v23 }
 0x371   :  { %v6721_v33 = vpop.eup %6720  ;;  %v3664_v12 = vmul.f32 %v6185_v6, %v6185_v6  ;;  %v3142_v54 = vadd.f32 %v6717_v18, %v3141_v21  ;;  %6740 = vpow2.f32 %v3301_v49  ;;  %v3695_v44 = vmul.f32 -50.0, %v3663_v46  ;;  %v8146_v21 = vpop.xlane.xlu1 %3791 }
 0x372   :  { %v6723_v22 = vpop.eup %6722  ;;  %v3887_v20 = vmul.f32 %v6216_v40, %v6216_v40  ;;  %6742 = vpow2.f32 %v3303_v11  ;;  %v3888_v52 = vmul.f32 %v6217_v0, %v6217_v0  ;;  %v6214_v7 = vadd.f32 -1.0, %v8005_v58 }
 0x373   :  { %v3137_v29 = vsel %vm1752_vm0, %v6723_v22, 0.0  ;;  %v3696_v60 = vmul.f32 -50.0, %v3664_v12  ;;  %3143 = vadd.xlane.f32.xlu1 %v3142_v54  ;;  %v3749_v51 = vmul.f32 1.442695, %v3695_v44  ;;  %v4946_v6 = vrot.slane %v7905_v17, %v7984_v30 }
 0x374   :  { %v6725_v55 = vpop.eup %6724  ;;  %v3138_v10 = vadd.f32 %v6721_v33, %v3137_v29  ;;  %v3919_v25 = vmul.f32 -500000.0, %v3887_v20  ;;  %v3920_v49 = vmul.f32 -500000.0, %v3888_v52  ;;  %v6215_v46 = vadd.f32 -1.0, %v8015_v4  ;;  %v8153_v4 = vpop.xlane.xlu0 %3563 }
 0x375   :  { %v6727_v23 = vpop.eup %6726  ;;  %v3751_v18 = vmul.f32 1.442695, %v3696_v60  ;;  %6744 = vpow2.f32 %v3749_v51  ;;  %v3885_v11 = vmul.f32 %v6214_v7, %v6214_v7  ;;  %v4850_v58 = vrot.slane %v7894_v48, %v7984_v30 }
 0x376   :  { %v6729_v40 = vpop.eup %6728  ;;  %3139 = vadd.xlane.f32.xlu0 %v3138_v10  ;;  %v3585_v0 = vsel %vm1752_vm0, %v6727_v23, 0.0  ;;  %v3973_v33 = vmul.f32 1.442695, %v3919_v25  ;;  %v3975_v17 = vmul.f32 1.442695, %v3920_v49  ;;  %v5038_v54 = vrot.slane %v7918_v50, %v7984_v30 }
 0x377   :  { %v6731_v12 = vpop.eup %6730  ;;  %v3586_v22 = vadd.f32 %v6725_v55, %v3585_v0  ;;  %6746 = vpow2.f32 %v3751_v18  ;;  %v3886_v20 = vmul.f32 %v6215_v46, %v6215_v46  ;;  %v4846_v29 = vrot.slane %v7844_v13, %v7984_v30 }
 0x378   :  { %v3361_v44 = vsel %vm1752_vm0, %v6731_v12, 0.0  ;;  %6748 = vpow2.f32 %v3973_v33  ;;  %v3917_v52 = vmul.f32 -500000.0, %v3885_v11  ;;  %v4366_v55 = vrot.slane %v7826_v39, %v7984_v30 }
 0x379   :  { %3587 = vadd.xlane.f32.xlu1 %v3586_v22  ;;  %v3362_v60 = vadd.f32 %v6729_v40, %v3361_v44  ;;  %6750 = vpow2.f32 %v3975_v17  ;;  %v6733_v48 = vpop.eup %6732  ;;  %v9535_v50 = vrot.slane %v7823_v19, %v7984_v30  ;;  %v5235_v51 = vsel %vm5115_vm1, %v4850_v58, %v4946_v6 }
 0x37a   :  { %v3918_v25 = vmul.f32 -500000.0, %v3886_v20  ;;  %v6735_v7 = vpop.eup %6734  ;;  %v9536_v13 = vrot.slane %v7832_v56, %v7984_v30  ;;  %v9537_v18 = vrot.slane %v7859_v62, %v7984_v30  ;;  %v5042_v19 = vrot.slane %v7873_v34, %v7984_v30  ;;  %v8183_v56 = vpop.xlane.xlu1 %4011 }
 0x37b   :  { %v5202_v10 = vsel %vm5200_vm6, %v8058_v28, %v9535_v50  ;;  %3363 = vadd.xlane.f32.xlu0 %v3362_v60  ;;  %v3969_v28 = vmul.f32 1.442695, %v3917_v52  ;;  %v4462_v6 = vrot.slane %v7837_v1, %v7984_v30  ;;  %v3809_v46 = vsel %vm1752_vm0, %v6735_v7, 0.0 }
 0x37c   :  { %v8170_v23 = vsel %vm5217_vm7, %v5202_v10, %v9536_v13  ;;  %v5234_v39 = vsel %vm5115_vm1, %v4846_v29, %v9537_v18  ;;  %v3971_v40 = vmul.f32 1.442695, %v3918_v25  ;;  %v6737_v0 = vpop.eup %6736  ;;  %v9538_v62 = vrot.slane %v7815_v5, %v7984_v30 }
 0x37d   :  { %v8181_v49 = vsel %vm5132_vm2, %v5234_v39, %v5038_v54  ;;  %v4558_v33 = vrot.slane %v7849_v37, %v7984_v30  ;;  %v8194_v1 = vsel %vm5132_vm2, %v5235_v51, %v5042_v19  ;;  %v3810_v11 = vadd.f32 %v6733_v48, %v3809_v46  ;;  %v6739_v12 = vpop.eup %6738  ;;  %v8200_v54 = vpop.xlane.xlu0 %3787 }
 0x37e   :  { %v5133_v34 = vsel %vm5132_vm2, %v8031_v63, %v9538_v62  ;;  %v5284_v22 = vadd.f32 1.0, %v8170_v23  ;;  %v4654_v17 = vrot.slane %v7866_v61, %v7984_v30  ;;  %6752 = vpow2.f32 %v3971_v40  ;;  %v6741_v5 = vpop.eup %6740  ;;  %v8207_v60 = vpop.xlane.xlu1 %1783 }
 0x37f   :  { %v5150_v58 = vsel %vm5149_vm3, %v5133_v34, %v4366_v55  ;;  %v4750_v63 = vrot.slane %v7877_v59, %v7984_v30  ;;  %v5275_v37 = vadd.f32 1.0, %v8181_v49  ;;  %3811 = vadd.xlane.f32.xlu1 %v3810_v11  ;;  %v3589_v44 = vsel %vm1752_vm0, %v6739_v12, 0.0  ;;  %v6743_v20 = vpop.eup %6742 }
 0x380   :  { %6754 = vpow2.f32 %v3969_v28  ;;  %v5167_v29 = vsel %vm5166_vm4, %v5150_v58, %v4462_v6  ;;  %v3590_v52 = vadd.f32 %v6737_v0, %v3589_v44  ;;  %v5293_v61 = vadd.f32 1.0, %v8194_v1 }
 0x381   :  { %v5184_v48 = vsel %vm5183_vm5, %v5167_v29, %v4558_v33  ;;  %v3365_v55 = vsel %vm1752_vm0, %v6743_v20, 0.0  ;;  %6756 = vlog2.f32 %v5284_v22  ;;  %v8216_v7 = vpop.xlane.xlu0 %4015  ;;  %v4182_v62 = vrot.slane %v7929_v57, %v7984_v30 }
 0x382   :  { %v5201_v59 = vsel %vm5200_vm6, %v5184_v48, %v4654_v17  ;;  %3591 = vadd.xlane.f32.xlu0 %v3590_v52  ;;  %v3366_v50 = vadd.f32 %v6741_v5, %v3365_v55  ;;  %v6745_v10 = vpop.eup %6744  ;;  %6758 = vlog2.f32 %v5275_v37  ;;  %v8220_v28 = vpop.xlane.xlu1 %2007  ;;  %v4086_v34 = vrot.slane %v7884_v8, %v7984_v30 }
 0x383   :  { %v8214_v51 = vsel %vm5217_vm7, %v5201_v59, %v4750_v63  ;;  %6760 = vlog2.f32 %v5293_v61  ;;  %v4090_v33 = vrot.slane %v7897_v27, %v7984_v30  ;;  %v4186_v11 = vrot.slane %v7910_v53, %v7984_v30 }
 0x384   :  { %v6747_v25 = vpop.eup %6746  ;;  %3367 = vadd.xlane.f32.xlu1 %v3366_v50  ;;  %v5266_v19 = vadd.f32 1.0, %v8214_v51  ;;  %v4278_v58 = vrot.slane %v7939_v36, %v7984_v30  ;;  %v5287_v22 = vmul.f32 -0.5, %v8170_v23  ;;  %v4374_v57 = vrot.slane %v7949_v31, %v7984_v30 }
 0x385   :  { %v6749_v13 = vpop.eup %6748  ;;  %v3813_v18 = vsel %vm1752_vm0, %v6747_v25, 0.0  ;;  %v8223_v40 = vpop.xlane.xlu0 %1779  ;;  %v5278_v27 = vmul.f32 -0.5, %v8181_v49  ;;  %v4470_v53 = vrot.slane %v7957_v43, %v7984_v30  ;;  %v4282_v63 = vrot.slane %v7923_v47, %v7984_v30 }
 0x386   :  { %v6751_v39 = vpop.eup %6750  ;;  %v3814_v6 = vadd.f32 %v6745_v10, %v3813_v18  ;;  %6762 = vlog2.f32 %v5266_v19  ;;  %v8238_v5 = vpop.xlane.xlu1 %2231  ;;  %v5118_v36 = vsel %vm5115_vm1, %v4086_v34, %v4182_v62  ;;  %v5119_v44 = vsel %vm5115_vm1, %v4090_v33, %v4186_v11 }
 0x387   :  { %v4037_v46 = vsel %vm1752_vm0, %v6751_v39, 0.0  ;;  %v4566_v31 = vrot.slane %v7967_v42, %v7984_v30  ;;  %v5296_v29 = vmul.f32 -0.5, %v8194_v1  ;;  %v5135_v61 = vsel %vm5132_vm2, %v5118_v36, %v4278_v58 }
 0x388   :  { %3815 = vadd.xlane.f32.xlu0 %v3814_v6  ;;  %v4038_v0 = vadd.f32 %v6749_v13, %v4037_v46  ;;  %v4662_v43 = vrot.slane %v7978_v15, %v7984_v30  ;;  %v5288_v47 = vadd.f32 1.0, %v5287_v22  ;;  %v5290_v48 = vand.u32 2147483647, %v8170_v23 }
 0x389   :  { %v8250_v20 = vpop.xlane.xlu0 %2003  ;;  %v5152_v59 = vsel %vm5149_vm3, %v5135_v61, %v4374_v57  ;;  %v4378_v42 = vrot.slane %v7936_v26, %v7984_v30  ;;  %v4758_v50 = vrot.slane %v7994_v35, %v7984_v30  ;;  %v5279_v10 = vadd.f32 1.0, %v5278_v27  ;;  %v9549_v27 = vld [vmem:[#allocation16_spill] sm:$0xff] }
 0x38a   :  { %4039 = vadd.xlane.f32.xlu1 %v4038_v0  ;;  %v5169_v13 = vsel %vm5166_vm4, %v5152_v59, %v4470_v53  ;;  %v5136_v15 = vsel %vm5132_vm2, %v5119_v44, %v4282_v63  ;;  %v5281_v18 = vand.u32 2147483647, %v8181_v49  ;;  %v5269_v39 = vmul.f32 -0.5, %v8214_v51  ;;  %v8267_v6 = vpop.xlane.xlu1 %2455 }
 0x38b   :  { %v6753_v12 = vpop.eup %6752  ;;  %v5186_v19 = vsel %vm5183_vm5, %v5169_v13, %v4566_v31  ;;  %v5297_v46 = vadd.f32 1.0, %v5296_v29  ;;  %v5299_v26 = vand.u32 2147483647, %v8194_v1  ;;  %v4474_v62 = vrot.slane %v7944_v2, %v7984_v30 }
 0x38c   :  { %v4033_v8 = vsel %vm1752_vm0, %v6753_v12, 0.0  ;;  %v5203_v35 = vsel %vm5200_vm6, %v5186_v19, %v4662_v43  ;;  %v5289_v33 = vmul.f32 %v5288_v47, %v8170_v23  ;;  %v5153_v11 = vsel %vm5149_vm3, %v5136_v15, %v4378_v42 }
 0x38d   :  { %v6755_v17 = vpop.eup %6754  ;;  %v8276_v12 = vsel %vm5217_vm7, %v5203_v35, %v4758_v50  ;;  %v4570_v58 = vrot.slane %v7954_v24, %v7984_v30  ;;  %v8280_v22 = vpop.xlane.xlu0 %2227  ;;  %v4666_v57 = vrot.slane %v7963_v45, %v7984_v30  ;;  %v5270_v2 = vadd.f32 1.0, %v5269_v39 }
 0x38e   :  { %v4034_v37 = vadd.f32 %v6755_v17, %v4033_v8  ;;  %v6757_v52 = vpop.eup %6756  ;;  %v5280_v8 = vmul.f32 %v5279_v10, %v8181_v49  ;;  %vm8285_vm10 = vcmp.lt.f32.partialorder %v5290_v48, 0.0004427343  ;;  %v4762_v23 = vrot.slane %v7976_v16, %v7984_v30  ;;  %v8309_v31 = vpop.xlane.xlu1 %2679 }
 0x38f   :  { %v6759_v55 = vpop.eup %6758  ;;  %v5286_v0 = vmul.f32 0.6931472, %v6757_v52  ;;  %vm8291_vm11 = vcmp.lt.f32.partialorder %v5281_v18, 0.0004427343  ;;  %v5298_v24 = vmul.f32 %v5297_v46, %v8194_v1  ;;  %v5170_v49 = vsel %vm5166_vm4, %v5153_v11, %v4474_v62 }
 0x390   :  { %4035 = vadd.xlane.f32.xlu0 %v4034_v37  ;;  %v6761_v25 = vpop.eup %6760  ;;  %v5277_v34 = vmul.f32 0.6931472, %v6759_v55  ;;  %v5302_v37 = vadd.f32 1.0, %v8276_v12  ;;  %vm8302_vm12 = vcmp.lt.f32.partialorder %v5299_v26, 0.0004427343  ;;  %v5187_v16 = vsel %vm5183_vm5, %v5170_v49, %v4570_v58 }
 0x391   :  { %v5295_v17 = vmul.f32 0.6931472, %v6761_v25  ;;  %v5292_v63 = vsel %vm8285_vm10, %v5289_v33, %v5286_v0  ;;  %v4950_v1 = vrot.slane %v8036_v41, %v7984_v30  ;;  %v5305_v52 = vmul.f32 -0.5, %v8276_v12  ;;  %v8327_v59 = vpop.xlane.xlu0 %2451 }
 0x392   :  { %v5283_v36 = vsel %vm8291_vm11, %v5280_v8, %v5277_v34  ;;  %v5204_v61 = vsel %vm5200_vm6, %v5187_v16, %v4666_v57  ;;  %v8316_v43 = vmul.f32 %v5270_v2, %v8214_v51  ;;  %v8320_v48 = vsel %vm5554_vm8, %v5292_v63, 0.0  ;;  %v8357_v11 = vpop.xlane.xlu1 %2903 }
 0x393   :  { %v6763_v45 = vpop.eup %6762  ;;  %v5301_v29 = vsel %vm8302_vm12, %v5298_v24, %v5295_v17  ;;  %9545 = vst [vmem:[#allocation32_spill] sm:$0xff] %v8320_v48  ;;  %v4854_v41 = vrot.slane %v8013_v3, %v7984_v30  ;;  %v8325_v55 = vsel %vm5217_vm7, %v5204_v61, %v4762_v23  ;;  %v8332_v50 = vsel %vm5558_vm9, %v5283_v36, 0.0  ;;  %9548 = vst [vmem:[#allocation35_spill] sm:$0xff] %v8357_v11 }
 0x394   :  { %9546 = vst [vmem:[#allocation33_spill] sm:$0xff] %v8332_v50  ;;  %v8334_v10 = vmul.f32 0.6931472, %v6763_v45  ;;  %v8340_v15 = vsel %vm5558_vm9, %v5301_v29, 0.0  ;;  %6764 = vlog2.f32 %v5302_v37  ;;  %v8348_v26 = vadd.f32 1.0, %v5305_v52 }
 0x395   :  { %9547 = vst [vmem:[#allocation34_spill] sm:$0xff] %v8340_v15  ;;  %v5236_v18 = vsel %vm5115_vm1, %v4854_v41, %v4950_v1  ;;  %v8351_v0 = vadd.f32 1.0, %v8325_v55  ;;  %v5046_v23 = vrot.slane %v9549_v27, %v7984_v30  ;;  %v8365_v63 = vpop.xlane.xlu0 %2675 }
 0x39b   :  { %v8329_v42 = vpop.f32.mrf.mxu0  ;;  %v8336_v25 = vpop.f32.mrf.mxu1 }
 0x39c   :  { %v5898_v13 = vadd.f32 0.9, %v8329_v42  ;;  %v5900_v19 = vadd.f32 0.9, %v8336_v25  ;;  %v5932_v46 = vadd.f32 0.7, %v8336_v25 }
 0x39d   :  { %v8344_v39 = vpop.f32.mrf.mxu0  ;;  %v8353_v35 = vpop.f32.mrf.mxu1  ;;  %v5930_v33 = vadd.f32 0.7, %v8329_v42  ;;  %v5994_v3 = vadd.f32 0.3, %v8329_v42 }
 0x39e   :  { %v5899_v62 = vadd.f32 0.9, %v8344_v39  ;;  %v1648_v34 = vmul.f32 %v5898_v13, %v5898_v13  ;;  %v5901_v58 = vadd.f32 0.9, %v8353_v35  ;;  %v1650_v17 = vmul.f32 %v5900_v19, %v5900_v19 }
 0x39f   :  { %v5933_v57 = vadd.f32 0.7, %v8353_v35  ;;  %v1875_v8 = vmul.f32 %v5932_v46, %v5932_v46  ;;  %v5931_v1 = vadd.f32 0.7, %v8344_v39  ;;  %v1873_v29 = vmul.f32 %v5930_v33, %v5930_v33 }
 0x3a0   :  { %v1649_v53 = vmul.f32 %v5899_v62, %v5899_v62  ;;  %v1680_v24 = vmul.f32 -50.0, %v1648_v34  ;;  %v1651_v45 = vmul.f32 %v5901_v58, %v5901_v58  ;;  %v1682_v49 = vmul.f32 -50.0, %v1650_v17  ;;  %v8372_v58 = vpop.xlane.xlu1 %3127 }
 0x3a1   :  { %v1876_v37 = vmul.f32 %v5933_v57, %v5933_v57  ;;  %v1907_v36 = vmul.f32 -50.0, %v1875_v8  ;;  %v5964_v13 = vadd.f32 0.5, %v8336_v25  ;;  %v1874_v62 = vmul.f32 %v5931_v1, %v5931_v1  ;;  %9550 = vst [vmem:[#allocation16_spill] sm:$0xff] %v8372_v58  ;;  %v9551_v8 = vld [vmem:[#allocation15_spill] sm:$0xff] }
 0x3a2   :  { %v1681_v44 = vmul.f32 -50.0, %v1649_v53  ;;  %v1736_v16 = vmul.f32 1.442695, %v1680_v24  ;;  %v1683_v52 = vmul.f32 -50.0, %v1651_v45  ;;  %v1740_v61 = vmul.f32 1.442695, %v1682_v49  ;;  %v8377_v24 = vpop.xlane.xlu0 %2899 }
 0x3a3   :  { %v1908_v41 = vmul.f32 -50.0, %v1876_v37  ;;  %v1965_v46 = vmul.f32 1.442695, %v1907_v36  ;;  %v8370_v34 = vsel %vm5132_vm2, %v5236_v18, %v5046_v23  ;;  %v4954_v33 = vrot.slane %v9551_v8, %v7984_v30  ;;  %9552 = vst [vmem:[#allocation15_spill] sm:$0xff] %v8377_v24  ;;  %v9553_v36 = vld [vmem:[#allocation11_spill] sm:$0xff] }
 0x3a4   :  { %6766 = vpow2.f32 %v1736_v16  ;;  %v1738_v19 = vmul.f32 1.442695, %v1681_v44  ;;  %v1742_v17 = vmul.f32 1.442695, %v1683_v52  ;;  %v1905_v27 = vmul.f32 -50.0, %v1873_v29  ;;  %v8382_v16 = vpop.eup %6764 }
 0x3a5   :  { %6768 = vpow2.f32 %v1740_v61  ;;  %v1967_v57 = vmul.f32 1.442695, %v1908_v41  ;;  %v5962_v53 = vadd.f32 0.5, %v8329_v42  ;;  %v1906_v45 = vmul.f32 -50.0, %v1874_v62  ;;  %v9554_v62 = vld [vmem:[#allocation12_spill] sm:$0xff] }
 0x3a6   :  { %6770 = vpow2.f32 %v1738_v19  ;;  %v5965_v49 = vadd.f32 0.5, %v8353_v35  ;;  %v2099_v18 = vmul.f32 %v5964_v13, %v5964_v13  ;;  %v5311_v23 = vadd.f32 1.0, %v8370_v34  ;;  %v8387_v13 = vpop.xlane.xlu1 %3351 }
 0x3a7   :  { %6772 = vpow2.f32 %v1742_v17  ;;  %v1961_v37 = vmul.f32 1.442695, %v1905_v27  ;;  %v6208_v44 = vadd.f32 -1.0, %v9553_v36  ;;  %v1963_v1 = vmul.f32 1.442695, %v1906_v45  ;;  %9555 = vst [vmem:[#allocation11_spill] sm:$0xff] %v8387_v13 }
 0x3a8   :  { %6774 = vpow2.f32 %v1965_v46  ;;  %v2100_v29 = vmul.f32 %v5965_v49, %v5965_v49  ;;  %v2131_v52 = vmul.f32 -50.0, %v2099_v18  ;;  %v5963_v61 = vadd.f32 0.5, %v8344_v39  ;;  %v8390_v49 = vpop.xlane.xlu0 %3123 }
 0x3a9   :  { %6776 = vpow2.f32 %v1967_v57  ;;  %v2097_v41 = vmul.f32 %v5962_v53, %v5962_v53  ;;  %v5996_v19 = vadd.f32 0.3, %v8336_v25  ;;  %v6209_v17 = vadd.f32 -1.0, %v9554_v62  ;;  %9556 = vst [vmem:[#allocation12_spill] sm:$0xff] %v8390_v49 }
 0x3aa   :  { %6778 = vpow2.f32 %v1963_v1  ;;  %v2132_v46 = vmul.f32 -50.0, %v2100_v29  ;;  %v2189_v8 = vmul.f32 1.442695, %v2131_v52  ;;  %v5997_v27 = vadd.f32 0.3, %v8353_v35 }
 0x3ab   :  { %6780 = vpow2.f32 %v1961_v37  ;;  %v2098_v36 = vmul.f32 %v5963_v61, %v5963_v61  ;;  %v2129_v57 = vmul.f32 -50.0, %v2097_v41  ;;  %v2323_v45 = vmul.f32 %v5996_v19, %v5996_v19 }
 0x3ac   :  { %6782 = vpow2.f32 %v2189_v8  ;;  %v2191_v18 = vmul.f32 1.442695, %v2132_v46  ;;  %v2324_v53 = vmul.f32 %v5997_v27, %v5997_v27  ;;  %v5995_v1 = vadd.f32 0.3, %v8344_v39  ;;  %v9558_v27 = vld [vmem:[#allocation18_spill] sm:$0xff] }
 0x3ad   :  { %v2130_v47 = vmul.f32 -50.0, %v2098_v36  ;;  %v2185_v62 = vmul.f32 1.442695, %v2129_v57  ;;  %v2355_v2 = vmul.f32 -50.0, %v2323_v45  ;;  %v9557_v29 = vrot.slane %v7990_v38, %v7984_v30  ;;  %v8400_v57 = vpop.xlane.xlu1 %3575 }
 0x3ae   :  { %6784 = vpow2.f32 %v2191_v18  ;;  %v2356_v52 = vmul.f32 -50.0, %v2324_v53  ;;  %v3879_v61 = vmul.f32 %v6208_v44, %v6208_v44  ;;  %v3880_v8 = vmul.f32 %v6209_v17, %v6209_v17  ;;  %9559 = vst [vmem:[#allocation18_spill] sm:$0xff] %v8400_v57 }
 0x3af   :  { %v5237_v37 = vsel %vm5115_vm1, %v9557_v29, %v4954_v33  ;;  %v2187_v41 = vmul.f32 1.442695, %v2130_v47  ;;  %v2413_v19 = vmul.f32 1.442695, %v2355_v2  ;;  %6786 = vlog2.f32 %v5311_v23  ;;  %v8407_v23 = vpop.xlane.xlu0 %3347 }
 0x3b0   :  { %v5050_v36 = vrot.slane %v9558_v27, %v7984_v30  ;;  %6788 = vpow2.f32 %v2185_v62  ;;  %v2415_v45 = vmul.f32 1.442695, %v2356_v52  ;;  %v2321_v48 = vmul.f32 %v5994_v3, %v5994_v3  ;;  %9560 = vst [vmem:[#allocation36_spill] sm:$0xff] %v8407_v23 }
 0x3b1   :  { %v6767_v46 = vpop.eup %6766  ;;  %6790 = vpow2.f32 %v2187_v41  ;;  %v2322_v38 = vmul.f32 %v5995_v1, %v5995_v1  ;;  %v6028_v33 = vadd.f32 0.1, %v8336_v25  ;;  %v6029_v44 = vadd.f32 0.1, %v8353_v35  ;;  %v8416_v50 = vpop.xlane.xlu1 %3799 }
 0x3b2   :  { %v6769_v15 = vpop.eup %6768  ;;  %v8405_v2 = vsel %vm5132_vm2, %v5237_v37, %v5050_v36  ;;  %6792 = vpow2.f32 %v2413_v19  ;;  %v2353_v17 = vmul.f32 -50.0, %v2321_v48  ;;  %v8409_v18 = vmul.f32 -500000.0, %v3879_v61  ;;  %9561 = vst [vmem:[#allocation37_spill] sm:$0xff] %v8416_v50 }
 0x3b3   :  { %v6771_v47 = vpop.eup %6770  ;;  %6794 = vpow2.f32 %v2415_v45  ;;  %v2354_v62 = vmul.f32 -50.0, %v2322_v38  ;;  %v8412_v1 = vmul.f32 -500000.0, %v3880_v8  ;;  %v6026_v37 = vadd.f32 0.1, %v8329_v42 }
 0x3b4   :  { %v6773_v53 = vpop.eup %6772  ;;  %v1801_v3 = vsel %vm1752_vm0, %v6771_v47, 0.0  ;;  %v2409_v27 = vmul.f32 1.442695, %v2353_v17  ;;  %v2547_v48 = vmul.f32 %v6028_v33, %v6028_v33  ;;  %v2548_v61 = vmul.f32 %v6029_v44, %v6029_v44  ;;  %v8426_v44 = vpop.xlane.xlu0 %3571 }
 0x3b5   :  { %v6775_v29 = vpop.eup %6774  ;;  %v1805_v52 = vsel %vm1752_vm0, %v6773_v53, 0.0  ;;  %v1802_v41 = vadd.f32 %v6767_v46, %v1801_v3  ;;  %v2411_v19 = vmul.f32 1.442695, %v2354_v62  ;;  %v6027_v8 = vadd.f32 0.1, %v8344_v39  ;;  %9562 = vst [vmem:[#allocation38_spill] sm:$0xff] %v8426_v44 }
 0x3b6   :  { %v6777_v36 = vpop.eup %6776  ;;  %v1806_v57 = vadd.f32 %v6769_v15, %v1805_v52  ;;  %6796 = vpow2.f32 %v2409_v27  ;;  %v8421_v38 = vadd.f32 1.0, %v8405_v2  ;;  %v2579_v17 = vmul.f32 -50.0, %v2547_v48 }
 0x3b7   :  { %1803 = vadd.xlane.f32.xlu0 %v1802_v41  ;;  %v2029_v45 = vsel %vm1752_vm0, %v6777_v36, 0.0  ;;  %v6779_v46 = vpop.eup %6778  ;;  %6798 = vpow2.f32 %v2411_v19  ;;  %v8424_v15 = vadd.f32 -0.5, %v8329_v42  ;;  %v2580_v3 = vmul.f32 -50.0, %v2548_v61 }
 0x3b8   :  { %1807 = vadd.xlane.f32.xlu1 %v1806_v57  ;;  %v2030_v47 = vadd.f32 %v6775_v29, %v2029_v45  ;;  %v6781_v33 = vpop.eup %6780  ;;  %v2025_v53 = vsel %vm1752_vm0, %v6779_v46, 0.0  ;;  %v2545_v62 = vmul.f32 %v6026_v37, %v6026_v37  ;;  %v2546_v52 = vmul.f32 %v6027_v8, %v6027_v8 }
 0x3b9   :  { %v6783_v41 = vpop.eup %6782  ;;  %v2026_v27 = vadd.f32 %v6781_v33, %v2025_v53  ;;  %v2637_v36 = vmul.f32 1.442695, %v2579_v17  ;;  %v6060_v50 = vadd.f32 -0.1, %v8336_v25  ;;  %v6061_v57 = vadd.f32 -0.1, %v8353_v35  ;;  %v8435_v17 = vpop.xlane.xlu1 %4019 }
 0x3ba   :  { %v2639_v29 = vmul.f32 1.442695, %v2580_v3  ;;  %v2577_v19 = vmul.f32 -50.0, %v2545_v62  ;;  %v2578_v48 = vmul.f32 -50.0, %v2546_v52  ;;  %v6058_v45 = vadd.f32 -0.1, %v8329_v42 }
 0x3bb   :  { %v6785_v23 = vpop.eup %6784  ;;  %2027 = vadd.xlane.f32.xlu0 %v2026_v27  ;;  %6800 = vpow2.f32 %v2637_v36  ;;  %v2771_v46 = vmul.f32 %v6060_v50, %v6060_v50  ;;  %v2772_v61 = vmul.f32 %v6061_v57, %v6061_v57  ;;  %v6059_v37 = vadd.f32 -0.1, %v8344_v39  ;;  %9563 = vst [vmem:[#allocation39_spill] sm:$0xff] %v8435_v17  ;;  %v8438_v36 = vpop.xlane.xlu0 %3795 }
 0x3bc   :  { %2031 = vadd.xlane.f32.xlu1 %v2030_v47  ;;  %v8433_v8 = vpop.eup %6786  ;;  %v2253_v33 = vsel %vm1752_vm0, %v6785_v23, 0.0  ;;  %6802 = vpow2.f32 %v2639_v29  ;;  %v2633_v53 = vmul.f32 1.442695, %v2577_v19  ;;  %v2635_v3 = vmul.f32 1.442695, %v2578_v48  ;;  %9564 = vst [vmem:[#allocation40_spill] sm:$0xff] %v8438_v36 }
 0x3bd   :  { %v6789_v62 = vpop.eup %6788  ;;  %v2254_v52 = vadd.f32 %v6783_v41, %v2253_v33  ;;  %v2803_v44 = vmul.f32 -50.0, %v2771_v46  ;;  %v2804_v13 = vmul.f32 -50.0, %v2772_v61  ;;  %v2769_v47 = vmul.f32 %v6058_v45, %v6058_v45  ;;  %v8443_v48 = vpop.xlane.xlu1 %1791 }
 0x3be   :  { %v6791_v27 = vpop.eup %6790  ;;  %6804 = vpow2.f32 %v2633_v53  ;;  %v2770_v50 = vmul.f32 %v6059_v37, %v6059_v37  ;;  %v6092_v57 = vadd.f32 -0.3, %v8336_v25  ;;  %v6093_v49 = vadd.f32 -0.3, %v8353_v35 }
 0x3bf   :  { %v6793_v17 = vpop.eup %6792  ;;  %v2249_v23 = vsel %vm1752_vm0, %v6791_v27, 0.0  ;;  %6806 = vpow2.f32 %v2635_v3  ;;  %v2861_v29 = vmul.f32 1.442695, %v2803_v44  ;;  %v2863_v19 = vmul.f32 1.442695, %v2804_v13  ;;  %v8447_v58 = vpop.xlane.xlu0 %1787 }
 0x3c0   :  { %2255 = vadd.xlane.f32.xlu1 %v2254_v52  ;;  %v6795_v41 = vpop.eup %6794  ;;  %v2250_v45 = vadd.f32 %v6789_v62, %v2249_v23  ;;  %v2801_v46 = vmul.f32 -50.0, %v2769_v47  ;;  %v2802_v61 = vmul.f32 -50.0, %v2770_v50  ;;  %v2995_v33 = vmul.f32 %v6092_v57, %v6092_v57  ;;  %9565 = vst [vmem:[#allocation41_spill] sm:$0xff] %v8447_v58 }
 0x3c1   :  { %v2477_v37 = vsel %vm1752_vm0, %v6795_v41, 0.0  ;;  %6808 = vpow2.f32 %v2861_v29  ;;  %v2996_v53 = vmul.f32 %v6093_v49, %v6093_v49  ;;  %v6090_v36 = vadd.f32 -0.3, %v8329_v42  ;;  %v8454_v41 = vpop.xlane.xlu1 %2015 }
 0x3c2   :  { %2251 = vadd.xlane.f32.xlu0 %v2250_v45  ;;  %v2478_v52 = vadd.f32 %v6793_v17, %v2477_v37  ;;  %6810 = vpow2.f32 %v2863_v19  ;;  %v2857_v44 = vmul.f32 1.442695, %v2801_v46  ;;  %v2859_v13 = vmul.f32 1.442695, %v2802_v61 }
 0x3c3   :  { %v6797_v3 = vpop.eup %6796  ;;  %v3027_v27 = vmul.f32 -50.0, %v2995_v33  ;;  %v3028_v24 = vmul.f32 -50.0, %v2996_v53  ;;  %v6091_v62 = vadd.f32 -0.3, %v8344_v39  ;;  %v2993_v47 = vmul.f32 %v6090_v36, %v6090_v36 }
 0x3c4   :  { %v6799_v50 = vpop.eup %6798  ;;  %2479 = vadd.xlane.f32.xlu1 %v2478_v52  ;;  %6812 = vpow2.f32 %v2857_v44  ;;  %v6154_v49 = vadd.f32 -0.7, %v8329_v42  ;;  %v6155_v57 = vadd.f32 -0.7, %v8344_v39  ;;  %v6123_v23 = vadd.f32 -0.5, %v8344_v39  ;;  %v8458_v44 = vpop.xlane.xlu0 %2011 }
 0x3c5   :  { %v2473_v17 = vsel %vm1752_vm0, %v6799_v50, 0.0  ;;  %6814 = vpow2.f32 %v2859_v13  ;;  %v3085_v29 = vmul.f32 1.442695, %v3027_v27  ;;  %v3087_v19 = vmul.f32 1.442695, %v3028_v24  ;;  %9566 = vst [vmem:[#allocation42_spill] sm:$0xff] %v8458_v44 }
 0x3c6   :  { %v2474_v45 = vadd.f32 %v6797_v3, %v2473_v17  ;;  %v2994_v46 = vmul.f32 %v6091_v62, %v6091_v62  ;;  %v3025_v61 = vmul.f32 -50.0, %v2993_v47  ;;  %v3441_v36 = vmul.f32 %v6154_v49, %v6154_v49 }
 0x3c7   :  { %6816 = vpow2.f32 %v3085_v29  ;;  %v3442_v33 = vmul.f32 %v6155_v57, %v6155_v57  ;;  %v3217_v37 = vmul.f32 %v8424_v15, %v8424_v15  ;;  %v3218_v53 = vmul.f32 %v6123_v23, %v6123_v23 }
 0x3c8   :  { %v6801_v52 = vpop.eup %6800  ;;  %2475 = vadd.xlane.f32.xlu0 %v2474_v45  ;;  %6818 = vpow2.f32 %v3087_v19  ;;  %v3026_v13 = vmul.f32 -50.0, %v2994_v46  ;;  %v3081_v27 = vmul.f32 1.442695, %v3025_v61  ;;  %v3473_v24 = vmul.f32 -50.0, %v3441_v36  ;;  %v8462_v46 = vpop.xlane.xlu1 %2239 }
 0x3c9   :  { %v6803_v50 = vpop.eup %6802  ;;  %v3474_v11 = vmul.f32 -50.0, %v3442_v33  ;;  %v3249_v3 = vmul.f32 -50.0, %v3217_v37  ;;  %v3250_v62 = vmul.f32 -50.0, %v3218_v53  ;;  %v6186_v47 = vadd.f32 -0.9, %v8329_v42  ;;  %9567 = vst [vmem:[#allocation43_spill] sm:$0xff] %v8462_v46 }
 0x3ca   :  { %v2701_v49 = vsel %vm1752_vm0, %v6803_v50, 0.0  ;;  %6820 = vpow2.f32 %v3081_v27  ;;  %v3083_v57 = vmul.f32 1.442695, %v3026_v13  ;;  %v3529_v15 = vmul.f32 1.442695, %v3473_v24  ;;  %v8469_v13 = vpop.xlane.xlu0 %2235 }
 0x3cb   :  { %v6805_v23 = vpop.eup %6804  ;;  %v2702_v17 = vadd.f32 %v6801_v52, %v2701_v49  ;;  %v3531_v29 = vmul.f32 1.442695, %v3474_v11  ;;  %v3305_v58 = vmul.f32 1.442695, %v3249_v3  ;;  %v3307_v45 = vmul.f32 1.442695, %v3250_v62 }
 0x3cc   :  { %v6807_v19 = vpop.eup %6806  ;;  %6822 = vpow2.f32 %v3083_v57  ;;  %v6187_v61 = vadd.f32 -0.9, %v8344_v39  ;;  %v3665_v36 = vmul.f32 %v6186_v47, %v6186_v47  ;;  %v6156_v33 = vadd.f32 -0.7, %v8336_v25  ;;  %9568 = vst [vmem:[#allocation44_spill] sm:$0xff] %v8469_v13 }
 0x3cd   :  { %2703 = vadd.xlane.f32.xlu1 %v2702_v17  ;;  %v2697_v37 = vsel %vm1752_vm0, %v6807_v19, 0.0  ;;  %6824 = vpow2.f32 %v3529_v15  ;;  %v6157_v53 = vadd.f32 -0.7, %v8353_v35  ;;  %v6124_v52 = vadd.f32 -0.5, %v8336_v25 }
 0x3ce   :  { %v6809_v11 = vpop.eup %6808  ;;  %v2698_v27 = vadd.f32 %v6805_v23, %v2697_v37  ;;  %6826 = vpow2.f32 %v3531_v29  ;;  %v3666_v24 = vmul.f32 %v6187_v61, %v6187_v61  ;;  %v3697_v50 = vmul.f32 -50.0, %v3665_v36  ;;  %v8473_v61 = vpop.xlane.xlu1 %2463 }
 0x3cf   :  { %v6811_v3 = vpop.eup %6810  ;;  %6828 = vpow2.f32 %v3305_v58  ;;  %v3443_v62 = vmul.f32 %v6156_v33, %v6156_v33  ;;  %v3444_v47 = vmul.f32 %v6157_v53, %v6157_v53  ;;  %v6125_v49 = vadd.f32 -0.5, %v8353_v35 }
 0x3d0   :  { %2699 = vadd.xlane.f32.xlu0 %v2698_v27  ;;  %v2925_v57 = vsel %vm1752_vm0, %v6811_v3, 0.0  ;;  %6830 = vpow2.f32 %v3307_v45  ;;  %v3698_v15 = vmul.f32 -50.0, %v3666_v24  ;;  %v3753_v17 = vmul.f32 1.442695, %v3697_v50  ;;  %v8477_v50 = vpop.xlane.xlu0 %2459 }
 0x3d1   :  { %v6813_v19 = vpop.eup %6812  ;;  %v2926_v46 = vadd.f32 %v6809_v11, %v2925_v57  ;;  %v3475_v44 = vmul.f32 -50.0, %v3443_v62  ;;  %v3476_v13 = vmul.f32 -50.0, %v3444_v47  ;;  %v3219_v23 = vmul.f32 %v6124_v52, %v6124_v52 }
 0x3d2   :  { %v6815_v29 = vpop.eup %6814  ;;  %6832 = vpow2.f32 %v3753_v17  ;;  %v3755_v58 = vmul.f32 1.442695, %v3698_v15  ;;  %v3220_v36 = vmul.f32 %v6125_v49, %v6125_v49  ;;  %v6188_v33 = vadd.f32 -0.9, %v8336_v25 }
 0x3d3   :  { %2927 = vadd.xlane.f32.xlu1 %v2926_v46  ;;  %v2921_v37 = vsel %vm1752_vm0, %v6815_v29, 0.0  ;;  %v3533_v53 = vmul.f32 1.442695, %v3475_v44  ;;  %v3535_v45 = vmul.f32 1.442695, %v3476_v13  ;;  %v3251_v27 = vmul.f32 -50.0, %v3219_v23 }
 0x3d4   :  { %v6817_v24 = vpop.eup %6816  ;;  %v2922_v11 = vadd.f32 %v6813_v19, %v2921_v37  ;;  %6834 = vpow2.f32 %v3755_v58  ;;  %v3252_v52 = vmul.f32 -50.0, %v3220_v36  ;;  %v6189_v3 = vadd.f32 -0.9, %v8353_v35  ;;  %v8489_v36 = vpop.xlane.xlu1 %2687 }
 0x3d5   :  { %v6819_v62 = vpop.eup %6818  ;;  %6836 = vpow2.f32 %v3533_v53  ;;  %v3309_v47 = vmul.f32 1.442695, %v3251_v27  ;;  %v3667_v49 = vmul.f32 %v6188_v33, %v6188_v33  ;;  %v6220_v57 = vadd.f32 -1.0, %v8336_v25 }
 0x3d6   :  { %v9569_v46 = vand.u32 2147483647, %v8214_v51  ;;  %2923 = vadd.xlane.f32.xlu0 %v2922_v11  ;;  %v3149_v13 = vsel %vm1752_vm0, %v6819_v62, 0.0  ;;  %6838 = vpow2.f32 %v3535_v45  ;;  %v3311_v15 = vmul.f32 1.442695, %v3252_v52  ;;  %v8494_v11 = vpop.xlane.xlu0 %2683 }
 0x3d7   :  { %v3668_v17 = vmul.f32 %v6189_v3, %v6189_v3  ;;  %v6821_v19 = vpop.eup %6820  ;;  %v3150_v23 = vadd.f32 %v6817_v24, %v3149_v13  ;;  %6840 = vpow2.f32 %v3309_v47  ;;  %v3699_v29 = vmul.f32 -50.0, %v3667_v49 }
 0x3d8   :  { %vm8483_vm13 = vcmp.lt.f32.partialorder %v9569_v46, 0.0004427343  ;;  %v6221_v58 = vadd.f32 -1.0, %v8353_v35  ;;  %6842 = vpow2.f32 %v3311_v15  ;;  %v3891_v25 = vmul.f32 %v6220_v57, %v6220_v57 }
 0x3d9   :  { %v3700_v51 = vmul.f32 -50.0, %v3668_v17  ;;  %v6218_v33 = vadd.f32 -1.0, %v8329_v42  ;;  %v6823_v37 = vpop.eup %6822  ;;  %3151 = vadd.xlane.f32.xlu1 %v3150_v23  ;;  %v3757_v53 = vmul.f32 1.442695, %v3699_v29  ;;  %v6219_v45 = vadd.f32 -1.0, %v8344_v39 }
 0x3da   :  { %v3892_v27 = vmul.f32 %v6221_v58, %v6221_v58  ;;  %6844 = vlog2.f32 %v8421_v38  ;;  %v6825_v24 = vpop.eup %6824  ;;  %v3145_v35 = vsel %vm1752_vm0, %v6823_v37, 0.0  ;;  %v3923_v3 = vmul.f32 -500000.0, %v3891_v25  ;;  %v8500_v58 = vpop.xlane.xlu1 %2911 }
 0x3db   :  { %v3759_v52 = vmul.f32 1.442695, %v3700_v51  ;;  %v3889_v62 = vmul.f32 %v6218_v33, %v6218_v33  ;;  %v6827_v47 = vpop.eup %6826  ;;  %v3146_v49 = vadd.f32 %v6821_v19, %v3145_v35  ;;  %6846 = vpow2.f32 %v3757_v53  ;;  %v8512_v35 = vpop.xlane.xlu0 %2907 }
 0x3dc   :  { %v3924_v42 = vmul.f32 -500000.0, %v3892_v27  ;;  %v3890_v57 = vmul.f32 %v6219_v45, %v6219_v45  ;;  %v6829_v46 = vpop.eup %6828  ;;  %v3593_v13 = vsel %vm1752_vm0, %v6827_v47, 0.0  ;;  %v3981_v39 = vmul.f32 1.442695, %v3923_v3  ;;  %v9573_v45 = vld [vmem:[#allocation19_spill] sm:$0xff] }
 0x3dd   :  { %6848 = vpow2.f32 %v3759_v52  ;;  %v3959_v38 = vmul.f32 1.442695, %v8412_v1  ;;  %v6831_v15 = vpop.eup %6830  ;;  %3147 = vadd.xlane.f32.xlu0 %v3146_v49  ;;  %v3594_v17 = vadd.f32 %v6825_v24, %v3593_v13  ;;  %v3921_v29 = vmul.f32 -500000.0, %v3889_v62 }
 0x3de   :  { %v3983_v23 = vmul.f32 1.442695, %v3924_v42  ;;  %6850 = vlog2.f32 %v8351_v0  ;;  %v3369_v19 = vsel %vm1752_vm0, %v6831_v15, 0.0  ;;  %v3922_v51 = vmul.f32 -500000.0, %v3890_v57  ;;  %v9572_v0 = vld [vmem:[#allocation17_spill] sm:$0xff] }
 0x3df   :  { %6852 = vpow2.f32 %v3981_v39  ;;  %v5274_v25 = vsel %vm8483_vm13, %v8316_v43, %v8334_v10  ;;  %v6833_v33 = vpop.eup %6832  ;;  %3595 = vadd.xlane.f32.xlu1 %v3594_v17  ;;  %v3370_v1 = vadd.f32 %v6829_v46, %v3369_v19  ;;  %v3977_v37 = vmul.f32 1.442695, %v3921_v29  ;;  %v9577_v42 = vld [vmem:[#allocation20_spill] sm:$0xff]  ;;  %v9578_v15 = vld [vmem:[#allocation21_spill] sm:$0xff] }
 0x3e0   :  { %6854 = vpow2.f32 %v3983_v23  ;;  %v5314_v53 = vmul.f32 -0.5, %v8370_v34  ;;  %v4098_v27 = vrot.slane %v9572_v0, %v7984_v30  ;;  %v4194_v24 = vrot.slane %v9573_v45, %v7984_v30 }
 0x3e1   :  { %v3979_v52 = vmul.f32 1.442695, %v3922_v51  ;;  %v9574_v3 = vand.u32 2147483647, %v8276_v12  ;;  %v6835_v10 = vpop.eup %6834  ;;  %3371 = vadd.xlane.f32.xlu0 %v3370_v1  ;;  %v3957_v44 = vmul.f32 1.442695, %v8409_v18  ;;  %6856 = vpow2.f32 %v3959_v38 }
 0x3e2   :  { %v5304_v62 = vmul.f32 0.6931472, %v8382_v16  ;;  %v5307_v47 = vmul.f32 %v8348_v26, %v8276_v12  ;;  %v6837_v49 = vpop.eup %6836  ;;  %v4094_v57 = vrot.slane %v9577_v42, %v7984_v30  ;;  %v3817_v46 = vsel %vm1752_vm0, %v6835_v10, 0.0  ;;  %v8531_v12 = vpop.xlane.xlu1 %3135  ;;  %v9579_v1 = vld [vmem:[#allocation22_spill] sm:$0xff] }
 0x3e3   :  { %vm8516_vm14 = vcmp.lt.f32.partialorder %v9574_v3, 0.0004427343  ;;  %6858 = vpow2.f32 %v3979_v52  ;;  %v5332_v13 = vmul.f32 -0.5, %v8405_v2  ;;  %v6839_v39 = vpop.eup %6838  ;;  %v4290_v17 = vrot.slane %v9578_v15, %v7984_v30 }
 0x3e4   :  { %v3818_v18 = vadd.f32 %v6833_v33, %v3817_v46  ;;  %6860 = vpow2.f32 %v3977_v37  ;;  %v5315_v38 = vadd.f32 1.0, %v5314_v53  ;;  %v6841_v16 = vpop.eup %6840  ;;  %v5121_v23 = vsel %vm5115_vm1, %v4098_v27, %v4194_v24  ;;  %v9580_v53 = vld [vmem:[#allocation23_spill] sm:$0xff]  ;;  %v8542_v24 = vpop.xlane.xlu0 %3131  ;;  %v9581_v46 = vld [vmem:[#allocation24_spill] sm:$0xff] }
 0x3e5   :  { %v3597_v26 = vsel %vm1752_vm0, %v6839_v39, 0.0  ;;  %v5317_v29 = vand.u32 2147483647, %v8370_v34  ;;  %v5323_v19 = vmul.f32 -0.5, %v8325_v55  ;;  %v6843_v51 = vpop.eup %6842  ;;  %v4190_v0 = vrot.slane %v9579_v1, %v7984_v30 }
 0x3e6   :  { %3819 = vadd.xlane.f32.xlu1 %v3818_v18  ;;  %v3598_v45 = vadd.f32 %v6837_v49, %v3597_v26  ;;  %6862 = vpow2.f32 %v3957_v44  ;;  %v5310_v33 = vsel %vm8516_vm14, %v5307_v47, %v5304_v62  ;;  %v4386_v27 = vrot.slane %v9580_v53, %v7984_v30  ;;  %v9582_v47 = vld [vmem:[#allocation26_spill] sm:$0xff] }
 0x3e7   :  { %v6845_v37 = vpop.eup %6844  ;;  %v3373_v52 = vsel %vm1752_vm0, %v6843_v51, 0.0  ;;  %v5333_v3 = vadd.f32 1.0, %v5332_v13  ;;  %v5335_v10 = vand.u32 2147483647, %v8405_v2  ;;  %v5138_v42 = vsel %vm5132_vm2, %v5121_v23, %v4290_v17  ;;  %v9584_v23 = vld [vmem:[#allocation25_spill] sm:$0xff] }
 0x3e8   :  { %v4286_v49 = vrot.slane %v9581_v46, %v7984_v30  ;;  %3599 = vadd.xlane.f32.xlu0 %v3598_v45  ;;  %v3374_v44 = vadd.f32 %v6841_v16, %v3373_v52  ;;  %v5326_v43 = vand.u32 2147483647, %v8325_v55  ;;  %v6847_v62 = vpop.eup %6846  ;;  %v4382_v39 = vrot.slane %v9582_v47, %v7984_v30  ;;  %v9592_v47 = vld [vmem:[#allocation28_spill] sm:$0xff] }
 0x3e9   :  { %v8553_v15 = vsel %vm5554_vm8, %v5274_v25, 0.0  ;;  %v8556_v13 = vmul.f32 0.6931472, %v8433_v8  ;;  %v5324_v18 = vadd.f32 1.0, %v5323_v19  ;;  %v5120_v17 = vsel %vm5115_vm1, %v4094_v57, %v4190_v0  ;;  %v8569_v8 = vpop.xlane.xlu1 %3579 }
 0x3ea   :  { %9583 = vst [vmem:[#allocation17_spill] sm:$0xff] %v8553_v15  ;;  %v6849_v26 = vpop.eup %6848  ;;  %v4482_v51 = vrot.slane %v9584_v23, %v7984_v30  ;;  %3375 = vadd.xlane.f32.xlu1 %v3374_v44  ;;  %v8562_v16 = vmul.f32 %v5315_v38, %v8370_v34  ;;  %vm8564_vm15 = vcmp.lt.f32.partialorder %v5317_v29, 0.0004427343  ;;  %v5155_v45 = vsel %vm5149_vm3, %v5138_v42, %v4386_v27 }
 0x3eb   :  { %v6851_v25 = vpop.eup %6850  ;;  %v3821_v19 = vsel %vm1752_vm0, %v6849_v26, 0.0  ;;  %v8573_v57 = vsel %vm5554_vm8, %v5310_v33, 0.0  ;;  %v8576_v0 = vmul.f32 %v5333_v3, %v8405_v2  ;;  %v5137_v34 = vsel %vm5132_vm2, %v5120_v17, %v4286_v49  ;;  %v8588_v33 = vpop.xlane.xlu0 %3355 }
 0x3ec   :  { %9587 = vst [vmem:[#allocation19_spill] sm:$0xff] %v8573_v57  ;;  %v6853_v53 = vpop.eup %6852  ;;  %v3822_v38 = vadd.f32 %v6847_v62, %v3821_v19  ;;  %vm8579_vm10 = vcmp.lt.f32.partialorder %v5335_v10, 0.0004427343  ;;  %vm8583_vm11 = vcmp.lt.f32.partialorder %v5326_v43, 0.0004427343  ;;  %v5154_v42 = vsel %vm5149_vm3, %v5137_v34, %v4382_v39 }
 0x3ed   :  { %v6855_v52 = vpop.eup %6854  ;;  %v5319_v2 = vsel %vm8564_vm15, %v8562_v16, %v8556_v13  ;;  %v5331_v3 = vmul.f32 0.6931472, %v6845_v37  ;;  %v5325_v10 = vmul.f32 %v5324_v18, %v8325_v55  ;;  %v5172_v46 = vsel %vm5166_vm4, %v5155_v45, %v4482_v51  ;;  %v9593_v18 = vld [vmem:[#allocation27_spill] sm:$0xff]  ;;  %v8619_v19 = vpop.xlane.xlu1 %3803 }
 0x3ee   :  { %v4958_v49 = vrot.slane %v8200_v54, %v7984_v30  ;;  %3823 = vadd.xlane.f32.xlu0 %v3822_v38  ;;  %v4045_v44 = vsel %vm1752_vm0, %v6855_v52, 0.0  ;;  %v5322_v43 = vmul.f32 0.6931472, %v6851_v25  ;;  %v6857_v62 = vpop.eup %6856  ;;  %v4478_v39 = vrot.slane %v9592_v47, %v7984_v30  ;;  %v9594_v54 = vld [vmem:[#allocation30_spill] sm:$0xff] }
 0x3ef   :  { %v4962_v26 = vrot.slane %v8146_v21, %v7984_v30  ;;  %v5054_v37 = vrot.slane %v8183_v56, %v7984_v30  ;;  %v4046_v55 = vadd.f32 %v6853_v53, %v4045_v44  ;;  %v4578_v17 = vrot.slane %v9593_v18, %v7984_v30  ;;  %v9595_v21 = vld [vmem:[#allocation29_spill] sm:$0xff] }
 0x3f0   :  { %v6859_v13 = vpop.eup %6858  ;;  %v4574_v23 = vrot.slane %v9594_v54, %v7984_v30  ;;  %v4862_v51 = vrot.slane %v8153_v4, %v7984_v30  ;;  %v5058_v16 = vrot.slane %v8216_v7, %v7984_v30  ;;  %v4674_v25 = vrot.slane %v9595_v21, %v7984_v30  ;;  %v9596_v4 = vld [vmem:[#allocation31_spill] sm:$0xff] }
 0x3f1   :  { %v6861_v1 = vpop.eup %6860  ;;  %v4670_v56 = vrot.slane %v8129_v14, %v7984_v30  ;;  %v4866_v45 = vrot.slane %v8134_v32, %v7984_v30  ;;  %4047 = vadd.xlane.f32.xlu1 %v4046_v55  ;;  %v4041_v53 = vsel %vm1752_vm0, %v6859_v13, 0.0  ;;  %v4770_v34 = vrot.slane %v9596_v4, %v7984_v30  ;;  %v8635_v13 = vpop.xlane.xlu0 %3583 }
 0x3f2   :  { %v4766_v7 = vrot.slane %v8139_v9, %v7984_v30  ;;  %v5238_v38 = vsel %vm5115_vm1, %v4862_v51, %v4958_v49  ;;  %v4042_v52 = vadd.f32 %v6861_v1, %v4041_v53  ;;  %v4106_v32 = vrot.slane %v8207_v60, %v7984_v30  ;;  %v8662_v29 = vpop.xlane.xlu1 %3359 }
 0x3f3   :  { %v6863_v44 = vpop.eup %6862  ;;  %v5239_v14 = vsel %vm5115_vm1, %v4866_v45, %v4962_v26  ;;  %v8629_v47 = vsel %vm5132_vm2, %v5238_v38, %v5054_v37  ;;  %v4202_v55 = vrot.slane %v8220_v28, %v7984_v30  ;;  %v5171_v18 = vsel %vm5166_vm4, %v5154_v42, %v4478_v39 }
 0x3f4   :  { %9597 = vst [vmem:[#allocation20_spill] sm:$0xff] %v8629_v47  ;;  %v5189_v9 = vsel %vm5183_vm5, %v5172_v46, %v4578_v17  ;;  %v8640_v49 = vsel %vm5132_vm2, %v5239_v14, %v5058_v16  ;;  %4043 = vadd.xlane.f32.xlu0 %v4042_v52  ;;  %v4021_v26 = vsel %vm1752_vm0, %v6857_v62, 0.0  ;;  %v5188_v37 = vsel %vm5183_vm5, %v5171_v18, %v4574_v23  ;;  %v9606_v14 = vld [vmem:[#allocation42_spill] sm:$0xff] }
 0x3f5   :  { %9598 = vst [vmem:[#allocation21_spill] sm:$0xff] %v8640_v49  ;;  %v5206_v54 = vsel %vm5200_vm6, %v5189_v9, %v4674_v25  ;;  %v5337_v60 = vsel %vm8579_vm10, %v8576_v0, %v5331_v3  ;;  %v5328_v28 = vsel %vm8583_vm11, %v5325_v10, %v5322_v43  ;;  %v5205_v42 = vsel %vm5200_vm6, %v5188_v37, %v4670_v56  ;;  %v8681_v21 = vpop.xlane.xlu0 %3807 }
 0x3f6   :  { %v8652_v46 = vsel %vm5217_vm7, %v5206_v54, %v4770_v34  ;;  %v4298_v39 = vrot.slane %v8238_v5, %v7984_v30  ;;  %v5350_v62 = vmul.f32 -0.5, %v8629_v47  ;;  %v8658_v17 = vsel %vm5217_vm7, %v5205_v42, %v4766_v7 }
 0x3f7   :  { %9599 = vst [vmem:[#allocation22_spill] sm:$0xff] %v8652_v46  ;;  %9600 = vst [vmem:[#allocation23_spill] sm:$0xff] %v8658_v17  ;;  %v5347_v23 = vadd.f32 1.0, %v8629_v47  ;;  %v5123_v0 = vsel %vm5115_vm1, %v4106_v32, %v4202_v55  ;;  %v5368_v27 = vmul.f32 -0.5, %v8640_v49  ;;  %v5365_v3 = vadd.f32 1.0, %v8640_v49 }
 0x3f8   :  { %v8666_v10 = vadd.f32 %v6863_v44, %v4021_v26  ;;  %v8669_v43 = vsel %vm5558_vm9, %v5319_v2, 0.0  ;;  %v8672_v5 = vsel %vm5558_vm9, %v5337_v60, 0.0  ;;  %v8675_v51 = vadd.f32 1.0, %v8652_v46  ;;  %v8705_v44 = vpop.xlane.xlu1 %4031  ;;  %v9610_v60 = vld [vmem:[#allocation41_spill] sm:$0xff] }
 0x3f9   :  { %9602 = vst [vmem:[#allocation26_spill] sm:$0xff] %v8669_v43  ;;  %9603 = vst [vmem:[#allocation25_spill] sm:$0xff] %v8672_v5  ;;  %v4198_v16 = vrot.slane %v8250_v20, %v7984_v30  ;;  %v4394_v1 = vrot.slane %v8267_v6, %v7984_v30  ;;  %v8684_v25 = vsel %vm5554_vm8, %v5328_v28, 0.0  ;;  %v5338_v2 = vadd.f32 1.0, %v8658_v17  ;;  %v8715_v9 = vpop.xlane.xlu0 %4027 }
 0x3fa   :  { %9601 = vst [vmem:[#allocation24_spill] sm:$0xff] %v8666_v10  ;;  %9604 = vst [vmem:[#allocation28_spill] sm:$0xff] %v8675_v51  ;;  %v5140_v56 = vsel %vm5132_vm2, %v5123_v0, %v4298_v39  ;;  %v4294_v45 = vrot.slane %v8280_v22, %v7984_v30  ;;  %v5351_v53 = vadd.f32 1.0, %v5350_v62  ;;  %v4102_v4 = vrot.slane %v8223_v40, %v7984_v30 }
 0x3fb   :  { %9605 = vst [vmem:[#allocation27_spill] sm:$0xff] %v8684_v25  ;;  %v4390_v20 = vrot.slane %v8327_v59, %v7984_v30  ;;  %6864 = vlog2.f32 %v5347_v23  ;;  %v5369_v6 = vadd.f32 1.0, %v5368_v27  ;;  %v4490_v34 = vrot.slane %v8309_v31, %v7984_v30 }
 0x3fc   :  { %v4486_v7 = vrot.slane %v8365_v63, %v7984_v30  ;;  %6866 = vlog2.f32 %v5365_v3  ;;  %v5122_v22 = vsel %vm5115_vm1, %v4102_v4, %v4198_v16  ;;  %v5157_v52 = vsel %vm5149_vm3, %v5140_v56, %v4394_v1  ;;  %v8737_v23 = vpop.xlane.xlu1 %1799  ;;  %v9611_v4 = vld [vmem:[#allocation43_spill] sm:$0xff] }
 0x3fd   :  { %v4114_v40 = vrot.slane %v8443_v48, %v7984_v30  ;;  %v4210_v59 = vrot.slane %v8454_v41, %v7984_v30  ;;  %v5139_v31 = vsel %vm5132_vm2, %v5122_v22, %v4294_v45  ;;  %v4206_v63 = vrot.slane %v9606_v14, %v7984_v30 }
 0x3fe   :  { %v8711_v32 = vmul.f32 %v5351_v53, %v8629_v47  ;;  %v5156_v18 = vsel %vm5149_vm3, %v5139_v31, %v4390_v20  ;;  %v8720_v41 = vmul.f32 %v5369_v6, %v8640_v49  ;;  %6868 = vlog2.f32 %v5338_v2  ;;  %v8751_v6 = vpop.xlane.xlu0 %1795 }
 0x3ff   :  { %v8717_v48 = vpop.f32.mrf.mxu0  ;;  %v8723_v26 = vmul.f32 -0.5, %v8658_v17  ;;  %v8726_v37 = vsel %vm5166_vm4, %v5157_v52, %v4490_v34  ;;  %v8729_v54 = vsel %vm5166_vm4, %v5156_v18, %v4486_v7  ;;  %v4110_v28 = vrot.slane %v9610_v60, %v7984_v30  ;;  %v8733_v42 = vpop.f32.mrf.mxu1  ;;  %v9612_v52 = vld [vmem:[#allocation44_spill] sm:$0xff] }
 0x400   :  { %9607 = vst [vmem:[#allocation30_spill] sm:$0xff] %v8711_v32  ;;  %9608 = vst [vmem:[#allocation29_spill] sm:$0xff] %v8720_v41  ;;  %v5902_v39 = vadd.f32 0.9, %v8717_v48  ;;  %v5125_v62 = vsel %vm5115_vm1, %v4114_v40, %v4210_v59  ;;  %v5904_v27 = vadd.f32 0.9, %v8733_v42  ;;  %v4306_v20 = vrot.slane %v9611_v4, %v7984_v30  ;;  %v8758_v17 = vpop.xlane.xlu1 %2023 }
 0x401   :  { %9609 = vst [vmem:[#allocation31_spill] sm:$0xff] %v8723_v26  ;;  %v8739_v0 = vpop.f32.mrf.mxu0  ;;  %v5936_v3 = vadd.f32 0.7, %v8733_v42  ;;  %v5934_v16 = vadd.f32 0.7, %v8717_v48  ;;  %v5124_v1 = vsel %vm5115_vm1, %v4110_v28, %v4206_v63  ;;  %v8745_v2 = vpop.f32.mrf.mxu1  ;;  %v4302_v40 = vrot.slane %v9612_v52, %v7984_v30 }
 0x402   :  { %v5903_v56 = vadd.f32 0.9, %v8739_v0  ;;  %v1652_v45 = vmul.f32 %v5902_v39, %v5902_v39  ;;  %v5935_v53 = vadd.f32 0.7, %v8739_v0  ;;  %v5905_v34 = vadd.f32 0.9, %v8745_v2 }
 0x403   :  { %v1654_v7 = vmul.f32 %v5904_v27, %v5904_v27  ;;  %v5937_v22 = vadd.f32 0.7, %v8745_v2  ;;  %v1879_v14 = vmul.f32 %v5936_v3, %v5936_v3  ;;  %v1877_v28 = vmul.f32 %v5934_v16, %v5934_v16 }
 0x404   :  { %v1653_v59 = vmul.f32 %v5903_v56, %v5903_v56  ;;  %v1684_v31 = vmul.f32 -50.0, %v1652_v45  ;;  %v1655_v63 = vmul.f32 %v5905_v34, %v5905_v34  ;;  %v1878_v38 = vmul.f32 %v5935_v53, %v5935_v53  ;;  %v8769_v53 = vpop.xlane.xlu0 %2019 }
 0x405   :  { %v1686_v18 = vmul.f32 -50.0, %v1654_v7  ;;  %v1880_v60 = vmul.f32 %v5937_v22, %v5937_v22  ;;  %v1911_v4 = vmul.f32 -50.0, %v1879_v14  ;;  %v5142_v25 = vsel %vm5132_vm2, %v5125_v62, %v4306_v20 }
 0x406   :  { %v1685_v39 = vmul.f32 -50.0, %v1653_v59  ;;  %v1744_v55 = vmul.f32 1.442695, %v1684_v31  ;;  %v1687_v27 = vmul.f32 -50.0, %v1655_v63  ;;  %v5141_v56 = vsel %vm5132_vm2, %v5124_v1, %v4302_v40 }
 0x407   :  { %v1748_v41 = vmul.f32 1.442695, %v1686_v18  ;;  %v1912_v46 = vmul.f32 -50.0, %v1880_v60  ;;  %v4402_v3 = vrot.slane %v8473_v61, %v7984_v30  ;;  %v4398_v16 = vrot.slane %v8477_v50, %v7984_v30 }
 0x408   :  { %v8760_v32 = vpop.eup %6864  ;;  %v1746_v45 = vmul.f32 1.442695, %v1685_v39  ;;  %v1750_v62 = vmul.f32 1.442695, %v1687_v27  ;;  %6870 = vpow2.f32 %v1744_v55  ;;  %v1973_v20 = vmul.f32 1.442695, %v1911_v4 }
 0x409   :  { %9613 = vst [vmem:[#allocation42_spill] sm:$0xff] %v8760_v32  ;;  %v8767_v34 = vpop.eup %6866  ;;  %v1909_v7 = vmul.f32 -50.0, %v1877_v28  ;;  %v1975_v22 = vmul.f32 1.442695, %v1912_v46  ;;  %v1910_v52 = vmul.f32 -50.0, %v1878_v38  ;;  %v5966_v1 = vadd.f32 0.5, %v8717_v48  ;;  %v8781_v38 = vpop.xlane.xlu1 %2247 }
 0x40a   :  { %9614 = vst [vmem:[#allocation41_spill] sm:$0xff] %v8767_v34  ;;  %6872 = vpow2.f32 %v1746_v45  ;;  %v4498_v61 = vrot.slane %v8489_v36, %v7984_v30  ;;  %v5968_v50 = vadd.f32 0.5, %v8733_v42  ;;  %v5969_v40 = vadd.f32 0.5, %v8745_v2 }
 0x40b   :  { %6874 = vpow2.f32 %v1748_v41  ;;  %v8776_v59 = vpop.eup %6868  ;;  %v4494_v55 = vrot.slane %v8494_v11, %v7984_v30  ;;  %v1971_v31 = vmul.f32 1.442695, %v1910_v52  ;;  %v5967_v46 = vadd.f32 0.5, %v8739_v0  ;;  %v8786_v11 = vpop.xlane.xlu0 %2243 }
 0x40c   :  { %9615 = vst [vmem:[#allocation43_spill] sm:$0xff] %v8776_v59  ;;  %6876 = vpow2.f32 %v1750_v62  ;;  %v1969_v14 = vmul.f32 1.442695, %v1909_v7  ;;  %v2103_v63 = vmul.f32 %v5968_v50, %v5968_v50  ;;  %v2104_v36 = vmul.f32 %v5969_v40, %v5969_v40 }
 0x40d   :  { %6878 = vpow2.f32 %v1973_v20  ;;  %v2101_v41 = vmul.f32 %v5966_v1, %v5966_v1  ;;  %v2102_v18 = vmul.f32 %v5967_v46, %v5967_v46  ;;  %v6000_v60 = vadd.f32 0.3, %v8733_v42  ;;  %v9616_v1 = vld [vmem:[#allocation35_spill] sm:$0xff]  ;;  %v8799_v40 = vpop.xlane.xlu1 %2471 }
 0x40e   :  { %6880 = vpow2.f32 %v1975_v22  ;;  %v5159_v28 = vsel %vm5149_vm3, %v5142_v25, %v4402_v3  ;;  %v5158_v39 = vsel %vm5149_vm3, %v5141_v56, %v4398_v16  ;;  %v2135_v4 = vmul.f32 -50.0, %v2103_v63 }
 0x40f   :  { %v2136_v27 = vmul.f32 -50.0, %v2104_v36  ;;  %6882 = vpow2.f32 %v1971_v31  ;;  %v2133_v45 = vmul.f32 -50.0, %v2101_v41  ;;  %v2134_v62 = vmul.f32 -50.0, %v2102_v18  ;;  %v8807_v41 = vpop.xlane.xlu0 %2467 }
 0x410   :  { %v6001_v20 = vadd.f32 0.3, %v8745_v2  ;;  %6884 = vpow2.f32 %v1969_v14  ;;  %v2197_v7 = vmul.f32 1.442695, %v2135_v4  ;;  %v2327_v52 = vmul.f32 %v6000_v60, %v6000_v60 }
 0x411   :  { %v2199_v22 = vmul.f32 1.442695, %v2136_v27  ;;  %v8792_v25 = vsel %vm5166_vm4, %v5159_v28, %v4498_v61  ;;  %v8795_v56 = vsel %vm5166_vm4, %v5158_v39, %v4494_v55  ;;  %v2193_v3 = vmul.f32 1.442695, %v2133_v45 }
 0x412   :  { %v2195_v31 = vmul.f32 1.442695, %v2134_v62  ;;  %v2328_v46 = vmul.f32 %v6001_v20, %v6001_v20  ;;  %v2359_v14 = vmul.f32 -50.0, %v2327_v52  ;;  %6886 = vpow2.f32 %v2197_v7 }
 0x413   :  { %v5998_v36 = vadd.f32 0.3, %v8717_v48  ;;  %v5999_v61 = vadd.f32 0.3, %v8739_v0  ;;  %v4974_v55 = vrot.slane %v8619_v19, %v7984_v30  ;;  %6888 = vpow2.f32 %v2199_v22 }
 0x414   :  { %v2360_v18 = vmul.f32 -50.0, %v2328_v46  ;;  %v6032_v60 = vadd.f32 0.1, %v8733_v42  ;;  %6890 = vpow2.f32 %v2193_v3  ;;  %v2421_v39 = vmul.f32 1.442695, %v2359_v14  ;;  %v8818_v14 = vpop.xlane.xlu1 %2695 }
 0x415   :  { %v6871_v28 = vpop.eup %6870  ;;  %v2325_v4 = vmul.f32 %v5998_v36, %v5998_v36  ;;  %v2326_v27 = vmul.f32 %v5999_v61, %v5999_v61  ;;  %6892 = vpow2.f32 %v2195_v31  ;;  %v6033_v7 = vadd.f32 0.1, %v8745_v2 }
 0x416   :  { %v2423_v20 = vmul.f32 1.442695, %v2360_v18  ;;  %v4878_v52 = vrot.slane %v8569_v8, %v7984_v30  ;;  %6894 = vpow2.f32 %v2421_v39  ;;  %v2551_v8 = vmul.f32 %v6032_v60, %v6032_v60 }
 0x417   :  { %v6873_v45 = vpop.eup %6872  ;;  %v2357_v61 = vmul.f32 -50.0, %v2325_v4  ;;  %v2358_v31 = vmul.f32 -50.0, %v2326_v27  ;;  %v6031_v50 = vadd.f32 0.1, %v8739_v0 }
 0x418   :  { %v6875_v19 = vpop.eup %6874  ;;  %v1809_v3 = vsel %vm1752_vm0, %v6873_v45, 0.0  ;;  %6896 = vpow2.f32 %v2423_v20  ;;  %v8823_v62 = vsel %vm5115_vm1, %v4878_v52, %v4974_v55  ;;  %v8826_v45 = vpop.xlane.xlu0 %2691  ;;  %v2552_v20 = vmul.f32 %v6033_v7, %v6033_v7 }
 0x419   :  { %v6877_v46 = vpop.eup %6876  ;;  %v1810_v36 = vadd.f32 %v6871_v28, %v1809_v3  ;;  %v2417_v63 = vmul.f32 1.442695, %v2357_v61  ;;  %v2419_v28 = vmul.f32 1.442695, %v2358_v31  ;;  %v2583_v3 = vmul.f32 -50.0, %v2551_v8  ;;  %v8840_v31 = vpop.xlane.xlu1 %2919 }
 0x41a   :  { %v6879_v18 = vpop.eup %6878  ;;  %v1813_v22 = vsel %vm1752_vm0, %v6877_v46, 0.0  ;;  %v6030_v55 = vadd.f32 0.1, %v8717_v48 }
 0x41b   :  { %v6881_v16 = vpop.eup %6880  ;;  %v1814_v39 = vadd.f32 %v6875_v19, %v1813_v22  ;;  %1811 = vadd.xlane.f32.xlu0 %v1810_v36  ;;  %v8837_v22 = vadd.f32 -0.5, %v8717_v48  ;;  %6898 = vpow2.f32 %v2419_v28  ;;  %v2645_v61 = vmul.f32 1.442695, %v2583_v3 }
 0x41c   :  { %v2037_v27 = vsel %vm1752_vm0, %v6881_v16, 0.0  ;;  %v6883_v52 = vpop.eup %6882  ;;  %v2584_v16 = vmul.f32 -50.0, %v2552_v20  ;;  %6900 = vpow2.f32 %v2417_v63  ;;  %v2549_v4 = vmul.f32 %v6030_v55, %v6030_v55  ;;  %v8845_v46 = vpop.xlane.xlu0 %2915 }
 0x41d   :  { %1815 = vadd.xlane.f32.xlu1 %v1814_v39  ;;  %v2038_v19 = vadd.f32 %v6879_v18, %v2037_v27  ;;  %v6885_v7 = vpop.eup %6884  ;;  %v2033_v36 = vsel %vm1752_vm0, %v6883_v52, 0.0  ;;  %6902 = vpow2.f32 %v2645_v61  ;;  %v6064_v18 = vadd.f32 -0.1, %v8733_v42  ;;  %v8851_v47 = vpop.xlane.xlu1 %3143 }
 0x41e   :  { %v2034_v8 = vadd.f32 %v6885_v7, %v2033_v36  ;;  %v2647_v60 = vmul.f32 1.442695, %v2584_v16  ;;  %v6065_v39 = vadd.f32 -0.1, %v8745_v2  ;;  %v2550_v28 = vmul.f32 %v6031_v50, %v6031_v50 }
 0x41f   :  { %v6887_v27 = vpop.eup %6886  ;;  %v2581_v20 = vmul.f32 -50.0, %v2549_v4  ;;  %v6062_v3 = vadd.f32 -0.1, %v8717_v48  ;;  %v6063_v63 = vadd.f32 -0.1, %v8739_v0  ;;  %v2775_v55 = vmul.f32 %v6064_v18, %v6064_v18 }
 0x420   :  { %2035 = vadd.xlane.f32.xlu0 %v2034_v8  ;;  %v6889_v52 = vpop.eup %6888  ;;  %6904 = vpow2.f32 %v2647_v60  ;;  %v2776_v7 = vmul.f32 %v6065_v39, %v6065_v39  ;;  %v6096_v36 = vadd.f32 -0.3, %v8733_v42  ;;  %v2582_v59 = vmul.f32 -50.0, %v2550_v28 }
 0x421   :  { %2039 = vadd.xlane.f32.xlu1 %v2038_v19  ;;  %v6891_v16 = vpop.eup %6890  ;;  %v2261_v61 = vsel %vm1752_vm0, %v6889_v52, 0.0  ;;  %v2641_v34 = vmul.f32 1.442695, %v2581_v20  ;;  %v2773_v57 = vmul.f32 %v6062_v3, %v6062_v3  ;;  %v2807_v50 = vmul.f32 -50.0, %v2775_v55  ;;  %v8854_v3 = vpop.xlane.xlu0 %3139 }
 0x422   :  { %v6893_v19 = vpop.eup %6892  ;;  %v2262_v8 = vadd.f32 %v6887_v27, %v2261_v61  ;;  %v2808_v4 = vmul.f32 -50.0, %v2776_v7  ;;  %v2774_v5 = vmul.f32 %v6063_v63, %v6063_v63  ;;  %v2643_v18 = vmul.f32 1.442695, %v2582_v59 }
 0x423   :  { %v6895_v49 = vpop.eup %6894  ;;  %v2257_v60 = vsel %vm1752_vm0, %v6893_v19, 0.0  ;;  %6906 = vpow2.f32 %v2641_v34  ;;  %v2805_v39 = vmul.f32 -50.0, %v2773_v57  ;;  %v2869_v52 = vmul.f32 1.442695, %v2807_v50  ;;  %v8862_v50 = vpop.xlane.xlu1 %3587 }
 0x424   :  { %v2258_v15 = vadd.f32 %v6891_v16, %v2257_v60  ;;  %v2871_v28 = vmul.f32 1.442695, %v2808_v4  ;;  %v2806_v20 = vmul.f32 -50.0, %v2774_v5  ;;  %6908 = vpow2.f32 %v2643_v18 }
 0x425   :  { %v6897_v43 = vpop.eup %6896  ;;  %2263 = vadd.xlane.f32.xlu1 %v2262_v8  ;;  %v2865_v63 = vmul.f32 1.442695, %v2805_v39  ;;  %v6097_v55 = vadd.f32 -0.3, %v8745_v2  ;;  %6910 = vpow2.f32 %v2869_v52  ;;  %v2999_v59 = vmul.f32 %v6096_v36, %v6096_v36 }
 0x426   :  { %v2485_v27 = vsel %vm1752_vm0, %v6897_v43, 0.0  ;;  %2259 = vadd.xlane.f32.xlu0 %v2258_v15  ;;  %v2867_v34 = vmul.f32 1.442695, %v2806_v20  ;;  %6912 = vpow2.f32 %v2871_v28  ;;  %v6094_v16 = vadd.f32 -0.3, %v8717_v48  ;;  %v8865_v20 = vpop.xlane.xlu0 %3363 }
 0x427   :  { %v2486_v7 = vadd.f32 %v6895_v49, %v2485_v27  ;;  %v3000_v57 = vmul.f32 %v6097_v55, %v6097_v55  ;;  %v6095_v61 = vadd.f32 -0.3, %v8739_v0  ;;  %6914 = vpow2.f32 %v2865_v63 }
 0x428   :  { %v3031_v5 = vmul.f32 -50.0, %v2999_v59  ;;  %v6158_v43 = vadd.f32 -0.7, %v8717_v48  ;;  %v6159_v19 = vadd.f32 -0.7, %v8739_v0  ;;  %v6899_v8 = vpop.eup %6898  ;;  %6916 = vpow2.f32 %v2867_v34 }
 0x429   :  { %2487 = vadd.xlane.f32.xlu1 %v2486_v7  ;;  %v3032_v15 = vmul.f32 -50.0, %v3000_v57  ;;  %v2997_v49 = vmul.f32 %v6094_v16, %v6094_v16  ;;  %v2998_v36 = vmul.f32 %v6095_v61, %v6095_v61  ;;  %v6901_v4 = vpop.eup %6900  ;;  %v2481_v60 = vsel %vm1752_vm0, %v6899_v8, 0.0 }
 0x42a   :  { %v3093_v18 = vmul.f32 1.442695, %v3031_v5  ;;  %v3445_v39 = vmul.f32 %v6158_v43, %v6158_v43  ;;  %v3446_v52 = vmul.f32 %v6159_v19, %v6159_v19  ;;  %v6903_v28 = vpop.eup %6902  ;;  %v2482_v27 = vadd.f32 %v6901_v4, %v2481_v60 }
 0x42b   :  { %v3095_v63 = vmul.f32 1.442695, %v3032_v15  ;;  %v3029_v55 = vmul.f32 -50.0, %v2997_v49  ;;  %v3030_v7 = vmul.f32 -50.0, %v2998_v36  ;;  %v6127_v34 = vadd.f32 -0.5, %v8739_v0  ;;  %v8871_v49 = vpop.xlane.xlu1 %3811 }
 0x42c   :  { %6918 = vpow2.f32 %v3093_v18  ;;  %v3477_v59 = vmul.f32 -50.0, %v3445_v39  ;;  %v3478_v26 = vmul.f32 -50.0, %v3446_v52  ;;  %2483 = vadd.xlane.f32.xlu0 %v2482_v27  ;;  %v3221_v5 = vmul.f32 %v8837_v22, %v8837_v22  ;;  %v8876_v22 = vpop.xlane.xlu0 %3591 }
 0x42d   :  { %v6905_v57 = vpop.eup %6904  ;;  %6920 = vpow2.f32 %v3095_v63  ;;  %v3089_v16 = vmul.f32 1.442695, %v3029_v55  ;;  %v3091_v61 = vmul.f32 1.442695, %v3030_v7  ;;  %v3222_v15 = vmul.f32 %v6127_v34, %v6127_v34 }
 0x42e   :  { %v2709_v43 = vsel %vm1752_vm0, %v6905_v57, 0.0  ;;  %v3537_v19 = vmul.f32 1.442695, %v3477_v59  ;;  %v3539_v8 = vmul.f32 1.442695, %v3478_v26  ;;  %v3253_v4 = vmul.f32 -50.0, %v3221_v5 }
 0x42f   :  { %v2710_v36 = vadd.f32 %v6903_v28, %v2709_v43  ;;  %6922 = vpow2.f32 %v3089_v16  ;;  %v6190_v60 = vadd.f32 -0.9, %v8717_v48  ;;  %v3254_v39 = vmul.f32 -50.0, %v3222_v15 }
 0x430   :  { %v6907_v18 = vpop.eup %6906  ;;  %6924 = vpow2.f32 %v3091_v61  ;;  %v6191_v52 = vadd.f32 -0.9, %v8739_v0  ;;  %v6160_v27 = vadd.f32 -0.7, %v8733_v42  ;;  %v3313_v26 = vmul.f32 1.442695, %v3253_v4 }
 0x431   :  { %2711 = vadd.xlane.f32.xlu1 %v2710_v36  ;;  %6926 = vpow2.f32 %v3537_v19  ;;  %v3669_v63 = vmul.f32 %v6190_v60, %v6190_v60  ;;  %v6161_v55 = vadd.f32 -0.7, %v8745_v2  ;;  %v6909_v28 = vpop.eup %6908  ;;  %v3315_v7 = vmul.f32 1.442695, %v3254_v39  ;;  %v8880_v60 = vpop.xlane.xlu1 %3367 }
 0x432   :  { %6928 = vpow2.f32 %v3539_v8  ;;  %v3670_v59 = vmul.f32 %v6191_v52, %v6191_v52  ;;  %v3447_v34 = vmul.f32 %v6160_v27, %v6160_v27  ;;  %v6911_v57 = vpop.eup %6910  ;;  %v2705_v16 = vsel %vm1752_vm0, %v6909_v28, 0.0 }
 0x433   :  { %6930 = vpow2.f32 %v3313_v26  ;;  %v3701_v61 = vmul.f32 -50.0, %v3669_v63  ;;  %v3448_v5 = vmul.f32 %v6161_v55, %v6161_v55  ;;  %v6913_v43 = vpop.eup %6912  ;;  %v2706_v15 = vadd.f32 %v6907_v18, %v2705_v16  ;;  %v8885_v18 = vpop.xlane.xlu0 %3815 }
 0x434   :  { %6932 = vpow2.f32 %v3315_v7  ;;  %v3702_v36 = vmul.f32 -50.0, %v3670_v59  ;;  %v3479_v19 = vmul.f32 -50.0, %v3447_v34  ;;  %v6915_v4 = vpop.eup %6914  ;;  %v2933_v32 = vsel %vm1752_vm0, %v6913_v43, 0.0 }
 0x435   :  { %v3761_v8 = vmul.f32 1.442695, %v3701_v61  ;;  %v3480_v39 = vmul.f32 -50.0, %v3448_v5  ;;  %v6128_v52 = vadd.f32 -0.5, %v8733_v42  ;;  %v6917_v27 = vpop.eup %6916  ;;  %2707 = vadd.xlane.f32.xlu0 %v2706_v15  ;;  %v2934_v28 = vadd.f32 %v6911_v57, %v2933_v32 }
 0x436   :  { %v3763_v26 = vmul.f32 1.442695, %v3702_v36  ;;  %v3541_v63 = vmul.f32 1.442695, %v3479_v19  ;;  %v6129_v55 = vadd.f32 -0.5, %v8745_v2  ;;  %v2929_v7 = vsel %vm1752_vm0, %v6917_v27, 0.0 }
 0x437   :  { %6934 = vpow2.f32 %v3761_v8  ;;  %v3543_v59 = vmul.f32 1.442695, %v3480_v39  ;;  %v3223_v34 = vmul.f32 %v6128_v52, %v6128_v52  ;;  %2935 = vadd.xlane.f32.xlu1 %v2934_v28  ;;  %v2930_v16 = vadd.f32 %v6915_v4, %v2929_v7  ;;  %v8892_v52 = vpop.xlane.xlu1 %4039  ;;  %v8895_v51 = vpop.xlane.xlu0 %4035 }
 0x438   :  { %6936 = vpow2.f32 %v3763_v26  ;;  %v3224_v61 = vmul.f32 %v6129_v55, %v6129_v55  ;;  %v6192_v5 = vadd.f32 -0.9, %v8733_v42  ;;  %v6193_v57 = vadd.f32 -0.9, %v8745_v2 }
 0x439   :  { %v6919_v43 = vpop.eup %6918  ;;  %6938 = vpow2.f32 %v3541_v63  ;;  %v3255_v32 = vmul.f32 -50.0, %v3223_v34  ;;  %v6224_v15 = vadd.f32 -1.0, %v8733_v42  ;;  %2931 = vadd.xlane.f32.xlu0 %v2930_v16  ;;  %v6225_v39 = vadd.f32 -1.0, %v8745_v2 }
 0x43a   :  { %v6921_v36 = vpop.eup %6920  ;;  %6940 = vpow2.f32 %v3543_v59  ;;  %v3256_v19 = vmul.f32 -50.0, %v3224_v61  ;;  %v3671_v8 = vmul.f32 %v6192_v5, %v6192_v5  ;;  %v3672_v28 = vmul.f32 %v6193_v57, %v6193_v57 }
 0x43b   :  { %v3157_v4 = vsel %vm1752_vm0, %v6921_v36, 0.0  ;;  %v3317_v27 = vmul.f32 1.442695, %v3255_v32  ;;  %v3895_v26 = vmul.f32 %v6224_v15, %v6224_v15  ;;  %v3896_v10 = vmul.f32 %v6225_v39, %v6225_v39 }
 0x43c   :  { %v6923_v63 = vpop.eup %6922  ;;  %v3158_v55 = vadd.f32 %v6919_v43, %v3157_v4  ;;  %v3319_v7 = vmul.f32 1.442695, %v3256_v19  ;;  %v3703_v34 = vmul.f32 -50.0, %v3671_v8  ;;  %v3704_v59 = vmul.f32 -50.0, %v3672_v28 }
 0x43d   :  { %v6925_v42 = vpop.eup %6924  ;;  %6942 = vpow2.f32 %v3317_v27  ;;  %v3927_v16 = vmul.f32 -500000.0, %v3895_v26  ;;  %v6222_v2 = vadd.f32 -1.0, %v8717_v48  ;;  %v3928_v57 = vmul.f32 -500000.0, %v3896_v10 }
 0x43e   :  { %v6927_v61 = vpop.eup %6926  ;;  %3159 = vadd.xlane.f32.xlu1 %v3158_v55  ;;  %v3153_v5 = vsel %vm1752_vm0, %v6925_v42, 0.0  ;;  %6944 = vpow2.f32 %v3319_v7  ;;  %v3765_v32 = vmul.f32 1.442695, %v3703_v34  ;;  %v5074_v43 = vrot.slane %v8705_v44, %v7984_v30 }
 0x43f   :  { %v6929_v15 = vpop.eup %6928  ;;  %v3154_v36 = vadd.f32 %v6923_v63, %v3153_v5  ;;  %v3767_v19 = vmul.f32 1.442695, %v3704_v59  ;;  %v3989_v39 = vmul.f32 1.442695, %v3927_v16  ;;  %v9617_v48 = vrot.slane %v8715_v9, %v7984_v30 }
 0x440   :  { %v6931_v4 = vpop.eup %6930  ;;  %v3601_v28 = vsel %vm1752_vm0, %v6929_v15, 0.0  ;;  %6946 = vpow2.f32 %v3765_v32  ;;  %v3991_v10 = vmul.f32 1.442695, %v3928_v57  ;;  %v8911_v63 = vpop.xlane.xlu0 %1803  ;;  %v6223_v55 = vadd.f32 -1.0, %v8739_v0 }
 0x441   :  { %v8901_v8 = vpop.xlane.xlu1 %1807  ;;  %v8908_v27 = vsel %vm5132_vm2, %v8823_v62, %v9617_v48  ;;  %v6933_v26 = vpop.eup %6932  ;;  %3155 = vadd.xlane.f32.xlu0 %v3154_v36  ;;  %v3602_v44 = vadd.f32 %v6927_v61, %v3601_v28  ;;  %6948 = vpow2.f32 %v3767_v19  ;;  %v3893_v7 = vmul.f32 %v6222_v2, %v6222_v2  ;;  %v9622_v19 = vld [vmem:[#allocation16_spill] sm:$0xff] }
 0x442   :  { %v4786_v9 = vrot.slane %v8662_v29, %v7984_v30  ;;  %v9618_v62 = vrot.slane %v8681_v21, %v7984_v30  ;;  %v9619_v34 = vrot.slane %v8635_v13, %v7984_v30  ;;  %v3377_v59 = vsel %vm1752_vm0, %v6933_v26, 0.0  ;;  %v9620_v29 = vld [vmem:[#allocation15_spill] sm:$0xff] }
 0x443   :  { %6950 = vpow2.f32 %v3989_v39  ;;  %3603 = vadd.xlane.f32.xlu1 %v3602_v44  ;;  %v3378_v16 = vadd.f32 %v6931_v4, %v3377_v59  ;;  %v3894_v61 = vmul.f32 %v6223_v55, %v6223_v55  ;;  %v3925_v0 = vmul.f32 -500000.0, %v3893_v7 }
 0x444   :  { %v5243_v42 = vsel %vm5115_vm1, %v9619_v34, %v9618_v62  ;;  %6952 = vpow2.f32 %v3991_v10  ;;  %v6935_v5 = vpop.eup %6934  ;;  %v4582_v32 = vrot.slane %v9620_v29, %v7984_v30  ;;  %v9621_v21 = vrot.slane %v8512_v35, %v7984_v30 }
 0x445   :  { %v8924_v2 = vpop.xlane.xlu1 %2031  ;;  %v8934_v57 = vsel %vm5132_vm2, %v5243_v42, %v5074_v43  ;;  %v5419_v15 = vadd.f32 1.0, %v8908_v27  ;;  %v6937_v36 = vpop.eup %6936  ;;  %v4682_v39 = vrot.slane %v9622_v19, %v7984_v30  ;;  %v9623_v4 = vrot.slane %v8500_v58, %v7984_v30  ;;  %3379 = vadd.xlane.f32.xlu0 %v3378_v16 }
 0x446   :  { %v5192_v13 = vsel %vm5183_vm5, %v8795_v56, %v9621_v21  ;;  %v9624_v35 = vrot.slane %v8542_v24, %v7984_v30  ;;  %v3926_v43 = vmul.f32 -500000.0, %v3894_v61  ;;  %v6939_v28 = vpop.eup %6938  ;;  %v9625_v10 = vrot.slane %v8531_v12, %v7984_v30  ;;  %v8963_v12 = vpop.xlane.xlu0 %2027 }
 0x447   :  { %v5193_v48 = vsel %vm5183_vm5, %v8792_v25, %v9623_v4  ;;  %v9626_v44 = vrot.slane %v8588_v33, %v7984_v30  ;;  %v3825_v25 = vsel %vm1752_vm0, %v6937_v36, 0.0  ;;  %v3985_v55 = vmul.f32 1.442695, %v3925_v0  ;;  %v6941_v24 = vpop.eup %6940 }
 0x448   :  { %v5209_v56 = vsel %vm5200_vm6, %v5192_v13, %v9624_v35  ;;  %v5210_v26 = vsel %vm5200_vm6, %v5193_v48, %v9625_v10  ;;  %v5437_v62 = vadd.f32 1.0, %v8934_v57  ;;  %v3826_v34 = vadd.f32 %v6935_v5, %v3825_v25 }
 0x449   :  { %v8956_v58 = vsel %vm5217_vm7, %v5209_v56, %v9626_v44  ;;  %v8960_v7 = vsel %vm5217_vm7, %v5210_v26, %v4786_v9  ;;  %v3987_v42 = vmul.f32 1.442695, %v3926_v43  ;;  %v4122_v59 = vrot.slane %v8737_v23, %v7984_v30  ;;  %v8974_v5 = vpop.xlane.xlu1 %2255 }
 0x44a   :  { %v4982_v33 = vrot.slane %v8871_v49, %v7984_v30  ;;  %v3605_v16 = vsel %vm1752_vm0, %v6941_v24, 0.0  ;;  %6954 = vlog2.f32 %v5419_v15  ;;  %v4214_v61 = vrot.slane %v8769_v53, %v7984_v30  ;;  %3827 = vadd.xlane.f32.xlu1 %v3826_v34  ;;  %v6943_v21 = vpop.eup %6942 }
 0x44b   :  { %v5078_v9 = vrot.slane %v8895_v51, %v7984_v30  ;;  %v3606_v0 = vadd.f32 %v6939_v28, %v3605_v16  ;;  %6956 = vpow2.f32 %v3987_v42  ;;  %v4218_v23 = vrot.slane %v8758_v17, %v7984_v30  ;;  %v6945_v53 = vpop.eup %6944 }
 0x44c   :  { %v4310_v49 = vrot.slane %v8786_v11, %v7984_v30  ;;  %v4886_v13 = vrot.slane %v8862_v50, %v7984_v30  ;;  %6958 = vpow2.f32 %v3985_v55  ;;  %v5410_v15 = vadd.f32 1.0, %v8956_v58 }
 0x44d   :  { %v5428_v51 = vadd.f32 1.0, %v8960_v7  ;;  %v4118_v36 = vrot.slane %v8751_v6, %v7984_v30  ;;  %v4406_v4 = vrot.slane %v8807_v41, %v7984_v30  ;;  %3607 = vadd.xlane.f32.xlu0 %v3606_v0  ;;  %v4502_v17 = vrot.slane %v8826_v45, %v7984_v30  ;;  %v6947_v48 = vpop.eup %6946  ;;  %v8998_v41 = vpop.xlane.xlu0 %2251 }
 0x44e   :  { %v5244_v11 = vsel %vm5115_vm1, %v4886_v13, %v4982_v33  ;;  %v3381_v50 = vsel %vm1752_vm0, %v6945_v53, 0.0  ;;  %6960 = vlog2.f32 %v5437_v62  ;;  %v4598_v56 = vrot.slane %v8845_v46, %v7984_v30  ;;  %v6949_v28 = vpop.eup %6948  ;;  %v9011_v34 = vpop.xlane.xlu1 %2479 }
 0x44f   :  { %v5126_v35 = vsel %vm5115_vm1, %v4118_v36, %v4214_v61  ;;  %v8996_v6 = vsel %vm5132_vm2, %v5244_v11, %v5078_v9  ;;  %v3382_v43 = vadd.f32 %v6943_v21, %v3381_v50  ;;  %v5127_v45 = vsel %vm5115_vm1, %v4122_v59, %v4218_v23 }
 0x450   :  { %v5143_v10 = vsel %vm5132_vm2, %v5126_v35, %v4310_v49  ;;  %v4694_v26 = vrot.slane %v8854_v3, %v7984_v30  ;;  %v5422_v44 = vmul.f32 -0.5, %v8908_v27  ;;  %v6951_v25 = vpop.eup %6950  ;;  %v4314_v46 = vrot.slane %v8781_v38, %v7984_v30  ;;  %v9630_v35 = vld [vmem:[#allocation36_spill] sm:$0xff] }
 0x451   :  { %v5160_v55 = vsel %vm5149_vm3, %v5143_v10, %v4406_v4  ;;  %v4790_v24 = vrot.slane %v8865_v20, %v7984_v30  ;;  %3383 = vadd.xlane.f32.xlu1 %v3382_v43  ;;  %v3829_v62 = vsel %vm1752_vm0, %v6949_v28, 0.0  ;;  %v6953_v42 = vpop.eup %6952  ;;  %v4986_v3 = vrot.slane %v8885_v18, %v7984_v30  ;;  %v9035_v53 = vpop.xlane.xlu0 %2475  ;;  %v9631_v43 = vld [vmem:[#allocation38_spill] sm:$0xff] }
 0x452   :  { %v5177_v59 = vsel %vm5166_vm4, %v5160_v55, %v4502_v17  ;;  %v5455_v33 = vadd.f32 1.0, %v8996_v6  ;;  %v3830_v16 = vadd.f32 %v6947_v48, %v3829_v62  ;;  %v5082_v61 = vrot.slane %v8892_v52, %v7984_v30 }
 0x453   :  { %v5194_v38 = vsel %vm5183_vm5, %v5177_v59, %v4598_v56  ;;  %v4053_v20 = vsel %vm1752_vm0, %v6953_v42, 0.0  ;;  %6962 = vlog2.f32 %v5410_v15  ;;  %v4410_v9 = vrot.slane %v8799_v40, %v7984_v30  ;;  %v9628_v15 = vld [vmem:[#allocation12_spill] sm:$0xff]  ;;  %v9634_v42 = vld [vmem:[#allocation39_spill] sm:$0xff] }
 0x454   :  { %v5211_v0 = vsel %vm5200_vm6, %v5194_v38, %v4694_v26  ;;  %v4890_v21 = vrot.slane %v8876_v22, %v7984_v30  ;;  %3831 = vadd.xlane.f32.xlu0 %v3830_v16  ;;  %v4054_v18 = vadd.f32 %v6951_v25, %v4053_v20  ;;  %v9627_v23 = vrot.slane %v9616_v1, %v7984_v30 }
 0x455   :  { %v5144_v52 = vsel %vm5132_vm2, %v5127_v45, %v4314_v46  ;;  %v9033_v13 = vsel %vm5217_vm7, %v5211_v0, %v4790_v24  ;;  %6964 = vlog2.f32 %v5428_v51  ;;  %v5190_v40 = vsel %vm5183_vm5, %v8729_v54, %v4582_v32  ;;  %v9629_v51 = vld [vmem:[#allocation11_spill] sm:$0xff]  ;;  %v9633_v24 = vld [vmem:[#allocation40_spill] sm:$0xff] }
 0x456   :  { %v5191_v49 = vsel %vm5183_vm5, %v8726_v37, %v9627_v23  ;;  %v5245_v37 = vsel %vm5115_vm1, %v4890_v21, %v4986_v3  ;;  %6966 = vlog2.f32 %v5455_v33  ;;  %4055 = vadd.xlane.f32.xlu1 %v4054_v18  ;;  %v4678_v36 = vrot.slane %v9628_v15, %v7984_v30  ;;  %v9056_v32 = vpop.xlane.xlu1 %2703 }
 0x457   :  { %v5208_v1 = vsel %vm5200_vm6, %v5191_v49, %v4682_v39  ;;  %v6955_v22 = vpop.eup %6954  ;;  %v4778_v4 = vrot.slane %v9629_v51, %v7984_v30  ;;  %v4506_v29 = vrot.slane %v8818_v14, %v7984_v30  ;;  %v9054_v54 = vsel %vm5132_vm2, %v5245_v37, %v5082_v61 }
 0x458   :  { %v6957_v19 = vpop.eup %6956  ;;  %v5161_v39 = vsel %vm5149_vm3, %v5144_v52, %v4410_v9  ;;  %v5446_v17 = vadd.f32 1.0, %v9033_v13  ;;  %v5423_v11 = vadd.f32 1.0, %v5422_v44  ;;  %v5440_v50 = vmul.f32 -0.5, %v8934_v57  ;;  %v9632_v44 = vld [vmem:[#allocation33_spill] sm:$0xff] }
 0x459   :  { %v6959_v48 = vpop.eup %6958  ;;  %v4774_v56 = vrot.slane %v9630_v35, %v7984_v30  ;;  %v4870_v14 = vrot.slane %v9631_v43, %v7984_v30  ;;  %v4049_v28 = vsel %vm1752_vm0, %v6957_v19, 0.0  ;;  %v5425_v45 = vand.u32 2147483647, %v8908_v27  ;;  %v9078_v16 = vpop.xlane.xlu0 %2699 }
 0x45a   :  { %v4602_v10 = vrot.slane %v8840_v31, %v7984_v30  ;;  %v5473_v26 = vadd.f32 1.0, %v9054_v54  ;;  %v4050_v25 = vadd.f32 %v6959_v48, %v4049_v28  ;;  %5560 = vadd.xlane.f32.xlu1 %v9632_v44  ;;  %v5421_v46 = vmul.f32 0.6931472, %v6955_v22  ;;  %v9638_v22 = vld [vmem:[#allocation28_spill] sm:$0xff] }
 0x45b   :  { %v6961_v55 = vpop.eup %6960  ;;  %v4966_v62 = vrot.slane %v9633_v24, %v7984_v30  ;;  %v5062_v59 = vrot.slane %v9634_v42, %v7984_v30  ;;  %v5178_v3 = vsel %vm5166_vm4, %v5161_v39, %v4506_v29  ;;  %v4698_v33 = vrot.slane %v8851_v47, %v7984_v30  ;;  %v9639_v39 = vld [vmem:[#allocation24_spill] sm:$0xff] }
 0x45c   :  { %6968 = vlog2.f32 %v5446_v17  ;;  %v4794_v31 = vrot.slane %v8880_v60, %v7984_v30  ;;  %4051 = vadd.xlane.f32.xlu0 %v4050_v25  ;;  %v5424_v38 = vmul.f32 %v5423_v11, %v8908_v27  ;;  %v5441_v61 = vadd.f32 1.0, %v5440_v50  ;;  %v9089_v21 = vpop.xlane.xlu1 %2927  ;;  %v9637_v60 = vld [vmem:[#allocation34_spill] sm:$0xff]  ;;  %v9643_v25 = vld [vmem:[#allocation31_spill] sm:$0xff] }
 0x45d   :  { %vm9083_vm0 = vcmp.lt.f32.partialorder %v5425_v45, 0.0004427343  ;;  %v5443_v9 = vand.u32 2147483647, %v8934_v57  ;;  %v5413_v0 = vmul.f32 -0.5, %v8956_v58  ;;  %v5431_v47 = vmul.f32 -0.5, %v8960_v7 }
 0x45e   :  { %v5195_v18 = vsel %vm5183_vm5, %v5178_v3, %v4602_v10  ;;  %6970 = vlog2.f32 %v5473_v26  ;;  %5566 = vadd.xlane.f32.xlu1 %v9637_v60  ;;  %v5427_v27 = vsel %vm9083_vm0, %v5424_v38, %v5421_v46  ;;  %v5439_v23 = vmul.f32 0.6931472, %v6961_v55  ;;  %v9642_v10 = vld [vmem:[#allocation42_spill] sm:$0xff]  ;;  %v9644_v55 = vld [vmem:[#allocation17_spill] sm:$0xff] }
 0x45f   :  { %v5207_v49 = vsel %vm5200_vm6, %v5190_v40, %v4678_v36  ;;  %v9098_v52 = vsel %vm5217_vm7, %v5208_v1, %v4778_v4  ;;  %v5212_v37 = vsel %vm5200_vm6, %v5195_v18, %v4698_v33  ;;  %6972 = vlog2.f32 %v9638_v22  ;;  %v9120_v11 = vpop.xlane.xlu0 %2923 }
 0x460   :  { %v6963_v15 = vpop.eup %6962  ;;  %v5240_v51 = vsel %vm5115_vm1, %v4870_v14, %v4966_v62  ;;  %v9104_v29 = vsel %vm5217_vm7, %v5212_v37, %v4794_v31  ;;  %v5458_v19 = vmul.f32 -0.5, %v8996_v6  ;;  %4023 = vadd.xlane.f32.xlu0 %v9639_v39  ;;  %v5442_v17 = vmul.f32 %v5441_v61, %v8934_v57 }
 0x461   :  { %v9110_v40 = vsel %vm5217_vm7, %v5207_v49, %v4774_v56  ;;  %v9113_v1 = vsel %vm5132_vm2, %v5240_v51, %v5062_v59  ;;  %v5607_v36 = vsel %vm5558_vm9, %v5427_v27, 0.0  ;;  %vm9116_vm12 = vcmp.lt.f32.partialorder %v5443_v9, 0.0004427343  ;;  %v9647_v27 = vld [vmem:[#allocation32_spill] sm:$0xff] }
 0x462   :  { %v6965_v50 = vpop.eup %6964  ;;  %5608 = vadd.xlane.f32.xlu1 %v5607_v36  ;;  %v5445_v48 = vsel %vm9116_vm12, %v5442_v17, %v5439_v23  ;;  %v5414_v57 = vadd.f32 1.0, %v5413_v0  ;;  %v5416_v35 = vand.u32 2147483647, %v8956_v58  ;;  %v5432_v56 = vadd.f32 1.0, %v5431_v47  ;;  %v9129_v45 = vpop.xlane.xlu1 %3151  ;;  %v9663_v23 = vld [vmem:[#allocation25_spill] sm:$0xff] }
 0x463   :  { %v6967_v43 = vpop.eup %6966  ;;  %v9126_v14 = vadd.f32 1.0, %v9098_v52  ;;  %v5464_v28 = vadd.f32 1.0, %v9104_v29  ;;  %v9132_v26 = vmul.f32 0.6931472, %v9642_v10  ;;  %v9135_v44 = vadd.f32 1.0, %v9643_v25 }
 0x464   :  { %v9138_v46 = vadd.f32 1.0, %v9110_v40  ;;  %5556 = vadd.xlane.f32.xlu0 %v9644_v55  ;;  %v5412_v24 = vmul.f32 0.6931472, %v6963_v15  ;;  %v5434_v62 = vand.u32 2147483647, %v8960_v7  ;;  %v5459_v42 = vadd.f32 1.0, %v5458_v19 }
 0x465   :  { %v5383_v59 = vadd.f32 1.0, %v9113_v1  ;;  %v5613_v3 = vsel %vm5558_vm9, %v5445_v48, 0.0  ;;  %v5430_v33 = vmul.f32 0.6931472, %v6965_v50  ;;  %v5461_v31 = vand.u32 2147483647, %v8996_v6 }
 0x466   :  { %5614 = vadd.xlane.f32.xlu1 %v5613_v3  ;;  %v5415_v38 = vmul.f32 %v5414_v57, %v8956_v58  ;;  %vm9146_vm13 = vcmp.lt.f32.partialorder %v5416_v35, 0.0004427343  ;;  %v5433_v20 = vmul.f32 %v5432_v56, %v8960_v7  ;;  %v5457_v9 = vmul.f32 0.6931472, %v6967_v43  ;;  %v9156_v60 = vpop.xlane.xlu0 %3147  ;;  %v9652_v19 = vld [vmem:[#allocation26_spill] sm:$0xff]  ;;  %v9653_v55 = vld [vmem:[#allocation20_spill] sm:$0xff] }
 0x467   :  { %6974 = vlog2.f32 %v5464_v28  ;;  %v5476_v0 = vmul.f32 -0.5, %v9054_v54  ;;  %v4130_v47 = vrot.slane %v8901_v8, %v7984_v30  ;;  %v4226_v18 = vrot.slane %v8924_v2, %v7984_v30 }
 0x468   :  { %v4222_v58 = vrot.slane %v8963_v12, %v7984_v30  ;;  %5563 = vadd.xlane.f32.xlu0 %v9647_v27  ;;  %v5418_v7 = vsel %vm9146_vm13, %v5415_v38, %v5412_v24  ;;  %vm9163_vm14 = vcmp.lt.f32.partialorder %v5434_v62, 0.0004427343  ;;  %v5460_v49 = vmul.f32 %v5459_v42, %v8996_v6  ;;  %v3596_v12 = vpop.xlane.xlu1 %3595 }
 0x469   :  { %v6969_v8 = vpop.eup %6968  ;;  %v5436_v2 = vsel %vm9163_vm14, %v5433_v20, %v5430_v33  ;;  %vm9170_vm15 = vcmp.lt.f32.partialorder %v5461_v31, 0.0004427343  ;;  %6976 = vlog2.f32 %v5383_v59  ;;  %v9175_v22 = vmul.f32 -0.5, %v9113_v1 }
 0x46a   :  { %v5449_v15 = vmul.f32 -0.5, %v9033_v13  ;;  %v4126_v51 = vrot.slane %v8911_v63, %v7984_v30  ;;  %v4322_v6 = vrot.slane %v8974_v5, %v7984_v30  ;;  %5572 = vadd.xlane.f32.xlu1 %v9652_v19  ;;  %v5463_v39 = vsel %vm9170_vm15, %v5460_v49, %v5457_v9  ;;  %v3372_v48 = vpop.xlane.xlu0 %3371 }
 0x46b   :  { %v6971_v17 = vpop.eup %6970  ;;  %v5129_v36 = vsel %vm5115_vm1, %v4130_v47, %v4226_v18  ;;  %v4318_v4 = vrot.slane %v8998_v41, %v7984_v30  ;;  %v5604_v50 = vsel %vm5554_vm8, %v5418_v7, 0.0  ;;  %v5477_v57 = vadd.f32 1.0, %v5476_v0 }
 0x46c   :  { %v9189_v35 = vpop.eup %6972  ;;  %v5467_v63 = vmul.f32 -0.5, %v9104_v29  ;;  %v5128_v5 = vsel %vm5115_vm1, %v4126_v51, %v4222_v58  ;;  %5605 = vadd.xlane.f32.xlu0 %v5604_v50  ;;  %v5610_v56 = vsel %vm5554_vm8, %v5436_v2, 0.0  ;;  %v5448_v43 = vmul.f32 0.6931472, %v6969_v8  ;;  %v9667_v50 = vld [vmem:[#allocation41_spill] sm:$0xff] }
 0x46d   :  { %v4418_v28 = vrot.slane %v9011_v34, %v7984_v30  ;;  %v4414_v41 = vrot.slane %v9035_v53, %v7984_v30  ;;  %v5619_v10 = vsel %vm5558_vm9, %v5463_v39, 0.0  ;;  %v5479_v25 = vand.u32 2147483647, %v9054_v54 }
 0x46e   :  { %v9654_v24 = vand.u32 2147483647, %v9653_v55  ;;  %v5146_v42 = vsel %vm5132_vm2, %v5129_v36, %v4322_v6  ;;  %v4510_v59 = vrot.slane %v9078_v16, %v7984_v30  ;;  %5620 = vadd.xlane.f32.xlu1 %v5619_v10  ;;  %v5450_v34 = vadd.f32 1.0, %v5449_v15 }
 0x46f   :  { %v5475_v3 = vmul.f32 0.6931472, %v6971_v17  ;;  %v5145_v53 = vsel %vm5132_vm2, %v5128_v5, %v4318_v4  ;;  %v4606_v33 = vrot.slane %v9120_v11, %v7984_v30  ;;  %v5452_v31 = vand.u32 2147483647, %v9033_v13  ;;  %v3820_v38 = vpop.xlane.xlu1 %3819  ;;  %v9666_v17 = vld [vmem:[#allocation19_spill] sm:$0xff] }
 0x470   :  { %vm9202_vm10 = vcmp.lt.f32.partialorder %v9654_v24, 0.0004427343  ;;  %v5478_v61 = vmul.f32 %v5477_v57, %v9054_v54  ;;  %v4514_v20 = vrot.slane %v9056_v32, %v7984_v30  ;;  %5611 = vadd.xlane.f32.xlu0 %v5610_v56  ;;  %v4702_v16 = vrot.slane %v9156_v60, %v7984_v30  ;;  %v9659_v32 = vld [vmem:[#allocation21_spill] sm:$0xff] }
 0x471   :  { %v4894_v9 = vrot.slane %v3596_v12, %v7984_v30  ;;  %v4990_v0 = vrot.slane %v3820_v38, %v7984_v30  ;;  %v5163_v47 = vsel %vm5149_vm3, %v5146_v42, %v4418_v28  ;;  %v5162_v11 = vsel %vm5149_vm3, %v5145_v53, %v4414_v41  ;;  %v3600_v58 = vpop.xlane.xlu0 %3599 }
 0x472   :  { %v4798_v18 = vrot.slane %v3372_v48, %v7984_v30  ;;  %vm9223_vm11 = vcmp.lt.f32.partialorder %v5479_v25, 0.0004427343  ;;  %v9660_v27 = vand.u32 2147483647, %v9659_v32  ;;  %v5179_v60 = vsel %vm5166_vm4, %v5162_v11, %v4510_v59  ;;  %5578 = vadd.xlane.f32.xlu1 %v9663_v23  ;;  %v9669_v59 = vld [vmem:[#allocation22_spill] sm:$0xff] }
 0x473   :  { %v5451_v49 = vmul.f32 %v5450_v34, %v9033_v13  ;;  %v9237_v8 = vsel %vm5115_vm1, %v4894_v9, %v4990_v0  ;;  %v5481_v2 = vsel %vm9223_vm11, %v5478_v61, %v5475_v3  ;;  %v4610_v37 = vrot.slane %v9089_v21, %v7984_v30  ;;  %v3376_v51 = vpop.xlane.xlu1 %3375  ;;  %v9674_v9 = vld [vmem:[#allocation23_spill] sm:$0xff] }
 0x474   :  { %vm9229_vm0 = vcmp.lt.f32.partialorder %v9660_v27, 0.0004427343  ;;  %v5196_v12 = vsel %vm5183_vm5, %v5179_v60, %v4606_v33  ;;  %vm9244_vm12 = vcmp.lt.f32.partialorder %v5452_v31, 0.0004427343  ;;  %6978 = vlog2.f32 %v9138_v46  ;;  %v6975_v6 = vpop.eup %6974  ;;  %5569 = vadd.xlane.f32.xlu0 %v9666_v17  ;;  %v9670_v33 = vld [vmem:[#allocation29_spill] sm:$0xff] }
 0x475   :  { %v5180_v13 = vsel %vm5166_vm4, %v5163_v47, %v4514_v20  ;;  %v4706_v19 = vrot.slane %v9129_v45, %v7984_v30  ;;  %v5213_v39 = vsel %vm5200_vm6, %v5196_v12, %v4702_v16  ;;  %v5454_v21 = vsel %vm9244_vm12, %v5451_v49, %v5448_v43  ;;  %v9668_v45 = vld [vmem:[#allocation30_spill] sm:$0xff]  ;;  %v9673_v20 = vld [vmem:[#allocation43_spill] sm:$0xff] }
 0x476   :  { %v9257_v36 = vsel %vm5217_vm7, %v5213_v39, %v4798_v18  ;;  %v5625_v4 = vsel %vm5558_vm9, %v5481_v2, 0.0  ;;  %v4802_v46 = vrot.slane %v3376_v51, %v7984_v30  ;;  %v5367_v48 = vmul.f32 0.6931472, %v9667_v50  ;;  %v6977_v57 = vpop.eup %6976  ;;  %v9675_v47 = vld [vmem:[#allocation27_spill] sm:$0xff] }
 0x477   :  { %5626 = vadd.xlane.f32.xlu1 %v5625_v4  ;;  %v5355_v5 = vsel %vm9202_vm10, %v9668_v45, %v9132_v26  ;;  %v5468_v56 = vadd.f32 1.0, %v5467_v63  ;;  %v5387_v28 = vadd.f32 1.0, %v9175_v22  ;;  %6980 = vlog2.f32 %v9126_v14  ;;  %v3824_v10 = vpop.xlane.xlu0 %3823 }
 0x478   :  { %v5197_v43 = vsel %vm5183_vm5, %v5180_v13, %v4610_v37  ;;  %v5616_v41 = vsel %vm5554_vm8, %v5454_v21, 0.0  ;;  %v5466_v25 = vmul.f32 0.6931472, %v6975_v6  ;;  %v5470_v55 = vand.u32 2147483647, %v9104_v29 }
 0x479   :  { %v5214_v24 = vsel %vm5200_vm6, %v5197_v43, %v4706_v19  ;;  %v5482_v42 = vadd.f32 1.0, %v9257_v36  ;;  %5617 = vadd.xlane.f32.xlu0 %v5616_v41  ;;  %v4898_v26 = vrot.slane %v3600_v58, %v7984_v30  ;;  %v4994_v63 = vrot.slane %v3824_v10, %v7984_v30 }
 0x47a   :  { %v9276_v22 = vsel %vm5217_vm7, %v5214_v24, %v4802_v46  ;;  %v5583_v14 = vsel %vm5558_vm9, %v5355_v5, 0.0  ;;  %v5389_v62 = vand.u32 2147483647, %v9113_v1  ;;  %v5359_v34 = vmul.f32 -0.5, %v9669_v59 }
 0x47b   :  { %v9282_v3 = vsel %vm5115_vm1, %v4898_v26, %v4994_v63  ;;  %5584 = vadd.xlane.f32.xlu1 %v5583_v14  ;;  %v5469_v53 = vmul.f32 %v5468_v56, %v9104_v29  ;;  %v5373_v31 = vsel %vm9229_vm0, %v9670_v33, %v5367_v48  ;;  %v5385_v38 = vmul.f32 0.6931472, %v6977_v57 }
 0x47c   :  { %vm9288_vm13 = vcmp.lt.f32.partialorder %v5470_v55, 0.0004427343  ;;  %v5340_v16 = vmul.f32 0.6931472, %v9673_v20  ;;  %v5344_v0 = vand.u32 2147483647, %v9674_v9  ;;  %6982 = vlog2.f32 %v5482_v42 }
 0x47d   :  { %5575 = vadd.xlane.f32.xlu0 %v9675_v47  ;;  %v5500_v11 = vadd.f32 1.0, %v9276_v22  ;;  %v5472_v29 = vsel %vm9288_vm13, %v5469_v53, %v5466_v25  ;;  %v5388_v18 = vmul.f32 %v5387_v28, %v9113_v1  ;;  %v5589_v58 = vsel %vm5558_vm9, %v5373_v31, 0.0 }
 0x47e   :  { %vm5390_vm14 = vcmp.lt.f32.partialorder %v5389_v62, 0.0004427343  ;;  %v5343_v54 = vmul.f32 %v9135_v44, %v9674_v9  ;;  %v5360_v27 = vadd.f32 1.0, %v5359_v34  ;;  %v5377_v7 = vmul.f32 -0.5, %v9110_v40  ;;  %v9327_v34 = vpop.xlane.xlu0 %4043 }
 0x47f   :  { %5590 = vadd.xlane.f32.xlu1 %v5589_v58  ;;  %v5391_v32 = vsel %vm5390_vm14, %v5388_v18, %v5385_v38  ;;  %v5622_v60 = vsel %vm5554_vm8, %v5472_v29, 0.0  ;;  %vm5345_vm15 = vcmp.lt.f32.partialorder %v5344_v0, 0.0004427343  ;;  %v5362_v23 = vand.u32 2147483647, %v9669_v59 }
 0x480   :  { %6984 = vlog2.f32 %v5500_v11  ;;  %v5346_v1 = vsel %vm5345_vm15, %v5343_v54, %v5340_v16  ;;  %v5358_v2 = vmul.f32 0.6931472, %v9189_v35  ;;  %v5595_v37 = vsel %vm5558_vm9, %v5391_v32, 0.0 }
 0x481   :  { %v6979_v49 = vpop.eup %6978  ;;  %5623 = vadd.xlane.f32.xlu0 %v5622_v60  ;;  %v5361_v44 = vmul.f32 %v5360_v27, %v9669_v59  ;;  %v5378_v12 = vadd.f32 1.0, %v5377_v7  ;;  %v5395_v15 = vmul.f32 -0.5, %v9098_v52  ;;  %v5580_v6 = vsel %vm5554_vm8, %v5346_v1, 0.0 }
 0x482   :  { %vm5363_vm10 = vcmp.lt.f32.partialorder %v5362_v23, 0.0004427343  ;;  %v5380_v13 = vand.u32 2147483647, %v9110_v40  ;;  %v5376_v39 = vmul.f32 0.6931472, %v6979_v49 }
 0x483   :  { %5596 = vadd.xlane.f32.xlu1 %v5595_v37  ;;  %v5364_v19 = vsel %vm5363_vm10, %v5361_v44, %v5358_v2  ;;  %v5485_v17 = vmul.f32 -0.5, %v9257_v36  ;;  %v5379_v35 = vmul.f32 %v5378_v12, %v9110_v40  ;;  %v5396_v21 = vadd.f32 1.0, %v5395_v15 }
 0x484   :  { %v6981_v51 = vpop.eup %6980  ;;  %v5586_v4 = vsel %vm5554_vm8, %v5364_v19, 0.0  ;;  %vm5381_vm11 = vcmp.lt.f32.partialorder %v5380_v13, 0.0004427343  ;;  %v5398_v46 = vand.u32 2147483647, %v9098_v52  ;;  %v5503_v45 = vmul.f32 -0.5, %v9276_v22 }
 0x485   :  { %5581 = vadd.xlane.f32.xlu0 %v5580_v6  ;;  %v5382_v50 = vsel %vm5381_vm11, %v5379_v35, %v5376_v39  ;;  %v5394_v48 = vmul.f32 0.6931472, %v6981_v51  ;;  %v5397_v5 = vmul.f32 %v5396_v21, %v9098_v52  ;;  %v5486_v56 = vadd.f32 1.0, %v5485_v17 }
 0x486   :  { %v5592_v28 = vsel %vm5554_vm8, %v5382_v50, 0.0  ;;  %vm5399_vm0 = vcmp.lt.f32.partialorder %v5398_v46, 0.0004427343  ;;  %v5488_v40 = vand.u32 2147483647, %v9257_v36  ;;  %v5504_v55 = vadd.f32 1.0, %v5503_v45 }
 0x487   :  { %v5400_v43 = vsel %vm5399_vm0, %v5397_v5, %v5394_v48  ;;  %v5487_v25 = vmul.f32 %v5486_v56, %v9257_v36  ;;  %v5506_v42 = vand.u32 2147483647, %v9276_v22  ;;  %v9325_v36 = vpop.xlane.xlu1 %4047  ;;  %vm5832_vm14 = vcmask 1042434  }
 0x488   :  { %v5598_v24 = vsel %vm5554_vm8, %v5400_v43, 0.0  ;;  %vm5489_vm12 = vcmp.lt.f32.partialorder %v5488_v40, 0.0004427343  ;;  %v5505_v63 = vmul.f32 %v5504_v55, %v9276_v22  ;;  %vm5834_vm15 = vcmask 1043459  }
 0x489   :  { %5587 = vadd.xlane.f32.xlu0 %v5586_v4  ;;  %v6983_v57 = vpop.eup %6982  ;;  %vm5507_vm13 = vcmp.lt.f32.partialorder %v5506_v42, 0.0004427343  ;;  %vm5836_vm10 = vcmask 1044484   ;;  %vm5838_vm11 = vcmask 1045509   ;;  %vm5840_vm0 = vcmask 1046534  }
 0x48a   :  { %v5484_v41 = vmul.f32 0.6931472, %v6983_v57 }
 0x48c   :  { %v5490_v52 = vsel %vm5489_vm12, %v5487_v25, %v5484_v41  ;;  %vm5842_vm12 = vcmask 1047559  }
 0x48d   :  { %5593 = vadd.xlane.f32.xlu0 %v5592_v28  ;;  %v6985_v10 = vpop.eup %6984  ;;  %v5628_v14 = vsel %vm5554_vm8, %v5490_v52, 0.0 }
 0x48e   :  { %v5502_v26 = vmul.f32 0.6931472, %v6985_v10 }
 0x490   :  { %v5508_v62 = vsel %vm5507_vm13, %v5505_v63, %v5502_v26  ;;  %v5086_v63 = vrot.slane %v9327_v34, %v7984_v30  ;;  %v9677_v34 = vld [vmem:[#allocation18_spill] sm:$0xff]  ;;  %vm5853_vm13 = vcmask 89088  }
 0x491   :  { %5599 = vadd.xlane.f32.xlu0 %v5598_v24  ;;  %v5634_v59 = vsel %vm5554_vm8, %v5508_v62, 0.0 }
 0x495   :  { %5629 = vadd.xlane.f32.xlu0 %v5628_v14 }
 0x499   :  { %5635 = vadd.xlane.f32.xlu0 %v5634_v59 }
 0x4a4   :  { %v1812_v33 = vpop.xlane.xlu0 %1811 }
 0x4a5   :  { %v4134_v54 = vrot.slane %v1812_v33, %v7984_v30 }
 0x4a6   :  { %v1816_v53 = vpop.xlane.xlu1 %1815 }
 0x4a7   :  { %v4138_v60 = vrot.slane %v1816_v53, %v7984_v30  ;;  %v5090_v53 = vrot.slane %v9325_v36, %v7984_v30 }
 0x4a9   :  { %v2036_v38 = vpop.xlane.xlu0 %2035 }
 0x4aa   :  { %v2040_v31 = vpop.xlane.xlu1 %2039  ;;  %v4230_v29 = vrot.slane %v2036_v38, %v7984_v30 }
 0x4ab   :  { %v4234_v23 = vrot.slane %v2040_v31, %v7984_v30  ;;  %v5262_v31 = vsel %vm5132_vm2, %v9237_v8, %v5086_v63 }
 0x4ac   :  { %v5130_v49 = vsel %vm5115_vm1, %v4134_v54, %v4230_v29  ;;  %v5491_v36 = vadd.f32 1.0, %v5262_v31 }
 0x4ad   :  { %v5131_v13 = vsel %vm5115_vm1, %v4138_v60, %v4234_v23 }
 0x4ae   :  { %v2264_v61 = vpop.xlane.xlu1 %2263 }
 0x4af   :  { %v2260_v20 = vpop.xlane.xlu0 %2259  ;;  %v4330_v15 = vrot.slane %v2264_v61, %v7984_v30 }
 0x4b0   :  { %v4326_v58 = vrot.slane %v2260_v20, %v7984_v30  ;;  %v9676_v20 = vld [vmem:[#allocation37_spill] sm:$0xff] }
 0x4b1   :  { %v5148_v4 = vsel %vm5132_vm2, %v5131_v13, %v4330_v15 }
 0x4b2   :  { %v2488_v16 = vpop.xlane.xlu1 %2487  ;;  %v5147_v2 = vsel %vm5132_vm2, %v5130_v49, %v4326_v58 }
 0x4b3   :  { %v4426_v35 = vrot.slane %v2488_v16, %v7984_v30  ;;  %v4970_v16 = vrot.slane %v9676_v20, %v7984_v30 }
 0x4b5   :  { %v2484_v22 = vpop.xlane.xlu0 %2483  ;;  %v5165_v57 = vsel %vm5149_vm3, %v5148_v4, %v4426_v35 }
 0x4b6   :  { %v4422_v32 = vrot.slane %v2484_v22, %v7984_v30 }
 0x4b8   :  { %v5164_v12 = vsel %vm5149_vm3, %v5147_v2, %v4422_v32 }
 0x4ba   :  { %v2712_v9 = vpop.xlane.xlu1 %2711 }
 0x4bb   :  { %v4522_v48 = vrot.slane %v2712_v9, %v7984_v30  ;;  %v4874_v9 = vrot.slane %v9677_v34, %v7984_v30 }
 0x4bd   :  { %v5182_v28 = vsel %vm5166_vm4, %v5165_v57, %v4522_v48  ;;  %v5241_v58 = vsel %vm5115_vm1, %v4874_v9, %v4970_v16 }
 0x4be   :  { %v2708_v0 = vpop.xlane.xlu0 %2707 }
 0x4bf   :  { %v4518_v27 = vrot.slane %v2708_v0, %v7984_v30  ;;  %v9374_v0 = vsel %vm5132_vm2, %v9282_v3, %v5090_v53 }
 0x4c0   :  { %v2936_v47 = vpop.xlane.xlu1 %2935  ;;  %v5512_v48 = vmul.f32 -0.5, %v9374_v0 }
 0x4c1   :  { %v5181_v51 = vsel %vm5166_vm4, %v5164_v12, %v4518_v27  ;;  %v4618_v45 = vrot.slane %v2936_v47, %v7984_v30 }
 0x4c2   :  { %v2932_v11 = vpop.xlane.xlu0 %2931 }
 0x4c3   :  { %v4614_v1 = vrot.slane %v2932_v11, %v7984_v30  ;;  %v5199_v43 = vsel %vm5183_vm5, %v5182_v28, %v4618_v45 }
 0x4c5   :  { %v5198_v19 = vsel %vm5183_vm5, %v5181_v51, %v4614_v1 }
 0x4c7   :  { %v3160_v18 = vpop.xlane.xlu1 %3159 }
 0x4c8   :  { %v4714_v5 = vrot.slane %v3160_v18, %v7984_v30 }
 0x4ca   :  { %v3156_v7 = vpop.xlane.xlu0 %3155  ;;  %v5216_v10 = vsel %vm5200_vm6, %v5199_v43, %v4714_v5  ;;  %v5497_v5 = vand.u32 2147483647, %v5262_v31 }
 0x4cb   :  { %v4710_v37 = vrot.slane %v3156_v7, %v7984_v30  ;;  %v5509_v7 = vadd.f32 1.0, %v9374_v0 }
 0x4cc   :  { %v9340_v44 = vpop.xlane.xlu1 %3603 }
 0x4cd   :  { %v5215_v17 = vsel %vm5200_vm6, %v5198_v19, %v4710_v37  ;;  %v4902_v54 = vrot.slane %v9340_v44, %v7984_v30 }
 0x4ce   :  { %v3380_v6 = vpop.xlane.xlu0 %3379 }
 0x4cf   :  { %v4806_v39 = vrot.slane %v3380_v6, %v7984_v30 }
 0x4d1   :  { %v5232_v21 = vsel %vm5217_vm7, %v5215_v17, %v4806_v39 }
 0x4d2   :  { %v5518_v46 = vadd.f32 1.0, %v5232_v21  ;;  %v5521_v25 = vmul.f32 -0.5, %v5232_v21  ;;  %v5524_v26 = vand.u32 2147483647, %v5232_v21 }
 0x4d3   :  { %v3828_v50 = vpop.xlane.xlu1 %3827 }
 0x4d4   :  { %6986 = vlog2.f32 %v5518_v46  ;;  %v5522_v52 = vadd.f32 1.0, %v5521_v25  ;;  %vm5525_vm3 = vcmp.lt.f32.partialorder %v5524_v26, 0.0004427343  ;;  %v4998_v47 = vrot.slane %v3828_v50, %v7984_v30 }
 0x4d6   :  { %v3608_v56 = vpop.xlane.xlu0 %3607  ;;  %v5523_v59 = vmul.f32 %v5522_v52, %v5232_v21  ;;  %v5248_v23 = vsel %vm5115_vm1, %v4902_v54, %v4998_v47  ;;  %v5494_v21 = vmul.f32 -0.5, %v5262_v31 }
 0x4d7   :  { %v4906_v44 = vrot.slane %v3608_v56, %v7984_v30 }
 0x4d8   :  { %v5495_v57 = vadd.f32 1.0, %v5494_v21 }
 0x4da   :  { %v3384_v40 = vpop.xlane.xlu1 %3383  ;;  %v5496_v25 = vmul.f32 %v5495_v57, %v5262_v31 }
 0x4db   :  { %v4810_v41 = vrot.slane %v3384_v40, %v7984_v30 }
 0x4dd   :  { %v5233_v55 = vsel %vm5217_vm7, %v5216_v10, %v4810_v41  ;;  %v3832_v42 = vpop.xlane.xlu0 %3831 }
 0x4de   :  { %v5536_v24 = vadd.f32 1.0, %v5233_v55  ;;  %v5539_v38 = vmul.f32 -0.5, %v5233_v55  ;;  %v5542_v27 = vand.u32 2147483647, %v5233_v55  ;;  %v5002_v49 = vrot.slane %v3832_v42, %v7984_v30 }
 0x4df   :  { %v4056_v32 = vpop.xlane.xlu1 %4055  ;;  %v5515_v42 = vand.u32 2147483647, %v9374_v0 }
 0x4e0   :  { %6988 = vlog2.f32 %v5536_v24  ;;  %v5540_v18 = vadd.f32 1.0, %v5539_v38  ;;  %v5098_v2 = vrot.slane %v4056_v32, %v7984_v30  ;;  %vm5543_vm4 = vcmp.lt.f32.partialorder %v5542_v27, 0.0004427343 }
 0x4e1   :  { %v6987_v14 = vpop.eup %6986  ;;  %6990 = vlog2.f32 %v5491_v36  ;;  %v5249_v6 = vsel %vm5115_vm1, %v4906_v44, %v5002_v49  ;;  %vm5516_vm5 = vcmp.lt.f32.partialorder %v5515_v42, 0.0004427343 }
 0x4e2   :  { %v5520_v62 = vmul.f32 0.6931472, %v6987_v14  ;;  %v5541_v15 = vmul.f32 %v5540_v18, %v5233_v55  ;;  %v5265_v39 = vsel %vm5132_vm2, %v5249_v6, %v5098_v2  ;;  %v5513_v55 = vadd.f32 1.0, %v5512_v48 }
 0x4e3   :  { %v5545_v17 = vadd.f32 1.0, %v5265_v39  ;;  %v5548_v14 = vmul.f32 -0.5, %v5265_v39  ;;  %v5551_v34 = vand.u32 2147483647, %v5265_v39 }
 0x4e4   :  { %v5526_v61 = vsel %vm5525_vm3, %v5523_v59, %v5520_v62  ;;  %v5514_v62 = vmul.f32 %v5513_v55, %v9374_v0 }
 0x4e5   :  { %v4052_v33 = vpop.xlane.xlu0 %4051  ;;  %v5640_v22 = vsel %vm5554_vm8, %v5526_v61, 0.0  ;;  %v5549_v16 = vadd.f32 1.0, %v5548_v14  ;;  %vm5552_vm7 = vcmp.lt.f32.partialorder %v5551_v34, 0.0004427343 }
 0x4e6   :  { %5641 = vadd.xlane.f32.xlu0 %v5640_v22  ;;  %v5094_v8 = vrot.slane %v4052_v33, %v7984_v30 }
 0x4e7   :  { %v5550_v47 = vmul.f32 %v5549_v16, %v5265_v39 }
 0x4e8   :  { %v5264_v37 = vsel %vm5132_vm2, %v5248_v23, %v5094_v8 }
 0x4e9   :  { %v4024_v11 = vpop.xlane.xlu0 %4023  ;;  %v5527_v13 = vadd.f32 1.0, %v5264_v37  ;;  %v5530_v41 = vmul.f32 -0.5, %v5264_v37  ;;  %v5533_v33 = vand.u32 2147483647, %v5264_v37 }
 0x4ea   :  { %v5066_v29 = vrot.slane %v4024_v11, %v7984_v30 }
 0x4eb   :  { %v5531_v59 = vadd.f32 1.0, %v5530_v41  ;;  %vm5534_vm6 = vcmp.lt.f32.partialorder %v5533_v33, 0.0004427343 }
 0x4ec   :  { %v5257_v3 = vsel %vm5132_vm2, %v5241_v58, %v5066_v29  ;;  %vm5498_vm2 = vcmp.lt.f32.partialorder %v5497_v5, 0.0004427343  ;;  %v5561_v58 = vpop.xlane.xlu1 %5560 }
 0x4ed   :  { %v6989_v60 = vpop.eup %6988  ;;  %v5401_v1 = vadd.f32 1.0, %v5257_v3  ;;  %v5404_v35 = vmul.f32 -0.5, %v5257_v3  ;;  %v5407_v50 = vand.u32 2147483647, %v5257_v3  ;;  %v5532_v20 = vmul.f32 %v5531_v59, %v5264_v37  ;;  %v5557_v29 = vpop.xlane.xlu0 %5556 }
 0x4ee   :  { %v5538_v12 = vmul.f32 0.6931472, %v6989_v60  ;;  %v6991_v46 = vpop.eup %6990  ;;  %v5687_v48 = vrot.slane %v5557_v29, %v7984_v30 }
 0x4ef   :  { %6992 = vlog2.f32 %v5401_v1  ;;  %v5405_v4 = vadd.f32 1.0, %v5404_v35  ;;  %v5493_v40 = vmul.f32 0.6931472, %v6991_v46  ;;  %vm5408_vm1 = vcmp.lt.f32.partialorder %v5407_v50, 0.0004427343  ;;  %v9679_v35 = vld [vmem:[#allocation14_spill] sm:$0xff] }
 0x4f0   :  { %v5544_v51 = vsel %vm5543_vm4, %v5541_v15, %v5538_v12  ;;  %6994 = vlog2.f32 %v5509_v7  ;;  %v5567_v32 = vpop.xlane.xlu1 %5566 }
 0x4f1   :  { %v5646_v19 = vsel %vm5554_vm8, %v5544_v51, 0.0  ;;  %6996 = vlog2.f32 %v5527_v13  ;;  %v5406_v28 = vmul.f32 %v5405_v4, %v5257_v3  ;;  %v5499_v52 = vsel %vm5498_vm2, %v5496_v25, %v5493_v40  ;;  %v5564_v18 = vpop.xlane.xlu0 %5563  ;;  %v9678_v13 = vld [vmem:[#allocation13_spill] sm:$0xff] }
 0x4f2   :  { %5647 = vadd.xlane.f32.xlu0 %v5646_v19  ;;  %6998 = vlog2.f32 %v5545_v17  ;;  %v5631_v53 = vsel %vm5558_vm9, %v5499_v52, 0.0  ;;  %v5688_v19 = vadd.s32 4294967288, %v9678_v13  ;;  %v5698_v4 = vrot.slane %v5564_v18, %v7984_v30 }
 0x4f3   :  { %vm5693_vm8 = vcmask 130112  }
 0x4f4   :  { %v9404_v7 = vpop.xlane.xlu1 %5608  ;;  %v9418_v21 = vsub.s32 %v5688_v19, %v9679_v35 }
 0x4f5   :  { %v9400_v54 = vpop.xlane.xlu0 %5605 }
 0x4f6   :  { %v5702_v50 = vrot.slane %v5567_v32, %v9418_v21  ;;  %v5761_v32 = vrot.slane %v9400_v54, %v7984_v30 }
 0x4f8   :  { %v9406_v60 = vpop.xlane.xlu1 %5614  ;;  %v5703_v40 = vsel %vm5693_vm8, %v5702_v50, %v5698_v4 }
 0x4f9   :  { %v9402_v27 = vpop.xlane.xlu0 %5611 }
 0x4fc   :  { %v6993_v45 = vpop.eup %6992  ;;  %v5573_v49 = vpop.xlane.xlu1 %5572 }
 0x4fd   :  { %v5403_v56 = vmul.f32 0.6931472, %v6993_v45  ;;  %v6995_v43 = vpop.eup %6994  ;;  %v5570_v3 = vpop.xlane.xlu0 %5569  ;;  %v5711_v45 = vrot.slane %v5573_v49, %v9418_v21 }
 0x4fe   :  { %v5511_v26 = vmul.f32 0.6931472, %v6995_v43  ;;  %v6997_v63 = vpop.eup %6996  ;;  %v5707_v46 = vrot.slane %v5570_v3, %v7984_v30 }
 0x4ff   :  { %v5409_v10 = vsel %vm5408_vm1, %v5406_v28, %v5403_v56  ;;  %v5529_v38 = vmul.f32 0.6931472, %v6997_v63  ;;  %v6999_v61 = vpop.eup %6998  ;;  %v5692_v28 = vrot.slane %v5561_v58, %v9418_v21  ;;  %v5774_v58 = vrot.slane %v9406_v60, %v9418_v21 }
 0x500   :  { %v5601_v24 = vsel %vm5558_vm9, %v5409_v10, 0.0  ;;  %v5517_v31 = vsel %vm5516_vm5, %v5514_v62, %v5511_v26  ;;  %v5547_v36 = vmul.f32 0.6931472, %v6999_v61  ;;  %v9410_v2 = vpop.xlane.xlu1 %5620  ;;  %v5712_v25 = vsel %vm5693_vm8, %v5711_v45, %v5707_v46 }
 0x501   :  { %5602 = vadd.xlane.f32.xlu1 %v5601_v24  ;;  %v5637_v22 = vsel %vm5558_vm9, %v5517_v31, 0.0  ;;  %v5535_v9 = vsel %vm5534_vm6, %v5532_v20, %v5529_v38  ;;  %v5694_v42 = vsel %vm5693_vm8, %v5692_v28, %v5687_v48  ;;  %v5783_v49 = vrot.slane %v9410_v2, %v9418_v21 }
 0x502   :  { %v5643_v0 = vsel %vm5558_vm9, %v5535_v9, 0.0  ;;  %v5553_v11 = vsel %vm5552_vm7, %v5550_v47, %v5547_v36  ;;  %v9408_v23 = vpop.xlane.xlu0 %5617 }
 0x503   :  { %v5649_v8 = vsel %vm5558_vm9, %v5553_v11, 0.0  ;;  %vm5830_vm9 = vcmask 1041409   ;;  %v5779_v29 = vrot.slane %v9408_v23, %v7984_v30 }
 0x504   :  { %v5579_v12 = vpop.xlane.xlu1 %5578  ;;  %v5831_v63 = vsel %vm5830_vm9, %v5703_v40, %v5694_v42 }
 0x505   :  { %5632 = vadd.xlane.f32.xlu1 %v5631_v53  ;;  %v5720_v43 = vrot.slane %v5579_v12, %v9418_v21  ;;  %v5833_v59 = vsel %vm5832_vm14, %v5712_v25, %v5831_v63  ;;  %v5784_v54 = vsel %vm5693_vm8, %v5783_v49, %v5779_v29 }
 0x506   :  { %v5576_v1 = vpop.xlane.xlu0 %5575 }
 0x507   :  { %v5716_v57 = vrot.slane %v5576_v1, %v7984_v30 }
 0x508   :  { %v9414_v44 = vpop.xlane.xlu1 %5626 }
 0x509   :  { %5638 = vadd.xlane.f32.xlu1 %v5637_v22  ;;  %v5721_v52 = vsel %vm5693_vm8, %v5720_v43, %v5716_v57  ;;  %v5792_v60 = vrot.slane %v9414_v44, %v9418_v21 }
 0x50a   :  { %v9412_v37 = vpop.xlane.xlu0 %5623  ;;  %v5835_v33 = vsel %vm5834_vm15, %v5721_v52, %v5833_v59 }
 0x50b   :  { %v5788_v3 = vrot.slane %v9412_v37, %v7984_v30 }
 0x50c   :  { %v5585_v6 = vpop.xlane.xlu1 %5584 }
 0x50d   :  { %5644 = vadd.xlane.f32.xlu1 %v5643_v0  ;;  %v5729_v55 = vrot.slane %v5585_v6, %v9418_v21  ;;  %v5793_v6 = vsel %vm5693_vm8, %v5792_v60, %v5788_v3 }
 0x50e   :  { %v5582_v15 = vpop.xlane.xlu0 %5581 }
 0x50f   :  { %v5725_v5 = vrot.slane %v5582_v15, %v7984_v30 }
 0x510   :  { %v5591_v17 = vpop.xlane.xlu1 %5590 }
 0x511   :  { %5650 = vadd.xlane.f32.xlu1 %v5649_v8  ;;  %v5738_v26 = vrot.slane %v5591_v17, %v9418_v21  ;;  %v5730_v14 = vsel %vm5693_vm8, %v5729_v55, %v5725_v5  ;;  %v5770_v8 = vrot.slane %v9402_v27, %v7984_v30  ;;  %v5765_v27 = vrot.slane %v9404_v7, %v9418_v21 }
 0x512   :  { %v5588_v51 = vpop.xlane.xlu0 %5587  ;;  %v5837_v20 = vsel %vm5836_vm10, %v5730_v14, %v5835_v33 }
 0x513   :  { %v5734_v10 = vrot.slane %v5588_v51, %v7984_v30  ;;  %v5775_v23 = vsel %vm5693_vm8, %v5774_v58, %v5770_v8  ;;  %v5766_v2 = vsel %vm5693_vm8, %v5765_v27, %v5761_v32 }
 0x514   :  { %v5597_v41 = vpop.xlane.xlu1 %5596  ;;  %v5844_v19 = vsel %vm5830_vm9, %v5775_v23, %v5766_v2 }
 0x515   :  { %v5747_v62 = vrot.slane %v5597_v41, %v9418_v21  ;;  %v5739_v53 = vsel %vm5693_vm8, %v5738_v26, %v5734_v10  ;;  %v5845_v35 = vsel %vm5832_vm14, %v5784_v54, %v5844_v19 }
 0x516   :  { %v5594_v39 = vpop.xlane.xlu0 %5593  ;;  %v5839_v34 = vsel %vm5838_vm11, %v5739_v53, %v5837_v20  ;;  %v5846_v46 = vsel %vm5834_vm15, %v5793_v6, %v5845_v35 }
 0x517   :  { %v5743_v24 = vrot.slane %v5594_v39, %v7984_v30 }
 0x519   :  { %v5748_v31 = vsel %vm5693_vm8, %v5747_v62, %v5743_v24 }
 0x51a   :  { %v5600_v56 = vpop.xlane.xlu0 %5599  ;;  %v5841_v9 = vsel %vm5840_vm0, %v5748_v31, %v5839_v34 }
 0x51b   :  { %v5752_v16 = vrot.slane %v5600_v56, %v7984_v30 }
 0x51e   :  { %v5630_v38 = vpop.xlane.xlu0 %5629 }
 0x51f   :  { %v5797_v37 = vrot.slane %v5630_v38, %v7984_v30 }
 0x522   :  { %v5636_v11 = vpop.xlane.xlu0 %5635 }
 0x523   :  { %v5806_v13 = vrot.slane %v5636_v11, %v7984_v30 }
 0x56f   :  { %v5642_v1 = vpop.xlane.xlu0 %5641 }
 0x570   :  { %v5815_v39 = vrot.slane %v5642_v1, %v7984_v30 }
 0x57b   :  { %v5648_v44 = vpop.xlane.xlu0 %5647 }
 0x57c   :  { %v5824_v57 = vrot.slane %v5648_v44, %v7984_v30 }
 0x58a   :  { %v5603_v61 = vpop.xlane.xlu1 %5602 }
 0x58b   :  { %v5756_v22 = vrot.slane %v5603_v61, %v9418_v21 }
 0x58d   :  { %v5757_v36 = vsel %vm5693_vm8, %v5756_v22, %v5752_v16 }
 0x58e   :  { %v5633_v47 = vpop.xlane.xlu1 %5632  ;;  %v5843_v0 = vsel %vm5842_vm12, %v5757_v36, %v5841_v9 }
 0x58f   :  { %5854 = vst.msk [vmem:[#allocation7] sm:$0xff] %vm5853_vm13, %v5843_v0  ;;  %v5801_v12 = vrot.slane %v5633_v47, %v9418_v21 }
 0x591   :  { %v5802_v17 = vsel %vm5693_vm8, %v5801_v12, %v5797_v37 }
 0x592   :  { %v5639_v18 = vpop.xlane.xlu1 %5638  ;;  %v5847_v45 = vsel %vm5836_vm10, %v5802_v17, %v5846_v46 }
 0x593   :  { %v5810_v15 = vrot.slane %v5639_v18, %v9418_v21 }
 0x595   :  { %v5811_v4 = vsel %vm5693_vm8, %v5810_v15, %v5806_v13 }
 0x596   :  { %v5645_v51 = vpop.xlane.xlu1 %5644  ;;  %v5848_v56 = vsel %vm5838_vm11, %v5811_v4, %v5847_v45 }
 0x597   :  { %v5819_v7 = vrot.slane %v5645_v51, %v9418_v21 }
 0x599   :  { %v5820_v50 = vsel %vm5693_vm8, %v5819_v7, %v5815_v39 }
 0x59a   :  { %v5651_v48 = vpop.xlane.xlu1 %5650  ;;  %v5849_v28 = vsel %vm5840_vm0, %v5820_v50, %v5848_v56 }
 0x59b   :  { %v5828_v5 = vrot.slane %v5651_v48, %v9418_v21 }
 0x59d   :  { %v5829_v40 = vsel %vm5693_vm8, %v5828_v5, %v5824_v57 }
 0x59e   :  { %v5850_v43 = vsel %vm5842_vm12, %v5829_v40, %v5849_v28 }
 0x59f   :  { %5855 = vst.msk [vmem:[#allocation7 + $0x8] sm:$0xff] %vm5853_vm13, %v5850_v43 }
 0x5a0   :  { %7051 = shalt.err (!%p7048_p0)
}
 0x5a1   :  { %5867 = dma.vmem_to_hbm [thread:$0]  %s5862_s1, 256, %s9500_s2, [#allocation4], %s7067_s12, %s7067_s12, %s7068_s13  }
 0x5a2   :  { %7064 = dma.done.wait [#allocation4], 256  }
 0x5a3   :  { %7065 = vsyncadd [#allocation4], 4294967040 }
 0x5a4   :  { %5871 = vsyncpa [#allocation3], 1 }
 0x5a5   :  { %5872 = vsyncpa [#allocation6], 1 }
 0x5a6   :  { %5873 = vsyncpa [#allocation4], 1 }

</bundles_post_ra>
